<compile_context>
chip_gen: v5e
topology: v5e:2x2
jax: 0.10.0
libtpu: 0.0.40
codegen_flags: <defaults>
</compile_context>

<pallas_src>
import numpy as np
import jax
import jax.numpy as jnp
from jax import lax
from jax.experimental import pallas as pl
from jax.experimental.pallas import tpu as pltpu


# ----------------------------------------------------------------------------
# Fused LeNet kernel (one image per grid step)
# ----------------------------------------------------------------------------
def lenet_fused_kernel(pcol_ref, w1_ref, b1_ref, pool1_ref, csel_ref, w2_ref,
                       b2_ref, pool2_ref, f1_ref, fb1_ref, f2_ref, fb2_ref,
                       f3_ref, fb3_ref, out_ref):
    f32 = jnp.float32

    # conv1 as im2col matmul (MXU) + bias + ReLU -> (784, 6)
    h1 = jnp.dot(pcol_ref[...], w1_ref[...], preferred_element_type=f32)
    h1 = jnp.maximum(h1 + b1_ref[...], 0.0)

    # 2x2/stride-2 sum-pool as a matmul (0.25 folded into conv2 weights) -> (196, 6)
    p1 = jnp.dot(pool1_ref[...], h1, preferred_element_type=f32)

    # conv2: 5x5 taps.  Row window = static slice over kh + constant 0/1
    # selection matmul over kw; channel mixing on the MXU.  -> (100, 16)
    acc = jnp.zeros((100, 16), f32) + b2_ref[...]
    for kh in range(5):
        p1h = p1[kh * 14: kh * 14 + 140, :]                               # (140, 6)
        for kw in range(5):
            win = jnp.dot(csel_ref[kw], p1h, preferred_element_type=f32)  # (100, 6)
            acc = acc + jnp.dot(win, w2_ref[kh * 5 + kw],
                                preferred_element_type=f32)               # (100, 16)
    h2 = jnp.maximum(acc, 0.0)

    # 2x2/stride-2 sum-pool as a matmul (0.25 folded into fc1 weights) -> (25, 16)
    p2 = jnp.dot(pool2_ref[...], h2, preferred_element_type=f32)

    # fc1: pool scale + PyTorch NCHW flatten order folded into f1_ref (25,16,120)
    z = fb1_ref[...]                                                      # (1, 120)
    for s in range(25):
        z = z + jnp.dot(p2[s:s + 1, :], f1_ref[s], preferred_element_type=f32)
    z = jnp.maximum(z, 0.0)

    # fc2 + ReLU, fc3
    z = jnp.maximum(jnp.dot(z, f2_ref[...], preferred_element_type=f32)
                    + fb2_ref[...], 0.0)
    z = jnp.dot(z, f3_ref[...], preferred_element_type=f32) + fb3_ref[...]  # (1, C)
    out_ref[0] = z


# ----------------------------------------------------------------------------
# One-time parameter preparation (hoisted out of the per-call path)
# ----------------------------------------------------------------------------
def prepare_lenet_params(params):
    (c1_w, c1_b, c2_w, c2_b, f1_w, f1_b, f2_w, f2_b, f3_w, f3_b) = params
    num_classes = f3_w.shape[0]

    # conv1 weight (6,1,5,5) -> (25, 6); row t = kh*5 + kw
    w1f = jnp.transpose(c1_w[:, 0, :, :], (1, 2, 0)).reshape(25, 6)
    b1 = c1_b.reshape(1, 6)

    # conv2 weight (16,6,5,5) -> (25, 6, 16); pool-1's 0.25 folded in
    w2f = 0.25 * jnp.transpose(c2_w, (2, 3, 1, 0)).reshape(25, 6, 16)
    b2 = c2_b.reshape(1, 16)

    # fc1: fold pool-2's 0.25 and the NCHW flatten order.
    # F1[s, c, k] = 0.25 * f1_w[k, c*25 + s]   (s = h5*5 + w5)
    F1 = 0.25 * jnp.transpose(f1_w.reshape(120, 16, 25), (2, 1, 0))
    fb1 = f1_b.reshape(1, 120)

    f2T = f2_w.T
    fb2 = f2_b.reshape(1, 84)
    f3T = f3_w.T
    fb3 = f3_b.reshape(1, num_classes)

    # Constant 0/1 structure matrices (sum-pool & conv2 window selection).
    P1 = np.zeros((196, 784), np.float32)           # pool1: (28,28) -> (14,14)
    for hq in range(14):
        for wq in range(14):
            for dh in range(2):
                for dw in range(2):
                    P1[hq * 14 + wq, (2 * hq + dh) * 28 + (2 * wq + dw)] = 1.0

    C = np.zeros((5, 100, 140), np.float32)         # conv2 window select over kw
    for kw in range(5):
        for oh in range(10):
            for ow in range(10):
                C[kw, oh * 10 + ow, oh * 14 + ow + kw] = 1.0

    P2 = np.zeros((25, 100), np.float32)            # pool2: (10,10) -> (5,5)
    for h5 in range(5):
        for w5 in range(5):
            for dh in range(2):
                for dw in range(2):
                    P2[h5 * 5 + w5, (2 * h5 + dh) * 10 + (2 * w5 + dw)] = 1.0

    return (w1f, b1, jnp.asarray(P1), jnp.asarray(C), w2f, b2,
            jnp.asarray(P2), F1, fb1, f2T, fb2, f3T, fb3)


# ----------------------------------------------------------------------------
# Forward wrapper
# ----------------------------------------------------------------------------
def lenet_forward(x_nchw, prep):
    """x_nchw: (N, 1, 28, 28) float32 (PyTorch layout)."""
    (w1f, b1, P1, C, w2f, b2, P2, F1, fb1, f2T, fb2, f3T, fb3) = prep
    N = x_nchw.shape[0]
    num_classes = f3T.shape[1]

    # im2col for conv1 (padding=2): (N*784, 25); column t = kh*5 + kw
    xp = jnp.pad(x_nchw[:, 0, :, :], ((0, 0), (2, 2), (2, 2)))
    cols = [xp[:, kh:kh + 28, kw:kw + 28] for kh in range(5) for kw in range(5)]
    patches1 = jnp.stack(cols, axis=-1).reshape(N * 784, 25)

    def full2(shape):
        return pl.BlockSpec(shape, lambda n: (0, 0))

    def full3(shape):
        return pl.BlockSpec(shape, lambda n: (0, 0, 0))

    out = pl.pallas_call(
        lenet_fused_kernel,
        out_shape=jax.ShapeDtypeStruct((N, 1, num_classes), jnp.float32),
        grid=(N,),
        in_specs=[
            pl.BlockSpec((784, 25), lambda n: (n, 0)),   # per-image conv1 patches
            full2(w1f.shape), full2(b1.shape),
            full2(P1.shape), full3(C.shape),
            full3(w2f.shape), full2(b2.shape),
            full2(P2.shape), full3(F1.shape), full2(fb1.shape),
            full2(f2T.shape), full2(fb2.shape),
            full2(f3T.shape), full2(fb3.shape),
        ],
        out_specs=pl.BlockSpec((1, 1, num_classes), lambda n: (n, 0, 0)),
        compiler_params=pltpu.CompilerParams(
            dimension_semantics=("parallel",)),          # 2 TCs on v7x
    )(patches1, w1f, b1, P1, C, w2f, b2, P2, F1, fb1, f2T, fb2, f3T, fb3)
    return out.reshape(N, num_classes)


# ----------------------------------------------------------------------------
# Pure-JAX reference (correctness check)
# ----------------------------------------------------------------------------
def lenet_reference(x_nchw, params):
    (c1_w, c1_b, c2_w, c2_b, f1_w, f1_b, f2_w, f2_b, f3_w, f3_b) = params
    dn = ("NCHW", "OIHW", "NCHW")
    y = lax.conv_general_dilated(x_nchw, c1_w, (1, 1), ((2, 2), (2, 2)),
                                 dimension_numbers=dn) + c1_b[None, :, None, None]
    y = jnp.maximum(y, 0.0)
    y = lax.reduce_window(y, 0.0, lax.add, (1, 1, 2, 2), (1, 1, 2, 2), "VALID") / 4.0
    y = lax.conv_general_dilated(y, c2_w, (1, 1), "VALID",
                                 dimension_numbers=dn) + c2_b[None, :, None, None]
    y = jnp.maximum(y, 0.0)
    y = lax.reduce_window(y, 0.0, lax.add, (1, 1, 2, 2), (1, 1, 2, 2), "VALID") / 4.0
    y = y.reshape(y.shape[0], -1)
    y = jnp.maximum(y @ f1_w.T + f1_b, 0.0)
    y = jnp.maximum(y @ f2_w.T + f2_b, 0.0)
    return y @ f3_w.T + f3_b


# ----------------------------------------------------------------------------
# Main
# ----------------------------------------------------------------------------
if __name__ == "__main__":
    num_classes = 10
    key = jax.random.PRNGKey(0)
    ks = jax.random.split(key, 11)

    # Deterministic synthetic parameters (PyTorch layouts).
    params = (
        jax.random.normal(ks[0], (6, 1, 5, 5), jnp.float32) * 0.1,       # conv1.weight
        jax.random.normal(ks[1], (6,), jnp.float32) * 0.1,               # conv1.bias
        jax.random.normal(ks[2], (16, 6, 5, 5), jnp.float32) * 0.1,      # conv2.weight
        jax.random.normal(ks[3], (16,), jnp.float32) * 0.1,              # conv2.bias
        jax.random.normal(ks[4], (120, 400), jnp.float32) * 0.05,        # fc1.weight
        jax.random.normal(ks[5], (120,), jnp.float32) * 0.05,            # fc1.bias
        jax.random.normal(ks[6], (84, 120), jnp.float32) * 0.05,         # fc2.weight
        jax.random.normal(ks[7], (84,), jnp.float32) * 0.05,             # fc2.bias
        jax.random.normal(ks[8], (num_classes, 84), jnp.float32) * 0.05,  # fc3.weight
        jax.random.normal(ks[9], (num_classes,), jnp.float32) * 0.05,     # fc3.bias
    )

    # LeNet requires 28x28 spatial input (fc1 expects 16*5*5); batch = 2.
    x = jax.random.normal(ks[10], (2, 1, 28, 28), jnp.float32)

    prep = prepare_lenet_params(params)        # one-time weight/constant prep
    fwd = jax.jit(lenet_forward)

    out = jax.block_until_ready(fwd(x, prep))

    ref = lenet_reference(x, params)
    np.testing.assert_allclose(np.asarray(out), np.asarray(ref), rtol=1e-4, atol=1e-4)

    print("KERNEL_OK")
</pallas_src>

<mosaic_0001>
module attributes {stable_mosaic.version = 11 : i64} {
  func.func @lenet_fused_kernel(%arg0: i32, %arg1: memref<784x25xf32, #tpu.memory_space<vmem>>, %arg2: memref<25x6xf32, #tpu.memory_space<vmem>>, %arg3: memref<1x6xf32, #tpu.memory_space<vmem>>, %arg4: memref<196x784xf32, #tpu.memory_space<vmem>>, %arg5: memref<5x100x140xf32, #tpu.memory_space<vmem>>, %arg6: memref<25x6x16xf32, #tpu.memory_space<vmem>>, %arg7: memref<1x16xf32, #tpu.memory_space<vmem>>, %arg8: memref<25x100xf32, #tpu.memory_space<vmem>>, %arg9: memref<25x16x120xf32, #tpu.memory_space<vmem>>, %arg10: memref<1x120xf32, #tpu.memory_space<vmem>>, %arg11: memref<120x84xf32, #tpu.memory_space<vmem>>, %arg12: memref<1x84xf32, #tpu.memory_space<vmem>>, %arg13: memref<84x10xf32, #tpu.memory_space<vmem>>, %arg14: memref<1x10xf32, #tpu.memory_space<vmem>>, %arg15: memref<1x1x10xf32, #tpu.memory_space<vmem>>) attributes {dimension_semantics = [#tpu.dimension_semantics<parallel>], iteration_bounds = array<i64: 2>, scalar_prefetch = 0 : i64, scratch_operands = 0 : i64, tpu.core_type = #tpu.core_type<tc>, window_params = [{transform_indices = @transform_0, window_bounds = array<i64: 784, 25>}, {pipeline_mode = #tpu.pipeline_mode<synchronous>, transform_indices = @transform_1, window_bounds = array<i64: 25, 6>}, {pipeline_mode = #tpu.pipeline_mode<synchronous>, transform_indices = @transform_2, window_bounds = array<i64: 1, 6>}, {pipeline_mode = #tpu.pipeline_mode<synchronous>, transform_indices = @transform_3, window_bounds = array<i64: 196, 784>}, {pipeline_mode = #tpu.pipeline_mode<synchronous>, transform_indices = @transform_4, window_bounds = array<i64: 5, 100, 140>}, {pipeline_mode = #tpu.pipeline_mode<synchronous>, transform_indices = @transform_5, window_bounds = array<i64: 25, 6, 16>}, {pipeline_mode = #tpu.pipeline_mode<synchronous>, transform_indices = @transform_6, window_bounds = array<i64: 1, 16>}, {pipeline_mode = #tpu.pipeline_mode<synchronous>, transform_indices = @transform_7, window_bounds = array<i64: 25, 100>}, {pipeline_mode = #tpu.pipeline_mode<synchronous>, transform_indices = @transform_8, window_bounds = array<i64: 25, 16, 120>}, {pipeline_mode = #tpu.pipeline_mode<synchronous>, transform_indices = @transform_9, window_bounds = array<i64: 1, 120>}, {pipeline_mode = #tpu.pipeline_mode<synchronous>, transform_indices = @transform_10, window_bounds = array<i64: 120, 84>}, {pipeline_mode = #tpu.pipeline_mode<synchronous>, transform_indices = @transform_11, window_bounds = array<i64: 1, 84>}, {pipeline_mode = #tpu.pipeline_mode<synchronous>, transform_indices = @transform_12, window_bounds = array<i64: 84, 10>}, {pipeline_mode = #tpu.pipeline_mode<synchronous>, transform_indices = @transform_13, window_bounds = array<i64: 1, 10>}, {transform_indices = @transform_14, window_bounds = array<i64: 1, 1, 10>}]} {
    %c0 = arith.constant 0 : index
    %c0_0 = arith.constant 0 : index
    %0 = vector.load %arg1[%c0, %c0_0] : memref<784x25xf32, #tpu.memory_space<vmem>>, vector<784x25xf32>
    %c0_1 = arith.constant 0 : index
    %c0_2 = arith.constant 0 : index
    %1 = vector.load %arg2[%c0_1, %c0_2] : memref<25x6xf32, #tpu.memory_space<vmem>>, vector<25x6xf32>
    %cst = arith.constant dense<0.000000e+00> : vector<784x6xf32>
    %2 = tpu.matmul %0, %1, %cst {dimension_numbers = #tpu.dot_dimension_numbers<[1], [0], [0], [1], [0, 0, 1, 1], [], []>} : vector<784x25xf32>, vector<25x6xf32>, vector<784x6xf32> -> vector<784x6xf32>
    %c0_3 = arith.constant 0 : index
    %c0_4 = arith.constant 0 : index
    %3 = vector.load %arg3[%c0_3, %c0_4] : memref<1x6xf32, #tpu.memory_space<vmem>>, vector<1x6xf32>
    %4 = vector.broadcast %3 : vector<1x6xf32> to vector<784x6xf32>
    %5 = arith.addf %2, %4 : vector<784x6xf32>
    %cst_5 = arith.constant 0.000000e+00 : f32
    %6 = vector.broadcast %cst_5 : f32 to vector<784x6xf32>
    %7 = arith.maximumf %5, %6 : vector<784x6xf32>
    %c0_6 = arith.constant 0 : index
    %c0_7 = arith.constant 0 : index
    %8 = vector.load %arg4[%c0_6, %c0_7] : memref<196x784xf32, #tpu.memory_space<vmem>>, vector<196x784xf32>
    %cst_8 = arith.constant dense<0.000000e+00> : vector<196x6xf32>
    %9 = tpu.matmul %8, %7, %cst_8 {dimension_numbers = #tpu.dot_dimension_numbers<[1], [0], [0], [1], [0, 0, 1, 1], [], []>} : vector<196x784xf32>, vector<784x6xf32>, vector<196x6xf32> -> vector<196x6xf32>
    %cst_9 = arith.constant 0.000000e+00 : f32
    %10 = vector.broadcast %cst_9 : f32 to vector<100x16xf32>
    %c0_10 = arith.constant 0 : index
    %c0_11 = arith.constant 0 : index
    %11 = vector.load %arg7[%c0_10, %c0_11] : memref<1x16xf32, #tpu.memory_space<vmem>>, vector<1x16xf32>
    %12 = vector.broadcast %11 : vector<1x16xf32> to vector<100x16xf32>
    %13 = arith.addf %10, %12 : vector<100x16xf32>
    %14 = vector.extract_strided_slice %9 {offsets = [0, 0], sizes = [140, 6], strides = [1, 1]} : vector<196x6xf32> to vector<140x6xf32>
    %c0_12 = arith.constant 0 : index
    %c0_13 = arith.constant 0 : index
    %c0_14 = arith.constant 0 : index
    %15 = vector.load %arg5[%c0_12, %c0_13, %c0_14] : memref<5x100x140xf32, #tpu.memory_space<vmem>>, vector<1x100x140xf32>
    %16 = vector.shape_cast %15 : vector<1x100x140xf32> to vector<100x140xf32>
    %cst_15 = arith.constant dense<0.000000e+00> : vector<100x6xf32>
    %17 = tpu.matmul %16, %14, %cst_15 {dimension_numbers = #tpu.dot_dimension_numbers<[1], [0], [0], [1], [0, 0, 1, 1], [], []>} : vector<100x140xf32>, vector<140x6xf32>, vector<100x6xf32> -> vector<100x6xf32>
    %c0_16 = arith.constant 0 : index
    %c0_17 = arith.constant 0 : index
    %c0_18 = arith.constant 0 : index
    %18 = vector.load %arg6[%c0_16, %c0_17, %c0_18] : memref<25x6x16xf32, #tpu.memory_space<vmem>>, vector<1x6x16xf32>
    %19 = vector.shape_cast %18 : vector<1x6x16xf32> to vector<6x16xf32>
    %cst_19 = arith.constant dense<0.000000e+00> : vector<100x16xf32>
    %20 = tpu.matmul %17, %19, %cst_19 {dimension_numbers = #tpu.dot_dimension_numbers<[1], [0], [0], [1], [0, 0, 1, 1], [], []>} : vector<100x6xf32>, vector<6x16xf32>, vector<100x16xf32> -> vector<100x16xf32>
    %21 = arith.addf %13, %20 : vector<100x16xf32>
    %c1 = arith.constant 1 : index
    %c0_20 = arith.constant 0 : index
    %c0_21 = arith.constant 0 : index
    %22 = vector.load %arg5[%c1, %c0_20, %c0_21] : memref<5x100x140xf32, #tpu.memory_space<vmem>>, vector<1x100x140xf32>
    %23 = vector.shape_cast %22 : vector<1x100x140xf32> to vector<100x140xf32>
    %cst_22 = arith.constant dense<0.000000e+00> : vector<100x6xf32>
    %24 = tpu.matmul %23, %14, %cst_22 {dimension_numbers = #tpu.dot_dimension_numbers<[1], [0], [0], [1], [0, 0, 1, 1], [], []>} : vector<100x140xf32>, vector<140x6xf32>, vector<100x6xf32> -> vector<100x6xf32>
    %c1_23 = arith.constant 1 : index
    %c0_24 = arith.constant 0 : index
    %c0_25 = arith.constant 0 : index
    %25 = vector.load %arg6[%c1_23, %c0_24, %c0_25] : memref<25x6x16xf32, #tpu.memory_space<vmem>>, vector<1x6x16xf32>
    %26 = vector.shape_cast %25 : vector<1x6x16xf32> to vector<6x16xf32>
    %cst_26 = arith.constant dense<0.000000e+00> : vector<100x16xf32>
    %27 = tpu.matmul %24, %26, %cst_26 {dimension_numbers = #tpu.dot_dimension_numbers<[1], [0], [0], [1], [0, 0, 1, 1], [], []>} : vector<100x6xf32>, vector<6x16xf32>, vector<100x16xf32> -> vector<100x16xf32>
    %28 = arith.addf %21, %27 : vector<100x16xf32>
    %c2 = arith.constant 2 : index
    %c0_27 = arith.constant 0 : index
    %c0_28 = arith.constant 0 : index
    %29 = vector.load %arg5[%c2, %c0_27, %c0_28] : memref<5x100x140xf32, #tpu.memory_space<vmem>>, vector<1x100x140xf32>
    %30 = vector.shape_cast %29 : vector<1x100x140xf32> to vector<100x140xf32>
    %cst_29 = arith.constant dense<0.000000e+00> : vector<100x6xf32>
    %31 = tpu.matmul %30, %14, %cst_29 {dimension_numbers = #tpu.dot_dimension_numbers<[1], [0], [0], [1], [0, 0, 1, 1], [], []>} : vector<100x140xf32>, vector<140x6xf32>, vector<100x6xf32> -> vector<100x6xf32>
    %c2_30 = arith.constant 2 : index
    %c0_31 = arith.constant 0 : index
    %c0_32 = arith.constant 0 : index
    %32 = vector.load %arg6[%c2_30, %c0_31, %c0_32] : memref<25x6x16xf32, #tpu.memory_space<vmem>>, vector<1x6x16xf32>
    %33 = vector.shape_cast %32 : vector<1x6x16xf32> to vector<6x16xf32>
    %cst_33 = arith.constant dense<0.000000e+00> : vector<100x16xf32>
    %34 = tpu.matmul %31, %33, %cst_33 {dimension_numbers = #tpu.dot_dimension_numbers<[1], [0], [0], [1], [0, 0, 1, 1], [], []>} : vector<100x6xf32>, vector<6x16xf32>, vector<100x16xf32> -> vector<100x16xf32>
    %35 = arith.addf %28, %34 : vector<100x16xf32>
    %c3 = arith.constant 3 : index
    %c0_34 = arith.constant 0 : index
    %c0_35 = arith.constant 0 : index
    %36 = vector.load %arg5[%c3, %c0_34, %c0_35] : memref<5x100x140xf32, #tpu.memory_space<vmem>>, vector<1x100x140xf32>
    %37 = vector.shape_cast %36 : vector<1x100x140xf32> to vector<100x140xf32>
    %cst_36 = arith.constant dense<0.000000e+00> : vector<100x6xf32>
    %38 = tpu.matmul %37, %14, %cst_36 {dimension_numbers = #tpu.dot_dimension_numbers<[1], [0], [0], [1], [0, 0, 1, 1], [], []>} : vector<100x140xf32>, vector<140x6xf32>, vector<100x6xf32> -> vector<100x6xf32>
    %c3_37 = arith.constant 3 : index
    %c0_38 = arith.constant 0 : index
    %c0_39 = arith.constant 0 : index
    %39 = vector.load %arg6[%c3_37, %c0_38, %c0_39] : memref<25x6x16xf32, #tpu.memory_space<vmem>>, vector<1x6x16xf32>
    %40 = vector.shape_cast %39 : vector<1x6x16xf32> to vector<6x16xf32>
    %cst_40 = arith.constant dense<0.000000e+00> : vector<100x16xf32>
    %41 = tpu.matmul %38, %40, %cst_40 {dimension_numbers = #tpu.dot_dimension_numbers<[1], [0], [0], [1], [0, 0, 1, 1], [], []>} : vector<100x6xf32>, vector<6x16xf32>, vector<100x16xf32> -> vector<100x16xf32>
    %42 = arith.addf %35, %41 : vector<100x16xf32>
    %c4 = arith.constant 4 : index
    %c0_41 = arith.constant 0 : index
    %c0_42 = arith.constant 0 : index
    %43 = vector.load %arg5[%c4, %c0_41, %c0_42] : memref<5x100x140xf32, #tpu.memory_space<vmem>>, vector<1x100x140xf32>
    %44 = vector.shape_cast %43 : vector<1x100x140xf32> to vector<100x140xf32>
    %cst_43 = arith.constant dense<0.000000e+00> : vector<100x6xf32>
    %45 = tpu.matmul %44, %14, %cst_43 {dimension_numbers = #tpu.dot_dimension_numbers<[1], [0], [0], [1], [0, 0, 1, 1], [], []>} : vector<100x140xf32>, vector<140x6xf32>, vector<100x6xf32> -> vector<100x6xf32>
    %c4_44 = arith.constant 4 : index
    %c0_45 = arith.constant 0 : index
    %c0_46 = arith.constant 0 : index
    %46 = vector.load %arg6[%c4_44, %c0_45, %c0_46] : memref<25x6x16xf32, #tpu.memory_space<vmem>>, vector<1x6x16xf32>
    %47 = vector.shape_cast %46 : vector<1x6x16xf32> to vector<6x16xf32>
    %cst_47 = arith.constant dense<0.000000e+00> : vector<100x16xf32>
    %48 = tpu.matmul %45, %47, %cst_47 {dimension_numbers = #tpu.dot_dimension_numbers<[1], [0], [0], [1], [0, 0, 1, 1], [], []>} : vector<100x6xf32>, vector<6x16xf32>, vector<100x16xf32> -> vector<100x16xf32>
    %49 = arith.addf %42, %48 : vector<100x16xf32>
    %50 = vector.extract_strided_slice %9 {offsets = [14, 0], sizes = [140, 6], strides = [1, 1]} : vector<196x6xf32> to vector<140x6xf32>
    %c0_48 = arith.constant 0 : index
    %c0_49 = arith.constant 0 : index
    %c0_50 = arith.constant 0 : index
    %51 = vector.load %arg5[%c0_48, %c0_49, %c0_50] : memref<5x100x140xf32, #tpu.memory_space<vmem>>, vector<1x100x140xf32>
    %52 = vector.shape_cast %51 : vector<1x100x140xf32> to vector<100x140xf32>
    %cst_51 = arith.constant dense<0.000000e+00> : vector<100x6xf32>
    %53 = tpu.matmul %52, %50, %cst_51 {dimension_numbers = #tpu.dot_dimension_numbers<[1], [0], [0], [1], [0, 0, 1, 1], [], []>} : vector<100x140xf32>, vector<140x6xf32>, vector<100x6xf32> -> vector<100x6xf32>
    %c5 = arith.constant 5 : index
    %c0_52 = arith.constant 0 : index
    %c0_53 = arith.constant 0 : index
    %54 = vector.load %arg6[%c5, %c0_52, %c0_53] : memref<25x6x16xf32, #tpu.memory_space<vmem>>, vector<1x6x16xf32>
    %55 = vector.shape_cast %54 : vector<1x6x16xf32> to vector<6x16xf32>
    %cst_54 = arith.constant dense<0.000000e+00> : vector<100x16xf32>
    %56 = tpu.matmul %53, %55, %cst_54 {dimension_numbers = #tpu.dot_dimension_numbers<[1], [0], [0], [1], [0, 0, 1, 1], [], []>} : vector<100x6xf32>, vector<6x16xf32>, vector<100x16xf32> -> vector<100x16xf32>
    %57 = arith.addf %49, %56 : vector<100x16xf32>
    %c1_55 = arith.constant 1 : index
    %c0_56 = arith.constant 0 : index
    %c0_57 = arith.constant 0 : index
    %58 = vector.load %arg5[%c1_55, %c0_56, %c0_57] : memref<5x100x140xf32, #tpu.memory_space<vmem>>, vector<1x100x140xf32>
    %59 = vector.shape_cast %58 : vector<1x100x140xf32> to vector<100x140xf32>
    %cst_58 = arith.constant dense<0.000000e+00> : vector<100x6xf32>
    %60 = tpu.matmul %59, %50, %cst_58 {dimension_numbers = #tpu.dot_dimension_numbers<[1], [0], [0], [1], [0, 0, 1, 1], [], []>} : vector<100x140xf32>, vector<140x6xf32>, vector<100x6xf32> -> vector<100x6xf32>
    %c6 = arith.constant 6 : index
    %c0_59 = arith.constant 0 : index
    %c0_60 = arith.constant 0 : index
    %61 = vector.load %arg6[%c6, %c0_59, %c0_60] : memref<25x6x16xf32, #tpu.memory_space<vmem>>, vector<1x6x16xf32>
    %62 = vector.shape_cast %61 : vector<1x6x16xf32> to vector<6x16xf32>
    %cst_61 = arith.constant dense<0.000000e+00> : vector<100x16xf32>
    %63 = tpu.matmul %60, %62, %cst_61 {dimension_numbers = #tpu.dot_dimension_numbers<[1], [0], [0], [1], [0, 0, 1, 1], [], []>} : vector<100x6xf32>, vector<6x16xf32>, vector<100x16xf32> -> vector<100x16xf32>
    %64 = arith.addf %57, %63 : vector<100x16xf32>
    %c2_62 = arith.constant 2 : index
    %c0_63 = arith.constant 0 : index
    %c0_64 = arith.constant 0 : index
    %65 = vector.load %arg5[%c2_62, %c0_63, %c0_64] : memref<5x100x140xf32, #tpu.memory_space<vmem>>, vector<1x100x140xf32>
    %66 = vector.shape_cast %65 : vector<1x100x140xf32> to vector<100x140xf32>
    %cst_65 = arith.constant dense<0.000000e+00> : vector<100x6xf32>
    %67 = tpu.matmul %66, %50, %cst_65 {dimension_numbers = #tpu.dot_dimension_numbers<[1], [0], [0], [1], [0, 0, 1, 1], [], []>} : vector<100x140xf32>, vector<140x6xf32>, vector<100x6xf32> -> vector<100x6xf32>
    %c7 = arith.constant 7 : index
    %c0_66 = arith.constant 0 : index
    %c0_67 = arith.constant 0 : index
    %68 = vector.load %arg6[%c7, %c0_66, %c0_67] : memref<25x6x16xf32, #tpu.memory_space<vmem>>, vector<1x6x16xf32>
    %69 = vector.shape_cast %68 : vector<1x6x16xf32> to vector<6x16xf32>
    %cst_68 = arith.constant dense<0.000000e+00> : vector<100x16xf32>
    %70 = tpu.matmul %67, %69, %cst_68 {dimension_numbers = #tpu.dot_dimension_numbers<[1], [0], [0], [1], [0, 0, 1, 1], [], []>} : vector<100x6xf32>, vector<6x16xf32>, vector<100x16xf32> -> vector<100x16xf32>
    %71 = arith.addf %64, %70 : vector<100x16xf32>
    %c3_69 = arith.constant 3 : index
    %c0_70 = arith.constant 0 : index
    %c0_71 = arith.constant 0 : index
    %72 = vector.load %arg5[%c3_69, %c0_70, %c0_71] : memref<5x100x140xf32, #tpu.memory_space<vmem>>, vector<1x100x140xf32>
    %73 = vector.shape_cast %72 : vector<1x100x140xf32> to vector<100x140xf32>
    %cst_72 = arith.constant dense<0.000000e+00> : vector<100x6xf32>
    %74 = tpu.matmul %73, %50, %cst_72 {dimension_numbers = #tpu.dot_dimension_numbers<[1], [0], [0], [1], [0, 0, 1, 1], [], []>} : vector<100x140xf32>, vector<140x6xf32>, vector<100x6xf32> -> vector<100x6xf32>
    %c8 = arith.constant 8 : index
    %c0_73 = arith.constant 0 : index
    %c0_74 = arith.constant 0 : index
    %75 = vector.load %arg6[%c8, %c0_73, %c0_74] : memref<25x6x16xf32, #tpu.memory_space<vmem>>, vector<1x6x16xf32>
    %76 = vector.shape_cast %75 : vector<1x6x16xf32> to vector<6x16xf32>
    %cst_75 = arith.constant dense<0.000000e+00> : vector<100x16xf32>
    %77 = tpu.matmul %74, %76, %cst_75 {dimension_numbers = #tpu.dot_dimension_numbers<[1], [0], [0], [1], [0, 0, 1, 1], [], []>} : vector<100x6xf32>, vector<6x16xf32>, vector<100x16xf32> -> vector<100x16xf32>
    %78 = arith.addf %71, %77 : vector<100x16xf32>
    %c4_76 = arith.constant 4 : index
    %c0_77 = arith.constant 0 : index
    %c0_78 = arith.constant 0 : index
    %79 = vector.load %arg5[%c4_76, %c0_77, %c0_78] : memref<5x100x140xf32, #tpu.memory_space<vmem>>, vector<1x100x140xf32>
    %80 = vector.shape_cast %79 : vector<1x100x140xf32> to vector<100x140xf32>
    %cst_79 = arith.constant dense<0.000000e+00> : vector<100x6xf32>
    %81 = tpu.matmul %80, %50, %cst_79 {dimension_numbers = #tpu.dot_dimension_numbers<[1], [0], [0], [1], [0, 0, 1, 1], [], []>} : vector<100x140xf32>, vector<140x6xf32>, vector<100x6xf32> -> vector<100x6xf32>
    %c9 = arith.constant 9 : index
    %c0_80 = arith.constant 0 : index
    %c0_81 = arith.constant 0 : index
    %82 = vector.load %arg6[%c9, %c0_80, %c0_81] : memref<25x6x16xf32, #tpu.memory_space<vmem>>, vector<1x6x16xf32>
    %83 = vector.shape_cast %82 : vector<1x6x16xf32> to vector<6x16xf32>
    %cst_82 = arith.constant dense<0.000000e+00> : vector<100x16xf32>
    %84 = tpu.matmul %81, %83, %cst_82 {dimension_numbers = #tpu.dot_dimension_numbers<[1], [0], [0], [1], [0, 0, 1, 1], [], []>} : vector<100x6xf32>, vector<6x16xf32>, vector<100x16xf32> -> vector<100x16xf32>
    %85 = arith.addf %78, %84 : vector<100x16xf32>
    %86 = vector.extract_strided_slice %9 {offsets = [28, 0], sizes = [140, 6], strides = [1, 1]} : vector<196x6xf32> to vector<140x6xf32>
    %c0_83 = arith.constant 0 : index
    %c0_84 = arith.constant 0 : index
    %c0_85 = arith.constant 0 : index
    %87 = vector.load %arg5[%c0_83, %c0_84, %c0_85] : memref<5x100x140xf32, #tpu.memory_space<vmem>>, vector<1x100x140xf32>
    %88 = vector.shape_cast %87 : vector<1x100x140xf32> to vector<100x140xf32>
    %cst_86 = arith.constant dense<0.000000e+00> : vector<100x6xf32>
    %89 = tpu.matmul %88, %86, %cst_86 {dimension_numbers = #tpu.dot_dimension_numbers<[1], [0], [0], [1], [0, 0, 1, 1], [], []>} : vector<100x140xf32>, vector<140x6xf32>, vector<100x6xf32> -> vector<100x6xf32>
    %c10 = arith.constant 10 : index
    %c0_87 = arith.constant 0 : index
    %c0_88 = arith.constant 0 : index
    %90 = vector.load %arg6[%c10, %c0_87, %c0_88] : memref<25x6x16xf32, #tpu.memory_space<vmem>>, vector<1x6x16xf32>
    %91 = vector.shape_cast %90 : vector<1x6x16xf32> to vector<6x16xf32>
    %cst_89 = arith.constant dense<0.000000e+00> : vector<100x16xf32>
    %92 = tpu.matmul %89, %91, %cst_89 {dimension_numbers = #tpu.dot_dimension_numbers<[1], [0], [0], [1], [0, 0, 1, 1], [], []>} : vector<100x6xf32>, vector<6x16xf32>, vector<100x16xf32> -> vector<100x16xf32>
    %93 = arith.addf %85, %92 : vector<100x16xf32>
    %c1_90 = arith.constant 1 : index
    %c0_91 = arith.constant 0 : index
    %c0_92 = arith.constant 0 : index
    %94 = vector.load %arg5[%c1_90, %c0_91, %c0_92] : memref<5x100x140xf32, #tpu.memory_space<vmem>>, vector<1x100x140xf32>
    %95 = vector.shape_cast %94 : vector<1x100x140xf32> to vector<100x140xf32>
    %cst_93 = arith.constant dense<0.000000e+00> : vector<100x6xf32>
    %96 = tpu.matmul %95, %86, %cst_93 {dimension_numbers = #tpu.dot_dimension_numbers<[1], [0], [0], [1], [0, 0, 1, 1], [], []>} : vector<100x140xf32>, vector<140x6xf32>, vector<100x6xf32> -> vector<100x6xf32>
    %c11 = arith.constant 11 : index
    %c0_94 = arith.constant 0 : index
    %c0_95 = arith.constant 0 : index
    %97 = vector.load %arg6[%c11, %c0_94, %c0_95] : memref<25x6x16xf32, #tpu.memory_space<vmem>>, vector<1x6x16xf32>
    %98 = vector.shape_cast %97 : vector<1x6x16xf32> to vector<6x16xf32>
    %cst_96 = arith.constant dense<0.000000e+00> : vector<100x16xf32>
    %99 = tpu.matmul %96, %98, %cst_96 {dimension_numbers = #tpu.dot_dimension_numbers<[1], [0], [0], [1], [0, 0, 1, 1], [], []>} : vector<100x6xf32>, vector<6x16xf32>, vector<100x16xf32> -> vector<100x16xf32>
    %100 = arith.addf %93, %99 : vector<100x16xf32>
    %c2_97 = arith.constant 2 : index
    %c0_98 = arith.constant 0 : index
    %c0_99 = arith.constant 0 : index
    %101 = vector.load %arg5[%c2_97, %c0_98, %c0_99] : memref<5x100x140xf32, #tpu.memory_space<vmem>>, vector<1x100x140xf32>
    %102 = vector.shape_cast %101 : vector<1x100x140xf32> to vector<100x140xf32>
    %cst_100 = arith.constant dense<0.000000e+00> : vector<100x6xf32>
    %103 = tpu.matmul %102, %86, %cst_100 {dimension_numbers = #tpu.dot_dimension_numbers<[1], [0], [0], [1], [0, 0, 1, 1], [], []>} : vector<100x140xf32>, vector<140x6xf32>, vector<100x6xf32> -> vector<100x6xf32>
    %c12 = arith.constant 12 : index
    %c0_101 = arith.constant 0 : index
    %c0_102 = arith.constant 0 : index
    %104 = vector.load %arg6[%c12, %c0_101, %c0_102] : memref<25x6x16xf32, #tpu.memory_space<vmem>>, vector<1x6x16xf32>
    %105 = vector.shape_cast %104 : vector<1x6x16xf32> to vector<6x16xf32>
    %cst_103 = arith.constant dense<0.000000e+00> : vector<100x16xf32>
    %106 = tpu.matmul %103, %105, %cst_103 {dimension_numbers = #tpu.dot_dimension_numbers<[1], [0], [0], [1], [0, 0, 1, 1], [], []>} : vector<100x6xf32>, vector<6x16xf32>, vector<100x16xf32> -> vector<100x16xf32>
    %107 = arith.addf %100, %106 : vector<100x16xf32>
    %c3_104 = arith.constant 3 : index
    %c0_105 = arith.constant 0 : index
    %c0_106 = arith.constant 0 : index
    %108 = vector.load %arg5[%c3_104, %c0_105, %c0_106] : memref<5x100x140xf32, #tpu.memory_space<vmem>>, vector<1x100x140xf32>
    %109 = vector.shape_cast %108 : vector<1x100x140xf32> to vector<100x140xf32>
    %cst_107 = arith.constant dense<0.000000e+00> : vector<100x6xf32>
    %110 = tpu.matmul %109, %86, %cst_107 {dimension_numbers = #tpu.dot_dimension_numbers<[1], [0], [0], [1], [0, 0, 1, 1], [], []>} : vector<100x140xf32>, vector<140x6xf32>, vector<100x6xf32> -> vector<100x6xf32>
    %c13 = arith.constant 13 : index
    %c0_108 = arith.constant 0 : index
    %c0_109 = arith.constant 0 : index
    %111 = vector.load %arg6[%c13, %c0_108, %c0_109] : memref<25x6x16xf32, #tpu.memory_space<vmem>>, vector<1x6x16xf32>
    %112 = vector.shape_cast %111 : vector<1x6x16xf32> to vector<6x16xf32>
    %cst_110 = arith.constant dense<0.000000e+00> : vector<100x16xf32>
    %113 = tpu.matmul %110, %112, %cst_110 {dimension_numbers = #tpu.dot_dimension_numbers<[1], [0], [0], [1], [0, 0, 1, 1], [], []>} : vector<100x6xf32>, vector<6x16xf32>, vector<100x16xf32> -> vector<100x16xf32>
    %114 = arith.addf %107, %113 : vector<100x16xf32>
    %c4_111 = arith.constant 4 : index
    %c0_112 = arith.constant 0 : index
    %c0_113 = arith.constant 0 : index
    %115 = vector.load %arg5[%c4_111, %c0_112, %c0_113] : memref<5x100x140xf32, #tpu.memory_space<vmem>>, vector<1x100x140xf32>
    %116 = vector.shape_cast %115 : vector<1x100x140xf32> to vector<100x140xf32>
    %cst_114 = arith.constant dense<0.000000e+00> : vector<100x6xf32>
    %117 = tpu.matmul %116, %86, %cst_114 {dimension_numbers = #tpu.dot_dimension_numbers<[1], [0], [0], [1], [0, 0, 1, 1], [], []>} : vector<100x140xf32>, vector<140x6xf32>, vector<100x6xf32> -> vector<100x6xf32>
    %c14 = arith.constant 14 : index
    %c0_115 = arith.constant 0 : index
    %c0_116 = arith.constant 0 : index
    %118 = vector.load %arg6[%c14, %c0_115, %c0_116] : memref<25x6x16xf32, #tpu.memory_space<vmem>>, vector<1x6x16xf32>
    %119 = vector.shape_cast %118 : vector<1x6x16xf32> to vector<6x16xf32>
    %cst_117 = arith.constant dense<0.000000e+00> : vector<100x16xf32>
    %120 = tpu.matmul %117, %119, %cst_117 {dimension_numbers = #tpu.dot_dimension_numbers<[1], [0], [0], [1], [0, 0, 1, 1], [], []>} : vector<100x6xf32>, vector<6x16xf32>, vector<100x16xf32> -> vector<100x16xf32>
    %121 = arith.addf %114, %120 : vector<100x16xf32>
    %122 = vector.extract_strided_slice %9 {offsets = [42, 0], sizes = [140, 6], strides = [1, 1]} : vector<196x6xf32> to vector<140x6xf32>
    %c0_118 = arith.constant 0 : index
    %c0_119 = arith.constant 0 : index
    %c0_120 = arith.constant 0 : index
    %123 = vector.load %arg5[%c0_118, %c0_119, %c0_120] : memref<5x100x140xf32, #tpu.memory_space<vmem>>, vector<1x100x140xf32>
    %124 = vector.shape_cast %123 : vector<1x100x140xf32> to vector<100x140xf32>
    %cst_121 = arith.constant dense<0.000000e+00> : vector<100x6xf32>
    %125 = tpu.matmul %124, %122, %cst_121 {dimension_numbers = #tpu.dot_dimension_numbers<[1], [0], [0], [1], [0, 0, 1, 1], [], []>} : vector<100x140xf32>, vector<140x6xf32>, vector<100x6xf32> -> vector<100x6xf32>
    %c15 = arith.constant 15 : index
    %c0_122 = arith.constant 0 : index
    %c0_123 = arith.constant 0 : index
    %126 = vector.load %arg6[%c15, %c0_122, %c0_123] : memref<25x6x16xf32, #tpu.memory_space<vmem>>, vector<1x6x16xf32>
    %127 = vector.shape_cast %126 : vector<1x6x16xf32> to vector<6x16xf32>
    %cst_124 = arith.constant dense<0.000000e+00> : vector<100x16xf32>
    %128 = tpu.matmul %125, %127, %cst_124 {dimension_numbers = #tpu.dot_dimension_numbers<[1], [0], [0], [1], [0, 0, 1, 1], [], []>} : vector<100x6xf32>, vector<6x16xf32>, vector<100x16xf32> -> vector<100x16xf32>
    %129 = arith.addf %121, %128 : vector<100x16xf32>
    %c1_125 = arith.constant 1 : index
    %c0_126 = arith.constant 0 : index
    %c0_127 = arith.constant 0 : index
    %130 = vector.load %arg5[%c1_125, %c0_126, %c0_127] : memref<5x100x140xf32, #tpu.memory_space<vmem>>, vector<1x100x140xf32>
    %131 = vector.shape_cast %130 : vector<1x100x140xf32> to vector<100x140xf32>
    %cst_128 = arith.constant dense<0.000000e+00> : vector<100x6xf32>
    %132 = tpu.matmul %131, %122, %cst_128 {dimension_numbers = #tpu.dot_dimension_numbers<[1], [0], [0], [1], [0, 0, 1, 1], [], []>} : vector<100x140xf32>, vector<140x6xf32>, vector<100x6xf32> -> vector<100x6xf32>
    %c16 = arith.constant 16 : index
    %c0_129 = arith.constant 0 : index
    %c0_130 = arith.constant 0 : index
    %133 = vector.load %arg6[%c16, %c0_129, %c0_130] : memref<25x6x16xf32, #tpu.memory_space<vmem>>, vector<1x6x16xf32>
    %134 = vector.shape_cast %133 : vector<1x6x16xf32> to vector<6x16xf32>
    %cst_131 = arith.constant dense<0.000000e+00> : vector<100x16xf32>
    %135 = tpu.matmul %132, %134, %cst_131 {dimension_numbers = #tpu.dot_dimension_numbers<[1], [0], [0], [1], [0, 0, 1, 1], [], []>} : vector<100x6xf32>, vector<6x16xf32>, vector<100x16xf32> -> vector<100x16xf32>
    %136 = arith.addf %129, %135 : vector<100x16xf32>
    %c2_132 = arith.constant 2 : index
    %c0_133 = arith.constant 0 : index
    %c0_134 = arith.constant 0 : index
    %137 = vector.load %arg5[%c2_132, %c0_133, %c0_134] : memref<5x100x140xf32, #tpu.memory_space<vmem>>, vector<1x100x140xf32>
    %138 = vector.shape_cast %137 : vector<1x100x140xf32> to vector<100x140xf32>
    %cst_135 = arith.constant dense<0.000000e+00> : vector<100x6xf32>
    %139 = tpu.matmul %138, %122, %cst_135 {dimension_numbers = #tpu.dot_dimension_numbers<[1], [0], [0], [1], [0, 0, 1, 1], [], []>} : vector<100x140xf32>, vector<140x6xf32>, vector<100x6xf32> -> vector<100x6xf32>
    %c17 = arith.constant 17 : index
    %c0_136 = arith.constant 0 : index
    %c0_137 = arith.constant 0 : index
    %140 = vector.load %arg6[%c17, %c0_136, %c0_137] : memref<25x6x16xf32, #tpu.memory_space<vmem>>, vector<1x6x16xf32>
    %141 = vector.shape_cast %140 : vector<1x6x16xf32> to vector<6x16xf32>
    %cst_138 = arith.constant dense<0.000000e+00> : vector<100x16xf32>
    %142 = tpu.matmul %139, %141, %cst_138 {dimension_numbers = #tpu.dot_dimension_numbers<[1], [0], [0], [1], [0, 0, 1, 1], [], []>} : vector<100x6xf32>, vector<6x16xf32>, vector<100x16xf32> -> vector<100x16xf32>
    %143 = arith.addf %136, %142 : vector<100x16xf32>
    %c3_139 = arith.constant 3 : index
    %c0_140 = arith.constant 0 : index
    %c0_141 = arith.constant 0 : index
    %144 = vector.load %arg5[%c3_139, %c0_140, %c0_141] : memref<5x100x140xf32, #tpu.memory_space<vmem>>, vector<1x100x140xf32>
    %145 = vector.shape_cast %144 : vector<1x100x140xf32> to vector<100x140xf32>
    %cst_142 = arith.constant dense<0.000000e+00> : vector<100x6xf32>
    %146 = tpu.matmul %145, %122, %cst_142 {dimension_numbers = #tpu.dot_dimension_numbers<[1], [0], [0], [1], [0, 0, 1, 1], [], []>} : vector<100x140xf32>, vector<140x6xf32>, vector<100x6xf32> -> vector<100x6xf32>
    %c18 = arith.constant 18 : index
    %c0_143 = arith.constant 0 : index
    %c0_144 = arith.constant 0 : index
    %147 = vector.load %arg6[%c18, %c0_143, %c0_144] : memref<25x6x16xf32, #tpu.memory_space<vmem>>, vector<1x6x16xf32>
    %148 = vector.shape_cast %147 : vector<1x6x16xf32> to vector<6x16xf32>
    %cst_145 = arith.constant dense<0.000000e+00> : vector<100x16xf32>
    %149 = tpu.matmul %146, %148, %cst_145 {dimension_numbers = #tpu.dot_dimension_numbers<[1], [0], [0], [1], [0, 0, 1, 1], [], []>} : vector<100x6xf32>, vector<6x16xf32>, vector<100x16xf32> -> vector<100x16xf32>
    %150 = arith.addf %143, %149 : vector<100x16xf32>
    %c4_146 = arith.constant 4 : index
    %c0_147 = arith.constant 0 : index
    %c0_148 = arith.constant 0 : index
    %151 = vector.load %arg5[%c4_146, %c0_147, %c0_148] : memref<5x100x140xf32, #tpu.memory_space<vmem>>, vector<1x100x140xf32>
    %152 = vector.shape_cast %151 : vector<1x100x140xf32> to vector<100x140xf32>
    %cst_149 = arith.constant dense<0.000000e+00> : vector<100x6xf32>
    %153 = tpu.matmul %152, %122, %cst_149 {dimension_numbers = #tpu.dot_dimension_numbers<[1], [0], [0], [1], [0, 0, 1, 1], [], []>} : vector<100x140xf32>, vector<140x6xf32>, vector<100x6xf32> -> vector<100x6xf32>
    %c19 = arith.constant 19 : index
    %c0_150 = arith.constant 0 : index
    %c0_151 = arith.constant 0 : index
    %154 = vector.load %arg6[%c19, %c0_150, %c0_151] : memref<25x6x16xf32, #tpu.memory_space<vmem>>, vector<1x6x16xf32>
    %155 = vector.shape_cast %154 : vector<1x6x16xf32> to vector<6x16xf32>
    %cst_152 = arith.constant dense<0.000000e+00> : vector<100x16xf32>
    %156 = tpu.matmul %153, %155, %cst_152 {dimension_numbers = #tpu.dot_dimension_numbers<[1], [0], [0], [1], [0, 0, 1, 1], [], []>} : vector<100x6xf32>, vector<6x16xf32>, vector<100x16xf32> -> vector<100x16xf32>
    %157 = arith.addf %150, %156 : vector<100x16xf32>
    %158 = vector.extract_strided_slice %9 {offsets = [56, 0], sizes = [140, 6], strides = [1, 1]} : vector<196x6xf32> to vector<140x6xf32>
    %c0_153 = arith.constant 0 : index
    %c0_154 = arith.constant 0 : index
    %c0_155 = arith.constant 0 : index
    %159 = vector.load %arg5[%c0_153, %c0_154, %c0_155] : memref<5x100x140xf32, #tpu.memory_space<vmem>>, vector<1x100x140xf32>
    %160 = vector.shape_cast %159 : vector<1x100x140xf32> to vector<100x140xf32>
    %cst_156 = arith.constant dense<0.000000e+00> : vector<100x6xf32>
    %161 = tpu.matmul %160, %158, %cst_156 {dimension_numbers = #tpu.dot_dimension_numbers<[1], [0], [0], [1], [0, 0, 1, 1], [], []>} : vector<100x140xf32>, vector<140x6xf32>, vector<100x6xf32> -> vector<100x6xf32>
    %c20 = arith.constant 20 : index
    %c0_157 = arith.constant 0 : index
    %c0_158 = arith.constant 0 : index
    %162 = vector.load %arg6[%c20, %c0_157, %c0_158] : memref<25x6x16xf32, #tpu.memory_space<vmem>>, vector<1x6x16xf32>
    %163 = vector.shape_cast %162 : vector<1x6x16xf32> to vector<6x16xf32>
    %cst_159 = arith.constant dense<0.000000e+00> : vector<100x16xf32>
    %164 = tpu.matmul %161, %163, %cst_159 {dimension_numbers = #tpu.dot_dimension_numbers<[1], [0], [0], [1], [0, 0, 1, 1], [], []>} : vector<100x6xf32>, vector<6x16xf32>, vector<100x16xf32> -> vector<100x16xf32>
    %165 = arith.addf %157, %164 : vector<100x16xf32>
    %c1_160 = arith.constant 1 : index
    %c0_161 = arith.constant 0 : index
    %c0_162 = arith.constant 0 : index
    %166 = vector.load %arg5[%c1_160, %c0_161, %c0_162] : memref<5x100x140xf32, #tpu.memory_space<vmem>>, vector<1x100x140xf32>
    %167 = vector.shape_cast %166 : vector<1x100x140xf32> to vector<100x140xf32>
    %cst_163 = arith.constant dense<0.000000e+00> : vector<100x6xf32>
    %168 = tpu.matmul %167, %158, %cst_163 {dimension_numbers = #tpu.dot_dimension_numbers<[1], [0], [0], [1], [0, 0, 1, 1], [], []>} : vector<100x140xf32>, vector<140x6xf32>, vector<100x6xf32> -> vector<100x6xf32>
    %c21 = arith.constant 21 : index
    %c0_164 = arith.constant 0 : index
    %c0_165 = arith.constant 0 : index
    %169 = vector.load %arg6[%c21, %c0_164, %c0_165] : memref<25x6x16xf32, #tpu.memory_space<vmem>>, vector<1x6x16xf32>
    %170 = vector.shape_cast %169 : vector<1x6x16xf32> to vector<6x16xf32>
    %cst_166 = arith.constant dense<0.000000e+00> : vector<100x16xf32>
    %171 = tpu.matmul %168, %170, %cst_166 {dimension_numbers = #tpu.dot_dimension_numbers<[1], [0], [0], [1], [0, 0, 1, 1], [], []>} : vector<100x6xf32>, vector<6x16xf32>, vector<100x16xf32> -> vector<100x16xf32>
    %172 = arith.addf %165, %171 : vector<100x16xf32>
    %c2_167 = arith.constant 2 : index
    %c0_168 = arith.constant 0 : index
    %c0_169 = arith.constant 0 : index
    %173 = vector.load %arg5[%c2_167, %c0_168, %c0_169] : memref<5x100x140xf32, #tpu.memory_space<vmem>>, vector<1x100x140xf32>
    %174 = vector.shape_cast %173 : vector<1x100x140xf32> to vector<100x140xf32>
    %cst_170 = arith.constant dense<0.000000e+00> : vector<100x6xf32>
    %175 = tpu.matmul %174, %158, %cst_170 {dimension_numbers = #tpu.dot_dimension_numbers<[1], [0], [0], [1], [0, 0, 1, 1], [], []>} : vector<100x140xf32>, vector<140x6xf32>, vector<100x6xf32> -> vector<100x6xf32>
    %c22 = arith.constant 22 : index
    %c0_171 = arith.constant 0 : index
    %c0_172 = arith.constant 0 : index
    %176 = vector.load %arg6[%c22, %c0_171, %c0_172] : memref<25x6x16xf32, #tpu.memory_space<vmem>>, vector<1x6x16xf32>
    %177 = vector.shape_cast %176 : vector<1x6x16xf32> to vector<6x16xf32>
    %cst_173 = arith.constant dense<0.000000e+00> : vector<100x16xf32>
    %178 = tpu.matmul %175, %177, %cst_173 {dimension_numbers = #tpu.dot_dimension_numbers<[1], [0], [0], [1], [0, 0, 1, 1], [], []>} : vector<100x6xf32>, vector<6x16xf32>, vector<100x16xf32> -> vector<100x16xf32>
    %179 = arith.addf %172, %178 : vector<100x16xf32>
    %c3_174 = arith.constant 3 : index
    %c0_175 = arith.constant 0 : index
    %c0_176 = arith.constant 0 : index
    %180 = vector.load %arg5[%c3_174, %c0_175, %c0_176] : memref<5x100x140xf32, #tpu.memory_space<vmem>>, vector<1x100x140xf32>
    %181 = vector.shape_cast %180 : vector<1x100x140xf32> to vector<100x140xf32>
    %cst_177 = arith.constant dense<0.000000e+00> : vector<100x6xf32>
    %182 = tpu.matmul %181, %158, %cst_177 {dimension_numbers = #tpu.dot_dimension_numbers<[1], [0], [0], [1], [0, 0, 1, 1], [], []>} : vector<100x140xf32>, vector<140x6xf32>, vector<100x6xf32> -> vector<100x6xf32>
    %c23 = arith.constant 23 : index
    %c0_178 = arith.constant 0 : index
    %c0_179 = arith.constant 0 : index
    %183 = vector.load %arg6[%c23, %c0_178, %c0_179] : memref<25x6x16xf32, #tpu.memory_space<vmem>>, vector<1x6x16xf32>
    %184 = vector.shape_cast %183 : vector<1x6x16xf32> to vector<6x16xf32>
    %cst_180 = arith.constant dense<0.000000e+00> : vector<100x16xf32>
    %185 = tpu.matmul %182, %184, %cst_180 {dimension_numbers = #tpu.dot_dimension_numbers<[1], [0], [0], [1], [0, 0, 1, 1], [], []>} : vector<100x6xf32>, vector<6x16xf32>, vector<100x16xf32> -> vector<100x16xf32>
    %186 = arith.addf %179, %185 : vector<100x16xf32>
    %c4_181 = arith.constant 4 : index
    %c0_182 = arith.constant 0 : index
    %c0_183 = arith.constant 0 : index
    %187 = vector.load %arg5[%c4_181, %c0_182, %c0_183] : memref<5x100x140xf32, #tpu.memory_space<vmem>>, vector<1x100x140xf32>
    %188 = vector.shape_cast %187 : vector<1x100x140xf32> to vector<100x140xf32>
    %cst_184 = arith.constant dense<0.000000e+00> : vector<100x6xf32>
    %189 = tpu.matmul %188, %158, %cst_184 {dimension_numbers = #tpu.dot_dimension_numbers<[1], [0], [0], [1], [0, 0, 1, 1], [], []>} : vector<100x140xf32>, vector<140x6xf32>, vector<100x6xf32> -> vector<100x6xf32>
    %c24 = arith.constant 24 : index
    %c0_185 = arith.constant 0 : index
    %c0_186 = arith.constant 0 : index
    %190 = vector.load %arg6[%c24, %c0_185, %c0_186] : memref<25x6x16xf32, #tpu.memory_space<vmem>>, vector<1x6x16xf32>
    %191 = vector.shape_cast %190 : vector<1x6x16xf32> to vector<6x16xf32>
    %cst_187 = arith.constant dense<0.000000e+00> : vector<100x16xf32>
    %192 = tpu.matmul %189, %191, %cst_187 {dimension_numbers = #tpu.dot_dimension_numbers<[1], [0], [0], [1], [0, 0, 1, 1], [], []>} : vector<100x6xf32>, vector<6x16xf32>, vector<100x16xf32> -> vector<100x16xf32>
    %193 = arith.addf %186, %192 : vector<100x16xf32>
    %cst_188 = arith.constant 0.000000e+00 : f32
    %194 = vector.broadcast %cst_188 : f32 to vector<100x16xf32>
    %195 = arith.maximumf %193, %194 : vector<100x16xf32>
    %c0_189 = arith.constant 0 : index
    %c0_190 = arith.constant 0 : index
    %196 = vector.load %arg8[%c0_189, %c0_190] : memref<25x100xf32, #tpu.memory_space<vmem>>, vector<25x100xf32>
    %cst_191 = arith.constant dense<0.000000e+00> : vector<25x16xf32>
    %197 = tpu.matmul %196, %195, %cst_191 {dimension_numbers = #tpu.dot_dimension_numbers<[1], [0], [0], [1], [0, 0, 1, 1], [], []>} : vector<25x100xf32>, vector<100x16xf32>, vector<25x16xf32> -> vector<25x16xf32>
    %c0_192 = arith.constant 0 : index
    %c0_193 = arith.constant 0 : index
    %198 = vector.load %arg10[%c0_192, %c0_193] : memref<1x120xf32, #tpu.memory_space<vmem>>, vector<1x120xf32>
    %199 = vector.extract_strided_slice %197 {offsets = [0, 0], sizes = [1, 16], strides = [1, 1]} : vector<25x16xf32> to vector<1x16xf32>
    %c0_194 = arith.constant 0 : index
    %c0_195 = arith.constant 0 : index
    %c0_196 = arith.constant 0 : index
    %200 = vector.load %arg9[%c0_194, %c0_195, %c0_196] : memref<25x16x120xf32, #tpu.memory_space<vmem>>, vector<1x16x120xf32>
    %201 = vector.shape_cast %200 : vector<1x16x120xf32> to vector<16x120xf32>
    %cst_197 = arith.constant dense<0.000000e+00> : vector<1x120xf32>
    %202 = tpu.matmul %199, %201, %cst_197 {dimension_numbers = #tpu.dot_dimension_numbers<[1], [0], [0], [1], [0, 0, 1, 1], [], []>} : vector<1x16xf32>, vector<16x120xf32>, vector<1x120xf32> -> vector<1x120xf32>
    %203 = arith.addf %198, %202 : vector<1x120xf32>
    %204 = vector.extract_strided_slice %197 {offsets = [1, 0], sizes = [1, 16], strides = [1, 1]} : vector<25x16xf32> to vector<1x16xf32>
    %c1_198 = arith.constant 1 : index
    %c0_199 = arith.constant 0 : index
    %c0_200 = arith.constant 0 : index
    %205 = vector.load %arg9[%c1_198, %c0_199, %c0_200] : memref<25x16x120xf32, #tpu.memory_space<vmem>>, vector<1x16x120xf32>
    %206 = vector.shape_cast %205 : vector<1x16x120xf32> to vector<16x120xf32>
    %cst_201 = arith.constant dense<0.000000e+00> : vector<1x120xf32>
    %207 = tpu.matmul %204, %206, %cst_201 {dimension_numbers = #tpu.dot_dimension_numbers<[1], [0], [0], [1], [0, 0, 1, 1], [], []>} : vector<1x16xf32>, vector<16x120xf32>, vector<1x120xf32> -> vector<1x120xf32>
    %208 = arith.addf %203, %207 : vector<1x120xf32>
    %209 = vector.extract_strided_slice %197 {offsets = [2, 0], sizes = [1, 16], strides = [1, 1]} : vector<25x16xf32> to vector<1x16xf32>
    %c2_202 = arith.constant 2 : index
    %c0_203 = arith.constant 0 : index
    %c0_204 = arith.constant 0 : index
    %210 = vector.load %arg9[%c2_202, %c0_203, %c0_204] : memref<25x16x120xf32, #tpu.memory_space<vmem>>, vector<1x16x120xf32>
    %211 = vector.shape_cast %210 : vector<1x16x120xf32> to vector<16x120xf32>
    %cst_205 = arith.constant dense<0.000000e+00> : vector<1x120xf32>
    %212 = tpu.matmul %209, %211, %cst_205 {dimension_numbers = #tpu.dot_dimension_numbers<[1], [0], [0], [1], [0, 0, 1, 1], [], []>} : vector<1x16xf32>, vector<16x120xf32>, vector<1x120xf32> -> vector<1x120xf32>
    %213 = arith.addf %208, %212 : vector<1x120xf32>
    %214 = vector.extract_strided_slice %197 {offsets = [3, 0], sizes = [1, 16], strides = [1, 1]} : vector<25x16xf32> to vector<1x16xf32>
    %c3_206 = arith.constant 3 : index
    %c0_207 = arith.constant 0 : index
    %c0_208 = arith.constant 0 : index
    %215 = vector.load %arg9[%c3_206, %c0_207, %c0_208] : memref<25x16x120xf32, #tpu.memory_space<vmem>>, vector<1x16x120xf32>
    %216 = vector.shape_cast %215 : vector<1x16x120xf32> to vector<16x120xf32>
    %cst_209 = arith.constant dense<0.000000e+00> : vector<1x120xf32>
    %217 = tpu.matmul %214, %216, %cst_209 {dimension_numbers = #tpu.dot_dimension_numbers<[1], [0], [0], [1], [0, 0, 1, 1], [], []>} : vector<1x16xf32>, vector<16x120xf32>, vector<1x120xf32> -> vector<1x120xf32>
    %218 = arith.addf %213, %217 : vector<1x120xf32>
    %219 = vector.extract_strided_slice %197 {offsets = [4, 0], sizes = [1, 16], strides = [1, 1]} : vector<25x16xf32> to vector<1x16xf32>
    %c4_210 = arith.constant 4 : index
    %c0_211 = arith.constant 0 : index
    %c0_212 = arith.constant 0 : index
    %220 = vector.load %arg9[%c4_210, %c0_211, %c0_212] : memref<25x16x120xf32, #tpu.memory_space<vmem>>, vector<1x16x120xf32>
    %221 = vector.shape_cast %220 : vector<1x16x120xf32> to vector<16x120xf32>
    %cst_213 = arith.constant dense<0.000000e+00> : vector<1x120xf32>
    %222 = tpu.matmul %219, %221, %cst_213 {dimension_numbers = #tpu.dot_dimension_numbers<[1], [0], [0], [1], [0, 0, 1, 1], [], []>} : vector<1x16xf32>, vector<16x120xf32>, vector<1x120xf32> -> vector<1x120xf32>
    %223 = arith.addf %218, %222 : vector<1x120xf32>
    %224 = vector.extract_strided_slice %197 {offsets = [5, 0], sizes = [1, 16], strides = [1, 1]} : vector<25x16xf32> to vector<1x16xf32>
    %c5_214 = arith.constant 5 : index
    %c0_215 = arith.constant 0 : index
    %c0_216 = arith.constant 0 : index
    %225 = vector.load %arg9[%c5_214, %c0_215, %c0_216] : memref<25x16x120xf32, #tpu.memory_space<vmem>>, vector<1x16x120xf32>
    %226 = vector.shape_cast %225 : vector<1x16x120xf32> to vector<16x120xf32>
    %cst_217 = arith.constant dense<0.000000e+00> : vector<1x120xf32>
    %227 = tpu.matmul %224, %226, %cst_217 {dimension_numbers = #tpu.dot_dimension_numbers<[1], [0], [0], [1], [0, 0, 1, 1], [], []>} : vector<1x16xf32>, vector<16x120xf32>, vector<1x120xf32> -> vector<1x120xf32>
    %228 = arith.addf %223, %227 : vector<1x120xf32>
    %229 = vector.extract_strided_slice %197 {offsets = [6, 0], sizes = [1, 16], strides = [1, 1]} : vector<25x16xf32> to vector<1x16xf32>
    %c6_218 = arith.constant 6 : index
    %c0_219 = arith.constant 0 : index
    %c0_220 = arith.constant 0 : index
    %230 = vector.load %arg9[%c6_218, %c0_219, %c0_220] : memref<25x16x120xf32, #tpu.memory_space<vmem>>, vector<1x16x120xf32>
    %231 = vector.shape_cast %230 : vector<1x16x120xf32> to vector<16x120xf32>
    %cst_221 = arith.constant dense<0.000000e+00> : vector<1x120xf32>
    %232 = tpu.matmul %229, %231, %cst_221 {dimension_numbers = #tpu.dot_dimension_numbers<[1], [0], [0], [1], [0, 0, 1, 1], [], []>} : vector<1x16xf32>, vector<16x120xf32>, vector<1x120xf32> -> vector<1x120xf32>
    %233 = arith.addf %228, %232 : vector<1x120xf32>
    %234 = vector.extract_strided_slice %197 {offsets = [7, 0], sizes = [1, 16], strides = [1, 1]} : vector<25x16xf32> to vector<1x16xf32>
    %c7_222 = arith.constant 7 : index
    %c0_223 = arith.constant 0 : index
    %c0_224 = arith.constant 0 : index
    %235 = vector.load %arg9[%c7_222, %c0_223, %c0_224] : memref<25x16x120xf32, #tpu.memory_space<vmem>>, vector<1x16x120xf32>
    %236 = vector.shape_cast %235 : vector<1x16x120xf32> to vector<16x120xf32>
    %cst_225 = arith.constant dense<0.000000e+00> : vector<1x120xf32>
    %237 = tpu.matmul %234, %236, %cst_225 {dimension_numbers = #tpu.dot_dimension_numbers<[1], [0], [0], [1], [0, 0, 1, 1], [], []>} : vector<1x16xf32>, vector<16x120xf32>, vector<1x120xf32> -> vector<1x120xf32>
    %238 = arith.addf %233, %237 : vector<1x120xf32>
    %239 = vector.extract_strided_slice %197 {offsets = [8, 0], sizes = [1, 16], strides = [1, 1]} : vector<25x16xf32> to vector<1x16xf32>
    %c8_226 = arith.constant 8 : index
    %c0_227 = arith.constant 0 : index
    %c0_228 = arith.constant 0 : index
    %240 = vector.load %arg9[%c8_226, %c0_227, %c0_228] : memref<25x16x120xf32, #tpu.memory_space<vmem>>, vector<1x16x120xf32>
    %241 = vector.shape_cast %240 : vector<1x16x120xf32> to vector<16x120xf32>
    %cst_229 = arith.constant dense<0.000000e+00> : vector<1x120xf32>
    %242 = tpu.matmul %239, %241, %cst_229 {dimension_numbers = #tpu.dot_dimension_numbers<[1], [0], [0], [1], [0, 0, 1, 1], [], []>} : vector<1x16xf32>, vector<16x120xf32>, vector<1x120xf32> -> vector<1x120xf32>
    %243 = arith.addf %238, %242 : vector<1x120xf32>
    %244 = vector.extract_strided_slice %197 {offsets = [9, 0], sizes = [1, 16], strides = [1, 1]} : vector<25x16xf32> to vector<1x16xf32>
    %c9_230 = arith.constant 9 : index
    %c0_231 = arith.constant 0 : index
    %c0_232 = arith.constant 0 : index
    %245 = vector.load %arg9[%c9_230, %c0_231, %c0_232] : memref<25x16x120xf32, #tpu.memory_space<vmem>>, vector<1x16x120xf32>
    %246 = vector.shape_cast %245 : vector<1x16x120xf32> to vector<16x120xf32>
    %cst_233 = arith.constant dense<0.000000e+00> : vector<1x120xf32>
    %247 = tpu.matmul %244, %246, %cst_233 {dimension_numbers = #tpu.dot_dimension_numbers<[1], [0], [0], [1], [0, 0, 1, 1], [], []>} : vector<1x16xf32>, vector<16x120xf32>, vector<1x120xf32> -> vector<1x120xf32>
    %248 = arith.addf %243, %247 : vector<1x120xf32>
    %249 = vector.extract_strided_slice %197 {offsets = [10, 0], sizes = [1, 16], strides = [1, 1]} : vector<25x16xf32> to vector<1x16xf32>
    %c10_234 = arith.constant 10 : index
    %c0_235 = arith.constant 0 : index
    %c0_236 = arith.constant 0 : index
    %250 = vector.load %arg9[%c10_234, %c0_235, %c0_236] : memref<25x16x120xf32, #tpu.memory_space<vmem>>, vector<1x16x120xf32>
    %251 = vector.shape_cast %250 : vector<1x16x120xf32> to vector<16x120xf32>
    %cst_237 = arith.constant dense<0.000000e+00> : vector<1x120xf32>
    %252 = tpu.matmul %249, %251, %cst_237 {dimension_numbers = #tpu.dot_dimension_numbers<[1], [0], [0], [1], [0, 0, 1, 1], [], []>} : vector<1x16xf32>, vector<16x120xf32>, vector<1x120xf32> -> vector<1x120xf32>
    %253 = arith.addf %248, %252 : vector<1x120xf32>
    %254 = vector.extract_strided_slice %197 {offsets = [11, 0], sizes = [1, 16], strides = [1, 1]} : vector<25x16xf32> to vector<1x16xf32>
    %c11_238 = arith.constant 11 : index
    %c0_239 = arith.constant 0 : index
    %c0_240 = arith.constant 0 : index
    %255 = vector.load %arg9[%c11_238, %c0_239, %c0_240] : memref<25x16x120xf32, #tpu.memory_space<vmem>>, vector<1x16x120xf32>
    %256 = vector.shape_cast %255 : vector<1x16x120xf32> to vector<16x120xf32>
    %cst_241 = arith.constant dense<0.000000e+00> : vector<1x120xf32>
    %257 = tpu.matmul %254, %256, %cst_241 {dimension_numbers = #tpu.dot_dimension_numbers<[1], [0], [0], [1], [0, 0, 1, 1], [], []>} : vector<1x16xf32>, vector<16x120xf32>, vector<1x120xf32> -> vector<1x120xf32>
    %258 = arith.addf %253, %257 : vector<1x120xf32>
    %259 = vector.extract_strided_slice %197 {offsets = [12, 0], sizes = [1, 16], strides = [1, 1]} : vector<25x16xf32> to vector<1x16xf32>
    %c12_242 = arith.constant 12 : index
    %c0_243 = arith.constant 0 : index
    %c0_244 = arith.constant 0 : index
    %260 = vector.load %arg9[%c12_242, %c0_243, %c0_244] : memref<25x16x120xf32, #tpu.memory_space<vmem>>, vector<1x16x120xf32>
    %261 = vector.shape_cast %260 : vector<1x16x120xf32> to vector<16x120xf32>
    %cst_245 = arith.constant dense<0.000000e+00> : vector<1x120xf32>
    %262 = tpu.matmul %259, %261, %cst_245 {dimension_numbers = #tpu.dot_dimension_numbers<[1], [0], [0], [1], [0, 0, 1, 1], [], []>} : vector<1x16xf32>, vector<16x120xf32>, vector<1x120xf32> -> vector<1x120xf32>
    %263 = arith.addf %258, %262 : vector<1x120xf32>
    %264 = vector.extract_strided_slice %197 {offsets = [13, 0], sizes = [1, 16], strides = [1, 1]} : vector<25x16xf32> to vector<1x16xf32>
    %c13_246 = arith.constant 13 : index
    %c0_247 = arith.constant 0 : index
    %c0_248 = arith.constant 0 : index
    %265 = vector.load %arg9[%c13_246, %c0_247, %c0_248] : memref<25x16x120xf32, #tpu.memory_space<vmem>>, vector<1x16x120xf32>
    %266 = vector.shape_cast %265 : vector<1x16x120xf32> to vector<16x120xf32>
    %cst_249 = arith.constant dense<0.000000e+00> : vector<1x120xf32>
    %267 = tpu.matmul %264, %266, %cst_249 {dimension_numbers = #tpu.dot_dimension_numbers<[1], [0], [0], [1], [0, 0, 1, 1], [], []>} : vector<1x16xf32>, vector<16x120xf32>, vector<1x120xf32> -> vector<1x120xf32>
    %268 = arith.addf %263, %267 : vector<1x120xf32>
    %269 = vector.extract_strided_slice %197 {offsets = [14, 0], sizes = [1, 16], strides = [1, 1]} : vector<25x16xf32> to vector<1x16xf32>
    %c14_250 = arith.constant 14 : index
    %c0_251 = arith.constant 0 : index
    %c0_252 = arith.constant 0 : index
    %270 = vector.load %arg9[%c14_250, %c0_251, %c0_252] : memref<25x16x120xf32, #tpu.memory_space<vmem>>, vector<1x16x120xf32>
    %271 = vector.shape_cast %270 : vector<1x16x120xf32> to vector<16x120xf32>
    %cst_253 = arith.constant dense<0.000000e+00> : vector<1x120xf32>
    %272 = tpu.matmul %269, %271, %cst_253 {dimension_numbers = #tpu.dot_dimension_numbers<[1], [0], [0], [1], [0, 0, 1, 1], [], []>} : vector<1x16xf32>, vector<16x120xf32>, vector<1x120xf32> -> vector<1x120xf32>
    %273 = arith.addf %268, %272 : vector<1x120xf32>
    %274 = vector.extract_strided_slice %197 {offsets = [15, 0], sizes = [1, 16], strides = [1, 1]} : vector<25x16xf32> to vector<1x16xf32>
    %c15_254 = arith.constant 15 : index
    %c0_255 = arith.constant 0 : index
    %c0_256 = arith.constant 0 : index
    %275 = vector.load %arg9[%c15_254, %c0_255, %c0_256] : memref<25x16x120xf32, #tpu.memory_space<vmem>>, vector<1x16x120xf32>
    %276 = vector.shape_cast %275 : vector<1x16x120xf32> to vector<16x120xf32>
    %cst_257 = arith.constant dense<0.000000e+00> : vector<1x120xf32>
    %277 = tpu.matmul %274, %276, %cst_257 {dimension_numbers = #tpu.dot_dimension_numbers<[1], [0], [0], [1], [0, 0, 1, 1], [], []>} : vector<1x16xf32>, vector<16x120xf32>, vector<1x120xf32> -> vector<1x120xf32>
    %278 = arith.addf %273, %277 : vector<1x120xf32>
    %279 = vector.extract_strided_slice %197 {offsets = [16, 0], sizes = [1, 16], strides = [1, 1]} : vector<25x16xf32> to vector<1x16xf32>
    %c16_258 = arith.constant 16 : index
    %c0_259 = arith.constant 0 : index
    %c0_260 = arith.constant 0 : index
    %280 = vector.load %arg9[%c16_258, %c0_259, %c0_260] : memref<25x16x120xf32, #tpu.memory_space<vmem>>, vector<1x16x120xf32>
    %281 = vector.shape_cast %280 : vector<1x16x120xf32> to vector<16x120xf32>
    %cst_261 = arith.constant dense<0.000000e+00> : vector<1x120xf32>
    %282 = tpu.matmul %279, %281, %cst_261 {dimension_numbers = #tpu.dot_dimension_numbers<[1], [0], [0], [1], [0, 0, 1, 1], [], []>} : vector<1x16xf32>, vector<16x120xf32>, vector<1x120xf32> -> vector<1x120xf32>
    %283 = arith.addf %278, %282 : vector<1x120xf32>
    %284 = vector.extract_strided_slice %197 {offsets = [17, 0], sizes = [1, 16], strides = [1, 1]} : vector<25x16xf32> to vector<1x16xf32>
    %c17_262 = arith.constant 17 : index
    %c0_263 = arith.constant 0 : index
    %c0_264 = arith.constant 0 : index
    %285 = vector.load %arg9[%c17_262, %c0_263, %c0_264] : memref<25x16x120xf32, #tpu.memory_space<vmem>>, vector<1x16x120xf32>
    %286 = vector.shape_cast %285 : vector<1x16x120xf32> to vector<16x120xf32>
    %cst_265 = arith.constant dense<0.000000e+00> : vector<1x120xf32>
    %287 = tpu.matmul %284, %286, %cst_265 {dimension_numbers = #tpu.dot_dimension_numbers<[1], [0], [0], [1], [0, 0, 1, 1], [], []>} : vector<1x16xf32>, vector<16x120xf32>, vector<1x120xf32> -> vector<1x120xf32>
    %288 = arith.addf %283, %287 : vector<1x120xf32>
    %289 = vector.extract_strided_slice %197 {offsets = [18, 0], sizes = [1, 16], strides = [1, 1]} : vector<25x16xf32> to vector<1x16xf32>
    %c18_266 = arith.constant 18 : index
    %c0_267 = arith.constant 0 : index
    %c0_268 = arith.constant 0 : index
    %290 = vector.load %arg9[%c18_266, %c0_267, %c0_268] : memref<25x16x120xf32, #tpu.memory_space<vmem>>, vector<1x16x120xf32>
    %291 = vector.shape_cast %290 : vector<1x16x120xf32> to vector<16x120xf32>
    %cst_269 = arith.constant dense<0.000000e+00> : vector<1x120xf32>
    %292 = tpu.matmul %289, %291, %cst_269 {dimension_numbers = #tpu.dot_dimension_numbers<[1], [0], [0], [1], [0, 0, 1, 1], [], []>} : vector<1x16xf32>, vector<16x120xf32>, vector<1x120xf32> -> vector<1x120xf32>
    %293 = arith.addf %288, %292 : vector<1x120xf32>
    %294 = vector.extract_strided_slice %197 {offsets = [19, 0], sizes = [1, 16], strides = [1, 1]} : vector<25x16xf32> to vector<1x16xf32>
    %c19_270 = arith.constant 19 : index
    %c0_271 = arith.constant 0 : index
    %c0_272 = arith.constant 0 : index
    %295 = vector.load %arg9[%c19_270, %c0_271, %c0_272] : memref<25x16x120xf32, #tpu.memory_space<vmem>>, vector<1x16x120xf32>
    %296 = vector.shape_cast %295 : vector<1x16x120xf32> to vector<16x120xf32>
    %cst_273 = arith.constant dense<0.000000e+00> : vector<1x120xf32>
    %297 = tpu.matmul %294, %296, %cst_273 {dimension_numbers = #tpu.dot_dimension_numbers<[1], [0], [0], [1], [0, 0, 1, 1], [], []>} : vector<1x16xf32>, vector<16x120xf32>, vector<1x120xf32> -> vector<1x120xf32>
    %298 = arith.addf %293, %297 : vector<1x120xf32>
    %299 = vector.extract_strided_slice %197 {offsets = [20, 0], sizes = [1, 16], strides = [1, 1]} : vector<25x16xf32> to vector<1x16xf32>
    %c20_274 = arith.constant 20 : index
    %c0_275 = arith.constant 0 : index
    %c0_276 = arith.constant 0 : index
    %300 = vector.load %arg9[%c20_274, %c0_275, %c0_276] : memref<25x16x120xf32, #tpu.memory_space<vmem>>, vector<1x16x120xf32>
    %301 = vector.shape_cast %300 : vector<1x16x120xf32> to vector<16x120xf32>
    %cst_277 = arith.constant dense<0.000000e+00> : vector<1x120xf32>
    %302 = tpu.matmul %299, %301, %cst_277 {dimension_numbers = #tpu.dot_dimension_numbers<[1], [0], [0], [1], [0, 0, 1, 1], [], []>} : vector<1x16xf32>, vector<16x120xf32>, vector<1x120xf32> -> vector<1x120xf32>
    %303 = arith.addf %298, %302 : vector<1x120xf32>
    %304 = vector.extract_strided_slice %197 {offsets = [21, 0], sizes = [1, 16], strides = [1, 1]} : vector<25x16xf32> to vector<1x16xf32>
    %c21_278 = arith.constant 21 : index
    %c0_279 = arith.constant 0 : index
    %c0_280 = arith.constant 0 : index
    %305 = vector.load %arg9[%c21_278, %c0_279, %c0_280] : memref<25x16x120xf32, #tpu.memory_space<vmem>>, vector<1x16x120xf32>
    %306 = vector.shape_cast %305 : vector<1x16x120xf32> to vector<16x120xf32>
    %cst_281 = arith.constant dense<0.000000e+00> : vector<1x120xf32>
    %307 = tpu.matmul %304, %306, %cst_281 {dimension_numbers = #tpu.dot_dimension_numbers<[1], [0], [0], [1], [0, 0, 1, 1], [], []>} : vector<1x16xf32>, vector<16x120xf32>, vector<1x120xf32> -> vector<1x120xf32>
    %308 = arith.addf %303, %307 : vector<1x120xf32>
    %309 = vector.extract_strided_slice %197 {offsets = [22, 0], sizes = [1, 16], strides = [1, 1]} : vector<25x16xf32> to vector<1x16xf32>
    %c22_282 = arith.constant 22 : index
    %c0_283 = arith.constant 0 : index
    %c0_284 = arith.constant 0 : index
    %310 = vector.load %arg9[%c22_282, %c0_283, %c0_284] : memref<25x16x120xf32, #tpu.memory_space<vmem>>, vector<1x16x120xf32>
    %311 = vector.shape_cast %310 : vector<1x16x120xf32> to vector<16x120xf32>
    %cst_285 = arith.constant dense<0.000000e+00> : vector<1x120xf32>
    %312 = tpu.matmul %309, %311, %cst_285 {dimension_numbers = #tpu.dot_dimension_numbers<[1], [0], [0], [1], [0, 0, 1, 1], [], []>} : vector<1x16xf32>, vector<16x120xf32>, vector<1x120xf32> -> vector<1x120xf32>
    %313 = arith.addf %308, %312 : vector<1x120xf32>
    %314 = vector.extract_strided_slice %197 {offsets = [23, 0], sizes = [1, 16], strides = [1, 1]} : vector<25x16xf32> to vector<1x16xf32>
    %c23_286 = arith.constant 23 : index
    %c0_287 = arith.constant 0 : index
    %c0_288 = arith.constant 0 : index
    %315 = vector.load %arg9[%c23_286, %c0_287, %c0_288] : memref<25x16x120xf32, #tpu.memory_space<vmem>>, vector<1x16x120xf32>
    %316 = vector.shape_cast %315 : vector<1x16x120xf32> to vector<16x120xf32>
    %cst_289 = arith.constant dense<0.000000e+00> : vector<1x120xf32>
    %317 = tpu.matmul %314, %316, %cst_289 {dimension_numbers = #tpu.dot_dimension_numbers<[1], [0], [0], [1], [0, 0, 1, 1], [], []>} : vector<1x16xf32>, vector<16x120xf32>, vector<1x120xf32> -> vector<1x120xf32>
    %318 = arith.addf %313, %317 : vector<1x120xf32>
    %319 = vector.extract_strided_slice %197 {offsets = [24, 0], sizes = [1, 16], strides = [1, 1]} : vector<25x16xf32> to vector<1x16xf32>
    %c24_290 = arith.constant 24 : index
    %c0_291 = arith.constant 0 : index
    %c0_292 = arith.constant 0 : index
    %320 = vector.load %arg9[%c24_290, %c0_291, %c0_292] : memref<25x16x120xf32, #tpu.memory_space<vmem>>, vector<1x16x120xf32>
    %321 = vector.shape_cast %320 : vector<1x16x120xf32> to vector<16x120xf32>
    %cst_293 = arith.constant dense<0.000000e+00> : vector<1x120xf32>
    %322 = tpu.matmul %319, %321, %cst_293 {dimension_numbers = #tpu.dot_dimension_numbers<[1], [0], [0], [1], [0, 0, 1, 1], [], []>} : vector<1x16xf32>, vector<16x120xf32>, vector<1x120xf32> -> vector<1x120xf32>
    %323 = arith.addf %318, %322 : vector<1x120xf32>
    %cst_294 = arith.constant 0.000000e+00 : f32
    %324 = vector.broadcast %cst_294 : f32 to vector<1x120xf32>
    %325 = arith.maximumf %323, %324 : vector<1x120xf32>
    %c0_295 = arith.constant 0 : index
    %c0_296 = arith.constant 0 : index
    %326 = vector.load %arg11[%c0_295, %c0_296] : memref<120x84xf32, #tpu.memory_space<vmem>>, vector<120x84xf32>
    %cst_297 = arith.constant dense<0.000000e+00> : vector<1x84xf32>
    %327 = tpu.matmul %325, %326, %cst_297 {dimension_numbers = #tpu.dot_dimension_numbers<[1], [0], [0], [1], [0, 0, 1, 1], [], []>} : vector<1x120xf32>, vector<120x84xf32>, vector<1x84xf32> -> vector<1x84xf32>
    %c0_298 = arith.constant 0 : index
    %c0_299 = arith.constant 0 : index
    %328 = vector.load %arg12[%c0_298, %c0_299] : memref<1x84xf32, #tpu.memory_space<vmem>>, vector<1x84xf32>
    %329 = arith.addf %327, %328 : vector<1x84xf32>
    %cst_300 = arith.constant 0.000000e+00 : f32
    %330 = vector.broadcast %cst_300 : f32 to vector<1x84xf32>
    %331 = arith.maximumf %329, %330 : vector<1x84xf32>
    %c0_301 = arith.constant 0 : index
    %c0_302 = arith.constant 0 : index
    %332 = vector.load %arg13[%c0_301, %c0_302] : memref<84x10xf32, #tpu.memory_space<vmem>>, vector<84x10xf32>
    %cst_303 = arith.constant dense<0.000000e+00> : vector<1x10xf32>
    %333 = tpu.matmul %331, %332, %cst_303 {dimension_numbers = #tpu.dot_dimension_numbers<[1], [0], [0], [1], [0, 0, 1, 1], [], []>} : vector<1x84xf32>, vector<84x10xf32>, vector<1x10xf32> -> vector<1x10xf32>
    %c0_304 = arith.constant 0 : index
    %c0_305 = arith.constant 0 : index
    %334 = vector.load %arg14[%c0_304, %c0_305] : memref<1x10xf32, #tpu.memory_space<vmem>>, vector<1x10xf32>
    %335 = arith.addf %333, %334 : vector<1x10xf32>
    %c0_306 = arith.constant 0 : index
    %c0_307 = arith.constant 0 : index
    %c0_308 = arith.constant 0 : index
    %336 = vector.load %arg15[%c0_306, %c0_307, %c0_308] : memref<1x1x10xf32, #tpu.memory_space<vmem>>, vector<1x1x10xf32>
    %337 = vector.shape_cast %336 : vector<1x1x10xf32> to vector<1x10xf32>
    %338 = vector.shape_cast %335 : vector<1x10xf32> to vector<1x1x10xf32>
    tpu.vector_store %arg15[%c0_306, %c0_307, %c0_308], %338 {strides = array<i32>} : memref<1x1x10xf32, #tpu.memory_space<vmem>>, vector<1x1x10xf32>,
    return
  }
  func.func @transform_0(%arg0: i32) -> (i32, i32) {
    %c0_i32 = arith.constant 0 : i32
    %c0_i32_0 = arith.constant 0 : i32
    return %arg0, %c0_i32 : i32, i32
  }
  func.func @transform_1(%arg0: i32) -> (i32, i32) {
    %c0_i32 = arith.constant 0 : i32
    %c0_i32_0 = arith.constant 0 : i32
    %c0_i32_1 = arith.constant 0 : i32
    return %c0_i32, %c0_i32_0 : i32, i32
  }
  func.func @transform_2(%arg0: i32) -> (i32, i32) {
    %c0_i32 = arith.constant 0 : i32
    %c0_i32_0 = arith.constant 0 : i32
    %c0_i32_1 = arith.constant 0 : i32
    return %c0_i32, %c0_i32_0 : i32, i32
  }
  func.func @transform_3(%arg0: i32) -> (i32, i32) {
    %c0_i32 = arith.constant 0 : i32
    %c0_i32_0 = arith.constant 0 : i32
    %c0_i32_1 = arith.constant 0 : i32
    return %c0_i32, %c0_i32_0 : i32, i32
  }
  func.func @transform_4(%arg0: i32) -> (i32, i32, i32) {
    %c0_i32 = arith.constant 0 : i32
    %c0_i32_0 = arith.constant 0 : i32
    %c0_i32_1 = arith.constant 0 : i32
    %c0_i32_2 = arith.constant 0 : i32
    return %c0_i32, %c0_i32_0, %c0_i32_1 : i32, i32, i32
  }
  func.func @transform_5(%arg0: i32) -> (i32, i32, i32) {
    %c0_i32 = arith.constant 0 : i32
    %c0_i32_0 = arith.constant 0 : i32
    %c0_i32_1 = arith.constant 0 : i32
    %c0_i32_2 = arith.constant 0 : i32
    return %c0_i32, %c0_i32_0, %c0_i32_1 : i32, i32, i32
  }
  func.func @transform_6(%arg0: i32) -> (i32, i32) {
    %c0_i32 = arith.constant 0 : i32
    %c0_i32_0 = arith.constant 0 : i32
    %c0_i32_1 = arith.constant 0 : i32
    return %c0_i32, %c0_i32_0 : i32, i32
  }
  func.func @transform_7(%arg0: i32) -> (i32, i32) {
    %c0_i32 = arith.constant 0 : i32
    %c0_i32_0 = arith.constant 0 : i32
    %c0_i32_1 = arith.constant 0 : i32
    return %c0_i32, %c0_i32_0 : i32, i32
  }
  func.func @transform_8(%arg0: i32) -> (i32, i32, i32) {
    %c0_i32 = arith.constant 0 : i32
    %c0_i32_0 = arith.constant 0 : i32
    %c0_i32_1 = arith.constant 0 : i32
    %c0_i32_2 = arith.constant 0 : i32
    return %c0_i32, %c0_i32_0, %c0_i32_1 : i32, i32, i32
  }
  func.func @transform_9(%arg0: i32) -> (i32, i32) {
    %c0_i32 = arith.constant 0 : i32
    %c0_i32_0 = arith.constant 0 : i32
    %c0_i32_1 = arith.constant 0 : i32
    return %c0_i32, %c0_i32_0 : i32, i32
  }
  func.func @transform_10(%arg0: i32) -> (i32, i32) {
    %c0_i32 = arith.constant 0 : i32
    %c0_i32_0 = arith.constant 0 : i32
    %c0_i32_1 = arith.constant 0 : i32
    return %c0_i32, %c0_i32_0 : i32, i32
  }
  func.func @transform_11(%arg0: i32) -> (i32, i32) {
    %c0_i32 = arith.constant 0 : i32
    %c0_i32_0 = arith.constant 0 : i32
    %c0_i32_1 = arith.constant 0 : i32
    return %c0_i32, %c0_i32_0 : i32, i32
  }
  func.func @transform_12(%arg0: i32) -> (i32, i32) {
    %c0_i32 = arith.constant 0 : i32
    %c0_i32_0 = arith.constant 0 : i32
    %c0_i32_1 = arith.constant 0 : i32
    return %c0_i32, %c0_i32_0 : i32, i32
  }
  func.func @transform_13(%arg0: i32) -> (i32, i32) {
    %c0_i32 = arith.constant 0 : i32
    %c0_i32_0 = arith.constant 0 : i32
    %c0_i32_1 = arith.constant 0 : i32
    return %c0_i32, %c0_i32_0 : i32, i32
  }
  func.func @transform_14(%arg0: i32) -> (i32, i32, i32) {
    %c0_i32 = arith.constant 0 : i32
    %c0_i32_0 = arith.constant 0 : i32
    %c0_i32_1 = arith.constant 0 : i32
    return %arg0, %c0_i32, %c0_i32_0 : i32, i32, i32
  }
}

</mosaic_0001>

<bundles_post_ra>
// kernel: lenet_forward.1
= control target key start
LH: loop header
LB: loop body
LE: loop exit
PB: predicated region body
PF: predicated region fallthrough
CT: control target
= control target key end

     0   :  { %s17213_s0 = inlined_call_operand.vmem [shape: f32[1568,25], index: 0, kind: input, shape index: {}]   ;;  %s17214_s1 = inlined_call_operand.vmem [shape: f32[25,6], index: 1, kind: input, shape index: {}]   ;;  %s17215_s2 = inlined_call_operand.vmem [shape: f32[1,6], index: 2, kind: input, shape index: {}]   ;;  %s17216_s3 = inlined_call_operand.vmem [shape: f32[196,784], index: 3, kind: input, shape index: {}]   ;;  %s17217_s4 = inlined_call_operand.vmem [shape: f32[5,100,140], index: 4, kind: input, shape index: {}]   ;;  %s17218_s5 = inlined_call_operand.vmem [shape: f32[25,6,16], index: 5, kind: input, shape index: {}]   ;;  %s17219_s6 = inlined_call_operand.vmem [shape: f32[1,16], index: 6, kind: input, shape index: {}]   ;;  %s17220_s7 = inlined_call_operand.vmem [shape: f32[25,100], index: 7, kind: input, shape index: {}]   ;;  %s17221_s8 = inlined_call_operand.vmem [shape: f32[25,16,120], index: 8, kind: input, shape index: {}]   ;;  %s17222_s9 = inlined_call_operand.vmem [shape: f32[1,120], index: 9, kind: input, shape index: {}]   ;;  %s17223_s10 = inlined_call_operand.vmem [shape: f32[120,84], index: 10, kind: input, shape index: {}]   ;;  %s17224_s11 = inlined_call_operand.vmem [shape: f32[1,84], index: 11, kind: input, shape index: {}]   ;;  %s17225_s12 = inlined_call_operand.vmem [shape: f32[84,10], index: 12, kind: input, shape index: {}]   ;;  %s17226_s13 = inlined_call_operand.vmem [shape: f32[1,10], index: 13, kind: input, shape index: {}]   ;;  %s17227_s14 = inlined_call_operand.hbm [shape: f32[2,1,10], index: 14, kind: output, shape index: {}]  }
   0x1   :  { %17270 = sst [smem:[#allocation95_spill]] %s17213_s0 }
   0x2   :  { %17271 = sst [smem:[#allocation96_spill]] %s17214_s1 }
   0x3   :  { %17272 = sst [smem:[#allocation97_spill]] %s17215_s2 }
   0x4   :  { %19 = vsyncpa [#allocation3], 0 }
   0x5   :  { %21 = vsyncpa [#allocation3 + $0x1], 0  ;;  %s10975_s29 = smov 0   ;;  %s10977_s30 = smov 0  }
   0x6   :  { %s10979_s15 = smov 0   ;;  %s10981_s16 = smov 0  }
   0x7 LB: > { %17273 = sst [smem:[#allocation5_spill]] %s10894_s15  ;;  %s10996_s17 = sadd.s32 4294967295, %s10898_s16   ;;  %s10898_s16 = sphi %s10981_s16, %s17550_s16   ;;  %s10894_s15 = sphi %s10979_s15, %s17547_s15   ;;  %s10890_s30 = sphi %s10977_s30, %s17549_s30   ;;  %s10886_s29 = sphi %s10975_s29, %s17548_s29  }
   0x8   : > { %s9218_s18 = sadd.s32 4294967294, %s10898_s16   ;;  %s11000_s19 = sadd.s32 1, %s10898_s16  }
   0x9   : > { %s333_s20 = sadd.s32 1, %s10894_s15  ;;  %s330_s21 = ssub.s32 %s10898_s16, %s11000_s19 }
   0xa   : > { %p343_p0 = scmp.ne.s32.totalorder %s10894_s15, %s10890_s30  ;;  %p331_p1 = scmp.eq.s32.totalorder %s330_s21, 0 }
   0xb   : > { %p344_p2 = scmp.eq.s32.totalorder %s10996_s17, 1  ;;  %p349_p3 = scmp.ne.s32.totalorder %s10890_s30, %s10886_s29 }
   0xc   : > { %p350_p4 = scmp.eq.s32.totalorder %s9218_s18, 1  ;;  %p9221_p7 = scmp.ge.s32.totalorder %s10898_s16, 1 }
   0xd   : > { %s11011_s22 = scalar_select %p331_p1, %s10894_s15, %s333_s20  }
   0xe   : > { %p11013_p5 = por %p344_p2, %p343_p0  ;;  %p11017_p6 = por %p350_p4, %p349_p3 }
   0xf   : > { %17274 = sst [smem:[#allocation6_spill]] %s11011_s22  ;;  %p416_p8 = scmp.lt.s32.totalorder %s10898_s16, 3 }
  0x11   : > { %p417_p9 = pnand %p9221_p7, %p416_p8 }
  0x13   : > { %420 = sbr.rel (%p417_p9) target bundleno = 5030 (0x13a6), region = 76 }
  0x18   : > { %s17277_s1 = sld [smem:[#allocation96_spill]]  ;;  %vm868_vm0 = vcmask 1040384   ;;  %s461_s18 = smul.u32 98, %s10996_s17  ;;  %vm573_vm1 = vcmask 203776   ;;  %vm1456_vm2 = vcmask 130048   ;;  %vm2247_vm3 = vcmask 1043456  }
  0x19   : > { %s17278_s0 = sld [smem:[#allocation95_spill]]  ;;  %vm2207_vm4 = vcmask 97280   ;;  %vm3659_vm5 = vcmask 1041408   ;;  %vm2404_vm6 = vcmask 1045504   ;;  %vm2364_vm7 = vcmask 48128   ;;  %s9159_s27 = scalar_lea.hbm %s17227_s14, %s10996_s17 }
  0x1a   : > { %p462_p10 = scmp.lt.s32.totalorder %s461_s18, 195  ;;  %s17279_s2 = sld [smem:[#allocation97_spill]]  ;;  %vm8347_vm8 = vcmask 818176   ;;  %vm9084_vm9 = vcmask 982016   ;;  %vm9121_vm10 = vcmask 687104   ;;  %vm9148_vm11 = vcmask 73728  }
  0x1b   : > { %s10856_s26 = scalar_lea.hbm %s17227_s14, 2 }
  0x1c   : > { %s17552_s18 = smov (!%p462_p10, %s461_s18), 195 }
  0x1d   : > { %s9222_s25 = sshll.u32 %s17552_s18, 3 }
  0x1e   : > { %v568_v0 = vld [vmem:[%s17277_s1 + $0x18] sm:$0x1]  ;;  %v567_v1 = vld [vmem:[%s17277_s1 + $0x10] sm:$0xff]  ;;  %v566_v2 = vld [vmem:[%s17277_s1 + $0x8] sm:$0xff] }
  0x1f   : > { %9223 = vmatpush.msk.msra.mxu0 %vm868_vm0, %v568_v0  ;;  %v565_v3 = vld [vmem:[%s17277_s1] sm:$0xff]  ;;  %s11039_s28 = scalar_lea.vmem %s17278_s0, %s9222_s25  ;;  %s459_s25 = sand.u32 1, %s10890_s30  }
  0x20   : > { %v467_v4 = vld [vmem:[%s11039_s28] sm:$0xff]  ;;  %v468_v5 = vld [vmem:[%s11039_s28 + $0x8] sm:$0xff]  ;;  %v469_v6 = vld [vmem:[%s11039_s28 + $0x10] sm:$0xff]  ;;  %s460_s0 = scalar_lea.vmem [#allocation2], %s459_s25  ;;  %s9163_s1 = sshll.u32 %s9159_s27, 4  ;;  %s9164_s1 = int_to_ptr.hbm [resolvable:$true] %s9163_s1 }
  0x21   : > { %885 = vmatpush.msra.mxu0 %v567_v1  ;;  %v470_v7 = vld [vmem:[%s11039_s28 + $0x18] sm:$0xff]  ;;  %v471_v8 = vld [vmem:[%s11039_s28 + $0x20] sm:$0xff]  ;;  %v472_v9 = vld [vmem:[%s11039_s28 + $0x28] sm:$0xff]  ;;  %s9161_s18 = sshll.u32 %s460_s0, 4  ;;  %s9151_s20 = scalar_lea.sflag [#allocation3], %s459_s25  ;;  %s9162_s18 = int_to_ptr.vmem [resolvable:$true] %s9161_s18 }
  0x22   : > { %v473_v10 = vld [vmem:[%s11039_s28 + $0x30] sm:$0xff]  ;;  %v474_v11 = vld [vmem:[%s11039_s28 + $0x38] sm:$0xff]  ;;  %v475_v12 = vld [vmem:[%s11039_s28 + $0x40] sm:$0xff]  ;;  %s10850_s21 = sshra.s32 %s9164_s1, 4  ;;  %s10851_s21 = int_to_ptr.hbm [resolvable:$true] %s10850_s21 }
  0x23   : > { %886 = vmatpush.msra.mxu0 %v566_v2  ;;  %v476_v13 = vld [vmem:[%s11039_s28 + $0x48] sm:$0xff]  ;;  %v477_v14 = vld [vmem:[%s11039_s28 + $0x50] sm:$0xff]  ;;  %v478_v15 = vld [vmem:[%s11039_s28 + $0x58] sm:$0xff]  ;;  %p10857_p0 = scmp.lt.s32.totalorder %s10851_s21, %s17227_s14 }
  0x24   : > { %v479_v16 = vld [vmem:[%s11039_s28 + $0x60] sm:$0xff]  ;;  %v480_v17 = vld [vmem:[%s11039_s28 + $0x68] sm:$0xff]  ;;  %v481_v18 = vld [vmem:[%s11039_s28 + $0x70] sm:$0xff] }
  0x25   : > { %887 = vmatpush.msra.mxu0 %v565_v3  ;;  %v482_v19 = vld [vmem:[%s11039_s28 + $0x78] sm:$0xff]  ;;  %v483_v21 = vld [vmem:[%s11039_s28 + $0x80] sm:$0xff]  ;;  %v484_v23 = vld [vmem:[%s11039_s28 + $0x88] sm:$0xff] }
  0x26   : > { %9224 = vmatmul.msk.f32.vlgmr.msra.gmra.mxu0 %vm573_vm1, %v467_v4  ;;  %v485_v25 = vld [vmem:[%s11039_s28 + $0x90] sm:$0xff]  ;;  %v486_v27 = vld [vmem:[%s11039_s28 + $0x98] sm:$0xff]  ;;  %v487_v29 = vld [vmem:[%s11039_s28 + $0xa0] sm:$0xff] }
  0x27   : > { %v488_v31 = vld [vmem:[%s11039_s28 + $0xa8] sm:$0xff]  ;;  %v489_v33 = vld [vmem:[%s11039_s28 + $0xb0] sm:$0xff]  ;;  %v490_v35 = vld [vmem:[%s11039_s28 + $0xb8] sm:$0xff] }
  0x28   : > { %v491_v37 = vld [vmem:[%s11039_s28 + $0xc0] sm:$0xff]  ;;  %v492_v39 = vld [vmem:[%s11039_s28 + $0xc8] sm:$0xff]  ;;  %v493_v41 = vld [vmem:[%s11039_s28 + $0xd0] sm:$0xff] }
  0x29   : > { %v494_v43 = vld [vmem:[%s11039_s28 + $0xd8] sm:$0xff]  ;;  %v495_v45 = vld [vmem:[%s11039_s28 + $0xe0] sm:$0xff]  ;;  %v496_v47 = vld [vmem:[%s11039_s28 + $0xe8] sm:$0xff] }
  0x2a   : > { %v497_v49 = vld [vmem:[%s11039_s28 + $0xf0] sm:$0xff]  ;;  %v11118_v50 = vld [vmem:[%s17279_s2] ss:$0 sm:$0xff]  ;;  %v498_v52 = vld [vmem:[%s11039_s28 + $0xf8] sm:$0xff] }
  0x2b   : > { %v499_v62 = vld [vmem:[%s11039_s28 + $0x100] sm:$0xff] }
  0x2e   : > { %9225 = vmatmul.msk.f32.gmra.mxu0 %vm573_vm1, %v468_v5 }
  0x36   : > { %9226 = vmatmul.msk.f32.gmra.mxu0 %vm573_vm1, %v469_v6 }
  0x3e   : > { %9227 = vmatmul.msk.f32.gmra.mxu0 %vm573_vm1, %v470_v7 }
  0x46   : > { %9228 = vmatmul.msk.f32.gmra.mxu0 %vm573_vm1, %v471_v8  ;;  %v500_v8 = vld [vmem:[%s11039_s28 + $0x108] sm:$0xff] }
  0x4e   : > { %9229 = vmatmul.msk.f32.gmra.mxu0 %vm573_vm1, %v472_v9 }
  0x56   : > { %9230 = vmatmul.msk.f32.gmra.mxu0 %vm573_vm1, %v473_v10 }
  0x5e   : > { %9231 = vmatmul.msk.f32.gmra.mxu0 %vm573_vm1, %v474_v11 }
  0x66   : > { %9232 = vmatmul.msk.f32.gmra.mxu0 %vm573_vm1, %v475_v12 }
  0x6e   : > { %9233 = vmatmul.msk.f32.gmra.mxu0 %vm573_vm1, %v476_v13 }
  0x76   : > { %9234 = vmatmul.msk.f32.gmra.mxu0 %vm573_vm1, %v477_v14 }
  0x7e   : > { %9235 = vmatmul.msk.f32.gmra.mxu0 %vm573_vm1, %v478_v15 }
  0x86   : > { %9236 = vmatmul.msk.f32.gmra.mxu0 %vm573_vm1, %v479_v16 }
  0x8e   : > { %9237 = vmatmul.msk.f32.gmra.mxu0 %vm573_vm1, %v480_v17 }
  0x96   : > { %9238 = vmatmul.msk.f32.gmra.mxu0 %vm573_vm1, %v481_v18  ;;  %v501_v18 = vld [vmem:[%s11039_s28 + $0x110] sm:$0xff] }
  0x9e   : > { %9239 = vmatmul.msk.f32.gmra.mxu0 %vm573_vm1, %v482_v19 }
  0xa3   : > { %v11073_v20 = vpop.f32.mrf.mxu0 }
  0xa6   : > { %9240 = vmatmul.msk.f32.gmra.mxu0 %vm573_vm1, %v483_v21 }
  0xab   : > { %v11077_v22 = vpop.f32.mrf.mxu0 }
  0xae   : > { %9241 = vmatmul.msk.f32.gmra.mxu0 %vm573_vm1, %v484_v23  ;;  %v893_v23 = vadd.f32 %v11118_v50, %v11077_v22 }
  0xb3   : > { %v11081_v24 = vpop.f32.mrf.mxu0 }
  0xb4   : > { %v896_v19 = vadd.f32 %v11118_v50, %v11081_v24 }
  0xb6   : > { %9242 = vmatmul.msk.f32.gmra.mxu0 %vm573_vm1, %v485_v25 }
  0xbb   : > { %v11085_v26 = vpop.f32.mrf.mxu0 }
  0xbc   : > { %v899_v15 = vadd.f32 %v11118_v50, %v11085_v26  ;;  %v890_v26 = vadd.f32 %v11118_v50, %v11073_v20 }
  0xbe   : > { %9243 = vmatmul.msk.f32.gmra.mxu0 %vm573_vm1, %v486_v27  ;;  %v1186_v25 = vmax.f32 %v899_v15, 0.0  ;;  %v1185_v27 = vmax.f32 %v896_v19, 0.0  ;;  %v1183_v22 = vmax.f32 %v890_v26, 0.0 }
  0xc3   : > { %v11089_v28 = vpop.f32.mrf.mxu0 }
  0xc4   : > { %v902_v13 = vadd.f32 %v11118_v50, %v11089_v28  ;;  %v1184_v28 = vmax.f32 %v893_v23, 0.0 }
  0xc6   : > { %9244 = vmatmul.msk.f32.gmra.mxu0 %vm573_vm1, %v487_v29  ;;  %v1187_v21 = vmax.f32 %v902_v13, 0.0  ;;  %v502_v29 = vld [vmem:[%s11039_s28 + $0x118] sm:$0xff] }
  0xcb   : > { %v11093_v30 = vpop.f32.mrf.mxu0 }
  0xcc   : > { %v905_v11 = vadd.f32 %v11118_v50, %v11093_v30 }
  0xce   : > { %9245 = vmatmul.msk.f32.gmra.mxu0 %vm573_vm1, %v488_v31  ;;  %v1188_v16 = vmax.f32 %v905_v11, 0.0  ;;  %v503_v31 = vld [vmem:[%s11039_s28 + $0x120] sm:$0xff]  ;;  %v516_v11 = vld [vmem:[%s11039_s28 + $0x188] sm:$0xff] }
  0xd3   : > { %v907_v32 = vpop.f32.mrf.mxu0 }
  0xd4   : > { %v908_v9 = vadd.f32 %v11118_v50, %v907_v32  ;;  %v504_v32 = vld [vmem:[%s11039_s28 + $0x128] sm:$0xff] }
  0xd6   : > { %9246 = vmatmul.msk.f32.gmra.mxu0 %vm573_vm1, %v489_v33  ;;  %v1189_v14 = vmax.f32 %v908_v9, 0.0 }
  0xdb   : > { %v910_v34 = vpop.f32.mrf.mxu0 }
  0xdc   : > { %v911_v5 = vadd.f32 %v11118_v50, %v910_v34  ;;  %v505_v34 = vld [vmem:[%s11039_s28 + $0x130] sm:$0xff] }
  0xde   : > { %9247 = vmatmul.msk.f32.gmra.mxu0 %vm573_vm1, %v490_v35  ;;  %v1190_v12 = vmax.f32 %v911_v5, 0.0 }
  0xe3   : > { %v913_v36 = vpop.f32.mrf.mxu0 }
  0xe4   : > { %v914_v3 = vadd.f32 %v11118_v50, %v913_v36  ;;  %v506_v36 = vld [vmem:[%s11039_s28 + $0x138] sm:$0xff] }
  0xe6   : > { %9248 = vmatmul.msk.f32.gmra.mxu0 %vm573_vm1, %v491_v37  ;;  %v1191_v10 = vmax.f32 %v914_v3, 0.0 }
  0xeb   : > { %v916_v38 = vpop.f32.mrf.mxu0 }
  0xec   : > { %v917_v1 = vadd.f32 %v11118_v50, %v916_v38  ;;  %v507_v38 = vld [vmem:[%s11039_s28 + $0x140] sm:$0xff] }
  0xee   : > { %9249 = vmatmul.msk.f32.gmra.mxu0 %vm573_vm1, %v492_v39  ;;  %v1192_v6 = vmax.f32 %v917_v1, 0.0 }
  0xf3   : > { %v919_v40 = vpop.f32.mrf.mxu0 }
  0xf4   : > { %v920_v63 = vadd.f32 %v11118_v50, %v919_v40  ;;  %v508_v40 = vld [vmem:[%s11039_s28 + $0x148] sm:$0xff] }
  0xf6   : > { %9250 = vmatmul.msk.f32.gmra.mxu0 %vm573_vm1, %v493_v41  ;;  %v1193_v4 = vmax.f32 %v920_v63, 0.0 }
  0xfb   : > { %v922_v42 = vpop.f32.mrf.mxu0 }
  0xfc   : > { %v923_v59 = vadd.f32 %v11118_v50, %v922_v42  ;;  %v509_v42 = vld [vmem:[%s11039_s28 + $0x150] sm:$0xff] }
  0xfe   : > { %9251 = vmatmul.msk.f32.gmra.mxu0 %vm573_vm1, %v494_v43  ;;  %v1194_v2 = vmax.f32 %v923_v59, 0.0 }
 0x103   : > { %v925_v44 = vpop.f32.mrf.mxu0 }
 0x104   : > { %v926_v57 = vadd.f32 %v11118_v50, %v925_v44  ;;  %v510_v44 = vld [vmem:[%s11039_s28 + $0x158] sm:$0xff] }
 0x106   : > { %9252 = vmatmul.msk.f32.gmra.mxu0 %vm573_vm1, %v495_v45  ;;  %v1195_v0 = vmax.f32 %v926_v57, 0.0 }
 0x10b   : > { %v928_v46 = vpop.f32.mrf.mxu0 }
 0x10c   : > { %v929_v55 = vadd.f32 %v11118_v50, %v928_v46  ;;  %v511_v46 = vld [vmem:[%s11039_s28 + $0x160] sm:$0xff] }
 0x10e   : > { %9253 = vmatmul.msk.f32.gmra.mxu0 %vm573_vm1, %v496_v47  ;;  %v1196_v60 = vmax.f32 %v929_v55, 0.0 }
 0x113   : > { %v931_v48 = vpop.f32.mrf.mxu0 }
 0x114   : > { %v932_v53 = vadd.f32 %v11118_v50, %v931_v48  ;;  %v512_v48 = vld [vmem:[%s11039_s28 + $0x168] sm:$0xff] }
 0x116   : > { %9254 = vmatmul.msk.f32.gmra.mxu0 %vm573_vm1, %v497_v49  ;;  %v1197_v58 = vmax.f32 %v932_v53, 0.0  ;;  %v514_v53 = vld [vmem:[%s11039_s28 + $0x178] sm:$0xff] }
 0x11b   : > { %v934_v51 = vpop.f32.mrf.mxu0 }
 0x11c   : > { %v935_v54 = vadd.f32 %v11118_v50, %v934_v51  ;;  %v513_v51 = vld [vmem:[%s11039_s28 + $0x170] sm:$0xff] }
 0x11e   : > { %9255 = vmatmul.msk.f32.gmra.mxu0 %vm573_vm1, %v498_v52  ;;  %v1198_v56 = vmax.f32 %v935_v54, 0.0 }
 0x120   : > { %1532 = vmatpush.msra.mxu1 %v1198_v56 }
 0x122   : > { %1533 = vmatpush.msra.mxu1 %v1197_v58 }
 0x123   : > { %v11127_v61 = vpop.f32.mrf.mxu0 }
 0x124   : > { %1534 = vmatpush.msra.mxu1 %v1196_v60 }
 0x126   : > { %9256 = vmatmul.msk.f32.gmra.mxu0 %vm573_vm1, %v499_v62  ;;  %1535 = vmatpush.msra.mxu1 %v1195_v0  ;;  %v515_v0 = vld [vmem:[%s11039_s28 + $0x180] sm:$0xff] }
 0x128   : > { %1536 = vmatpush.msra.mxu1 %v1194_v2 }
 0x12a   : > { %1537 = vmatpush.msra.mxu1 %v1193_v4 }
 0x12b   : > { %v11135_v7 = vpop.f32.mrf.mxu0 }
 0x12c   : > { %1538 = vmatpush.msra.mxu1 %v1192_v6 }
 0x12e   : > { %9257 = vmatmul.msk.f32.gmra.mxu0 %vm573_vm1, %v500_v8  ;;  %1539 = vmatpush.msra.mxu1 %v1191_v10 }
 0x130   : > { %1540 = vmatpush.msra.mxu1 %v1190_v12 }
 0x132   : > { %1541 = vmatpush.msra.mxu1 %v1189_v14 }
 0x133   : > { %v11146_v17 = vpop.f32.mrf.mxu0 }
 0x134   : > { %1542 = vmatpush.msra.mxu1 %v1188_v16  ;;  %v944_v26 = vadd.f32 %v11118_v50, %v11146_v17 }
 0x136   : > { %9258 = vmatmul.msk.f32.gmra.mxu0 %vm573_vm1, %v501_v18  ;;  %1543 = vmatpush.msra.mxu1 %v1187_v21 }
 0x138   : > { %1544 = vmatpush.msra.mxu1 %v1186_v25  ;;  %v517_v25 = vld [vmem:[%s11039_s28 + $0x190] sm:$0xff] }
 0x13a   : > { %1545 = vmatpush.msra.mxu1 %v1185_v27 }
 0x13b   : > { %v11156_v24 = vpop.f32.mrf.mxu0 }
 0x13c   : > { %1546 = vmatpush.msra.mxu1 %v1184_v28  ;;  %v947_v19 = vadd.f32 %v11118_v50, %v11156_v24  ;;  %v941_v28 = vadd.f32 %v11118_v50, %v11135_v7  ;;  %v518_v7 = vld [vmem:[%s11039_s28 + $0x198] sm:$0xff] }
 0x13e   : > { %9259 = vmatmul.msk.f32.gmra.mxu0 %vm573_vm1, %v502_v29  ;;  %1547 = vmatpush.msra.mxu1 %v1183_v22  ;;  %v1202_v24 = vmax.f32 %v947_v19, 0.0  ;;  %v938_v29 = vadd.f32 %v11118_v50, %v11127_v61  ;;  %v1201_v22 = vmax.f32 %v944_v26, 0.0  ;;  %v1200_v17 = vmax.f32 %v941_v28, 0.0  ;;  %v1351_v26 = vld [vmem:[%s17216_s3 + $0x230] sm:$0xff] }
 0x143   : > { %v11160_v30 = vpop.f32.mrf.mxu0 }
 0x144   : > { %v950_v16 = vadd.f32 %v11118_v50, %v11160_v30 }
 0x146   : > { %9260 = vmatmul.msk.f32.gmra.mxu0 %vm573_vm1, %v503_v31  ;;  %v1203_v27 = vmax.f32 %v950_v16, 0.0  ;;  %v1199_v31 = vmax.f32 %v938_v29, 0.0  ;;  %v531_v16 = vld [vmem:[%s11039_s28 + $0x200] sm:$0xff] }
 0x14b   : > { %v11164_v20 = vpop.f32.mrf.mxu0 }
 0x14c   : > { %v953_v14 = vadd.f32 %v11118_v50, %v11164_v20  ;;  %v519_v20 = vld [vmem:[%s11039_s28 + $0x1a0] sm:$0xff] }
 0x14e   : > { %9261 = vmatmul.msk.f32.gmra.mxu0 %vm573_vm1, %v504_v32  ;;  %v1204_v21 = vmax.f32 %v953_v14, 0.0 }
 0x153   : > { %v11168_v33 = vpop.f32.mrf.mxu0 }
 0x154   : > { %v956_v12 = vadd.f32 %v11118_v50, %v11168_v33  ;;  %v520_v33 = vld [vmem:[%s11039_s28 + $0x1a8] sm:$0xff] }
 0x156   : > { %9262 = vmatmul.msk.f32.gmra.mxu0 %vm573_vm1, %v505_v34  ;;  %v1205_v18 = vmax.f32 %v956_v12, 0.0 }
 0x15b   : > { %v958_v35 = vpop.f32.mrf.mxu0 }
 0x15c   : > { %v959_v8 = vadd.f32 %v11118_v50, %v958_v35  ;;  %v521_v35 = vld [vmem:[%s11039_s28 + $0x1b0] sm:$0xff] }
 0x15e   : > { %9263 = vmatmul.msk.f32.gmra.mxu0 %vm573_vm1, %v506_v36  ;;  %v1206_v15 = vmax.f32 %v959_v8, 0.0  ;;  %v1281_v36 = vld [vmem:[%s17216_s3] sm:$0xff]  ;;  %v1344_v8 = vld [vmem:[%s17216_s3 + $0x1f8] sm:$0xff] }
 0x15f   : > { %1548 = vmatmul.f32.vlgmr.msra.gmra.mxu1 %v1281_v36  ;;  %v1358_v36 = vld [vmem:[%s17216_s3 + $0x268] sm:$0xff] }
 0x163   : > { %v961_v37 = vpop.f32.mrf.mxu0 }
 0x164   : > { %v962_v5 = vadd.f32 %v11118_v50, %v961_v37 }
 0x166   : > { %9264 = vmatmul.msk.f32.gmra.mxu0 %vm573_vm1, %v507_v38  ;;  %v1207_v13 = vmax.f32 %v962_v5, 0.0  ;;  %v522_v38 = vld [vmem:[%s11039_s28 + $0x1b8] sm:$0xff] }
 0x16b   : > { %v964_v39 = vpop.f32.mrf.mxu0 }
 0x16c   : > { %v965_v3 = vadd.f32 %v11118_v50, %v964_v39  ;;  %v1288_v39 = vld [vmem:[%s17216_s3 + $0x38] sm:$0xff] }
 0x16d   : > { %1551 = vmatmul.f32.gmra.mxu1 %v1288_v39 }
 0x16e   : > { %9265 = vmatmul.msk.f32.gmra.mxu0 %vm573_vm1, %v508_v40  ;;  %v1208_v9 = vmax.f32 %v965_v3, 0.0 }
 0x173   : > { %v967_v41 = vpop.f32.mrf.mxu0 }
 0x174   : > { %v968_v1 = vadd.f32 %v11118_v50, %v967_v41  ;;  %v523_v41 = vld [vmem:[%s11039_s28 + $0x1c0] sm:$0xff] }
 0x176   : > { %9266 = vmatmul.msk.f32.gmra.mxu0 %vm573_vm1, %v509_v42  ;;  %v1209_v6 = vmax.f32 %v968_v1, 0.0  ;;  %v1295_v42 = vld [vmem:[%s17216_s3 + $0x70] sm:$0xff] }
 0x177   : > { %1554 = vmatmul.f32.gmra.mxu1 %v1295_v42 }
 0x17b   : > { %v970_v43 = vpop.f32.mrf.mxu0 }
 0x17c   : > { %v971_v60 = vadd.f32 %v11118_v50, %v970_v43 }
 0x17e   : > { %9267 = vmatmul.msk.f32.gmra.mxu0 %vm573_vm1, %v510_v44  ;;  %v1210_v4 = vmax.f32 %v971_v60, 0.0  ;;  %v524_v44 = vld [vmem:[%s11039_s28 + $0x1c8] sm:$0xff]  ;;  %v529_v60 = vld [vmem:[%s11039_s28 + $0x1f0] sm:$0xff] }
 0x183   : > { %v973_v45 = vpop.f32.mrf.mxu0 }
 0x184   : > { %v974_v58 = vadd.f32 %v11118_v50, %v973_v45  ;;  %v1302_v45 = vld [vmem:[%s17216_s3 + $0xa8] sm:$0xff] }
 0x185   : > { %1557 = vmatmul.f32.gmra.mxu1 %v1302_v45  ;;  %v1317_v45 = vld [vmem:[%s17216_s3 + $0x120] sm:$0xff] }
 0x186   : > { %9268 = vmatmul.msk.f32.gmra.mxu0 %vm573_vm1, %v511_v46  ;;  %v1211_v2 = vmax.f32 %v974_v58, 0.0  ;;  %v1330_v58 = vld [vmem:[%s17216_s3 + $0x188] sm:$0xff] }
 0x18b   : > { %v976_v47 = vpop.f32.mrf.mxu0 }
 0x18c   : > { %v977_v56 = vadd.f32 %v11118_v50, %v976_v47  ;;  %v525_v47 = vld [vmem:[%s11039_s28 + $0x1d0] sm:$0xff] }
 0x18e   : > { %9269 = vmatmul.msk.f32.gmra.mxu0 %vm573_vm1, %v512_v48  ;;  %v1212_v62 = vmax.f32 %v977_v56, 0.0  ;;  %v1309_v48 = vld [vmem:[%s17216_s3 + $0xe0] sm:$0xff] }
 0x18f   : > { %1560 = vmatmul.f32.gmra.mxu1 %v1309_v48  ;;  %v534_v48 = vld [vmem:[%s11039_s28 + $0x218] sm:$0xff] }
 0x193   : > { %v979_v49 = vpop.f32.mrf.mxu0 }
 0x194   : > { %v980_v54 = vadd.f32 %v11118_v50, %v979_v49 }
 0x196   : > { %9270 = vmatmul.msk.f32.gmra.mxu0 %vm573_vm1, %v513_v51  ;;  %v1213_v59 = vmax.f32 %v980_v54, 0.0  ;;  %v526_v51 = vld [vmem:[%s11039_s28 + $0x1d8] sm:$0xff]  ;;  %v527_v54 = vld [vmem:[%s11039_s28 + $0x1e0] sm:$0xff] }
 0x19b   : > { %v982_v52 = vpop.f32.mrf.mxu0 }
 0x19c   : > { %v983_v55 = vadd.f32 %v11118_v50, %v982_v52  ;;  %v1316_v52 = vld [vmem:[%s17216_s3 + $0x118] sm:$0xff] }
 0x19d   : > { %1563 = vmatmul.f32.gmra.mxu1 %v1316_v52  ;;  %v1324_v52 = vld [vmem:[%s17216_s3 + $0x158] sm:$0xff] }
 0x19e   : > { %9271 = vmatmul.msk.f32.gmra.mxu0 %vm573_vm1, %v514_v53  ;;  %v1214_v57 = vmax.f32 %v983_v55, 0.0  ;;  %v1323_v55 = vld [vmem:[%s17216_s3 + $0x150] sm:$0xff] }
 0x1a0   : > { %1624 = vmatpush.msrb.mxu0 %v1214_v57  ;;  %10258 = vmatpush.msra.mxu2 %v1214_v57  ;;  %v528_v57 = vld [vmem:[%s11039_s28 + $0x1e8] sm:$0xff] }
 0x1a2   : > { %1625 = vmatpush.msrb.mxu0 %v1213_v59  ;;  %10259 = vmatpush.msra.mxu2 %v1213_v59 }
 0x1a3   : > { %v11195_v63 = vpop.f32.mrf.mxu0 }
 0x1a4   : > { %1626 = vmatpush.msrb.mxu0 %v1212_v62  ;;  %10260 = vmatpush.msra.mxu2 %v1212_v62  ;;  %v1337_v62 = vld [vmem:[%s17216_s3 + $0x1c0] sm:$0xff] }
 0x1a5   : > { %1566 = vmatmul.f32.gmra.mxu1 %v1323_v55  ;;  %v1290_v55 = vld [vmem:[%s17216_s3 + $0x48] sm:$0xff] }
 0x1a6   : > { %9272 = vmatmul.msk.f32.gmra.mxu0 %vm573_vm1, %v515_v0  ;;  %10261 = vmatpush.msra.mxu2 %v1211_v2  ;;  %v1289_v0 = vld [vmem:[%s17216_s3 + $0x40] sm:$0xff] }
 0x1a7   : > { %1627 = vmatpush.msrb.mxu0 %v1211_v2  ;;  %v530_v2 = vld [vmem:[%s11039_s28 + $0x1f8] sm:$0xff] }
 0x1a8   : > { %10262 = vmatpush.msra.mxu2 %v1210_v4 }
 0x1a9   : > { %1628 = vmatpush.msrb.mxu0 %v1210_v4 }
 0x1aa   : > { %10263 = vmatpush.msra.mxu2 %v1209_v6 }
 0x1ab   : > { %1629 = vmatpush.msrb.mxu0 %v1209_v6  ;;  %v11203_v10 = vpop.f32.mrf.mxu0 }
 0x1ac   : > { %10264 = vmatpush.msra.mxu2 %v1208_v9 }
 0x1ad   : > { %1630 = vmatpush.msrb.mxu0 %v1208_v9  ;;  %1569 = vmatmul.f32.gmra.mxu1 %v1330_v58  ;;  %v1296_v9 = vld [vmem:[%s17216_s3 + $0x78] sm:$0xff] }
 0x1ae   : > { %9273 = vmatmul.msk.f32.gmra.mxu0 %vm573_vm1, %v516_v11  ;;  %10265 = vmatpush.msra.mxu2 %v1207_v13 }
 0x1af   : > { %1631 = vmatpush.msrb.mxu0 %v1207_v13 }
 0x1b0   : > { %10266 = vmatpush.msra.mxu2 %v1206_v15 }
 0x1b1   : > { %1632 = vmatpush.msrb.mxu0 %v1206_v15 }
 0x1b2   : > { %10267 = vmatpush.msra.mxu2 %v1205_v18 }
 0x1b3   : > { %1633 = vmatpush.msrb.mxu0 %v1205_v18  ;;  %v11215_v23 = vpop.f32.mrf.mxu0 }
 0x1b4   : > { %10268 = vmatpush.msra.mxu2 %v1204_v21  ;;  %v992_v42 = vadd.f32 %v11118_v50, %v11215_v23  ;;  %v986_v23 = vadd.f32 %v11118_v50, %v11195_v63  ;;  %v1372_v63 = vld [vmem:[%s17216_s3 + $0x2d8] sm:$0xff] }
 0x1b5   : > { %1634 = vmatpush.msrb.mxu0 %v1204_v21  ;;  %1572 = vmatmul.f32.gmra.mxu1 %v1337_v62  ;;  %v1386_v62 = vld [vmem:[%s17216_s3 + $0x348] sm:$0xff] }
 0x1b6   : > { %9274 = vmatmul.msk.f32.gmra.mxu0 %vm573_vm1, %v517_v25  ;;  %10269 = vmatpush.msra.mxu2 %v1203_v27 }
 0x1b7   : > { %1635 = vmatpush.msrb.mxu0 %v1203_v27  ;;  %v1303_v27 = vld [vmem:[%s17216_s3 + $0xb0] sm:$0xff] }
 0x1b8   : > { %10270 = vmatpush.msra.mxu2 %v1202_v24 }
 0x1b9   : > { %1636 = vmatpush.msrb.mxu0 %v1202_v24 }
 0x1ba   : > { %10271 = vmatpush.msra.mxu2 %v1201_v22 }
 0x1bb   : > { %1637 = vmatpush.msrb.mxu0 %v1201_v22  ;;  %v11225_v30 = vpop.f32.mrf.mxu0 }
 0x1bc   : > { %10272 = vmatpush.msra.mxu2 %v1200_v17 }
 0x1bd   : > { %1638 = vmatpush.msrb.mxu0 %v1200_v17  ;;  %1575 = vmatmul.f32.gmra.mxu1 %v1344_v8 }
 0x1be   : > { %9275 = vmatmul.msk.f32.gmra.mxu0 %vm573_vm1, %v518_v7  ;;  %10273 = vmatpush.msra.mxu2 %v1199_v31  ;;  %v532_v7 = vld [vmem:[%s11039_s28 + $0x208] sm:$0xff] }
 0x1bf   : > { %1639 = vmatpush.msrb.mxu0 %v1199_v31  ;;  %1643 = vmatmul.f32.vlgmr.msra.gmra.mxu2 %v1289_v0  ;;  %v1338_v0 = vld [vmem:[%s17216_s3 + $0x1c8] sm:$0xff] }
 0x1c3   : > { %v11229_v61 = vpop.f32.mrf.mxu0 }
 0x1c5   : > { %1578 = vmatmul.f32.gmra.mxu1 %v1351_v26  ;;  %v1359_v26 = vld [vmem:[%s17216_s3 + $0x270] sm:$0xff] }
 0x1c6   : > { %9276 = vmatmul.msk.f32.gmra.mxu0 %vm573_vm1, %v519_v20 }
 0x1c7   : > { %1646 = vmatmul.f32.gmra.mxu2 %v1296_v9  ;;  %v538_v9 = vld [vmem:[%s11039_s28 + $0x238] sm:$0xff] }
 0x1cb   : > { %v11233_v32 = vpop.f32.mrf.mxu0 }
 0x1cd   : > { %1581 = vmatmul.f32.gmra.mxu1 %v1358_v36  ;;  %v1421_v36 = vld [vmem:[%s17216_s3 + $0x460] sm:$0xff] }
 0x1ce   : > { %9277 = vmatmul.msk.f32.gmra.mxu0 %vm573_vm1, %v520_v33  ;;  %v1001_v33 = vadd.f32 %v11118_v50, %v11233_v32  ;;  %v995_v32 = vadd.f32 %v11118_v50, %v11225_v30  ;;  %v1365_v30 = vld [vmem:[%s17216_s3 + $0x2a0] sm:$0xff] }
 0x1cf   : > { %1649 = vmatmul.f32.gmra.mxu2 %v1303_v27 }
 0x1d0   : > { %v1220_v39 = vmax.f32 %v1001_v33, 0.0  ;;  %v1332_v33 = vld [vmem:[%s17216_s3 + $0x198] sm:$0xff] }
 0x1d3   : > { %v11237_v34 = vpop.f32.mrf.mxu0 }
 0x1d4   : > { %v1004_v31 = vadd.f32 %v11118_v50, %v11237_v34  ;;  %v998_v34 = vadd.f32 %v11118_v50, %v11229_v61  ;;  %v989_v61 = vadd.f32 %v11118_v50, %v11203_v10 }
 0x1d5   : > { %1584 = vmatmul.f32.gmra.mxu1 %v1365_v30 }
 0x1d6   : > { %9278 = vmatmul.msk.f32.gmra.mxu0 %vm573_vm1, %v521_v35  ;;  %v1216_v10 = vmax.f32 %v989_v61, 0.0  ;;  %v543_v61 = vld [vmem:[%s11039_s28 + $0x260] sm:$0xff] }
 0x1db   : > { %v11244_v37 = vpop.f32.mrf.mxu0 }
 0x1dc   : > { %v1007_v29 = vadd.f32 %v11118_v50, %v11244_v37  ;;  %v1310_v37 = vld [vmem:[%s17216_s3 + $0xe8] sm:$0xff] }
 0x1dd   : > { %1652 = vmatmul.f32.gmra.mxu2 %v1310_v37  ;;  %1587 = vmatmul.f32.gmra.mxu1 %v1372_v63  ;;  %v1373_v37 = vld [vmem:[%s17216_s3 + $0x2e0] sm:$0xff]  ;;  %v1394_v63 = vld [vmem:[%s17216_s3 + $0x388] sm:$0xff] }
 0x1de   : > { %9279 = vmatmul.msk.f32.gmra.mxu0 %vm573_vm1, %v522_v38  ;;  %v1222_v35 = vmax.f32 %v1007_v29, 0.0  ;;  %v1221_v38 = vmax.f32 %v1004_v31, 0.0 }
 0x1e3   : > { %v11251_v40 = vpop.f32.mrf.mxu0 }
 0x1e4   : > { %v1010_v28 = vadd.f32 %v11118_v50, %v11251_v40 }
 0x1e5   : > { %1655 = vmatmul.f32.gmra.mxu2 %v1317_v45  ;;  %v1435_v45 = vld [vmem:[%s17216_s3 + $0x4d0] sm:$0xff] }
 0x1e6   : > { %9280 = vmatmul.msk.f32.gmra.mxu0 %vm573_vm1, %v523_v41  ;;  %v1223_v20 = vmax.f32 %v1010_v28, 0.0  ;;  %v533_v41 = vld [vmem:[%s11039_s28 + $0x210] sm:$0xff]  ;;  %v540_v28 = vld [vmem:[%s11039_s28 + $0x248] sm:$0xff] }
 0x1eb   : > { %v1012_v43 = vpop.f32.mrf.mxu0 }
 0x1ec   : > { %v1013_v21 = vadd.f32 %v11118_v50, %v1012_v43  ;;  %v1219_v43 = vmax.f32 %v998_v34, 0.0 }
 0x1ed   : > { %1658 = vmatmul.f32.gmra.mxu2 %v1324_v52 }
 0x1ee   : > { %9281 = vmatmul.msk.f32.gmra.mxu0 %vm573_vm1, %v524_v44  ;;  %v1224_v22 = vmax.f32 %v1013_v21, 0.0  ;;  %v1218_v44 = vmax.f32 %v995_v32, 0.0  ;;  %v1339_v32 = vld [vmem:[%s17216_s3 + $0x1d0] sm:$0xff] }
 0x1f3   : > { %v1015_v46 = vpop.f32.mrf.mxu0 }
 0x1f4   : > { %v1016_v18 = vadd.f32 %v11118_v50, %v1015_v46  ;;  %v1217_v46 = vmax.f32 %v992_v42, 0.0  ;;  %v1380_v42 = vld [vmem:[%s17216_s3 + $0x318] sm:$0xff] }
 0x1f6   : > { %9282 = vmatmul.msk.f32.gmra.mxu0 %vm573_vm1, %v525_v47  ;;  %v1225_v24 = vmax.f32 %v1016_v18, 0.0  ;;  %v539_v18 = vld [vmem:[%s11039_s28 + $0x240] sm:$0xff] }
 0x1fb   : > { %v1018_v49 = vpop.f32.mrf.mxu0 }
 0x1fc   : > { %v1019_v13 = vadd.f32 %v11118_v50, %v1018_v49  ;;  %v1215_v49 = vmax.f32 %v986_v23, 0.0  ;;  %v1387_v23 = vld [vmem:[%s17216_s3 + $0x350] sm:$0xff] }
 0x1fe   : > { %9283 = vmatmul.msk.f32.gmra.mxu0 %vm573_vm1, %v526_v51  ;;  %v1226_v25 = vmax.f32 %v1019_v13, 0.0  ;;  %v1283_v51 = vld [vmem:[%s17216_s3 + $0x10] sm:$0xff]  ;;  %v1400_v13 = vld [vmem:[%s17216_s3 + $0x3b8] sm:$0xff] }
 0x203   : > { %v1021_v53 = vpop.f32.mrf.mxu0 }
 0x204   : > { %v1022_v11 = vadd.f32 %v11118_v50, %v1021_v53 }
 0x206   : > { %9284 = vmatmul.msk.f32.gmra.mxu0 %vm573_vm1, %v527_v54  ;;  %v1227_v19 = vmax.f32 %v1022_v11, 0.0  ;;  %v535_v54 = vld [vmem:[%s11039_s28 + $0x220] sm:$0xff]  ;;  %v1311_v11 = vld [vmem:[%s17216_s3 + $0xf0] sm:$0xff] }
 0x20b   : > { %v1024_v56 = vpop.f32.mrf.mxu0 }
 0x20c   : > { %v1025_v5 = vadd.f32 %v11118_v50, %v1024_v56  ;;  %v1379_v56 = vld [vmem:[%s17216_s3 + $0x310] sm:$0xff] }
 0x20d   : > { %1590 = vmatmul.f32.gmra.mxu1 %v1379_v56 }
 0x20e   : > { %9285 = vmatmul.msk.f32.gmra.mxu0 %vm573_vm1, %v528_v57  ;;  %v1228_v14 = vmax.f32 %v1025_v5, 0.0  ;;  %v1331_v57 = vld [vmem:[%s17216_s3 + $0x190] sm:$0xff]  ;;  %v1393_v5 = vld [vmem:[%s17216_s3 + $0x380] sm:$0xff] }
 0x20f   : > { %1661 = vmatmul.f32.gmra.mxu2 %v1331_v57  ;;  %v1449_v57 = vld [vmem:[%s17216_s3 + $0x540] sm:$0xf] }
 0x213   : > { %v1027_v59 = vpop.f32.mrf.mxu0 }
 0x214   : > { %v1028_v3 = vadd.f32 %v11118_v50, %v1027_v59  ;;  %v536_v59 = vld [vmem:[%s11039_s28 + $0x228] sm:$0xff] }
 0x215   : > { %1593 = vmatmul.f32.gmra.mxu1 %v1386_v62  ;;  %v546_v62 = vld [vmem:[%s11039_s28 + $0x278] sm:$0xff] }
 0x216   : > { %9286 = vmatmul.msk.f32.gmra.mxu0 %vm573_vm1, %v529_v60  ;;  %v1229_v12 = vmax.f32 %v1028_v3, 0.0  ;;  %v1297_v60 = vld [vmem:[%s17216_s3 + $0x80] sm:$0xff]  ;;  %v1304_v3 = vld [vmem:[%s17216_s3 + $0xb8] sm:$0xff] }
 0x217   : > { %1664 = vmatmul.f32.gmra.mxu2 %v1338_v0 }
 0x21b   : > { %v1030_v1 = vpop.f32.mrf.mxu0 }
 0x21c   : > { %v1031_v4 = vadd.f32 %v11118_v50, %v1030_v1 }
 0x21d   : > { %1596 = vmatmul.f32.gmra.mxu1 %v1393_v5 }
 0x21e   : > { %9287 = vmatmul.msk.f32.gmra.mxu0 %vm573_vm1, %v530_v2  ;;  %v1230_v6 = vmax.f32 %v1031_v4, 0.0  ;;  %v537_v2 = vld [vmem:[%s11039_s28 + $0x230] sm:$0xff]  ;;  %v11399_v4 = vpop.f32.mrf.mxu1 }
 0x220   : > { %1716 = vmatpush.msra.mxu3 %v1230_v6  ;;  %v1345_v6 = vld [vmem:[%s17216_s3 + $0x200] sm:$0xff] }
 0x221   : > { %1667 = vmatmul.f32.gmra.mxu2 %v1345_v6 }
 0x222   : > { %1717 = vmatpush.msra.mxu3 %v1229_v12 }
 0x223   : > { %v11304_v15 = vpop.f32.mrf.mxu0 }
 0x224   : > { %1718 = vmatpush.msra.mxu3 %v1228_v14  ;;  %v1352_v14 = vld [vmem:[%s17216_s3 + $0x238] sm:$0xff] }
 0x225   : > { %1599 = vmatmul.f32.gmra.mxu1 %v1400_v13 }
 0x226   : > { %9288 = vmatmul.msk.f32.gmra.mxu0 %vm573_vm1, %v531_v16  ;;  %1719 = vmatpush.msra.mxu3 %v1227_v19  ;;  %v11414_v12 = vpop.f32.mrf.mxu1  ;;  %v1318_v19 = vld [vmem:[%s17216_s3 + $0x128] sm:$0xff] }
 0x227   : > { %17280 = vst [vmem:[#allocation7_spill] sm:$0xff] %v11414_v12 }
 0x228   : > { %1720 = vmatpush.msra.mxu3 %v1226_v25  ;;  %v1407_v25 = vld [vmem:[%s17216_s3 + $0x3f0] sm:$0xff] }
 0x229   : > { %1670 = vmatmul.f32.gmra.mxu2 %v1352_v14 }
 0x22a   : > { %1721 = vmatpush.msra.mxu3 %v1225_v24  ;;  %v1325_v24 = vld [vmem:[%s17216_s3 + $0x160] sm:$0xff] }
 0x22b   : > { %v11320_v17 = vpop.f32.mrf.mxu0 }
 0x22c   : > { %1722 = vmatpush.msra.mxu3 %v1224_v22  ;;  %v1414_v22 = vld [vmem:[%s17216_s3 + $0x428] sm:$0xff] }
 0x22d   : > { %1602 = vmatmul.f32.gmra.mxu1 %v1407_v25 }
 0x22e   : > { %9289 = vmatmul.msk.f32.gmra.mxu0 %vm573_vm1, %v532_v7  ;;  %1723 = vmatpush.msra.mxu3 %v1223_v20  ;;  %v11429_v21 = vpop.f32.mrf.mxu1  ;;  %v1366_v7 = vld [vmem:[%s17216_s3 + $0x2a8] sm:$0xff]  ;;  %v541_v20 = vld [vmem:[%s11039_s28 + $0x250] sm:$0xff] }
 0x22f   : > { %17281 = vst [vmem:[#allocation8_spill] sm:$0xff] %v11429_v21 }
 0x230   : > { %1724 = vmatpush.msra.mxu3 %v1222_v35 }
 0x231   : > { %1673 = vmatmul.f32.gmra.mxu2 %v1359_v26  ;;  %v547_v26 = vld [vmem:[%s11039_s28 + $0x280] sm:$0xff] }
 0x232   : > { %1725 = vmatpush.msra.mxu3 %v1221_v38  ;;  %v542_v38 = vld [vmem:[%s11039_s28 + $0x258] sm:$0xff] }
 0x233   : > { %v11338_v40 = vpop.f32.mrf.mxu0 }
 0x234   : > { %1726 = vmatpush.msra.mxu3 %v1220_v39 }
 0x235   : > { %1605 = vmatmul.f32.gmra.mxu1 %v1414_v22  ;;  %v1374_v22 = vld [vmem:[%s17216_s3 + $0x2e8] sm:$0xff] }
 0x236   : > { %9290 = vmatmul.msk.f32.gmra.mxu0 %vm573_vm1, %v533_v41  ;;  %1727 = vmatpush.msra.mxu3 %v1219_v43  ;;  %v11444_v29 = vpop.f32.mrf.mxu1  ;;  %v1428_v41 = vld [vmem:[%s17216_s3 + $0x498] sm:$0xff] }
 0x237   : > { %17282 = vst [vmem:[#allocation9_spill] sm:$0xff] %v11444_v29 }
 0x238   : > { %1728 = vmatpush.msra.mxu3 %v1218_v44  ;;  %v1346_v44 = vld [vmem:[%s17216_s3 + $0x208] sm:$0xff] }
 0x239   : > { %1676 = vmatmul.f32.gmra.mxu2 %v1366_v7 }
 0x23a   : > { %1729 = vmatpush.msra.mxu3 %v1217_v46 }
 0x23b   : > { %v11354_v47 = vpop.f32.mrf.mxu0 }
 0x23c   : > { %1730 = vmatpush.msra.mxu3 %v1216_v10  ;;  %v544_v10 = vld [vmem:[%s11039_s28 + $0x268] sm:$0xff] }
 0x23d   : > { %1608 = vmatmul.f32.gmra.mxu1 %v1421_v36 }
 0x23e   : > { %9291 = vmatmul.msk.f32.gmra.mxu0 %vm573_vm1, %v534_v48  ;;  %1731 = vmatpush.msra.mxu3 %v1215_v49  ;;  %v11459_v35 = vpop.f32.mrf.mxu1  ;;  %v1353_v48 = vld [vmem:[%s17216_s3 + $0x240] sm:$0xff] }
 0x23f   : > { %1732 = vmatmul.f32.vlgmr.msra.gmra.mxu3 %v1283_v51  ;;  %17283 = vst [vmem:[#allocation10_spill] sm:$0xff] %v11459_v35  ;;  %v1442_v51 = vld [vmem:[%s17216_s3 + $0x508] sm:$0xff] }
 0x241   : > { %1679 = vmatmul.f32.gmra.mxu2 %v1373_v37 }
 0x243   : > { %v11367_v53 = vpop.f32.mrf.mxu0 }
 0x245   : > { %1611 = vmatmul.f32.gmra.mxu1 %v1428_v41 }
 0x246   : > { %9292 = vmatmul.msk.f32.gmra.mxu0 %vm573_vm1, %v535_v54  ;;  %v11472_v39 = vpop.f32.mrf.mxu1  ;;  %v545_v54 = vld [vmem:[%s11039_s28 + $0x270] sm:$0xff] }
 0x247   : > { %1735 = vmatmul.f32.gmra.mxu3 %v1290_v55  ;;  %17284 = vst [vmem:[#allocation11_spill] sm:$0xff] %v11472_v39  ;;  %v1360_v55 = vld [vmem:[%s17216_s3 + $0x278] sm:$0xff] }
 0x249   : > { %1682 = vmatmul.f32.gmra.mxu2 %v1380_v42 }
 0x24b   : > { %v11380_v58 = vpop.f32.mrf.mxu0 }
 0x24d   : > { %1614 = vmatmul.f32.gmra.mxu1 %v1435_v45 }
 0x24e   : > { %9293 = vmatmul.msk.f32.gmra.mxu0 %vm573_vm1, %v536_v59  ;;  %v11485_v30 = vpop.f32.mrf.mxu1  ;;  %v1401_v59 = vld [vmem:[%s17216_s3 + $0x3c0] sm:$0xff] }
 0x24f   : > { %1738 = vmatmul.f32.gmra.mxu3 %v1297_v60 }
 0x251   : > { %1685 = vmatmul.f32.gmra.mxu2 %v1387_v23 }
 0x253   : > { %v11393_v1 = vpop.f32.mrf.mxu0 }
 0x254   : > { %v1052_v41 = vadd.f32 %v11118_v50, %v11393_v1  ;;  %v1046_v1 = vadd.f32 %v11118_v50, %v11367_v53  ;;  %v1388_v53 = vld [vmem:[%s17216_s3 + $0x358] sm:$0xff] }
 0x255   : > { %1617 = vmatmul.f32.gmra.mxu1 %v1442_v51 }
 0x256   : > { %9294 = vmatmul.msk.f32.gmra.mxu0 %vm573_vm1, %v537_v2  ;;  %v11498_v49 = vpop.f32.mrf.mxu1  ;;  %v1235_v51 = vmax.f32 %v1046_v1, 0.0  ;;  %v1437_v1 = vld [vmem:[%s17216_s3 + $0x4e0] sm:$0xff] }
 0x257   : > { %1741 = vmatmul.f32.gmra.mxu3 %v1304_v3  ;;  %v1367_v3 = vld [vmem:[%s17216_s3 + $0x2b0] sm:$0xff] }
 0x259   : > { %1688 = vmatmul.f32.gmra.mxu2 %v1394_v63  ;;  %v1037_v63 = vadd.f32 %v11118_v50, %v11320_v17 }
 0x25b   : > { %v11408_v8 = vpop.f32.mrf.mxu0 }
 0x25d   : > { %1620 = vmatmul.f32.gmra.mxu1 %v1449_v57 }
 0x25e   : > { %9295 = vmatmul.msk.f32.gmra.mxu0 %vm573_vm1, %v538_v9  ;;  %v11511_v56 = vpop.f32.mrf.mxu1 }
 0x25f   : > { %1744 = vmatmul.f32.gmra.mxu3 %v1311_v11  ;;  %v1408_v11 = vld [vmem:[%s17216_s3 + $0x3f8] sm:$0xff] }
 0x261   : > { %1691 = vmatmul.f32.gmra.mxu2 %v1401_v59  ;;  %v550_v59 = vld [vmem:[%s11039_s28 + $0x298] sm:$0xff] }
 0x263   : > { %v11423_v16 = vpop.f32.mrf.mxu0 }
 0x264   : > { %v1058_v36 = vadd.f32 %v11118_v50, %v11423_v16  ;;  %v1381_v16 = vld [vmem:[%s17216_s3 + $0x320] sm:$0xff] }
 0x266   : > { %9296 = vmatmul.msk.f32.gmra.mxu0 %vm573_vm1, %v539_v18  ;;  %v11526_v5 = vpop.f32.mrf.mxu1  ;;  %v1239_v42 = vmax.f32 %v1058_v36, 0.0 }
 0x267   : > { %1747 = vmatmul.f32.gmra.mxu3 %v1318_v19 }
 0x269   : > { %1694 = vmatmul.f32.gmra.mxu2 %v1408_v11  ;;  %v1443_v11 = vld [vmem:[%s17216_s3 + $0x510] sm:$0xff] }
 0x26b   : > { %v11438_v27 = vpop.f32.mrf.mxu0 }
 0x26c   : > { %v1061_v7 = vadd.f32 %v11118_v50, %v11438_v27  ;;  %v1055_v27 = vadd.f32 %v11118_v50, %v11408_v8 }
 0x26e   : > { %9297 = vmatmul.msk.f32.gmra.mxu0 %vm573_vm1, %v540_v28  ;;  %v1238_v8 = vmax.f32 %v1055_v27, 0.0  ;;  %v1423_v27 = vld [vmem:[%s17216_s3 + $0x470] sm:$0xff] }
 0x26f   : > { %1750 = vmatmul.f32.gmra.mxu3 %v1325_v24 }
 0x273   : > { %v11453_v31 = vpop.f32.mrf.mxu0 }
 0x274   : > { %v1064_v28 = vadd.f32 %v11118_v50, %v11453_v31  ;;  %v1415_v31 = vld [vmem:[%s17216_s3 + $0x430] sm:$0xff] }
 0x275   : > { %1697 = vmatmul.f32.gmra.mxu2 %v1415_v31 }
 0x276   : > { %9298 = vmatmul.msk.f32.gmra.mxu0 %vm573_vm1, %v541_v20  ;;  %v1241_v37 = vmax.f32 %v1064_v28, 0.0  ;;  %v1450_v28 = vld [vmem:[%s17216_s3 + $0x548] sm:$0xf] }
 0x277   : > { %1753 = vmatmul.f32.gmra.mxu3 %v1332_v33  ;;  %v11546_v33 = vpop.f32.mrf.mxu1 }
 0x27b   : > { %v1066_v34 = vpop.f32.mrf.mxu0 }
 0x27c   : > { %v1067_v18 = vadd.f32 %v11118_v50, %v1066_v34  ;;  %v1240_v34 = vmax.f32 %v1061_v7, 0.0  ;;  %v1416_v7 = vld [vmem:[%s17216_s3 + $0x438] sm:$0xff] }
 0x27e   : > { %9299 = vmatmul.msk.f32.gmra.mxu0 %vm573_vm1, %v542_v38  ;;  %v1242_v20 = vmax.f32 %v1067_v18, 0.0  ;;  %v1409_v18 = vld [vmem:[%s17216_s3 + $0x400] sm:$0xff] }
 0x27f   : > { %1756 = vmatmul.f32.gmra.mxu3 %v1339_v32  ;;  %v548_v32 = vld [vmem:[%s11039_s28 + $0x288] sm:$0xff]  ;;  %v11571_v45 = vpop.f32.mrf.mxu1 }
 0x283   : > { %v1069_v43 = vpop.f32.mrf.mxu0 }
 0x284   : > { %v1070_v13 = vadd.f32 %v11118_v50, %v1069_v43  ;;  %v1049_v43 = vadd.f32 %v11118_v50, %v11380_v58  ;;  %v1043_v58 = vadd.f32 %v11118_v50, %v11354_v47 }
 0x286   : > { %9300 = vmatmul.msk.f32.gmra.mxu0 %vm573_vm1, %v543_v61  ;;  %v1243_v24 = vmax.f32 %v1070_v13, 0.0  ;;  %v1422_v61 = vld [vmem:[%s17216_s3 + $0x468] sm:$0xff]  ;;  %v1236_v23 = vmax.f32 %v1049_v43, 0.0  ;;  %v1234_v47 = vmax.f32 %v1043_v58, 0.0  ;;  %v1319_v43 = vld [vmem:[%s17216_s3 + $0x130] sm:$0xff] }
 0x287   : > { %1759 = vmatmul.f32.gmra.mxu3 %v1346_v44  ;;  %v1237_v44 = vmax.f32 %v1052_v41, 0.0  ;;  %1700 = vmatmul.f32.gmra.mxu2 %v1422_v61  ;;  %v11591_v57 = vpop.f32.mrf.mxu1  ;;  %v556_v61 = vld [vmem:[%s11039_s28 + $0x2c8] sm:$0xff] }
 0x28b   : > { %v1072_v46 = vpop.f32.mrf.mxu0 }
 0x28c   : > { %v1073_v6 = vadd.f32 %v11118_v50, %v1072_v46 }
 0x28e   : > { %9301 = vmatmul.msk.f32.gmra.mxu0 %vm573_vm1, %v544_v10  ;;  %v1244_v19 = vmax.f32 %v1073_v6, 0.0  ;;  %v549_v10 = vld [vmem:[%s11039_s28 + $0x290] sm:$0xff] }
 0x28f   : > { %1762 = vmatmul.f32.gmra.mxu3 %v1353_v48  ;;  %v1040_v48 = vadd.f32 %v11118_v50, %v11338_v40  ;;  %v1034_v40 = vadd.f32 %v11118_v50, %v11304_v15  ;;  %v1436_v15 = vld [vmem:[%s17216_s3 + $0x4d8] sm:$0xff]  ;;  %v1291_v6 = vld [vmem:[%s17216_s3 + $0x50] sm:$0xff] }
 0x293   : > { %v1075_v52 = vpop.f32.mrf.mxu0 }
 0x294   : > { %v1076_v0 = vadd.f32 %v11118_v50, %v1075_v52  ;;  %v1429_v52 = vld [vmem:[%s17216_s3 + $0x4a0] sm:$0xff] }
 0x295   : > { %1703 = vmatmul.f32.gmra.mxu2 %v1429_v52  ;;  %v1451_v52 = vld [vmem:[%s17216_s3 + $0x550] sm:$0xf] }
 0x296   : > { %9302 = vmatmul.msk.f32.gmra.mxu0 %vm573_vm1, %v545_v54  ;;  %v1245_v14 = vmax.f32 %v1076_v0, 0.0  ;;  %v1233_v54 = vmax.f32 %v1040_v48, 0.0  ;;  %v1444_v48 = vld [vmem:[%s17216_s3 + $0x518] sm:$0xff] }
 0x297   : > { %1765 = vmatmul.f32.gmra.mxu3 %v1360_v55  ;;  %v1232_v55 = vmax.f32 %v1037_v63, 0.0 }
 0x29b   : > { %v1078_v60 = vpop.f32.mrf.mxu0 }
 0x29c   : > { %v1079_v2 = vadd.f32 %v11118_v50, %v1078_v60  ;;  %v1231_v60 = vmax.f32 %v1034_v40, 0.0  ;;  %v1284_v50 = vld [vmem:[%s17216_s3 + $0x18] sm:$0xff] }
 0x29d   : > { %1706 = vmatmul.f32.gmra.mxu2 %v1436_v15  ;;  %v1340_v40 = vld [vmem:[%s17216_s3 + $0x1d8] sm:$0xff] }
 0x29e   : > { %9303 = vmatmul.msk.f32.gmra.mxu0 %vm573_vm1, %v546_v62  ;;  %v1246_v9 = vmax.f32 %v1079_v2, 0.0  ;;  %v1395_v62 = vld [vmem:[%s17216_s3 + $0x390] sm:$0xff]  ;;  %v551_v2 = vld [vmem:[%s11039_s28 + $0x2a0] sm:$0xff] }
 0x29f   : > { %1768 = vmatmul.f32.gmra.mxu3 %v1367_v3  ;;  %v1402_v3 = vld [vmem:[%s17216_s3 + $0x3c8] sm:$0xff] }
 0x2a0   : > { %1808 = vmatpush.msrb.mxu1 %v1246_v9  ;;  %v11615_v9 = vpop.f32.mrf.mxu1 }
 0x2a2   : > { %1809 = vmatpush.msrb.mxu1 %v1245_v14  ;;  %v552_v14 = vld [vmem:[%s11039_s28 + $0x2a8] sm:$0xff] }
 0x2a3   : > { %v11535_v25 = vpop.f32.mrf.mxu0 }
 0x2a4   : > { %1810 = vmatpush.msrb.mxu1 %v1244_v19  ;;  %v1298_v19 = vld [vmem:[%s17216_s3 + $0x88] sm:$0xff] }
 0x2a5   : > { %1709 = vmatmul.f32.gmra.mxu2 %v1443_v11 }
 0x2a6   : > { %9304 = vmatmul.msk.f32.gmra.mxu0 %vm573_vm1, %v547_v26  ;;  %1811 = vmatpush.msrb.mxu1 %v1243_v24 }
 0x2a7   : > { %1771 = vmatmul.f32.gmra.mxu3 %v1374_v22  ;;  %v553_v22 = vld [vmem:[%s11039_s28 + $0x2b0] sm:$0xff] }
 0x2a8   : > { %1812 = vmatpush.msrb.mxu1 %v1242_v20  ;;  %v11631_v26 = vpop.f32.mrf.mxu1  ;;  %v1305_v20 = vld [vmem:[%s17216_s3 + $0xc0] sm:$0xff] }
 0x2aa   : > { %1813 = vmatpush.msrb.mxu1 %v1241_v37  ;;  %v554_v37 = vld [vmem:[%s11039_s28 + $0x2b8] sm:$0xff] }
 0x2ab   : > { %v11555_v38 = vpop.f32.mrf.mxu0 }
 0x2ac   : > { %1814 = vmatpush.msrb.mxu1 %v1240_v34  ;;  %v1312_v34 = vld [vmem:[%s17216_s3 + $0xf8] sm:$0xff] }
 0x2ad   : > { %1712 = vmatmul.f32.gmra.mxu2 %v1450_v28 }
 0x2ae   : > { %9305 = vmatmul.msk.f32.gmra.mxu0 %vm573_vm1, %v548_v32  ;;  %1815 = vmatpush.msrb.mxu1 %v1239_v42  ;;  %v555_v42 = vld [vmem:[%s11039_s28 + $0x2c0] sm:$0xff] }
 0x2af   : > { %1774 = vmatmul.f32.gmra.mxu3 %v1381_v16  ;;  %v1430_v16 = vld [vmem:[%s17216_s3 + $0x4a8] sm:$0xff] }
 0x2b0   : > { %1816 = vmatpush.msrb.mxu1 %v1238_v8  ;;  %v11646_v31 = vpop.f32.mrf.mxu1 }
 0x2b2   : > { %1817 = vmatpush.msrb.mxu1 %v1237_v44  ;;  %v1326_v44 = vld [vmem:[%s17216_s3 + $0x168] sm:$0xff] }
 0x2b3   : > { %v11575_v46 = vpop.f32.mrf.mxu0 }
 0x2b4   : > { %1818 = vmatpush.msrb.mxu1 %v1236_v23 }
 0x2b6   : > { %9306 = vmatmul.msk.f32.gmra.mxu0 %vm573_vm1, %v549_v10  ;;  %1819 = vmatpush.msrb.mxu1 %v1235_v51  ;;  %v557_v10 = vld [vmem:[%s11039_s28 + $0x2d0] sm:$0xff]  ;;  %v1333_v51 = vld [vmem:[%s17216_s3 + $0x1a0] sm:$0xff] }
 0x2b7   : > { %1777 = vmatmul.f32.gmra.mxu3 %v1388_v53 }
 0x2b8   : > { %1820 = vmatpush.msrb.mxu1 %v1234_v47  ;;  %v11658_v32 = vpop.f32.mrf.mxu1  ;;  %v558_v47 = vld [vmem:[%s11039_s28 + $0x2d8] sm:$0xff] }
 0x2ba   : > { %1821 = vmatpush.msrb.mxu1 %v1233_v54 }
 0x2bb   : > { %v11593_v17 = vpop.f32.mrf.mxu0 }
 0x2bc   : > { %1822 = vmatpush.msrb.mxu1 %v1232_v55 }
 0x2be   : > { %9307 = vmatmul.msk.f32.gmra.mxu0 %vm573_vm1, %v550_v59  ;;  %1823 = vmatpush.msrb.mxu1 %v1231_v60  ;;  %v559_v60 = vld [vmem:[%s11039_s28 + $0x2e0] sm:$0xff] }
 0x2bf   : > { %1780 = vmatmul.f32.gmra.mxu3 %v1395_v62  ;;  %1824 = vmatmul.f32.vlgmr.msrb.gmra.mxu1 %v1284_v50  ;;  %v1347_v62 = vld [vmem:[%s17216_s3 + $0x210] sm:$0xff] }
 0x2c0   : > { %v11679_v58 = vpop.f32.mrf.mxu1 }
 0x2c2   : > { %v11700_v54 = vpop.f32.mrf.mxu3 }
 0x2c3   : > { %v11606_v0 = vpop.f32.mrf.mxu0 }
 0x2c6   : > { %9308 = vmatmul.msk.f32.gmra.mxu0 %vm573_vm1, %v551_v2  ;;  %v560_v2 = vld [vmem:[%s11039_s28 + $0x2e8] sm:$0xff] }
 0x2c7   : > { %1783 = vmatmul.f32.gmra.mxu3 %v1402_v3  ;;  %1827 = vmatmul.f32.gmra.mxu1 %v1291_v6  ;;  %v1354_v3 = vld [vmem:[%s17216_s3 + $0x248] sm:$0xff]  ;;  %v11716_v6 = vpop.f32.mrf.mxu2 }
 0x2c8   : > { %v11690_v53 = vpop.f32.mrf.mxu1  ;;  %17288 = vst [vmem:[#allocation15_spill] sm:$0xff] %v11716_v6 }
 0x2c9   : > { %17285 = vst [vmem:[#allocation12_spill] sm:$0xff] %v11690_v53 }
 0x2cb   : > { %v11621_v13 = vpop.f32.mrf.mxu0 }
 0x2ce   : > { %9309 = vmatmul.msk.f32.gmra.mxu0 %vm573_vm1, %v552_v14  ;;  %v561_v14 = vld [vmem:[%s11039_s28 + $0x2f0] sm:$0xff] }
 0x2cf   : > { %1786 = vmatmul.f32.gmra.mxu3 %v1409_v18  ;;  %1830 = vmatmul.f32.gmra.mxu1 %v1298_v19  ;;  %v1361_v18 = vld [vmem:[%s17216_s3 + $0x280] sm:$0xff]  ;;  %v11725_v28 = vpop.f32.mrf.mxu2 }
 0x2d0   : > { %v11702_v55 = vpop.f32.mrf.mxu1  ;;  %17290 = vst [vmem:[#allocation17_spill] sm:$0xff] %v11725_v28 }
 0x2d1   : > { %17286 = vst [vmem:[#allocation13_spill] sm:$0xff] %v11702_v55 }
 0x2d3   : > { %v11636_v24 = vpop.f32.mrf.mxu0 }
 0x2d6   : > { %9310 = vmatmul.msk.f32.gmra.mxu0 %vm573_vm1, %v553_v22 }
 0x2d7   : > { %1789 = vmatmul.f32.gmra.mxu3 %v1416_v7  ;;  %1833 = vmatmul.f32.gmra.mxu1 %v1305_v20  ;;  %v562_v7 = vld [vmem:[%s11039_s28 + $0x2f8] sm:$0xff]  ;;  %v11731_v20 = vld [vmem:[%s17279_s2] ss:$0 sm:$0xff]  ;;  %s10852_s2 = scalar_lea.hbm %s10851_s21, 1 }
 0x2d8   : > { %v11709_v50 = vpop.f32.mrf.mxu1  ;;  %p10853_p11 = scmp.ne.s32.totalorder %s10851_s21, %s10852_s2  ;;  %p10858_p1 = scmp.lt.s32.totalorder %s10856_s26, %s10852_s2 }
 0x2d9   : > { %17287 = vst [vmem:[#allocation14_spill] sm:$0xff] %v11709_v50 }
 0x2da   : > { %p10854_p12 = pnand %p10853_p11, %p11013_p5  ;;  %p10859_p2 = por %p10858_p1, %p10857_p0 }
 0x2db   : > { %v11648_v36 = vpop.f32.mrf.mxu0 }
 0x2dc   : > { %p10855_p13 = pneg %p10854_p12 }
 0x2de   : > { %9311 = vmatmul.msk.f32.gmra.mxu0 %vm573_vm1, %v554_v37  ;;  %p10860_p3 = pnand %p10859_p2, %p10855_p13 }
 0x2df   : > { %1792 = vmatmul.f32.gmra.mxu3 %v1423_v27  ;;  %1836 = vmatmul.f32.gmra.mxu1 %v1312_v34  ;;  %v1368_v34 = vld [vmem:[%s17216_s3 + $0x2b8] sm:$0xff] }
 0x2e0   : > { %v11722_v19 = vpop.f32.mrf.mxu1 }
 0x2e1   : > { %17289 = vst [vmem:[#allocation16_spill] sm:$0xff] %v11722_v19 }
 0x2e3   : > { %v11660_v41 = vpop.f32.mrf.mxu0 }
 0x2e6   : > { %9312 = vmatmul.msk.f32.gmra.mxu0 %vm573_vm1, %v555_v42 }
 0x2e7   : > { %1795 = vmatmul.f32.gmra.mxu3 %v1430_v16  ;;  %1839 = vmatmul.f32.gmra.mxu1 %v1319_v43 }
 0x2e8   : > { %v11740_v43 = vpop.f32.mrf.mxu1 }
 0x2e9   : > { %17291 = vst [vmem:[#allocation18_spill] sm:$0xff] %v11740_v43 }
 0x2eb   : > { %v11670_v8 = vpop.f32.mrf.mxu0 }
 0x2ee   : > { %9313 = vmatmul.msk.f32.gmra.mxu0 %vm573_vm1, %v556_v61 }
 0x2ef   : > { %1798 = vmatmul.f32.gmra.mxu3 %v1437_v1  ;;  %1842 = vmatmul.f32.gmra.mxu1 %v1326_v44 }
 0x2f3   : > { %v1111_v23 = vpop.f32.mrf.mxu0 }
 0x2f6   : > { %9314 = vmatmul.msk.f32.gmra.mxu0 %vm573_vm1, %v557_v10 }
 0x2f7   : > { %1801 = vmatmul.f32.gmra.mxu3 %v1444_v48  ;;  %1845 = vmatmul.f32.gmra.mxu1 %v1333_v51  ;;  %v563_v51 = vld [vmem:[%s11039_s28 + $0x300] sm:$0xff] }
 0x2fb   : > { %v1114_v63 = vpop.f32.mrf.mxu0 }
 0x2fc   : > { %v1115_v44 = vadd.f32 %v11731_v20, %v1114_v63 }
 0x2fe   : > { %9315 = vmatmul.msk.f32.gmra.mxu0 %vm573_vm1, %v558_v47  ;;  %v1112_v47 = vadd.f32 %v11731_v20, %v1111_v23  ;;  %v1258_v63 = vmax.f32 %v1115_v44, 0.0  ;;  %v1106_v23 = vadd.f32 %v11731_v20, %v11660_v41  ;;  %v1382_v41 = vld [vmem:[%s17216_s3 + $0x328] sm:$0xff] }
 0x2ff   : > { %1804 = vmatmul.f32.gmra.mxu3 %v1451_v52  ;;  %1848 = vmatmul.f32.gmra.mxu1 %v1340_v40  ;;  %v1375_v40 = vld [vmem:[%s17216_s3 + $0x2f0] sm:$0xff] }
 0x303   : > { %v1117_v59 = vpop.f32.mrf.mxu0 }
 0x304   : > { %v1118_v61 = vadd.f32 %v11731_v20, %v1117_v59  ;;  %v1109_v59 = vadd.f32 %v11731_v20, %v11670_v8  ;;  %v564_v8 = vld [vmem:[%s11039_s28 + $0x308] sm:$0xff] }
 0x306   : > { %9316 = vmatmul.msk.f32.gmra.mxu0 %vm573_vm1, %v559_v60  ;;  %v1259_v52 = vmax.f32 %v1118_v61, 0.0  ;;  %v11751_v60 = vpop.f32.mrf.mxu2  ;;  %v1088_v61 = vadd.f32 %v11731_v20, %v11575_v46 }
 0x307   : > { %1851 = vmatmul.f32.gmra.mxu1 %v1347_v62  ;;  %17292 = vst [vmem:[#allocation19_spill] sm:$0xff] %v11751_v60  ;;  %v1257_v62 = vmax.f32 %v1112_v47, 0.0 }
 0x30b   : > { %v1120_v15 = vpop.f32.mrf.mxu0 }
 0x30c   : > { %v1121_v42 = vadd.f32 %v11731_v20, %v1120_v15  ;;  %v11758_v15 = vpop.f32.mrf.mxu1 }
 0x30d   : > { %17293 = vst [vmem:[#allocation20_spill] sm:$0xff] %v11758_v15 }
 0x30e   : > { %9317 = vmatmul.msk.f32.gmra.mxu0 %vm573_vm1, %v560_v2  ;;  %v1260_v10 = vmax.f32 %v1121_v42, 0.0  ;;  %v1103_v2 = vadd.f32 %v11731_v20, %v11648_v36 }
 0x30f   : > { %1854 = vmatmul.f32.gmra.mxu1 %v1354_v3  ;;  %v1256_v3 = vmax.f32 %v1109_v59, 0.0 }
 0x310   : > { %v1254_v36 = vmax.f32 %v1103_v2, 0.0  ;;  %v1403_v2 = vld [vmem:[%s17216_s3 + $0x3d0] sm:$0xff] }
 0x313   : > { %v1123_v11 = vpop.f32.mrf.mxu0 }
 0x314   : > { %v1124_v37 = vadd.f32 %v11731_v20, %v1123_v11 }
 0x316   : > { %9318 = vmatmul.msk.f32.gmra.mxu0 %vm573_vm1, %v561_v14  ;;  %v1261_v1 = vmax.f32 %v1124_v37, 0.0  ;;  %v1100_v14 = vadd.f32 %v11731_v20, %v11636_v24  ;;  %v1094_v37 = vadd.f32 %v11731_v20, %v11606_v0 }
 0x317   : > { %1857 = vmatmul.f32.gmra.mxu1 %v1361_v18  ;;  %v1255_v18 = vmax.f32 %v1106_v23, 0.0 }
 0x318   : > { %v1253_v24 = vmax.f32 %v1100_v14, 0.0  ;;  %v1251_v0 = vmax.f32 %v1094_v37, 0.0 }
 0x31b   : > { %v1126_v22 = vpop.f32.mrf.mxu0 }
 0x31c   : > { %v1127_v27 = vadd.f32 %v11731_v20, %v1126_v22  ;;  %v1097_v22 = vadd.f32 %v11731_v20, %v11621_v13 }
 0x31e   : > { %9319 = vmatmul.msk.f32.gmra.mxu0 %vm573_vm1, %v562_v7  ;;  %v1262_v16 = vmax.f32 %v1127_v27, 0.0  ;;  %v11773_v7 = vpop.f32.mrf.mxu2  ;;  %v1091_v27 = vadd.f32 %v11731_v20, %v11593_v17  ;;  %v1252_v42 = vmax.f32 %v1097_v22, 0.0  ;;  %v1085_v17 = vadd.f32 %v11731_v20, %v11555_v38  ;;  %v1396_v38 = vld [vmem:[%s17216_s3 + $0x398] sm:$0xff] }
 0x31f   : > { %1860 = vmatmul.f32.gmra.mxu1 %v1368_v34  ;;  %17294 = vst [vmem:[#allocation21_spill] sm:$0xff] %v11773_v7  ;;  %v11779_v34 = vpop.f32.mrf.mxu1 }
 0x320   : > { %1900 = vmatpush.msrb.mxu2 %v1262_v16  ;;  %17295 = vst [vmem:[#allocation22_spill] sm:$0xff] %v11779_v34  ;;  %v1282_v16 = vld [vmem:[%s17216_s3 + $0x8] sm:$0xff]  ;;  %v1250_v44 = vmax.f32 %v1091_v27, 0.0  ;;  %v1248_v46 = vmax.f32 %v1085_v17, 0.0  ;;  %v1341_v34 = vld [vmem:[%s17216_s3 + $0x1e0] sm:$0xff] }
 0x321   : > { %v1306_v27 = vld [vmem:[%s17216_s3 + $0xc8] sm:$0xff] }
 0x322   : > { %1901 = vmatpush.msrb.mxu2 %v1261_v1  ;;  %v1389_v1 = vld [vmem:[%s17216_s3 + $0x360] sm:$0xff] }
 0x323   : > { %v11744_v48 = vpop.f32.mrf.mxu0 }
 0x324   : > { %1902 = vmatpush.msrb.mxu2 %v1260_v10  ;;  %v1082_v10 = vadd.f32 %v11731_v20, %v11535_v25  ;;  %v1285_v25 = vld [vmem:[%s17216_s3 + $0x20] sm:$0xff] }
 0x326   : > { %9320 = vmatmul.msk.f32.gmra.mxu0 %vm573_vm1, %v563_v51  ;;  %1903 = vmatpush.msrb.mxu2 %v1259_v52  ;;  %v1249_v51 = vmax.f32 %v1088_v61, 0.0  ;;  %v11795_v47 = vpop.f32.mrf.mxu2  ;;  %v1247_v59 = vmax.f32 %v1082_v10, 0.0 }
 0x327   : > { %1863 = vmatmul.f32.gmra.mxu1 %v1375_v40  ;;  %17296 = vst [vmem:[#allocation23_spill] sm:$0xff] %v11795_v47 }
 0x328   : > { %1904 = vmatpush.msrb.mxu2 %v1258_v63 }
 0x32a   : > { %1905 = vmatpush.msrb.mxu2 %v1257_v62 }
 0x32b   : > { %v11762_v11 = vpop.f32.mrf.mxu0 }
 0x32c   : > { %1906 = vmatpush.msrb.mxu2 %v1256_v3  ;;  %v1292_v3 = vld [vmem:[%s17216_s3 + $0x58] sm:$0xff] }
 0x32e   : > { %9321 = vmatmul.msk.f32.gmra.mxu0 %vm573_vm1, %v564_v8  ;;  %1907 = vmatpush.msrb.mxu2 %v1255_v18  ;;  %v11807_v63 = vpop.f32.mrf.mxu2  ;;  %v1410_v18 = vld [vmem:[%s17216_s3 + $0x408] sm:$0xff] }
 0x32f   : > { %1866 = vmatmul.f32.gmra.mxu1 %v1382_v41  ;;  %v1299_v41 = vld [vmem:[%s17216_s3 + $0x90] sm:$0xff] }
 0x330   : > { %1908 = vmatpush.msrb.mxu2 %v1254_v36  ;;  %v11831_v36 = vpop.f32.mrf.mxu3 }
 0x331   : > { %17299 = vst [vmem:[#allocation26_spill] sm:$0xff] %v11831_v36 }
 0x332   : > { %1909 = vmatpush.msrb.mxu2 %v1253_v24  ;;  %v1417_v24 = vld [vmem:[%s17216_s3 + $0x440] sm:$0xff] }
 0x333   : > { %v11781_v13 = vpop.f32.mrf.mxu0 }
 0x334   : > { %1910 = vmatpush.msrb.mxu2 %v1252_v42 }
 0x336   : > { %1640 = vmatmul.f32.vlgmr.msrb.gmra.mxu0 %v1282_v16  ;;  %1911 = vmatpush.msrb.mxu2 %v1251_v0  ;;  %v11829_v22 = vpop.f32.mrf.mxu2  ;;  %v1424_v0 = vld [vmem:[%s17216_s3 + $0x478] sm:$0xff] }
 0x337   : > { %1869 = vmatmul.f32.gmra.mxu1 %v1389_v1  ;;  %v1313_v1 = vld [vmem:[%s17216_s3 + $0x100] sm:$0xff] }
 0x338   : > { %1912 = vmatpush.msrb.mxu2 %v1250_v44  ;;  %v11853_v17 = vpop.f32.mrf.mxu3 }
 0x339   : > { %17301 = vst [vmem:[#allocation28_spill] sm:$0xff] %v11853_v17 }
 0x33a   : > { %1913 = vmatpush.msrb.mxu2 %v1249_v51 }
 0x33b   : > { %v11797_v52 = vpop.f32.mrf.mxu0 }
 0x33c   : > { %v11799_v40 = vpop.f32.mrf.mxu1  ;;  %1914 = vmatpush.msrb.mxu2 %v1248_v46  ;;  %v1431_v46 = vld [vmem:[%s17216_s3 + $0x4b0] sm:$0xff] }
 0x33e   : > { %1915 = vmatpush.msrb.mxu2 %v1247_v59  ;;  %v11843_v16 = vpop.f32.mrf.mxu2  ;;  %v1320_v59 = vld [vmem:[%s17216_s3 + $0x138] sm:$0xff] }
 0x33f   : > { %1872 = vmatmul.f32.gmra.mxu1 %v1396_v38  ;;  %1916 = vmatmul.f32.vlgmr.msrb.gmra.mxu2 %v1285_v25 }
 0x340   : > { %v11867_v38 = vpop.f32.mrf.mxu3 }
 0x341   : > { %17303 = vst [vmem:[#allocation30_spill] sm:$0xff] %v11867_v38 }
 0x343   : > { %v11809_v23 = vpop.f32.mrf.mxu0 }
 0x344   : > { %v11811_v62 = vpop.f32.mrf.mxu1 }
 0x345   : > { %17297 = vst [vmem:[#allocation24_spill] sm:$0xff] %v11811_v62 }
 0x346   : > { %v11857_v10 = vpop.f32.mrf.mxu2 }
 0x347   : > { %1875 = vmatmul.f32.gmra.mxu1 %v1403_v2  ;;  %1919 = vmatmul.f32.gmra.mxu2 %v1292_v3 }
 0x34b   : > { %v11819_v8 = vpop.f32.mrf.mxu0 }
 0x34c   : > { %v11821_v14 = vpop.f32.mrf.mxu1 }
 0x34d   : > { %17298 = vst [vmem:[#allocation25_spill] sm:$0xff] %v11821_v14  ;;  %v1355_v14 = vld [vmem:[%s17216_s3 + $0x250] sm:$0xff] }
 0x34e   : > { %v11871_v2 = vpop.f32.mrf.mxu2 }
 0x34f   : > { %1878 = vmatmul.f32.gmra.mxu1 %v1410_v18  ;;  %1922 = vmatmul.f32.gmra.mxu2 %v1299_v41  ;;  %v1438_v18 = vld [vmem:[%s17216_s3 + $0x4e8] sm:$0xff]  ;;  %v1327_v41 = vld [vmem:[%s17216_s3 + $0x170] sm:$0xff] }
 0x353   : > { %v11833_v37 = vpop.f32.mrf.mxu0 }
 0x354   : > { %v11841_v42 = vpop.f32.mrf.mxu1 }
 0x355   : > { %17300 = vst [vmem:[#allocation27_spill] sm:$0xff] %v11841_v42 }
 0x357   : > { %1881 = vmatmul.f32.gmra.mxu1 %v1417_v24  ;;  %1925 = vmatmul.f32.gmra.mxu2 %v1306_v27  ;;  %v11879_v24 = vpop.f32.mrf.mxu3 }
 0x358   : > { %17305 = vst [vmem:[#allocation32_spill] sm:$0xff] %v11879_v24 }
 0x35b   : > { %v11845_v61 = vpop.f32.mrf.mxu0 }
 0x35c   : > { %v11855_v44 = vpop.f32.mrf.mxu1 }
 0x35d   : > { %17302 = vst [vmem:[#allocation29_spill] sm:$0xff] %v11855_v44 }
 0x35f   : > { %1884 = vmatmul.f32.gmra.mxu1 %v1424_v0  ;;  %1928 = vmatmul.f32.gmra.mxu2 %v1313_v1  ;;  %v1445_v1 = vld [vmem:[%s17216_s3 + $0x520] sm:$0xff]  ;;  %v11891_v15 = vpop.f32.mrf.mxu3 }
 0x360   : > { %17307 = vst [vmem:[#allocation34_spill] sm:$0xff] %v11891_v15  ;;  %v1398_v15 = vld [vmem:[%s17216_s3 + $0x3a8] sm:$0xff] }
 0x363   : > { %v11859_v51 = vpop.f32.mrf.mxu0 }
 0x364   : > { %v11869_v25 = vpop.f32.mrf.mxu1 }
 0x365   : > { %17304 = vst [vmem:[#allocation31_spill] sm:$0xff] %v11869_v25 }
 0x367   : > { %1887 = vmatmul.f32.gmra.mxu1 %v1431_v46  ;;  %1931 = vmatmul.f32.gmra.mxu2 %v1320_v59  ;;  %v1334_v46 = vld [vmem:[%s17216_s3 + $0x1a8] sm:$0xff]  ;;  %v11889_v59 = vpop.f32.mrf.mxu2 }
 0x36b   : > { %v1156_v3 = vpop.f32.mrf.mxu0 }
 0x36c   : > { %v11881_v0 = vpop.f32.mrf.mxu1 }
 0x36d   : > { %17306 = vst [vmem:[#allocation33_spill] sm:$0xff] %v11881_v0 }
 0x36f   : > { %1890 = vmatmul.f32.gmra.mxu1 %v1438_v18  ;;  %1934 = vmatmul.f32.gmra.mxu2 %v1327_v41  ;;  %v1452_v41 = vld [vmem:[%s17216_s3 + $0x558] sm:$0xf]  ;;  %v11901_v19 = vpop.f32.mrf.mxu2 }
 0x373   : > { %v1159_v27 = vpop.f32.mrf.mxu0 }
 0x374   : > { %v11899_v43 = vpop.f32.mrf.mxu1  ;;  %v1160_v7 = vadd.f32 %v11731_v20, %v1159_v27  ;;  %v1151_v27 = vadd.f32 %v11731_v20, %v11845_v61  ;;  %v1145_v61 = vadd.f32 %v11731_v20, %v11819_v8  ;;  %v1139_v8 = vadd.f32 %v11731_v20, %v11797_v52 }
 0x375   : > { %17308 = vst [vmem:[#allocation35_spill] sm:$0xff] %v11899_v43 }
 0x377   : > { %1893 = vmatmul.f32.gmra.mxu1 %v1445_v1  ;;  %1937 = vmatmul.f32.gmra.mxu2 %v1334_v46  ;;  %v1348_v1 = vld [vmem:[%s17216_s3 + $0x218] sm:$0xff]  ;;  %v11906_v46 = vpop.f32.mrf.mxu3  ;;  %v11910_v55 = vpop.f32.mrf.mxu2 }
 0x378   : > { %17309 = vst [vmem:[#allocation36_spill] sm:$0xff] %v11906_v46 }
 0x37b   : > { %v1162_v18 = vpop.f32.mrf.mxu0 }
 0x37c   : > { %v11908_v53 = vpop.f32.mrf.mxu1  ;;  %v1163_v12 = vadd.f32 %v11731_v20, %v1162_v18 }
 0x37f   : > { %1896 = vmatmul.f32.gmra.mxu1 %v1452_v41  ;;  %1940 = vmatmul.f32.gmra.mxu2 %v1341_v34  ;;  %v11915_v36 = vpop.f32.mrf.mxu3  ;;  %v11919_v41 = vpop.f32.mrf.mxu2 }
 0x383   : > { %v1165_v50 = vpop.f32.mrf.mxu0 }
 0x384   : > { %v11917_v34 = vpop.f32.mrf.mxu1 }
 0x387   : > { %1943 = vmatmul.f32.gmra.mxu2 %v1348_v1  ;;  %v1362_v1 = vld [vmem:[%s17216_s3 + $0x288] sm:$0xff]  ;;  %v11924_v17 = vpop.f32.mrf.mxu3  ;;  %v11933_v24 = vpop.f32.mrf.mxu2 }
 0x38b   : > { %v1168_v62 = vpop.f32.mrf.mxu0 }
 0x38c   : > { %v11926_v38 = vpop.f32.mrf.mxu1  ;;  %v1169_v60 = vadd.f32 %v11731_v20, %v1168_v62  ;;  %v1157_v62 = vadd.f32 %v11731_v20, %v1156_v3 }
 0x38f   : > { %1946 = vmatmul.f32.gmra.mxu2 %v1355_v14  ;;  %v1369_v14 = vld [vmem:[%s17216_s3 + $0x2c0] sm:$0xff]  ;;  %v11938_v25 = vpop.f32.mrf.mxu3 }
 0x393   : > { %v1171_v42 = vpop.f32.mrf.mxu0 }
 0x394   : > { %v1172_v28 = vadd.f32 %v11731_v20, %v1171_v42  ;;  %v1276_v42 = vmax.f32 %v1169_v60, 0.0  ;;  %v1273_v60 = vmax.f32 %v1160_v7, 0.0 }
 0x396   : > { %v1277_v6 = vmax.f32 %v1172_v28, 0.0  ;;  %v11947_v28 = vpop.f32.mrf.mxu2 }
 0x397   : > { %1949 = vmatmul.f32.gmra.mxu2 %v1362_v1  ;;  %v1166_v1 = vadd.f32 %v11731_v20, %v1165_v50  ;;  %v11945_v50 = vpop.f32.mrf.mxu1  ;;  %v11960_v7 = vpop.f32.mrf.mxu3 }
 0x399   : > { %v1275_v35 = vmax.f32 %v1166_v1, 0.0 }
 0x39b   : > { %v1174_v44 = vpop.f32.mrf.mxu0 }
 0x39c   : > { %v1175_v21 = vadd.f32 %v11731_v20, %v1174_v44 }
 0x39e   : > { %v1278_v29 = vmax.f32 %v1175_v21, 0.0  ;;  %v1376_v21 = vld [vmem:[%s17216_s3 + $0x2f8] sm:$0xff] }
 0x39f   : > { %1952 = vmatmul.f32.gmra.mxu2 %v1369_v14  ;;  %v1272_v14 = vmax.f32 %v1157_v62, 0.0  ;;  %v11966_v62 = vpop.f32.mrf.mxu1  ;;  %v11983_v52 = vpop.f32.mrf.mxu3 }
 0x3a0   : > { %1992 = vmatpush.msrb.mxu3 %v1278_v29  ;;  %v1274_v29 = vmax.f32 %v1163_v12, 0.0 }
 0x3a2   : > { %1993 = vmatpush.msrb.mxu3 %v1277_v6  ;;  %v1154_v6 = vadd.f32 %v11731_v20, %v11859_v51  ;;  %v1383_v51 = vld [vmem:[%s17216_s3 + $0x330] sm:$0xff] }
 0x3a3   : > { %v1177_v44 = vpop.f32.mrf.mxu0 }
 0x3a4   : > { %1994 = vmatpush.msrb.mxu3 %v1276_v42  ;;  %v1178_v18 = vadd.f32 %v11731_v20, %v1177_v44  ;;  %v1271_v1 = vmax.f32 %v1154_v6, 0.0  ;;  %v1287_v6 = vld [vmem:[%s17216_s3 + $0x30] sm:$0xff] }
 0x3a6   : > { %1995 = vmatpush.msrb.mxu3 %v1275_v35  ;;  %v1148_v35 = vadd.f32 %v11731_v20, %v11833_v37  ;;  %v1279_v42 = vmax.f32 %v1178_v18, 0.0  ;;  %v1142_v37 = vadd.f32 %v11731_v20, %v11809_v23  ;;  %v1136_v23 = vadd.f32 %v11731_v20, %v11781_v13  ;;  %v1294_v13 = vld [vmem:[%s17216_s3 + $0x68] sm:$0xff] }
 0x3a7   : > { %1955 = vmatmul.f32.gmra.mxu2 %v1376_v21  ;;  %v1270_v21 = vmax.f32 %v1151_v27, 0.0  ;;  %v1268_v27 = vmax.f32 %v1145_v61, 0.0 }
 0x3a8   : > { %1996 = vmatpush.msrb.mxu3 %v1274_v29  ;;  %v1269_v29 = vmax.f32 %v1148_v35, 0.0  ;;  %v1267_v18 = vmax.f32 %v1142_v37, 0.0  ;;  %v1266_v35 = vmax.f32 %v1139_v8, 0.0 }
 0x3aa   : > { %1997 = vmatpush.msrb.mxu3 %v1273_v60  ;;  %v11971_v60 = vpop.f32.mrf.mxu2 }
 0x3ab   : > { %v1180_v3 = vpop.f32.mrf.mxu0 }
 0x3ac   : > { %v1181_v12 = vadd.f32 %v11731_v20, %v1180_v3  ;;  %1998 = vmatpush.msrb.mxu3 %v1272_v14  ;;  %v1390_v14 = vld [vmem:[%s17216_s3 + $0x368] sm:$0xff]  ;;  %v1133_v3 = vadd.f32 %v11731_v20, %v11762_v11 }
 0x3ae   : > { %v1280_v44 = vmax.f32 %v1181_v12, 0.0  ;;  %1999 = vmatpush.msrb.mxu3 %v1271_v1  ;;  %v1130_v12 = vadd.f32 %v11731_v20, %v11744_v48  ;;  %v1265_v1 = vmax.f32 %v1136_v23, 0.0  ;;  %v1264_v61 = vmax.f32 %v1133_v3, 0.0  ;;  %v1397_v20 = vld [vmem:[%s17216_s3 + $0x3a0] sm:$0xff]  ;;  %v1286_v48 = vld [vmem:[%s17216_s3 + $0x28] sm:$0xff] }
 0x3af   : > { %1958 = vmatmul.f32.gmra.mxu2 %v1383_v51  ;;  %v11990_v51 = vpop.f32.mrf.mxu1 }
 0x3b0   : > { %2000 = vmatpush.msrb.mxu3 %v1270_v21  ;;  %2098 = vmatpush.msra.mxu1 %v1280_v44  ;;  %v1263_v11 = vmax.f32 %v1130_v12, 0.0  ;;  %v1301_v44 = vld [vmem:[%s17216_s3 + $0xa0] sm:$0xff]  ;;  %v12004_v21 = vpop.f32.mrf.mxu3  ;;  %v1315_v12 = vld [vmem:[%s17216_s3 + $0x110] sm:$0xff] }
 0x3b2   : > { %2001 = vmatpush.msrb.mxu3 %v1269_v29  ;;  %2099 = vmatpush.msra.mxu1 %v1279_v42  ;;  %v11992_v42 = vpop.f32.mrf.mxu2  ;;  %v1404_v29 = vld [vmem:[%s17216_s3 + $0x3d8] sm:$0xff] }
 0x3b3   : > { %9322 = vmatmul.msk.f32.vlgmr.msra.gmra.mxu1 %vm1456_vm2, %v1287_v6  ;;  %17310 = vst [vmem:[#allocation37_spill] sm:$0xff] %v11992_v42  ;;  %v1293_v6 = vld [vmem:[%s17216_s3 + $0x60] sm:$0xff] }
 0x3b4   : > { %2002 = vmatpush.msrb.mxu3 %v1268_v27  ;;  %v1308_v27 = vld [vmem:[%s17216_s3 + $0xd8] sm:$0xff] }
 0x3b6   : > { %2003 = vmatpush.msrb.mxu3 %v1267_v18  ;;  %v1411_v18 = vld [vmem:[%s17216_s3 + $0x410] sm:$0xff] }
 0x3b7   : > { %1961 = vmatmul.f32.gmra.mxu2 %v1390_v14  ;;  %v12007_v37 = vpop.f32.mrf.mxu1  ;;  %v1300_v14 = vld [vmem:[%s17216_s3 + $0x98] sm:$0xff] }
 0x3b8   : > { %2004 = vmatpush.msrb.mxu3 %v1266_v35  ;;  %v12020_v23 = vpop.f32.mrf.mxu3 }
 0x3ba   : > { %2005 = vmatpush.msrb.mxu3 %v1265_v1  ;;  %v12015_v8 = vpop.f32.mrf.mxu2  ;;  %v1418_v1 = vld [vmem:[%s17216_s3 + $0x448] sm:$0xff] }
 0x3bb   : > { %9323 = vmatmul.msk.f32.gmra.mxu1 %vm1456_vm2, %v1294_v13  ;;  %17311 = vst [vmem:[#allocation38_spill] sm:$0xff] %v12015_v8  ;;  %v1307_v13 = vld [vmem:[%s17216_s3 + $0xd0] sm:$0xff] }
 0x3bc   : > { %2006 = vmatpush.msrb.mxu3 %v1264_v61 }
 0x3be   : > { %2007 = vmatpush.msrb.mxu3 %v1263_v11 }
 0x3bf   : > { %1964 = vmatmul.f32.gmra.mxu2 %v1397_v20  ;;  %2008 = vmatmul.f32.vlgmr.msrb.gmra.mxu3 %v1286_v48  ;;  %v12029_v3 = vpop.f32.mrf.mxu1  ;;  %v1322_v20 = vld [vmem:[%s17216_s3 + $0x148] sm:$0xff] }
 0x3c0   : > { %v12043_v61 = vpop.f32.mrf.mxu3 }
 0x3c2   : > { %v12031_v35 = vpop.f32.mrf.mxu2 }
 0x3c3   : > { %9324 = vmatmul.msk.f32.gmra.mxu1 %vm1456_vm2, %v1301_v44  ;;  %17312 = vst [vmem:[#allocation39_spill] sm:$0xff] %v12031_v35  ;;  %v1425_v44 = vld [vmem:[%s17216_s3 + $0x480] sm:$0xff] }
 0x3c7   : > { %1967 = vmatmul.f32.gmra.mxu2 %v1404_v29  ;;  %2011 = vmatmul.f32.gmra.mxu3 %v1293_v6  ;;  %v12045_v11 = vpop.f32.mrf.mxu1  ;;  %v1314_v29 = vld [vmem:[%s17216_s3 + $0x108] sm:$0xff] }
 0x3c8   : > { %17313 = vst [vmem:[#allocation40_spill] sm:$0xff] %v12045_v11  ;;  %v12059_v6 = vpop.f32.mrf.mxu3 }
 0x3ca   : > { %v12050_v48 = vpop.f32.mrf.mxu2 }
 0x3cb   : > { %9325 = vmatmul.msk.f32.gmra.mxu1 %vm1456_vm2, %v1308_v27  ;;  %17314 = vst [vmem:[#allocation41_spill] sm:$0xff] %v12050_v48  ;;  %v1329_v27 = vld [vmem:[%s17216_s3 + $0x180] sm:$0xff]  ;;  %v1335_v48 = vld [vmem:[%s17216_s3 + $0x1b0] sm:$0xff] }
 0x3cf   : > { %1970 = vmatmul.f32.gmra.mxu2 %v1411_v18  ;;  %2014 = vmatmul.f32.gmra.mxu3 %v1300_v14  ;;  %v12064_v18 = vpop.f32.mrf.mxu1 }
 0x3d0   : > { %17315 = vst [vmem:[#allocation42_spill] sm:$0xff] %v12064_v18 }
 0x3d2   : > { %v12066_v14 = vpop.f32.mrf.mxu2 }
 0x3d3   : > { %9326 = vmatmul.msk.f32.gmra.mxu1 %vm1456_vm2, %v1315_v12  ;;  %17316 = vst [vmem:[#allocation43_spill] sm:$0xff] %v12066_v14  ;;  %v1432_v12 = vld [vmem:[%s17216_s3 + $0x4b8] sm:$0xff] }
 0x3d7   : > { %1973 = vmatmul.f32.gmra.mxu2 %v1418_v1  ;;  %2017 = vmatmul.f32.gmra.mxu3 %v1307_v13  ;;  %v1321_v1 = vld [vmem:[%s17216_s3 + $0x140] sm:$0xff]  ;;  %v1336_v13 = vld [vmem:[%s17216_s3 + $0x1b8] sm:$0xff] }
 0x3db   : > { %9327 = vmatmul.msk.f32.gmra.mxu1 %vm1456_vm2, %v1322_v20  ;;  %v12078_v20 = vpop.f32.mrf.mxu3 }
 0x3dc   : > { %17317 = vst [vmem:[#allocation44_spill] sm:$0xff] %v12078_v20  ;;  %v1678_v20 = vadd.f32 %v11901_v19, %v11591_v57 }
 0x3df   : > { %1976 = vmatmul.f32.gmra.mxu2 %v1425_v44  ;;  %2020 = vmatmul.f32.gmra.mxu3 %v1314_v29  ;;  %v12081_v44 = vpop.f32.mrf.mxu1  ;;  %v1439_v29 = vld [vmem:[%s17216_s3 + $0x4f0] sm:$0xff] }
 0x3e0   : > { %17318 = vst [vmem:[#allocation45_spill] sm:$0xff] %v12081_v44 }
 0x3e3   : > { %9328 = vmatmul.msk.f32.gmra.mxu1 %vm1456_vm2, %v1329_v27  ;;  %v1328_v27 = vld [vmem:[%s17216_s3 + $0x178] sm:$0xff]  ;;  %v12094_v14 = vpop.f32.mrf.mxu3 }
 0x3e4   : > { %17320 = vst [vmem:[#allocation47_spill] sm:$0xff] %v12094_v14 }
 0x3e7   : > { %1979 = vmatmul.f32.gmra.mxu2 %v1432_v12  ;;  %2023 = vmatmul.f32.gmra.mxu3 %v1321_v1  ;;  %v12089_v12 = vpop.f32.mrf.mxu2  ;;  %v1343_v1 = vld [vmem:[%s17216_s3 + $0x1f0] sm:$0xff]  ;;  %v12103_v35 = vpop.f32.mrf.mxu1 }
 0x3e8   : > { %17319 = vst [vmem:[#allocation46_spill] sm:$0xff] %v12089_v12  ;;  %v1342_v12 = vld [vmem:[%s17216_s3 + $0x1e8] sm:$0xff] }
 0x3e9   : > { %17321 = vst [vmem:[#allocation48_spill] sm:$0xff] %v12103_v35 }
 0x3eb   : > { %9329 = vmatmul.msk.f32.gmra.mxu1 %vm1456_vm2, %v1336_v13  ;;  %v1446_v13 = vld [vmem:[%s17216_s3 + $0x528] sm:$0xff]  ;;  %v12117_v44 = vpop.f32.mrf.mxu3 }
 0x3ec   : > { %17323 = vst [vmem:[#allocation50_spill] sm:$0xff] %v12117_v44 }
 0x3ef   : > { %1982 = vmatmul.f32.gmra.mxu2 %v1439_v29  ;;  %2026 = vmatmul.f32.gmra.mxu3 %v1328_v27  ;;  %v12105_v29 = vpop.f32.mrf.mxu2  ;;  %v1350_v27 = vld [vmem:[%s17216_s3 + $0x228] sm:$0xff] }
 0x3f0   : > { %17322 = vst [vmem:[#allocation49_spill] sm:$0xff] %v12105_v29 }
 0x3f3   : > { %9330 = vmatmul.msk.f32.gmra.mxu1 %vm1456_vm2, %v1343_v1  ;;  %v1453_v1 = vld [vmem:[%s17216_s3 + $0x560] sm:$0xf]  ;;  %v12128_v29 = vpop.f32.mrf.mxu3 }
 0x3f4   : > { %17325 = vst [vmem:[#allocation52_spill] sm:$0xff] %v12128_v29 }
 0x3f7   : > { %1985 = vmatmul.f32.gmra.mxu2 %v1446_v13  ;;  %2029 = vmatmul.f32.gmra.mxu3 %v1335_v48  ;;  %v1917_v35 = vpop.f32.mrf.mxu2  ;;  %v12119_v48 = vpop.f32.mrf.mxu1  ;;  %v1357_v13 = vld [vmem:[%s17216_s3 + $0x260] sm:$0xff] }
 0x3f8   : > { %17324 = vst [vmem:[#allocation51_spill] sm:$0xff] %v12119_v48  ;;  %v1356_v48 = vld [vmem:[%s17216_s3 + $0x258] sm:$0xff] }
 0x3fb   : > { %9331 = vmatmul.msk.f32.gmra.mxu1 %vm1456_vm2, %v1350_v27  ;;  %v1349_v27 = vld [vmem:[%s17216_s3 + $0x220] sm:$0xff]  ;;  %v12142_v44 = vpop.f32.mrf.mxu3 }
 0x3fc   : > { %17327 = vst [vmem:[#allocation54_spill] sm:$0xff] %v12142_v44  ;;  %v1370_v44 = vld [vmem:[%s17216_s3 + $0x2c8] sm:$0xff] }
 0x3ff   : > { %1988 = vmatmul.f32.gmra.mxu2 %v1453_v1  ;;  %2032 = vmatmul.f32.gmra.mxu3 %v1342_v12  ;;  %v1364_v1 = vld [vmem:[%s17216_s3 + $0x298] sm:$0xff]  ;;  %v12133_v12 = vpop.f32.mrf.mxu1 }
 0x400   : > { %17326 = vst [vmem:[#allocation53_spill] sm:$0xff] %v12133_v12  ;;  %v1363_v12 = vld [vmem:[%s17216_s3 + $0x290] sm:$0xff] }
 0x403   : > { %9332 = vmatmul.msk.f32.gmra.mxu1 %vm1456_vm2, %v1357_v13  ;;  %v1371_v13 = vld [vmem:[%s17216_s3 + $0x2d0] sm:$0xff] }
 0x407   : > { %2035 = vmatmul.f32.gmra.mxu3 %v1349_v27  ;;  %v12145_v27 = vpop.f32.mrf.mxu1 }
 0x408   : > { %17328 = vst [vmem:[#allocation55_spill] sm:$0xff] %v12145_v27  ;;  %v1385_v27 = vld [vmem:[%s17216_s3 + $0x340] sm:$0xff] }
 0x40b   : > { %9333 = vmatmul.msk.f32.gmra.mxu1 %vm1456_vm2, %v1364_v1  ;;  %v1378_v1 = vld [vmem:[%s17216_s3 + $0x308] sm:$0xff] }
 0x40f   : > { %2038 = vmatmul.f32.gmra.mxu3 %v1356_v48  ;;  %v12153_v48 = vpop.f32.mrf.mxu3 }
 0x410   : > { %17329 = vst [vmem:[#allocation56_spill] sm:$0xff] %v12153_v48 }
 0x413   : > { %9334 = vmatmul.msk.f32.gmra.mxu1 %vm1456_vm2, %v1371_v13  ;;  %v12159_v13 = vpop.f32.mrf.mxu1 }
 0x414   : > { %17330 = vst [vmem:[#allocation57_spill] sm:$0xff] %v12159_v13 }
 0x417   : > { %2041 = vmatmul.f32.gmra.mxu3 %v1363_v12  ;;  %v1377_v12 = vld [vmem:[%s17216_s3 + $0x300] sm:$0xff]  ;;  %v12168_v48 = vpop.f32.mrf.mxu3 }
 0x418   : > { %17331 = vst [vmem:[#allocation58_spill] sm:$0xff] %v12168_v48 }
 0x41b   : > { %9335 = vmatmul.msk.f32.gmra.mxu1 %vm1456_vm2, %v1378_v1  ;;  %v12170_v1 = vpop.f32.mrf.mxu2  ;;  %v12172_v29 = vpop.f32.mrf.mxu1 }
 0x41c   : > { %17332 = vst [vmem:[#allocation59_spill] sm:$0xff] %v12170_v1 }
 0x41d   : > { %17333 = vst [vmem:[#allocation60_spill] sm:$0xff] %v12172_v29  ;;  %v1641_v29 = vpop.f32.mrf.mxu0 }
 0x41e   : > { %v1642_v8 = vadd.f32 %v1641_v29, %v11399_v4 }
 0x41f   : > { %2044 = vmatmul.f32.gmra.mxu3 %v1370_v44  ;;  %v1392_v44 = vld [vmem:[%s17216_s3 + $0x378] sm:$0xff]  ;;  %v12181_v13 = vpop.f32.mrf.mxu3 }
 0x420   : > { %17334 = vst [vmem:[#allocation61_spill] sm:$0xff] %v12181_v13 }
 0x423   : > { %9336 = vmatmul.msk.f32.gmra.mxu1 %vm1456_vm2, %v1385_v27  ;;  %v1384_v27 = vld [vmem:[%s17216_s3 + $0x338] sm:$0xff]  ;;  %v12183_v42 = vpop.f32.mrf.mxu2 }
 0x424   : > { %17335 = vst [vmem:[#allocation62_spill] sm:$0xff] %v12183_v42 }
 0x427   : > { %2047 = vmatmul.f32.gmra.mxu3 %v1377_v12  ;;  %v1399_v12 = vld [vmem:[%s17216_s3 + $0x3b0] sm:$0xff]  ;;  %v12198_v13 = vpop.f32.mrf.mxu3 }
 0x428   : > { %17337 = vst [vmem:[#allocation64_spill] sm:$0xff] %v12198_v13 }
 0x42b   : > { %9337 = vmatmul.msk.f32.gmra.mxu1 %vm1456_vm2, %v1392_v44  ;;  %v1391_v44 = vld [vmem:[%s17216_s3 + $0x370] sm:$0xff]  ;;  %v12200_v42 = vpop.f32.mrf.mxu2 }
 0x42c   : > { %17338 = vst [vmem:[#allocation65_spill] sm:$0xff] %v12200_v42 }
 0x42f   : > { %2050 = vmatmul.f32.gmra.mxu3 %v1384_v27  ;;  %v1406_v27 = vld [vmem:[%s17216_s3 + $0x3e8] sm:$0xff] }
 0x430   : > { %v2101_v48 = vpop.f32.mrf.mxu1 }
 0x433   : > { %9338 = vmatmul.msk.f32.gmra.mxu1 %vm1456_vm2, %v1399_v12  ;;  %v1734_v12 = vadd.f32 %v11700_v54, %v1642_v8  ;;  %v12214_v54 = vpop.f32.mrf.mxu2  ;;  %v1405_v8 = vld [vmem:[%s17216_s3 + $0x3e0] sm:$0xff] }
 0x434   : > { %17340 = vst [vmem:[#allocation67_spill] sm:$0xff] %v12214_v54 }
 0x435   : > { %v1826_v4 = vadd.f32 %v11799_v40, %v1734_v12  ;;  %v1420_v40 = vld [vmem:[%s17216_s3 + $0x458] sm:$0xff] }
 0x437   : > { %2053 = vmatmul.f32.gmra.mxu3 %v1391_v44  ;;  %v1413_v44 = vld [vmem:[%s17216_s3 + $0x420] sm:$0xff]  ;;  %v1918_v13 = vadd.f32 %v1917_v35, %v1826_v4  ;;  %v1419_v4 = vld [vmem:[%s17216_s3 + $0x450] sm:$0xff] }
 0x438   : > { %v12193_v1 = vpop.f32.mrf.mxu1 }
 0x439   : > { %17336 = vst [vmem:[#allocation63_spill] sm:$0xff] %v12193_v1 }
 0x43b   : > { %9339 = vmatmul.msk.f32.gmra.mxu1 %vm1456_vm2, %v1406_v27 }
 0x43f   : > { %2056 = vmatmul.f32.gmra.mxu3 %v1398_v15 }
 0x440   : > { %v12208_v29 = vpop.f32.mrf.mxu1 }
 0x441   : > { %17339 = vst [vmem:[#allocation66_spill] sm:$0xff] %v12208_v29 }
 0x442   : > { %v2009_v1 = vpop.f32.mrf.mxu3 }
 0x443   : > { %v2010_v42 = vadd.f32 %v2009_v1, %v1918_v13  ;;  %9340 = vmatmul.msk.f32.gmra.mxu1 %vm1456_vm2, %v1413_v44  ;;  %v1412_v13 = vld [vmem:[%s17216_s3 + $0x418] sm:$0xff]  ;;  %v12232_v1 = vpop.f32.mrf.mxu2 }
 0x444   : > { %17344 = vst [vmem:[#allocation71_spill] sm:$0xff] %v12232_v1 }
 0x445   : > { %v12219_v27 = vadd.f32 %v2101_v48, %v2010_v42  ;;  %v1427_v48 = vld [vmem:[%s17216_s3 + $0x490] sm:$0xff] }
 0x447   : > { %17341 = vst [vmem:[#allocation68_spill] sm:$0xff] %v12219_v27  ;;  %2059 = vmatmul.f32.gmra.mxu3 %v1405_v8 }
 0x448   : > { %v12221_v15 = vpop.f32.mrf.mxu1 }
 0x449   : > { %17342 = vst [vmem:[#allocation69_spill] sm:$0xff] %v12221_v15 }
 0x44a   : > { %v12226_v35 = vpop.f32.mrf.mxu3 }
 0x44b   : > { %17343 = vst [vmem:[#allocation70_spill] sm:$0xff] %v12226_v35  ;;  %9341 = vmatmul.msk.f32.gmra.mxu1 %vm1456_vm2, %v1420_v40  ;;  %v12245_v44 = vpop.f32.mrf.mxu2  ;;  %v1434_v40 = vld [vmem:[%s17216_s3 + $0x4c8] sm:$0xff] }
 0x44c   : > { %17347 = vst [vmem:[#allocation74_spill] sm:$0xff] %v12245_v44 }
 0x44f   : > { %2062 = vmatmul.f32.gmra.mxu3 %v1412_v13 }
 0x450   : > { %v12234_v42 = vpop.f32.mrf.mxu1 }
 0x451   : > { %17345 = vst [vmem:[#allocation72_spill] sm:$0xff] %v12234_v42 }
 0x452   : > { %v12239_v12 = vpop.f32.mrf.mxu3 }
 0x453   : > { %17346 = vst [vmem:[#allocation73_spill] sm:$0xff] %v12239_v12  ;;  %9342 = vmatmul.msk.f32.gmra.mxu1 %vm1456_vm2, %v1427_v48  ;;  %v1426_v48 = vld [vmem:[%s17216_s3 + $0x488] sm:$0xff]  ;;  %v12263_v29 = vpop.f32.mrf.mxu2 }
 0x454   : > { %17351 = vst [vmem:[#allocation78_spill] sm:$0xff] %v12263_v29 }
 0x457   : > { %2065 = vmatmul.f32.gmra.mxu3 %v1419_v4  ;;  %v1441_v4 = vld [vmem:[%s17216_s3 + $0x500] sm:$0xff] }
 0x458   : > { %v12247_v8 = vpop.f32.mrf.mxu1 }
 0x459   : > { %17348 = vst [vmem:[#allocation75_spill] sm:$0xff] %v12247_v8 }
 0x45a   : > { %v12252_v13 = vpop.f32.mrf.mxu3 }
 0x45b   : > { %17349 = vst [vmem:[#allocation76_spill] sm:$0xff] %v12252_v13  ;;  %9343 = vmatmul.msk.f32.gmra.mxu1 %vm1456_vm2, %v1434_v40  ;;  %v1433_v40 = vld [vmem:[%s17216_s3 + $0x4c0] sm:$0xff]  ;;  %v12279_v12 = vpop.f32.mrf.mxu2 }
 0x45c   : > { %17355 = vst [vmem:[#allocation82_spill] sm:$0xff] %v12279_v12 }
 0x45f   : > { %2068 = vmatmul.f32.gmra.mxu3 %v1426_v48  ;;  %v1448_v48 = vld [vmem:[%s17216_s3 + $0x538] sm:$0xff] }
 0x460   : > { %v12258_v27 = vpop.f32.mrf.mxu1 }
 0x461   : > { %17350 = vst [vmem:[#allocation77_spill] sm:$0xff] %v12258_v27  ;;  %v1454_v27 = vld [vmem:[%s17216_s3 + $0x568] sm:$0xf] }
 0x462   : > { %v12265_v15 = vpop.f32.mrf.mxu3 }
 0x463   : > { %17352 = vst [vmem:[#allocation79_spill] sm:$0xff] %v12265_v15  ;;  %9344 = vmatmul.msk.f32.gmra.mxu1 %vm1456_vm2, %v1441_v4  ;;  %v1440_v4 = vld [vmem:[%s17216_s3 + $0x4f8] sm:$0xff]  ;;  %v12295_v15 = vpop.f32.mrf.mxu2 }
 0x467   : > { %2071 = vmatmul.f32.gmra.mxu3 %v1433_v40  ;;  %v1455_v40 = vld [vmem:[%s17216_s3 + $0x570] sm:$0xf] }
 0x468   : > { %v12271_v35 = vpop.f32.mrf.mxu1 }
 0x469   : > { %17353 = vst [vmem:[#allocation80_spill] sm:$0xff] %v12271_v35 }
 0x46a   : > { %v12276_v42 = vpop.f32.mrf.mxu3 }
 0x46b   : > { %17354 = vst [vmem:[#allocation81_spill] sm:$0xff] %v12276_v42  ;;  %9345 = vmatmul.msk.f32.gmra.mxu1 %vm1456_vm2, %v1448_v48  ;;  %v1447_v48 = vld [vmem:[%s17216_s3 + $0x530] sm:$0xff]  ;;  %v1947_v42 = vpop.f32.mrf.mxu2 }
 0x46f   : > { %2074 = vmatmul.f32.gmra.mxu3 %v1440_v4 }
 0x470   : > { %v12284_v13 = vpop.f32.mrf.mxu1 }
 0x471   : > { %17356 = vst [vmem:[#allocation83_spill] sm:$0xff] %v12284_v13 }
 0x472   : > { %v12289_v8 = vpop.f32.mrf.mxu3 }
 0x473   : > { %17357 = vst [vmem:[#allocation84_spill] sm:$0xff] %v12289_v8  ;;  %9346 = vmatmul.msk.f32.gmra.mxu1 %vm1456_vm2, %v1455_v40  ;;  %v1950_v1 = vpop.f32.mrf.mxu2 }
 0x477   : > { %2077 = vmatmul.f32.gmra.mxu3 %v1447_v48 }
 0x478   : > { %v12299_v4 = vpop.f32.mrf.mxu1 }
 0x479   : > { %17359 = vst [vmem:[#allocation86_spill] sm:$0xff] %v12299_v4 }
 0x47a   : > { %v12297_v54 = vpop.f32.mrf.mxu3 }
 0x47b   : > { %17358 = vst [vmem:[#allocation85_spill] sm:$0xff] %v12297_v54  ;;  %v1953_v54 = vpop.f32.mrf.mxu2 }
 0x47f   : > { %2080 = vmatmul.f32.gmra.mxu3 %v1454_v27 }
 0x480   : > { %v12306_v40 = vpop.f32.mrf.mxu1 }
 0x481   : > { %17361 = vst [vmem:[#allocation88_spill] sm:$0xff] %v12306_v40  ;;  %v1684_v40 = vadd.f32 %v11919_v41, %v11631_v26 }
 0x482   : > { %v12304_v35 = vpop.f32.mrf.mxu3 }
 0x483   : > { %17360 = vst [vmem:[#allocation87_spill] sm:$0xff] %v12304_v35  ;;  %v1956_v29 = vpop.f32.mrf.mxu2  ;;  %v1776_v12 = vadd.f32 %v12043_v61, %v1684_v40  ;;  %v1672_v61 = vadd.f32 %v11871_v2, %v11546_v33  ;;  %v1666_v33 = vadd.f32 %v11843_v16, %v11511_v56 }
 0x488   : > { %v12310_v8 = vpop.f32.mrf.mxu1 }
 0x489   : > { %17363 = vst [vmem:[#allocation90_spill] sm:$0xff] %v12310_v8  ;;  %v1681_v8 = vadd.f32 %v11910_v55, %v11615_v9 }
 0x48a   : > { %v12308_v13 = vpop.f32.mrf.mxu3 }
 0x48b   : > { %17362 = vst [vmem:[#allocation89_spill] sm:$0xff] %v12308_v13  ;;  %v1959_v0 = vpop.f32.mrf.mxu2  ;;  %v1687_v13 = vadd.f32 %v11933_v24, %v11646_v31  ;;  %v1773_v46 = vadd.f32 %v12020_v23, %v1681_v8  ;;  %v1675_v31 = vadd.f32 %v11889_v59, %v11571_v45  ;;  %v1770_v24 = vadd.f32 %v12004_v21, %v1678_v20  ;;  %v17379_v8 = vld [vmem:[#allocation23_spill] sm:$0xff] }
 0x48c   : > { %v1669_v45 = vadd.f32 %v11857_v10, %v11526_v5  ;;  %v1764_v59 = vadd.f32 %v11960_v7, %v1672_v61  ;;  %v1663_v5 = vadd.f32 %v11829_v22, %v11498_v49  ;;  %v1758_v10 = vadd.f32 %v11924_v17, %v1666_v33 }
 0x48d   : > { %v1779_v43 = vadd.f32 %v12059_v6, %v1687_v13  ;;  %v1865_v9 = vadd.f32 %v11990_v51, %v1773_v46  ;;  %v1767_v57 = vadd.f32 %v11983_v52, %v1675_v31  ;;  %v1862_v23 = vadd.f32 %v11966_v62, %v1770_v24  ;;  %v17382_v31 = vld [vmem:[#allocation42_spill] sm:$0xff] }
 0x48e   : > { %v1761_v2 = vadd.f32 %v11938_v25, %v1669_v45  ;;  %v1856_v62 = vadd.f32 %v11926_v38, %v1764_v59  ;;  %v1755_v38 = vadd.f32 %v11915_v36, %v1663_v5  ;;  %v1690_v25 = vadd.f32 %v11947_v28, %v11658_v32  ;;  %v17371_v36 = vld [vmem:[#allocation44_spill] sm:$0xff]  ;;  %v17373_v28 = vld [vmem:[#allocation35_spill] sm:$0xff] }
 0x48f   : > { %v1871_v26 = vadd.f32 %v12029_v3, %v1779_v43  ;;  %v1693_v49 = vadd.f32 %v11971_v60, %v11679_v58  ;;  %v1850_v17 = vadd.f32 %v11908_v53, %v1758_v10  ;;  %v17374_v58 = vld [vmem:[#allocation82_spill] sm:$0xff] }
 0x490   : > { %v2137_v44 = vpop.f32.mrf.mxu1  ;;  %v1853_v7 = vadd.f32 %v11917_v34, %v1761_v2  ;;  %v17392_v2 = vld [vmem:[#allocation10_spill] sm:$0xff] }
 0x491   : > { %v1942_v60 = vadd.f32 %v17374_v58, %v1850_v17  ;;  %v17399_v17 = vld [vmem:[#allocation15_spill] sm:$0xff] }
 0x492   : > { %v12312_v48 = vpop.f32.mrf.mxu3  ;;  %v1945_v34 = vadd.f32 %v12295_v15, %v1853_v7  ;;  %v17394_v7 = vld [vmem:[#allocation31_spill] sm:$0xff] }
 0x493   : > { %17364 = vst [vmem:[#allocation91_spill] sm:$0xff] %v12312_v48  ;;  %v1962_v39 = vpop.f32.mrf.mxu2  ;;  %v1868_v48 = vadd.f32 %v12007_v37, %v1776_v12  ;;  %v1957_v37 = vadd.f32 %v1956_v29, %v1865_v9  ;;  %v17376_v12 = vld [vmem:[#allocation90_spill] sm:$0xff] }
 0x494   : > { %v1963_v41 = vadd.f32 %v1962_v39, %v1871_v26  ;;  %v1954_v39 = vadd.f32 %v1953_v54, %v1862_v23  ;;  %v1782_v54 = vadd.f32 %v17371_v36, %v1690_v25  ;;  %v17383_v9 = vld [vmem:[#allocation78_spill] sm:$0xff]  ;;  %v17403_v36 = vld [vmem:[#allocation8_spill] sm:$0xff] }
 0x495   : > { %v1960_v55 = vadd.f32 %v1959_v0, %v1868_v48  ;;  %v1859_v0 = vadd.f32 %v11945_v50, %v1767_v57  ;;  %v17381_v48 = vld [vmem:[#allocation40_spill] sm:$0xff]  ;;  %v17387_v23 = vld [vmem:[#allocation34_spill] sm:$0xff] }
 0x496   : > { %v17385_v57 = vld [vmem:[#allocation88_spill] sm:$0xff] }
 0x497   : > { %v1951_v52 = vadd.f32 %v1950_v1, %v1859_v0  ;;  %v1847_v1 = vadd.f32 %v17373_v28, %v1755_v38  ;;  %v17389_v0 = vld [vmem:[#allocation85_spill] sm:$0xff] }
 0x498   : > { %v2140_v11 = vpop.f32.mrf.mxu1 }
 0x49a   : > { %v2042_v4 = vpop.f32.mrf.mxu3 }
 0x49b   : > { %v1965_v21 = vpop.f32.mrf.mxu2  ;;  %v2043_v56 = vadd.f32 %v2042_v4, %v1951_v52  ;;  %v17380_v4 = vld [vmem:[#allocation33_spill] sm:$0xff] }
 0x49d   : > { %v12375_v15 = vadd.f32 %v17376_v12, %v2043_v56  ;;  %v17395_v56 = vld [vmem:[#allocation84_spill] sm:$0xff]  ;;  %v17410_v12 = vld [vmem:[#allocation29_spill] sm:$0xff] }
 0x4a0   : > { %v2143_v47 = vpop.f32.mrf.mxu1 }
 0x4a2   : > { %v2045_v18 = vpop.f32.mrf.mxu3 }
 0x4a3   : > { %v2046_v3 = vadd.f32 %v2045_v18, %v1954_v39  ;;  %v1968_v26 = vpop.f32.mrf.mxu2 }
 0x4a5   : > { %v12365_v29 = vadd.f32 %v2137_v44, %v2046_v3  ;;  %v17378_v44 = vld [vmem:[#allocation11_spill] sm:$0xff] }
 0x4a6   : > { %v1657_v13 = vadd.f32 %v17379_v8, %v17378_v44 }
 0x4a8   : > { %v2146_v14 = vpop.f32.mrf.mxu1 }
 0x4aa   : > { %v2048_v27 = vpop.f32.mrf.mxu3 }
 0x4ab   : > { %v2049_v46 = vadd.f32 %v2048_v27, %v1957_v37  ;;  %v1874_v27 = vadd.f32 %v17381_v48, %v1782_v54  ;;  %v1749_v37 = vadd.f32 %v17387_v23, %v1657_v13  ;;  %v17404_v54 = vld [vmem:[#allocation17_spill] sm:$0xff]  ;;  %v17412_v13 = vld [vmem:[#allocation28_spill] sm:$0xff] }
 0x4ad   : > { %v12352_v16 = vadd.f32 %v2140_v11, %v2049_v46  ;;  %v17368_v11 = vld [vmem:[#allocation91_spill] sm:$0xff]  ;;  %v17390_v46 = vld [vmem:[#allocation86_spill] sm:$0xff] }
 0x4ae   : > { %17369 = vst [vmem:[#allocation91_spill] sm:$0xff] %v12365_v29 }
 0x4af   : > { %17367 = vst [vmem:[#allocation94_spill] sm:$0xff] %v12352_v16 }
 0x4b0   : > { %v2149_v50 = vpop.f32.mrf.mxu1 }
 0x4b2   : > { %v2051_v35 = vpop.f32.mrf.mxu3 }
 0x4b3   : > { %v2052_v6 = vadd.f32 %v2051_v35, %v1960_v55  ;;  %v17372_v35 = vld [vmem:[#allocation47_spill] sm:$0xff]  ;;  %v1939_v55 = vadd.f32 %v17383_v9, %v1847_v1  ;;  %v17406_v1 = vld [vmem:[#allocation80_spill] sm:$0xff] }
 0x4b4   : > { %v1785_v32 = vadd.f32 %v17372_v35, %v1693_v49  ;;  %v17398_v49 = vld [vmem:[#allocation7_spill] sm:$0xff]  ;;  %v1648_v35 = vadd.f32 %v17404_v54, %v17403_v36 }
 0x4b5   : > { %v12345_v20 = vadd.f32 %v2143_v47, %v2052_v6  ;;  %v1660_v47 = vadd.f32 %v11807_v63, %v11485_v30  ;;  %v17370_v30 = vld [vmem:[#allocation36_spill] sm:$0xff]  ;;  %v1966_v6 = vadd.f32 %v1965_v21, %v1874_v27  ;;  %v2031_v39 = vadd.f32 %v17389_v0, %v1939_v55  ;;  %v17414_v27 = vld [vmem:[#allocation77_spill] sm:$0xff]  ;;  %v17417_v9 = vld [vmem:[#allocation67_spill] sm:$0xff] }
 0x4b6   : > { %17377 = vst [vmem:[#allocation36_spill] sm:$0xff] %v12375_v15  ;;  %v1877_v24 = vadd.f32 %v17382_v31, %v1785_v32  ;;  %v17405_v32 = vld [vmem:[#allocation71_spill] sm:$0xff] }
 0x4b7   : > { %17366 = vst [vmem:[#allocation93_spill] sm:$0xff] %v12345_v20  ;;  %v1752_v63 = vadd.f32 %v17370_v30, %v1660_v47  ;;  %v17396_v47 = vld [vmem:[#allocation83_spill] sm:$0xff]  ;;  %v12413_v58 = vadd.f32 %v17406_v1, %v2031_v39 }
 0x4b8   : > { %v1969_v59 = vadd.f32 %v1968_v26, %v1877_v24  ;;  %v2152_v10 = vpop.f32.mrf.mxu1  ;;  %v17416_v31 = vld [vmem:[#allocation27_spill] sm:$0xff] }
 0x4b9   : > { %v1844_v40 = vadd.f32 %v17380_v4, %v1752_v63  ;;  %v17402_v63 = vld [vmem:[#allocation32_spill] sm:$0xff]  ;;  %17407 = vst [vmem:[#allocation82_spill] sm:$0xff] %v12413_v58  ;;  %v1740_v4 = vadd.f32 %v17412_v13, %v1648_v35  ;;  %v9580_v39 = vld [vmem:[%s17218_s5 + $0x20] sm:$0x3f]  ;;  %v3685_v35 = vrot.slane %v12345_v20, 6 }
 0x4ba   : > { %v2054_v19 = vpop.f32.mrf.mxu3 }
 0x4bb   : > { %v2055_v43 = vadd.f32 %v2054_v19, %v1963_v41  ;;  %v17384_v41 = vld [vmem:[#allocation87_spill] sm:$0xff] }
 0x4bc   : > { %v2034_v61 = vadd.f32 %v17384_v41, %v1942_v60  ;;  %v9376_v41 = vld [vmem:[%s17217_s4 + $0xd8] sm:$0xff] }
 0x4bd   : > { %v12339_v51 = vadd.f32 %v2146_v14, %v2055_v43  ;;  %v1948_v14 = vadd.f32 %v1947_v42, %v1856_v62  ;;  %v17375_v42 = vld [vmem:[#allocation89_spill] sm:$0xff]  ;;  %v17388_v43 = vld [vmem:[#allocation74_spill] sm:$0xff] }
 0x4be   : > { %v2037_v53 = vadd.f32 %v17375_v42, %v1945_v34  ;;  %v1936_v45 = vadd.f32 %v17388_v43, %v1844_v40  ;;  %v17393_v62 = vld [vmem:[#allocation21_spill] sm:$0xff]  ;;  %v12401_v38 = vadd.f32 %v17396_v47, %v2034_v61  ;;  %v1645_v34 = vadd.f32 %v17399_v17, %v17398_v49  ;;  %v17409_v42 = vld [vmem:[#allocation30_spill] sm:$0xff]  ;;  %v17427_v47 = vld [vmem:[#allocation59_spill] sm:$0xff] }
 0x4bf   : > { %17365 = vst [vmem:[#allocation92_spill] sm:$0xff] %v12339_v51  ;;  %2251 = vmatpush.msra.mxu2 %v12339_v51  ;;  %v2040_v18 = vadd.f32 %v17368_v11, %v1948_v14  ;;  %v1654_v52 = vadd.f32 %v17393_v62, %v17392_v2  ;;  %v1841_v14 = vadd.f32 %v17394_v7, %v1749_v37  ;;  %v17400_v11 = vld [vmem:[#allocation9_spill] sm:$0xff]  ;;  %v17422_v2 = vld [vmem:[#allocation24_spill] sm:$0xff] }
 0x4c0   : > { %v12393_v33 = vadd.f32 %v17390_v46, %v2037_v53  ;;  %v2028_v21 = vadd.f32 %v17395_v56, %v1936_v45  ;;  %17397 = vst [vmem:[#allocation35_spill] sm:$0xff] %v12401_v38  ;;  %v17413_v40 = vld [vmem:[#allocation81_spill] sm:$0xff] }
 0x4c1   : > { %2252 = vmatpush.msra.mxu2 %v12345_v20  ;;  %v12386_v19 = vadd.f32 %v17385_v57, %v2040_v18  ;;  %v17401_v18 = vld [vmem:[#allocation19_spill] sm:$0xff]  ;;  %v1933_v28 = vadd.f32 %v17405_v32, %v1841_v14  ;;  %v17418_v57 = vld [vmem:[#allocation26_spill] sm:$0xff]  ;;  %v17419_v37 = vld [vmem:[#allocation25_spill] sm:$0xff] }
 0x4c2   : > { %v2057_v22 = vpop.f32.mrf.mxu3  ;;  %17391 = vst [vmem:[#allocation47_spill] sm:$0xff] %v12393_v33  ;;  %v1651_v30 = vadd.f32 %v17401_v18, %v17400_v11  ;;  %v12425_v26 = vadd.f32 %v17414_v27, %v2028_v21  ;;  %v1737_v23 = vadd.f32 %v17418_v57, %v1645_v34  ;;  %v17420_v43 = vld [vmem:[#allocation65_spill] sm:$0xff]  ;;  %v17426_v14 = vld [vmem:[#allocation76_spill] sm:$0xff]  ;;  %v3687_v18 = vrot.slane %v12339_v51, 6 }
 0x4c3   : > { %2253 = vmatpush.msra.mxu2 %v12352_v16  ;;  %17386 = vst [vmem:[#allocation44_spill] sm:$0xff] %v12386_v19  ;;  %v2058_v3 = vadd.f32 %v2057_v22, %v1966_v6  ;;  %v1746_v22 = vadd.f32 %v17402_v63, %v1654_v52  ;;  %v2025_v48 = vadd.f32 %v17413_v40, %v1933_v28  ;;  %v17423_v52 = vld [vmem:[#allocation75_spill] sm:$0xff]  ;;  %v17428_v49 = vld [vmem:[#allocation73_spill] sm:$0xff]  ;;  %v17429_v34 = vld [vmem:[#allocation72_spill] sm:$0xff]  ;;  %v3681_v40 = vrot.slane %v12365_v29, 6 }
 0x4c4   : > { %v1743_v53 = vadd.f32 %v17409_v42, %v1651_v30  ;;  %17415 = vst [vmem:[#allocation11_spill] sm:$0xff] %v12425_v26  ;;  %v1832_v6 = vadd.f32 %v17419_v37, %v1740_v4  ;;  %v1829_v62 = vadd.f32 %v17422_v2, %v1737_v23  ;;  %v17431_v30 = vld [vmem:[#allocation70_spill] sm:$0xff]  ;;  %v12505_v42 = vsel %vm3659_vm5, %v3685_v35, %v3687_v18 }
 0x4c5   : > { %2254 = vmatpush.msra.mxu2 %v12365_v29  ;;  %v1838_v44 = vadd.f32 %v17410_v12, %v1746_v22  ;;  %v12420_v8 = vadd.f32 %v2149_v50, %v2058_v3  ;;  %v2182_v50 = vld [vmem:[%s17217_s4 + $0x8] sm:$0xff]  ;;  %v12457_v3 = vadd.f32 %v17423_v52, %v2025_v48  ;;  %v17432_v22 = vld [vmem:[#allocation69_spill] sm:$0xff]  ;;  %v17434_v28 = vld [vmem:[#allocation66_spill] sm:$0xff]  ;;  %v3679_v27 = vrot.slane %v12375_v15, 6 }
 0x4c6   : > { %v1835_v24 = vadd.f32 %v17416_v31, %v1743_v53  ;;  %v2184_v32 = vld [vmem:[%s17217_s4 + $0x18] sm:$0xff]  ;;  %v3683_v53 = vrot.slane %v12352_v16, 6  ;;  %v9378_v12 = vld [vmem:[%s17217_s4 + $0xe8] sm:$0xff]  ;;  %v2181_v31 = vld [vmem:[%s17217_s4] sm:$0xff]  ;;  %v3675_v57 = vrot.slane %v12393_v33, 6 }
 0x4c7   : > { %2255 = vmatpush.msra.mxu2 %v12375_v15  ;;  %17411 = vst [vmem:[#allocation90_spill] sm:$0xff] %v12420_v8  ;;  %v1930_v55 = vadd.f32 %v17417_v9, %v1838_v44  ;;  %v3689_v46 = vrot.slane %v12420_v8, 6  ;;  %v17435_v44 = vld [vmem:[#allocation63_spill] sm:$0xff]  ;;  %v12537_v9 = vsel %vm3659_vm5, %v3679_v27, %v3681_v40  ;;  %v9380_v23 = vld [vmem:[%s17217_s4 + $0xf8] sm:$0xff] }
 0x4c8   : > { %v1927_v45 = vadd.f32 %v17420_v43, %v1835_v24  ;;  %17424 = vst [vmem:[#allocation23_spill] sm:$0xff] %v12457_v3  ;;  %v12519_v4 = vsel %vm3659_vm5, %v3683_v53, %v3685_v35  ;;  %v12527_v48 = vsel %vm3659_vm5, %v3681_v40, %v3683_v53  ;;  %v17436_v24 = vld [vmem:[#allocation68_spill] sm:$0xff]  ;;  %v9388_v53 = vld [vmem:[%s17217_s4 + $0x138] sm:$0xff] }
 0x4c9   : > { %2256 = vmatpush.msra.mxu2 %v12386_v19  ;;  %v12492_v54 = vsel %vm3659_vm5, %v3687_v18, %v3689_v46  ;;  %v9382_v52 = vld [vmem:[%s17217_s4 + $0x108] sm:$0xff]  ;;  %v9384_v18 = vld [vmem:[%s17217_s4 + $0x118] sm:$0xff] }
 0x4ca   : > { %v2060_v5 = vpop.f32.mrf.mxu3  ;;  %v2019_v56 = vadd.f32 %v17426_v14, %v1927_v45  ;;  %v3671_v45 = vrot.slane %v12413_v58, 6  ;;  %v9386_v35 = vld [vmem:[%s17217_s4 + $0x128] sm:$0xff] }
 0x4cb   : > { %v2061_v25 = vadd.f32 %v2060_v5, %v1969_v59  ;;  %2257 = vmatpush.msra.mxu2 %v12393_v33  ;;  %v17421_v59 = vld [vmem:[#allocation79_spill] sm:$0xff]  ;;  %v9486_v5 = vld [vmem:[%s17217_s4 + $0x278] sm:$0xff] }
 0x4cc   : > { %v2022_v0 = vadd.f32 %v17421_v59, %v1930_v55  ;;  %v12488_v36 = vadd.f32 %v17432_v22, %v2019_v56  ;;  %v3677_v55 = vrot.slane %v12386_v19, 6  ;;  %v2183_v59 = vld [vmem:[%s17217_s4 + $0x10] sm:$0xff]  ;;  %v2185_v56 = vld [vmem:[%s17217_s4 + $0x20] sm:$0xff]  ;;  %v2192_v22 = vld [vmem:[%s17217_s4 + $0x58] sm:$0xff] }
 0x4cd   : > { %v12415_v60 = vadd.f32 %v2152_v10, %v2061_v25  ;;  %2258 = vmatpush.msra.mxu2 %v12401_v38  ;;  %v17425_v10 = vld [vmem:[#allocation62_spill] sm:$0xff]  ;;  %v1921_v25 = vadd.f32 %v17427_v47, %v1829_v62  ;;  %v3667_v62 = vrot.slane %v12457_v3, 6  ;;  %v9390_v40 = vld [vmem:[%s17217_s4 + $0x148] sm:$0xff] }
 0x4ce   : > { %v1924_v7 = vadd.f32 %v17425_v10, %v1832_v6  ;;  %v12479_v11 = vadd.f32 %v17429_v34, %v2022_v0  ;;  %17433 = vst [vmem:[#allocation40_spill] sm:$0xff] %v12488_v36  ;;  %v12556_v37 = vsel %vm3659_vm5, %v3675_v57, %v3677_v55  ;;  %v3673_v6 = vrot.slane %v12401_v38, 6 }
 0x4cf   : > { %17408 = vst [vmem:[#allocation89_spill] sm:$0xff] %v12415_v60  ;;  %2259 = vmatpush.msra.mxu2 %v12413_v58  ;;  %9347 = vmatpush.msk.msra.mxu3 %vm2247_vm3, %v12415_v60  ;;  %v17230_v61 = vrot.slane %v12415_v60, 6  ;;  %v2013_v63 = vadd.f32 %v17431_v30, %v1921_v25  ;;  %v3663_v14 = vrot.slane %v12488_v36, 6 }
 0x4d0   : > { %9401 = vmatpush.msk.msrb.mxu1 %vm2247_vm3, %v12415_v60  ;;  %9511 = vmatpush.msk.msra.mxu0 %vm2247_vm3, %v12415_v60  ;;  %v2016_v17 = vadd.f32 %v17428_v49, %v1924_v7  ;;  %17430 = vst [vmem:[#allocation33_spill] sm:$0xff] %v12479_v11  ;;  %v12563_v43 = vsel %vm3659_vm5, %v3673_v6, %v3675_v57  ;;  %v3665_v10 = vrot.slane %v12479_v11, 6  ;;  %v2190_v49 = vld [vmem:[%s17217_s4 + $0x48] sm:$0xff]  ;;  %v2195_v57 = vld [vmem:[%s17217_s4 + $0x70] sm:$0xff] }
 0x4d1   : > { %2260 = vmatpush.msra.mxu2 %v12425_v26  ;;  %2322 = vmatpush.msra.mxu3 %v12420_v8  ;;  %v12472_v21 = vsel %vm3659_vm5, %v3689_v46, %v17230_v61  ;;  %v12515_v13 = vadd.f32 %v17435_v44, %v2013_v63  ;;  %v12572_v0 = vsel %vm3659_vm5, %v3671_v45, %v3673_v6  ;;  %v2188_v46 = vld [vmem:[%s17217_s4 + $0x38] sm:$0xff]  ;;  %v2187_v63 = vld [vmem:[%s17217_s4 + $0x30] sm:$0xff] }
 0x4d2   : > { %2614 = vmatpush.msrb.mxu1 %v12420_v8  ;;  %3196 = vmatpush.msra.mxu0 %v12420_v8  ;;  %v12501_v1 = vadd.f32 %v17434_v28, %v2016_v17  ;;  %v12598_v7 = vsel %vm3659_vm5, %v3665_v10, %v3667_v62  ;;  %v12607_v47 = vsel %vm3659_vm5, %v3663_v14, %v3665_v10  ;;  %v2194_v28 = vld [vmem:[%s17217_s4 + $0x68] sm:$0xff]  ;;  %v2196_v44 = vld [vmem:[%s17217_s4 + $0x78] sm:$0xff] }
 0x4d3   : > { %9348 = vmatmul.msk.f32.vlgmr.msra.gmra.mxu3 %vm2207_vm4, %v2182_v50  ;;  %9402 = vmatmul.msk.f32.vlgmr.msrb.gmra.mxu1 %vm2207_vm4, %v9376_v41  ;;  %v2186_v50 = vld [vmem:[%s17217_s4 + $0x28] sm:$0xff]  ;;  %v12546_v41 = vsel %vm3659_vm5, %v3677_v55, %v3679_v27  ;;  %v3660_v34 = vrot.slane %v12515_v13, 6  ;;  %v2193_v27 = vld [vmem:[%s17217_s4 + $0x60] sm:$0xff]  ;;  %v2200_v6 = vld [vmem:[%s17217_s4 + $0x98] sm:$0xff] }
 0x4d4   : > { %2543 = vmatpush.msrb.mxu3 %v12339_v51  ;;  %9456 = vmatpush.msk.msra.mxu1 %vm2247_vm3, %v12415_v60  ;;  %v3661_v25 = vrot.slane %v12501_v1, 6  ;;  %v2198_v55 = vld [vmem:[%s17217_s4 + $0x88] sm:$0xff] }
 0x4d5   : > { %9581 = vmatpush.msk.msrb.mxu0 %vm2404_vm6, %v9580_v39  ;;  %2261 = vmatpush.msra.mxu2 %v12457_v3  ;;  %v3669_v39 = vrot.slane %v12425_v26, 6 }
 0x4d6   : > { %9512 = vmatmul.msk.f32.vlgmr.msra.gmra.mxu0 %vm2207_vm4, %v9486_v5  ;;  %2544 = vmatpush.msrb.mxu3 %v12345_v20  ;;  %v12616_v17 = vsel %vm3659_vm5, %v3661_v25, %v3663_v14  ;;  %v12626_v30 = vsel %vm3659_vm5, %v3660_v34, %v3661_v25  ;;  %v2199_v14 = vld [vmem:[%s17217_s4 + $0x90] sm:$0xff]  ;;  %v2204_v25 = vld [vmem:[%s17217_s4 + $0xb8] sm:$0xff]  ;;  %v2201_v34 = vld [vmem:[%s17217_s4 + $0xa0] sm:$0xff] }
 0x4d7   : > { %3941 = vmatpush.msra.mxu0 %v12472_v21  ;;  %2905 = vmatpush.msra.mxu1 %v12420_v8  ;;  %v12581_v2 = vsel %vm3659_vm5, %v3669_v39, %v3671_v45  ;;  %v12591_v5 = vsel %vm3659_vm5, %v3667_v62, %v3669_v39  ;;  %v9394_v45 = vld [vmem:[%s17217_s4 + $0x168] sm:$0xff]  ;;  %v2197_v39 = vld [vmem:[%s17217_s4 + $0x80] sm:$0xff] }
 0x4d8   : > { %2262 = vmatpush.msra.mxu2 %v12479_v11  ;;  %2545 = vmatpush.msrb.mxu3 %v12352_v16  ;;  %v2202_v62 = vld [vmem:[%s17217_s4 + $0xa8] sm:$0xff] }
 0x4d9   : > { %3942 = vmatpush.msra.mxu0 %v12492_v54 }
 0x4da   : > { %2263 = vmatpush.msra.mxu2 %v12488_v36  ;;  %2546 = vmatpush.msrb.mxu3 %v12365_v29 }
 0x4db   : > { %3943 = vmatpush.msra.mxu0 %v12505_v42  ;;  %9349 = vmatmul.msk.f32.gmra.mxu3 %vm2207_vm4, %v2184_v32  ;;  %v2189_v32 = vld [vmem:[%s17217_s4 + $0x40] sm:$0xff] }
 0x4dc   : > { %2264 = vmatpush.msra.mxu2 %v12501_v1  ;;  %2547 = vmatpush.msrb.mxu3 %v12375_v15 }
 0x4dd   : > { %3944 = vmatpush.msra.mxu0 %v12519_v4  ;;  %9403 = vmatmul.msk.f32.gmra.mxu1 %vm2207_vm4, %v9378_v12  ;;  %v2191_v12 = vld [vmem:[%s17217_s4 + $0x50] sm:$0xff] }
 0x4de   : > { %2265 = vmatpush.msra.mxu2 %v12515_v13  ;;  %2548 = vmatpush.msrb.mxu3 %v12386_v19 }
 0x4df   : > { %3945 = vmatpush.msra.mxu0 %v12527_v48 }
 0x4e0   : > { %2266 = vmatpush.msra.mxu2 %v17436_v24  ;;  %2549 = vmatpush.msrb.mxu3 %v12393_v33 }
 0x4e1   : > { %3946 = vmatpush.msra.mxu0 %v12537_v9  ;;  %2267 = vmatmul.f32.vlgmr.msra.gmra.mxu2 %v2181_v31  ;;  %v12681_v31 = vpop.f32.mrf.mxu3 }
 0x4e2   : > { %2550 = vmatpush.msrb.mxu3 %v12401_v38 }
 0x4e3   : > { %3947 = vmatpush.msra.mxu0 %v12546_v41  ;;  %9350 = vmatmul.msk.f32.gmra.mxu3 %vm2207_vm4, %v2186_v50  ;;  %v9392_v50 = vld [vmem:[%s17217_s4 + $0x158] sm:$0xff] }
 0x4e4   : > { %2551 = vmatpush.msrb.mxu3 %v12413_v58 }
 0x4e5   : > { %3948 = vmatpush.msra.mxu0 %v12556_v37  ;;  %9404 = vmatmul.msk.f32.gmra.mxu1 %vm2207_vm4, %v9380_v23  ;;  %v9525_v23 = vld [vmem:[%s17218_s5 + $0x18] sm:$0x3f] }
 0x4e6   : > { %2552 = vmatpush.msrb.mxu3 %v12425_v26  ;;  %9526 = vmatpush.msk.msrb.mxu1 %vm2404_vm6, %v9525_v23  ;;  %v9379_v23 = vld [vmem:[%s17217_s4 + $0xf0] sm:$0xff] }
 0x4e7   : > { %3949 = vmatpush.msra.mxu0 %v12563_v43 }
 0x4e8   : > { %2553 = vmatpush.msrb.mxu3 %v12457_v3 }
 0x4e9   : > { %3950 = vmatpush.msra.mxu0 %v12572_v0  ;;  %2270 = vmatmul.f32.gmra.mxu2 %v2183_v59  ;;  %v12705_v59 = vpop.f32.mrf.mxu3 }
 0x4ea   : > { %2554 = vmatpush.msrb.mxu3 %v12479_v11 }
 0x4eb   : > { %3951 = vmatpush.msra.mxu0 %v12581_v2  ;;  %9351 = vmatmul.msk.f32.gmra.mxu3 %vm2207_vm4, %v2188_v46  ;;  %v12712_v46 = vpop.f32.mrf.mxu2 }
 0x4ec   : > { %2555 = vmatpush.msrb.mxu3 %v12488_v36 }
 0x4ed   : > { %3952 = vmatpush.msra.mxu0 %v12591_v5  ;;  %9405 = vmatmul.msk.f32.gmra.mxu1 %vm2207_vm4, %v9382_v52  ;;  %v9396_v52 = vld [vmem:[%s17217_s4 + $0x178] sm:$0xff] }
 0x4ee   : > { %2556 = vmatpush.msrb.mxu3 %v12501_v1 }
 0x4ef   : > { %3953 = vmatpush.msra.mxu0 %v12598_v7 }
 0x4f0   : > { %2557 = vmatpush.msrb.mxu3 %v12515_v13 }
 0x4f1   : > { %3954 = vmatpush.msra.mxu0 %v12607_v47  ;;  %2273 = vmatmul.f32.gmra.mxu2 %v2185_v56  ;;  %v12722_v10 = vpop.f32.mrf.mxu3 }
 0x4f2   : > { %2558 = vmatpush.msrb.mxu3 %v17436_v24  ;;  %17437 = vst [vmem:[#allocation42_spill] sm:$0xff] %v12722_v10  ;;  %v17457_v10 = vld [vmem:[#allocation50_spill] sm:$0xff] }
 0x4f3   : > { %3955 = vmatpush.msra.mxu0 %v12616_v17  ;;  %9352 = vmatmul.msk.f32.gmra.mxu3 %vm2207_vm4, %v2190_v49  ;;  %v12727_v56 = vpop.f32.mrf.mxu2  ;;  %v9398_v49 = vld [vmem:[%s17217_s4 + $0x188] sm:$0xff] }
 0x4f4   : > { %2834 = vmatpush.msra.mxu3 %v12339_v51 }
 0x4f5   : > { %3956 = vmatpush.msra.mxu0 %v12626_v30  ;;  %9406 = vmatmul.msk.f32.gmra.mxu1 %vm2207_vm4, %v9384_v18 }
 0x4f6   : > { %2835 = vmatpush.msra.mxu3 %v12345_v20 }
 0x4f8   : > { %2836 = vmatpush.msra.mxu3 %v12352_v16 }
 0x4f9   : > { %2276 = vmatmul.f32.gmra.mxu2 %v2187_v63  ;;  %v12740_v18 = vpop.f32.mrf.mxu3  ;;  %v2206_v63 = vld [vmem:[%s17217_s4 + $0xc8] sm:$0xf] }
 0x4fa   : > { %2837 = vmatpush.msra.mxu3 %v12365_v29  ;;  %17438 = vst [vmem:[#allocation78_spill] sm:$0xff] %v12740_v18  ;;  %v9498_v18 = vld [vmem:[%s17217_s4 + $0x2d8] sm:$0xff] }
 0x4fb   : > { %9353 = vmatmul.msk.f32.gmra.mxu3 %vm2207_vm4, %v2192_v22  ;;  %v9400_v22 = vld [vmem:[%s17217_s4 + $0x198] sm:$0xf] }
 0x4fc   : > { %2838 = vmatpush.msra.mxu3 %v12375_v15 }
 0x4fd   : > { %9407 = vmatmul.msk.f32.gmra.mxu1 %vm2207_vm4, %v9386_v35  ;;  %v12748_v35 = vpop.f32.mrf.mxu2 }
 0x4fe   : > { %2839 = vmatpush.msra.mxu3 %v12386_v19  ;;  %17439 = vst [vmem:[#allocation87_spill] sm:$0xff] %v12748_v35 }
 0x500   : > { %2840 = vmatpush.msra.mxu3 %v12393_v33 }
 0x501   : > { %2279 = vmatmul.f32.gmra.mxu2 %v2189_v32  ;;  %v2203_v32 = vld [vmem:[%s17217_s4 + $0xb0] sm:$0xff] }
 0x502   : > { %2841 = vmatpush.msra.mxu3 %v12401_v38 }
 0x503   : > { %9354 = vmatmul.msk.f32.gmra.mxu3 %vm2207_vm4, %v2194_v28  ;;  %v12755_v28 = vpop.f32.mrf.mxu3 }
 0x504   : > { %2842 = vmatpush.msra.mxu3 %v12413_v58  ;;  %17440 = vst [vmem:[#allocation88_spill] sm:$0xff] %v12755_v28 }
 0x505   : > { %9408 = vmatmul.msk.f32.gmra.mxu1 %vm2207_vm4, %v9388_v53  ;;  %v9375_v53 = vld [vmem:[%s17217_s4 + $0xd0] sm:$0xff] }
 0x506   : > { %2843 = vmatpush.msra.mxu3 %v12425_v26 }
 0x508   : > { %2844 = vmatpush.msra.mxu3 %v12457_v3 }
 0x509   : > { %2282 = vmatmul.f32.gmra.mxu2 %v2191_v12  ;;  %v9431_v12 = vld [vmem:[%s17217_s4 + $0x1a8] sm:$0xff] }
 0x50a   : > { %2845 = vmatpush.msra.mxu3 %v12479_v11 }
 0x50b   : > { %9355 = vmatmul.msk.f32.gmra.mxu3 %vm2207_vm4, %v2196_v44  ;;  %v12764_v44 = vpop.f32.mrf.mxu2 }
 0x50c   : > { %2846 = vmatpush.msra.mxu3 %v12488_v36  ;;  %17441 = vst [vmem:[#allocation34_spill] sm:$0xff] %v12764_v44  ;;  %v17456_v44 = vld [vmem:[#allocation52_spill] sm:$0xff] }
 0x50d   : > { %9409 = vmatmul.msk.f32.gmra.mxu1 %vm2207_vm4, %v9390_v40  ;;  %v2205_v40 = vld [vmem:[%s17217_s4 + $0xc0] sm:$0xf] }
 0x50e   : > { %2847 = vmatpush.msra.mxu3 %v12501_v1 }
 0x510   : > { %2848 = vmatpush.msra.mxu3 %v12515_v13 }
 0x511   : > { %2285 = vmatmul.f32.gmra.mxu2 %v2193_v27  ;;  %v9377_v27 = vld [vmem:[%s17217_s4 + $0xe0] sm:$0xff] }
 0x512   : > { %2849 = vmatpush.msra.mxu3 %v17436_v24 }
 0x513   : > { %9356 = vmatmul.msk.f32.gmra.mxu3 %vm2207_vm4, %v2198_v55  ;;  %v12778_v55 = vpop.f32.mrf.mxu3 }
 0x514   : > { %17442 = vst [vmem:[#allocation74_spill] sm:$0xff] %v12778_v55 }
 0x515   : > { %9410 = vmatmul.msk.f32.gmra.mxu1 %vm2207_vm4, %v9392_v50  ;;  %v2363_v50 = vld [vmem:[%s17218_s5] sm:$0x3f] }
 0x516   : > { %9361 = vmatpush.msk.msrb.mxu2 %vm2404_vm6, %v2363_v50 }
 0x519   : > { %2288 = vmatmul.f32.gmra.mxu2 %v2195_v57  ;;  %v12788_v57 = vpop.f32.mrf.mxu2 }
 0x51a   : > { %17443 = vst [vmem:[#allocation85_spill] sm:$0xff] %v12788_v57  ;;  %v17452_v57 = vld [vmem:[#allocation13_spill] sm:$0xff] }
 0x51b   : > { %9357 = vmatmul.msk.f32.gmra.mxu3 %vm2207_vm4, %v2200_v6  ;;  %v12799_v6 = vpop.f32.mrf.mxu3 }
 0x51c   : > { %17444 = vst [vmem:[#allocation86_spill] sm:$0xff] %v12799_v6 }
 0x51d   : > { %9411 = vmatmul.msk.f32.gmra.mxu1 %vm2207_vm4, %v9394_v45 }
 0x521   : > { %2291 = vmatmul.f32.gmra.mxu2 %v2197_v39  ;;  %v12805_v45 = vpop.f32.mrf.mxu2  ;;  %v9381_v39 = vld [vmem:[%s17217_s4 + $0x100] sm:$0xff] }
 0x522   : > { %17445 = vst [vmem:[#allocation10_spill] sm:$0xff] %v12805_v45 }
 0x523   : > { %9358 = vmatmul.msk.f32.gmra.mxu3 %vm2207_vm4, %v2202_v62 }
 0x525   : > { %9412 = vmatmul.msk.f32.gmra.mxu1 %vm2207_vm4, %v9396_v52  ;;  %v9383_v52 = vld [vmem:[%s17217_s4 + $0x110] sm:$0xff] }
 0x529   : > { %2294 = vmatmul.f32.gmra.mxu2 %v2199_v14  ;;  %v12823_v14 = vpop.f32.mrf.mxu2 }
 0x52a   : > { %17446 = vst [vmem:[#allocation21_spill] sm:$0xff] %v12823_v14 }
 0x52b   : > { %9359 = vmatmul.msk.f32.gmra.mxu3 %vm2207_vm4, %v2204_v25 }
 0x52d   : > { %9413 = vmatmul.msk.f32.gmra.mxu1 %vm2207_vm4, %v9398_v49  ;;  %v9385_v49 = vld [vmem:[%s17217_s4 + $0x120] sm:$0xff] }
 0x531   : > { %2297 = vmatmul.f32.gmra.mxu2 %v2201_v34 }
 0x533   : > { %9360 = vmatmul.msk.f32.gmra.mxu3 %vm2207_vm4, %v2206_v63 }
 0x535   : > { %9414 = vmatmul.msk.f32.gmra.mxu1 %vm2207_vm4, %v9400_v22  ;;  %v12830_v22 = vpop.f32.mrf.mxu1 }
 0x539   : > { %2300 = vmatmul.f32.gmra.mxu2 %v2203_v32 }
 0x53b   : > { %2559 = vmatmul.f32.vlgmr.msrb.gmra.mxu3 %v9375_v53  ;;  %v9387_v53 = vld [vmem:[%s17217_s4 + $0x130] sm:$0xff] }
 0x53c   : > { %3125 = vmatpush.msrb.mxu3 %v12339_v51 }
 0x53d   : > { %9457 = vmatmul.msk.f32.vlgmr.msra.gmra.mxu1 %vm2207_vm4, %v9431_v12  ;;  %v12837_v50 = vpop.f32.mrf.mxu1 }
 0x53e   : > { %3716 = vmatpush.msra.mxu1 %v12472_v21  ;;  %3126 = vmatpush.msrb.mxu3 %v12345_v20 }
 0x540   : > { %3717 = vmatpush.msra.mxu1 %v12492_v54  ;;  %3127 = vmatpush.msrb.mxu3 %v12352_v16 }
 0x541   : > { %2303 = vmatmul.f32.gmra.mxu2 %v2205_v40 }
 0x542   : > { %3718 = vmatpush.msra.mxu1 %v12505_v42  ;;  %3128 = vmatpush.msrb.mxu3 %v12365_v29 }
 0x543   : > { %2562 = vmatmul.f32.gmra.mxu3 %v9377_v27 }
 0x544   : > { %3719 = vmatpush.msra.mxu1 %v12519_v4  ;;  %3129 = vmatpush.msrb.mxu3 %v12375_v15 }
 0x546   : > { %3720 = vmatpush.msra.mxu1 %v12527_v48  ;;  %3130 = vmatpush.msrb.mxu3 %v12386_v19 }
 0x548   : > { %3721 = vmatpush.msra.mxu1 %v12537_v9  ;;  %3131 = vmatpush.msrb.mxu3 %v12393_v33 }
 0x54a   : > { %3722 = vmatpush.msra.mxu1 %v12546_v41  ;;  %3132 = vmatpush.msrb.mxu3 %v12401_v38 }
 0x54b   : > { %2565 = vmatmul.f32.gmra.mxu3 %v9379_v23  ;;  %v9389_v23 = vld [vmem:[%s17217_s4 + $0x140] sm:$0xff] }
 0x54c   : > { %3723 = vmatpush.msra.mxu1 %v12556_v37  ;;  %3133 = vmatpush.msrb.mxu3 %v12413_v58 }
 0x54e   : > { %3724 = vmatpush.msra.mxu1 %v12563_v43  ;;  %3134 = vmatpush.msrb.mxu3 %v12425_v26 }
 0x550   : > { %3725 = vmatpush.msra.mxu1 %v12572_v0  ;;  %3135 = vmatpush.msrb.mxu3 %v12457_v3 }
 0x552   : > { %3726 = vmatpush.msra.mxu1 %v12581_v2  ;;  %3136 = vmatpush.msrb.mxu3 %v12479_v11 }
 0x553   : > { %2568 = vmatmul.f32.gmra.mxu3 %v9381_v39 }
 0x554   : > { %3727 = vmatpush.msra.mxu1 %v12591_v5  ;;  %3137 = vmatpush.msrb.mxu3 %v12488_v36 }
 0x556   : > { %3728 = vmatpush.msra.mxu1 %v12598_v7  ;;  %v2324_v62 = vpop.f32.mrf.mxu3  ;;  %3138 = vmatpush.msrb.mxu3 %v12501_v1 }
 0x558   : > { %3729 = vmatpush.msra.mxu1 %v12607_v47  ;;  %3139 = vmatpush.msrb.mxu3 %v12515_v13 }
 0x55a   : > { %3730 = vmatpush.msra.mxu1 %v12616_v17  ;;  %3140 = vmatpush.msrb.mxu3 %v17436_v24 }
 0x55b   : > { %2571 = vmatmul.f32.gmra.mxu3 %v9383_v52 }
 0x55c   : > { %3731 = vmatpush.msra.mxu1 %v12626_v30 }
 0x55e   : > { %v2327_v25 = vpop.f32.mrf.mxu3 }
 0x563   : > { %2574 = vmatmul.f32.gmra.mxu3 %v9385_v49  ;;  %v12843_v49 = vpop.f32.mrf.mxu1 }
 0x564   : > { %v2268_v34 = vpop.f32.mrf.mxu2  ;;  %17447 = vst [vmem:[#allocation31_spill] sm:$0xff] %v12843_v49 }
 0x565   : > { %v2325_v63 = vadd.f32 %v2324_v62, %v2268_v34 }
 0x566   : > { %v2330_v32 = vpop.f32.mrf.mxu3 }
 0x567   : > { %9362 = vmatmul.msk.f32.vlgmr.msrb.gmra.mxu2 %vm2364_vm7, %v2325_v63 }
 0x56b   : > { %2577 = vmatmul.f32.gmra.mxu3 %v9387_v53 }
 0x56c   : > { %v2271_v12 = vpop.f32.mrf.mxu2 }
 0x56d   : > { %v2328_v40 = vadd.f32 %v2327_v25, %v2271_v12  ;;  %v9391_v25 = vld [vmem:[%s17217_s4 + $0x150] sm:$0xff]  ;;  %v12852_v12 = vpop.f32.mrf.mxu1 }
 0x56e   : > { %v2333_v27 = vpop.f32.mrf.mxu3  ;;  %17448 = vst [vmem:[#allocation84_spill] sm:$0xff] %v12852_v12  ;;  %v17453_v12 = vld [vmem:[#allocation38_spill] sm:$0xff] }
 0x56f   : > { %9363 = vmatmul.msk.f32.gmra.mxu2 %vm2364_vm7, %v2328_v40 }
 0x573   : > { %2580 = vmatmul.f32.gmra.mxu3 %v9389_v23 }
 0x574   : > { %v2274_v39 = vpop.f32.mrf.mxu2 }
 0x575   : > { %v2331_v62 = vadd.f32 %v2330_v32, %v2274_v39  ;;  %v9393_v32 = vld [vmem:[%s17217_s4 + $0x160] sm:$0xff] }
 0x576   : > { %v2336_v52 = vpop.f32.mrf.mxu3 }
 0x577   : > { %9364 = vmatmul.msk.f32.gmra.mxu2 %vm2364_vm7, %v2331_v62 }
 0x57b   : > { %2583 = vmatmul.f32.gmra.mxu3 %v9391_v25 }
 0x57c   : > { %v2277_v34 = vpop.f32.mrf.mxu2 }
 0x57d   : > { %v2334_v63 = vadd.f32 %v2333_v27, %v2277_v34  ;;  %v9395_v27 = vld [vmem:[%s17217_s4 + $0x170] sm:$0xff]  ;;  %v12858_v34 = vpop.f32.mrf.mxu1 }
 0x57e   : > { %v2339_v53 = vpop.f32.mrf.mxu3  ;;  %17449 = vst [vmem:[#allocation83_spill] sm:$0xff] %v12858_v34 }
 0x57f   : > { %9365 = vmatmul.msk.f32.gmra.mxu2 %vm2364_vm7, %v2334_v63 }
 0x583   : > { %2586 = vmatmul.f32.gmra.mxu3 %v9393_v32 }
 0x584   : > { %v2280_v40 = vpop.f32.mrf.mxu2 }
 0x585   : > { %v2337_v23 = vadd.f32 %v2336_v52, %v2280_v40  ;;  %v9397_v52 = vld [vmem:[%s17217_s4 + $0x180] sm:$0xff] }
 0x586   : > { %v2342_v39 = vpop.f32.mrf.mxu3 }
 0x587   : > { %9366 = vmatmul.msk.f32.gmra.mxu2 %vm2364_vm7, %v2337_v23  ;;  %v12865_v23 = vpop.f32.mrf.mxu1 }
 0x588   : > { %17450 = vst [vmem:[#allocation7_spill] sm:$0xff] %v12865_v23 }
 0x58b   : > { %2589 = vmatmul.f32.gmra.mxu3 %v9395_v27 }
 0x58c   : > { %v2283_v62 = vpop.f32.mrf.mxu2 }
 0x58d   : > { %v2340_v25 = vadd.f32 %v2339_v53, %v2283_v62  ;;  %v9399_v53 = vld [vmem:[%s17217_s4 + $0x190] sm:$0xf] }
 0x58e   : > { %v2345_v63 = vpop.f32.mrf.mxu3 }
 0x58f   : > { %9367 = vmatmul.msk.f32.gmra.mxu2 %vm2364_vm7, %v2340_v25  ;;  %v9433_v25 = vld [vmem:[%s17217_s4 + $0x1b8] sm:$0xff] }
 0x590   : > { %9458 = vmatmul.msk.f32.gmra.mxu1 %vm2207_vm4, %v9433_v25 }
 0x593   : > { %2592 = vmatmul.f32.gmra.mxu3 %v9397_v52  ;;  %v12875_v52 = vpop.f32.mrf.mxu1 }
 0x594   : > { %v2286_v32 = vpop.f32.mrf.mxu2  ;;  %17451 = vst [vmem:[#allocation15_spill] sm:$0xff] %v12875_v52 }
 0x595   : > { %v2343_v40 = vadd.f32 %v2342_v39, %v2286_v32  ;;  %v9430_v32 = vld [vmem:[%s17217_s4 + $0x1a0] sm:$0xff] }
 0x596   : > { %v2348_v61 = vpop.f32.mrf.mxu3 }
 0x597   : > { %9368 = vmatmul.msk.f32.gmra.mxu2 %vm2364_vm7, %v2343_v40 }
 0x59b   : > { %2595 = vmatmul.f32.gmra.mxu3 %v9399_v53 }
 0x59c   : > { %v2289_v27 = vpop.f32.mrf.mxu2 }
 0x59d   : > { %v2346_v62 = vadd.f32 %v2345_v63, %v2289_v27  ;;  %v9435_v63 = vld [vmem:[%s17217_s4 + $0x1c8] sm:$0xff] }
 0x59e   : > { %v2351_v39 = vpop.f32.mrf.mxu3  ;;  %9459 = vmatmul.msk.f32.gmra.mxu1 %vm2207_vm4, %v9435_v63  ;;  %v9415_v27 = vld [vmem:[%s17218_s5 + $0x8] sm:$0x3f] }
 0x59f   : > { %9369 = vmatmul.msk.f32.gmra.mxu2 %vm2364_vm7, %v2346_v62 }
 0x5a0   : > { %9416 = vmatpush.msk.msra.mxu2 %vm2404_vm6, %v9415_v27 }
 0x5a3   : > { %2850 = vmatmul.f32.vlgmr.msra.gmra.mxu3 %v9430_v32  ;;  %v9470_v32 = vld [vmem:[%s17218_s5 + $0x10] sm:$0x3f] }
 0x5a4   : > { %v2292_v40 = vpop.f32.mrf.mxu2  ;;  %9566 = vmatpush.msk.msra.mxu3 %vm2247_vm3, %v12415_v60  ;;  %9471 = vmatpush.msk.msrb.mxu2 %vm2404_vm6, %v9470_v32 }
 0x5a5   : > { %v2349_v23 = vadd.f32 %v2348_v61, %v2292_v40  ;;  %v9432_v61 = vld [vmem:[%s17217_s4 + $0x1b0] sm:$0xff]  ;;  %v9437_v40 = vld [vmem:[%s17217_s4 + $0x1d8] sm:$0xff] }
 0x5a6   : > { %3487 = vmatpush.msra.mxu3 %v12420_v8  ;;  %v2354_v53 = vpop.f32.mrf.mxu3  ;;  %9460 = vmatmul.msk.f32.gmra.mxu1 %vm2207_vm4, %v9437_v40  ;;  %v9436_v40 = vld [vmem:[%s17217_s4 + $0x1d0] sm:$0xff] }
 0x5a7   : > { %9370 = vmatmul.msk.f32.gmra.mxu2 %vm2364_vm7, %v2349_v23  ;;  %v2616_v23 = vpop.f32.mrf.mxu1 }
 0x5ab   : > { %2853 = vmatmul.f32.gmra.mxu3 %v9432_v61 }
 0x5ac   : > { %v2295_v62 = vpop.f32.mrf.mxu2 }
 0x5ad   : > { %v2352_v25 = vadd.f32 %v2351_v39, %v2295_v62  ;;  %v9434_v39 = vld [vmem:[%s17217_s4 + $0x1c0] sm:$0xff] }
 0x5ae   : > { %v2357_v63 = vpop.f32.mrf.mxu3 }
 0x5af   : > { %9371 = vmatmul.msk.f32.gmra.mxu2 %vm2364_vm7, %v2352_v25  ;;  %v2619_v61 = vpop.f32.mrf.mxu1  ;;  %v9439_v25 = vld [vmem:[%s17217_s4 + $0x1e8] sm:$0xff] }
 0x5b0   : > { %9461 = vmatmul.msk.f32.gmra.mxu1 %vm2207_vm4, %v9439_v25 }
 0x5b3   : > { %2856 = vmatmul.f32.gmra.mxu3 %v9434_v39 }
 0x5b4   : > { %v2298_v27 = vpop.f32.mrf.mxu2 }
 0x5b5   : > { %v2355_v62 = vadd.f32 %v2354_v53, %v2298_v27  ;;  %v9441_v53 = vld [vmem:[%s17217_s4 + $0x1f8] sm:$0xff]  ;;  %v9438_v27 = vld [vmem:[%s17217_s4 + $0x1e0] sm:$0xff] }
 0x5b6   : > { %v2360_v32 = vpop.f32.mrf.mxu3 }
 0x5b7   : > { %9372 = vmatmul.msk.f32.gmra.mxu2 %vm2364_vm7, %v2355_v62  ;;  %v2622_v55 = vpop.f32.mrf.mxu1 }
 0x5b8   : > { %9462 = vmatmul.msk.f32.gmra.mxu1 %vm2207_vm4, %v9441_v53 }
 0x5bb   : > { %2859 = vmatmul.f32.gmra.mxu3 %v9436_v40 }
 0x5bc   : > { %v2301_v52 = vpop.f32.mrf.mxu2 }
 0x5bd   : > { %v2358_v6 = vadd.f32 %v2357_v63, %v2301_v52  ;;  %v9440_v63 = vld [vmem:[%s17217_s4 + $0x1f0] sm:$0xff] }
 0x5be   : > { %v2560_v39 = vpop.f32.mrf.mxu3 }
 0x5bf   : > { %9373 = vmatmul.msk.f32.gmra.mxu2 %vm2364_vm7, %v2358_v6  ;;  %v2625_v25 = vpop.f32.mrf.mxu1  ;;  %v9443_v6 = vld [vmem:[%s17217_s4 + $0x208] sm:$0xff]  ;;  %v2617_v40 = vadd.f32 %v2616_v23, %v2560_v39 }
 0x5c0   : > { %9463 = vmatmul.msk.f32.gmra.mxu1 %vm2207_vm4, %v9443_v6 }
 0x5c3   : > { %2862 = vmatmul.f32.gmra.mxu3 %v9438_v27  ;;  %v9442_v27 = vld [vmem:[%s17217_s4 + $0x200] sm:$0xff] }
 0x5c4   : > { %v2304_v62 = vpop.f32.mrf.mxu2 }
 0x5c5   : > { %v2361_v45 = vadd.f32 %v2360_v32, %v2304_v62  ;;  %v9447_v62 = vld [vmem:[%s17217_s4 + $0x228] sm:$0xff] }
 0x5c6   : > { %v2563_v52 = vpop.f32.mrf.mxu3 }
 0x5c7   : > { %9374 = vmatmul.msk.f32.gmra.mxu2 %vm2364_vm7, %v2361_v45  ;;  %v2628_v53 = vpop.f32.mrf.mxu1  ;;  %v9445_v45 = vld [vmem:[%s17217_s4 + $0x218] sm:$0xff]  ;;  %v2620_v23 = vadd.f32 %v2619_v61, %v2563_v52  ;;  %v9444_v61 = vld [vmem:[%s17217_s4 + $0x210] sm:$0xff] }
 0x5c8   : > { %9464 = vmatmul.msk.f32.gmra.mxu1 %vm2207_vm4, %v9445_v45 }
 0x5cb   : > { %2865 = vmatmul.f32.gmra.mxu3 %v9440_v63 }
 0x5ce   : > { %v2566_v32 = vpop.f32.mrf.mxu3 }
 0x5cf   : > { %9417 = vmatmul.msk.f32.vlgmr.msra.gmra.mxu2 %vm2364_vm7, %v2617_v40  ;;  %v2631_v39 = vpop.f32.mrf.mxu1  ;;  %v2623_v52 = vadd.f32 %v2622_v55, %v2566_v32  ;;  %v9449_v40 = vld [vmem:[%s17217_s4 + $0x238] sm:$0xff]  ;;  %v9446_v55 = vld [vmem:[%s17217_s4 + $0x220] sm:$0xff] }
 0x5d0   : > { %3416 = vmatpush.msra.mxu2 %v12339_v51  ;;  %9465 = vmatmul.msk.f32.gmra.mxu1 %vm2207_vm4, %v9447_v62 }
 0x5d2   : > { %3417 = vmatpush.msra.mxu2 %v12345_v20 }
 0x5d3   : > { %2868 = vmatmul.f32.gmra.mxu3 %v9442_v27 }
 0x5d4   : > { %3418 = vmatpush.msra.mxu2 %v12352_v16 }
 0x5d6   : > { %3419 = vmatpush.msra.mxu2 %v12365_v29  ;;  %v2569_v6 = vpop.f32.mrf.mxu3 }
 0x5d7   : > { %9418 = vmatmul.msk.f32.gmra.mxu2 %vm2364_vm7, %v2620_v23  ;;  %v2634_v63 = vpop.f32.mrf.mxu1  ;;  %v2626_v32 = vadd.f32 %v2625_v25, %v2569_v6  ;;  %v9451_v23 = vld [vmem:[%s17217_s4 + $0x248] sm:$0xff]  ;;  %v9448_v6 = vld [vmem:[%s17217_s4 + $0x230] sm:$0xff] }
 0x5d8   : > { %3420 = vmatpush.msra.mxu2 %v12375_v15  ;;  %9466 = vmatmul.msk.f32.gmra.mxu1 %vm2207_vm4, %v9449_v40  ;;  %v9453_v40 = vld [vmem:[%s17217_s4 + $0x258] sm:$0xff] }
 0x5da   : > { %3421 = vmatpush.msra.mxu2 %v12386_v19 }
 0x5db   : > { %2871 = vmatmul.f32.gmra.mxu3 %v9444_v61 }
 0x5dc   : > { %3422 = vmatpush.msra.mxu2 %v12393_v33 }
 0x5de   : > { %3423 = vmatpush.msra.mxu2 %v12401_v38  ;;  %v2572_v45 = vpop.f32.mrf.mxu3 }
 0x5df   : > { %9419 = vmatmul.msk.f32.gmra.mxu2 %vm2364_vm7, %v2623_v52  ;;  %v2637_v27 = vpop.f32.mrf.mxu1  ;;  %v2629_v61 = vadd.f32 %v2628_v53, %v2572_v45  ;;  %v9450_v53 = vld [vmem:[%s17217_s4 + $0x240] sm:$0xff] }
 0x5e0   : > { %3424 = vmatpush.msra.mxu2 %v12413_v58  ;;  %9467 = vmatmul.msk.f32.gmra.mxu1 %vm2207_vm4, %v9451_v23 }
 0x5e2   : > { %3425 = vmatpush.msra.mxu2 %v12425_v26 }
 0x5e3   : > { %2874 = vmatmul.f32.gmra.mxu3 %v9446_v55 }
 0x5e4   : > { %3426 = vmatpush.msra.mxu2 %v12457_v3 }
 0x5e6   : > { %3427 = vmatpush.msra.mxu2 %v12479_v11  ;;  %v2575_v62 = vpop.f32.mrf.mxu3 }
 0x5e7   : > { %9420 = vmatmul.msk.f32.gmra.mxu2 %vm2364_vm7, %v2626_v32  ;;  %v2640_v52 = vpop.f32.mrf.mxu1 }
 0x5e8   : > { %3428 = vmatpush.msra.mxu2 %v12488_v36  ;;  %9468 = vmatmul.msk.f32.gmra.mxu1 %vm2207_vm4, %v9453_v40  ;;  %v17458_v36 = vld [vmem:[#allocation48_spill] sm:$0xff] }
 0x5ea   : > { %3429 = vmatpush.msra.mxu2 %v12501_v1  ;;  %v12974_v25 = vpop.f32.mrf.mxu2 }
 0x5eb   : > { %2877 = vmatmul.f32.gmra.mxu3 %v9448_v6  ;;  %v9452_v6 = vld [vmem:[%s17217_s4 + $0x250] sm:$0xff] }
 0x5ec   : > { %3430 = vmatpush.msra.mxu2 %v12515_v13  ;;  %v2632_v13 = vadd.f32 %v2631_v39, %v2575_v62  ;;  %v9488_v39 = vld [vmem:[%s17217_s4 + $0x288] sm:$0xff] }
 0x5ed   : > { %9513 = vmatmul.msk.f32.gmra.mxu0 %vm2207_vm4, %v9488_v39  ;;  %v9485_v39 = vld [vmem:[%s17217_s4 + $0x270] sm:$0xff] }
 0x5ee   : > { %3431 = vmatpush.msra.mxu2 %v17436_v24  ;;  %v2578_v1 = vpop.f32.mrf.mxu3  ;;  %v9455_v24 = vld [vmem:[%s17217_s4 + $0x268] sm:$0xf] }
 0x5ef   : > { %9421 = vmatmul.msk.f32.gmra.mxu2 %vm2364_vm7, %v2629_v61  ;;  %v2643_v45 = vpop.f32.mrf.mxu1  ;;  %v2635_v61 = vadd.f32 %v2634_v63, %v2578_v1  ;;  %v9490_v63 = vld [vmem:[%s17217_s4 + $0x298] sm:$0xff] }
 0x5f0   : > { %9469 = vmatmul.msk.f32.gmra.mxu1 %vm2207_vm4, %v9455_v24 }
 0x5f2   : > { %v12986_v55 = vpop.f32.mrf.mxu2 }
 0x5f3   : > { %2880 = vmatmul.f32.gmra.mxu3 %v9450_v53 }
 0x5f5   : > { %9514 = vmatmul.msk.f32.gmra.mxu0 %vm2207_vm4, %v9490_v63  ;;  %v9487_v63 = vld [vmem:[%s17217_s4 + $0x280] sm:$0xff] }
 0x5f6   : > { %v2581_v32 = vpop.f32.mrf.mxu3 }
 0x5f7   : > { %9422 = vmatmul.msk.f32.gmra.mxu2 %vm2364_vm7, %v2632_v13  ;;  %v2646_v62 = vpop.f32.mrf.mxu1  ;;  %v9454_v13 = vld [vmem:[%s17217_s4 + $0x260] sm:$0xf]  ;;  %v2638_v24 = vadd.f32 %v2637_v27, %v2581_v32  ;;  %v9492_v27 = vld [vmem:[%s17217_s4 + $0x2a8] sm:$0xff] }
 0x5fa   : > { %v12996_v23 = vpop.f32.mrf.mxu2 }
 0x5fb   : > { %2883 = vmatmul.f32.gmra.mxu3 %v9452_v6 }
 0x5fd   : > { %9515 = vmatmul.msk.f32.gmra.mxu0 %vm2207_vm4, %v9492_v27  ;;  %v9489_v27 = vld [vmem:[%s17217_s4 + $0x290] sm:$0xff] }
 0x5fe   : > { %v2584_v40 = vpop.f32.mrf.mxu3 }
 0x5ff   : > { %9423 = vmatmul.msk.f32.gmra.mxu2 %vm2364_vm7, %v2635_v61  ;;  %v2649_v1 = vpop.f32.mrf.mxu1  ;;  %v2641_v14 = vadd.f32 %v2640_v52, %v2584_v40  ;;  %v9494_v52 = vld [vmem:[%s17217_s4 + $0x2b8] sm:$0xff] }
 0x602   : > { %v13006_v53 = vpop.f32.mrf.mxu2 }
 0x603   : > { %2886 = vmatmul.f32.gmra.mxu3 %v9454_v13 }
 0x605   : > { %9516 = vmatmul.msk.f32.gmra.mxu0 %vm2207_vm4, %v9494_v52 }
 0x606   : > { %v2587_v6 = vpop.f32.mrf.mxu3 }
 0x607   : > { %9424 = vmatmul.msk.f32.gmra.mxu2 %vm2364_vm7, %v2638_v24  ;;  %v2652_v32 = vpop.f32.mrf.mxu1  ;;  %v2644_v34 = vadd.f32 %v2643_v45, %v2587_v6  ;;  %v9496_v45 = vld [vmem:[%s17217_s4 + $0x2c8] sm:$0xff] }
 0x60a   : > { %v13016_v61 = vpop.f32.mrf.mxu2 }
 0x60b   : > { %3141 = vmatmul.f32.vlgmr.msrb.gmra.mxu3 %v9485_v39 }
 0x60d   : > { %9517 = vmatmul.msk.f32.gmra.mxu0 %vm2207_vm4, %v9496_v45 }
 0x60e   : > { %v2590_v13 = vpop.f32.mrf.mxu3 }
 0x60f   : > { %9425 = vmatmul.msk.f32.gmra.mxu2 %vm2364_vm7, %v2641_v14  ;;  %v2907_v39 = vpop.f32.mrf.mxu1  ;;  %v2647_v28 = vadd.f32 %v2646_v62, %v2590_v13  ;;  %v1699_v62 = vadd.f32 %v17453_v12, %v17452_v57  ;;  %v17459_v12 = vld [vmem:[#allocation45_spill] sm:$0xff] }
 0x611   : > { %v1791_v49 = vadd.f32 %v17456_v44, %v1699_v62 }
 0x612   : > { %v13026_v24 = vpop.f32.mrf.mxu2 }
 0x613   : > { %3144 = vmatmul.f32.gmra.mxu3 %v9487_v63  ;;  %v9491_v63 = vld [vmem:[%s17217_s4 + $0x2a0] sm:$0xff]  ;;  %v1883_v11 = vadd.f32 %v17458_v36, %v1791_v49  ;;  %v9500_v36 = vld [vmem:[%s17217_s4 + $0x2e8] sm:$0xff] }
 0x615   : > { %9518 = vmatmul.msk.f32.gmra.mxu0 %vm2207_vm4, %v9498_v18  ;;  %v9493_v18 = vld [vmem:[%s17217_s4 + $0x2b0] sm:$0xff] }
 0x616   : > { %v2593_v40 = vpop.f32.mrf.mxu3 }
 0x617   : > { %9426 = vmatmul.msk.f32.gmra.mxu2 %vm2364_vm7, %v2644_v34  ;;  %v2910_v52 = vpop.f32.mrf.mxu1  ;;  %v2650_v13 = vadd.f32 %v2649_v1, %v2593_v40  ;;  %v1975_v40 = vadd.f32 %v12727_v56, %v1883_v11 }
 0x61a   : > { %v13036_v14 = vpop.f32.mrf.mxu2 }
 0x61b   : > { %3147 = vmatmul.f32.gmra.mxu3 %v9489_v27  ;;  %v17454_v27 = vld [vmem:[#allocation12_spill] sm:$0xff] }
 0x61d   : > { %9519 = vmatmul.msk.f32.gmra.mxu0 %vm2207_vm4, %v9500_v36 }
 0x61e   : > { %v2596_v6 = vpop.f32.mrf.mxu3 }
 0x61f   : > { %9427 = vmatmul.msk.f32.gmra.mxu2 %vm2364_vm7, %v2647_v28  ;;  %v17455_v28 = vld [vmem:[#allocation37_spill] sm:$0xff]  ;;  %v2913_v49 = vpop.f32.mrf.mxu1 }
 0x620   : > { %v1696_v45 = vadd.f32 %v17455_v28, %v17454_v27  ;;  %v17462_v27 = vrot.slane %v12415_v60, 6 }
 0x622   : > { %v13046_v34 = vpop.f32.mrf.mxu2  ;;  %v1788_v35 = vadd.f32 %v17457_v10, %v1696_v45  ;;  %v2653_v10 = vadd.f32 %v2652_v32, %v2596_v6  ;;  %v9495_v32 = vld [vmem:[%s17217_s4 + $0x2c0] sm:$0xff] }
 0x623   : > { %3150 = vmatmul.f32.gmra.mxu3 %v9491_v63  ;;  %v2067_v63 = vadd.f32 %v12705_v59, %v1975_v40 }
 0x624   : > { %v1880_v1 = vadd.f32 %v17459_v12, %v1788_v35 }
 0x625   : > { %v13078_v56 = vadd.f32 %v12837_v50, %v2067_v63  ;;  %v9499_v63 = vld [vmem:[%s17217_s4 + $0x2e0] sm:$0xff] }
 0x626   : > { %v2851_v57 = vpop.f32.mrf.mxu3  ;;  %v1972_v44 = vadd.f32 %v12712_v46, %v1880_v1  ;;  %v9504_v1 = vld [vmem:[%s17217_s4 + $0x308] sm:$0xff] }
 0x627   : > { %9428 = vmatmul.msk.f32.gmra.mxu2 %vm2364_vm7, %v2650_v13  ;;  %17460 = vst [vmem:[#allocation9_spill] sm:$0xff] %v13078_v56  ;;  %v2908_v6 = vadd.f32 %v2907_v39, %v2851_v57  ;;  %v3695_v62 = vrot.slane %v13078_v56, 6  ;;  %v9497_v57 = vld [vmem:[%s17217_s4 + $0x2d0] sm:$0xff] }
 0x628   : > { %v2064_v11 = vadd.f32 %v12681_v31, %v1972_v44  ;;  %v9502_v31 = vld [vmem:[%s17217_s4 + $0x2f8] sm:$0xff] }
 0x629   : > { %9520 = vmatmul.msk.f32.gmra.mxu0 %vm2207_vm4, %v9502_v31 }
 0x62a   : > { %v13065_v3 = vpop.f32.mrf.mxu2  ;;  %v13082_v46 = vadd.f32 %v12830_v22, %v2064_v11  ;;  %v2916_v22 = vpop.f32.mrf.mxu1 }
 0x62b   : > { %3153 = vmatmul.f32.gmra.mxu3 %v9493_v18 }
 0x62c   : > { %17461 = vst [vmem:[#allocation19_spill] sm:$0xff] %v13082_v46  ;;  %v3693_v50 = vrot.slane %v13082_v46, 6 }
 0x62e   : > { %v2854_v35 = vpop.f32.mrf.mxu3  ;;  %v13097_v13 = vsel %vm3659_vm5, %v3693_v50, %v3695_v62  ;;  %v13104_v28 = vsel %vm3659_vm5, %v17462_v27, %v3693_v50  ;;  %v13139_v62 = vld [vmem:[%s17219_s6] ss:$0 sm:$0xff] }
 0x62f   : > { %9429 = vmatmul.msk.f32.gmra.mxu2 %vm2364_vm7, %v2653_v10  ;;  %v2911_v12 = vadd.f32 %v2910_v52, %v2854_v35  ;;  %v9506_v52 = vld [vmem:[%s17217_s4 + $0x318] sm:$0xff]  ;;  %v9501_v35 = vld [vmem:[%s17217_s4 + $0x2f0] sm:$0xff]  ;;  %v2464_v50 = vadd.f32 %v13139_v62, %v12974_v25 }
 0x631   : > { %9521 = vmatmul.msk.f32.gmra.mxu0 %vm2207_vm4, %v9504_v1  ;;  %v9609_v1 = vld [vmem:[%s17218_s5 + $0x28] sm:$0x3f] }
 0x632   : > { %v13084_v59 = vpop.f32.mrf.mxu2  ;;  %v2919_v18 = vpop.f32.mrf.mxu1  ;;  %9610 = vmatpush.msk.msrb.mxu3 %vm2404_vm6, %v9609_v1 }
 0x633   : > { %3156 = vmatmul.f32.gmra.mxu3 %v9495_v32 }
 0x636   : > { %v2857_v39 = vpop.f32.mrf.mxu3 }
 0x637   : > { %9472 = vmatmul.msk.f32.vlgmr.msrb.gmra.mxu2 %vm2364_vm7, %v2908_v6  ;;  %v2914_v10 = vadd.f32 %v2913_v49, %v2857_v39  ;;  %v9508_v49 = vld [vmem:[%s17217_s4 + $0x328] sm:$0xff] }
 0x638   : > { %9595 = vmatpush.msk.msrb.mxu2 %vm2247_vm3, %v13097_v13 }
 0x639   : > { %9522 = vmatmul.msk.f32.gmra.mxu0 %vm2207_vm4, %v9506_v52 }
 0x63a   : > { %3787 = vmatpush.msrb.mxu2 %v13104_v28  ;;  %v13107_v45 = vpop.f32.mrf.mxu2  ;;  %v2922_v32 = vpop.f32.mrf.mxu1 }
 0x63b   : > { %3159 = vmatmul.f32.gmra.mxu3 %v9497_v57 }
 0x63e   : > { %v2860_v40 = vpop.f32.mrf.mxu3 }
 0x63f   : > { %9473 = vmatmul.msk.f32.gmra.mxu2 %vm2364_vm7, %v2911_v12  ;;  %v2917_v6 = vadd.f32 %v2916_v22, %v2860_v40  ;;  %v9503_v22 = vld [vmem:[%s17217_s4 + $0x300] sm:$0xff]  ;;  %v9510_v12 = vld [vmem:[%s17217_s4 + $0x338] sm:$0xf] }
 0x641   : > { %9523 = vmatmul.msk.f32.gmra.mxu0 %vm2207_vm4, %v9508_v49  ;;  %v2466_v49 = vadd.f32 %v13139_v62, %v12996_v23  ;;  %v9509_v23 = vld [vmem:[%s17217_s4 + $0x330] sm:$0xf] }
 0x642   : > { %v13117_v44 = vpop.f32.mrf.mxu2  ;;  %v2925_v40 = vpop.f32.mrf.mxu1 }
 0x643   : > { %3162 = vmatmul.f32.gmra.mxu3 %v9499_v63 }
 0x646   : > { %v2863_v36 = vpop.f32.mrf.mxu3 }
 0x647   : > { %9474 = vmatmul.msk.f32.gmra.mxu2 %vm2364_vm7, %v2914_v10  ;;  %v2920_v57 = vadd.f32 %v2919_v18, %v2863_v36  ;;  %v2465_v18 = vadd.f32 %v13139_v62, %v12986_v55  ;;  %v9505_v10 = vld [vmem:[%s17217_s4 + $0x310] sm:$0xff]  ;;  %v9507_v55 = vld [vmem:[%s17217_s4 + $0x320] sm:$0xff] }
 0x649   : > { %9524 = vmatmul.msk.f32.gmra.mxu0 %vm2207_vm4, %v9510_v12 }
 0x64a   : > { %v13127_v11 = vpop.f32.mrf.mxu2 }
 0x64b   : > { %3165 = vmatmul.f32.gmra.mxu3 %v9501_v35  ;;  %v2928_v35 = vpop.f32.mrf.mxu1 }
 0x64e   : > { %v2866_v31 = vpop.f32.mrf.mxu3 }
 0x64f   : > { %9475 = vmatmul.msk.f32.gmra.mxu2 %vm2364_vm7, %v2917_v6  ;;  %v2923_v36 = vadd.f32 %v2922_v32, %v2866_v31 }
 0x652   : > { %v2716_v39 = vpop.f32.mrf.mxu2 }
 0x653   : > { %v13147_v27 = vadd.f32 %v2716_v39, %v2464_v50  ;;  %3168 = vmatmul.f32.gmra.mxu3 %v9503_v22  ;;  %v2931_v31 = vpop.f32.mrf.mxu1 }
 0x656   : > { %v2869_v25 = vpop.f32.mrf.mxu3 }
 0x657   : > { %9476 = vmatmul.msk.f32.gmra.mxu2 %vm2364_vm7, %v2920_v57  ;;  %v2926_v22 = vadd.f32 %v2925_v40, %v2869_v25  ;;  %v2467_v57 = vadd.f32 %v13139_v62, %v13006_v53  ;;  %v2468_v25 = vadd.f32 %v13139_v62, %v13016_v61  ;;  %v9541_v53 = vld [vmem:[%s17217_s4 + $0x348] sm:$0xff]  ;;  %v2469_v61 = vadd.f32 %v13139_v62, %v13026_v24 }
 0x658   : > { %v2470_v24 = vadd.f32 %v13139_v62, %v13036_v14 }
 0x65a   : > { %v2719_v63 = vpop.f32.mrf.mxu2 }
 0x65b   : > { %v13163_v52 = vadd.f32 %v2719_v63, %v2465_v18  ;;  %3171 = vmatmul.f32.gmra.mxu3 %v9505_v10  ;;  %v2934_v10 = vpop.f32.mrf.mxu1 }
 0x65e   : > { %v2872_v6 = vpop.f32.mrf.mxu3 }
 0x65f   : > { %9477 = vmatmul.msk.f32.gmra.mxu2 %vm2364_vm7, %v2923_v36  ;;  %v2929_v18 = vadd.f32 %v2928_v35, %v2872_v6  ;;  %v3198_v35 = vpop.f32.mrf.mxu0 }
 0x662   : > { %v2722_v50 = vpop.f32.mrf.mxu2 }
 0x663   : > { %v13171_v39 = vadd.f32 %v2722_v50, %v2466_v49  ;;  %3174 = vmatmul.f32.gmra.mxu3 %v9507_v55 }
 0x666   : > { %v2875_v32 = vpop.f32.mrf.mxu3 }
 0x667   : > { %9478 = vmatmul.msk.f32.gmra.mxu2 %vm2364_vm7, %v2926_v22  ;;  %v2932_v49 = vadd.f32 %v2931_v31, %v2875_v32  ;;  %v2937_v32 = vpop.f32.mrf.mxu1 }
 0x66a   : > { %v2725_v12 = vpop.f32.mrf.mxu2 }
 0x66b   : > { %v13179_v1 = vadd.f32 %v2725_v12, %v2467_v57  ;;  %3177 = vmatmul.f32.gmra.mxu3 %v9509_v23  ;;  %v3201_v57 = vpop.f32.mrf.mxu0 }
 0x66e   : > { %v2878_v40 = vpop.f32.mrf.mxu3 }
 0x66f   : > { %9479 = vmatmul.msk.f32.gmra.mxu2 %vm2364_vm7, %v2929_v18  ;;  %v2935_v22 = vadd.f32 %v2934_v10, %v2878_v40  ;;  %v2940_v40 = vpop.f32.mrf.mxu1 }
 0x672   : > { %v2728_v63 = vpop.f32.mrf.mxu2 }
 0x673   : > { %v13187_v36 = vadd.f32 %v2728_v63, %v2468_v25  ;;  %9567 = vmatmul.msk.f32.vlgmr.msra.gmra.mxu3 %vm2207_vm4, %v9541_v53  ;;  %v9543_v25 = vld [vmem:[%s17217_s4 + $0x358] sm:$0xff]  ;;  %v2471_v63 = vadd.f32 %v13139_v62, %v13046_v34  ;;  %v3204_v10 = vpop.f32.mrf.mxu0 }
 0x674   : > { %4166 = vmatpush.msra.mxu3 %v12472_v21 }
 0x676   : > { %4167 = vmatpush.msra.mxu3 %v12492_v54  ;;  %v2881_v6 = vpop.f32.mrf.mxu3 }
 0x677   : > { %9480 = vmatmul.msk.f32.gmra.mxu2 %vm2364_vm7, %v2932_v49  ;;  %v2938_v18 = vadd.f32 %v2937_v32, %v2881_v6 }
 0x678   : > { %4168 = vmatpush.msra.mxu3 %v12505_v42 }
 0x67a   : > { %v2731_v50 = vpop.f32.mrf.mxu2  ;;  %4169 = vmatpush.msra.mxu3 %v12519_v4 }
 0x67b   : > { %v13196_v55 = vadd.f32 %v2731_v50, %v2469_v61  ;;  %9568 = vmatmul.msk.f32.gmra.mxu3 %vm2207_vm4, %v9543_v25  ;;  %v9545_v61 = vld [vmem:[%s17217_s4 + $0x368] sm:$0xff]  ;;  %v2943_v50 = vpop.f32.mrf.mxu1 }
 0x67c   : > { %4170 = vmatpush.msra.mxu3 %v12527_v48 }
 0x67e   : > { %4171 = vmatpush.msra.mxu3 %v12537_v9  ;;  %v2884_v31 = vpop.f32.mrf.mxu3 }
 0x67f   : > { %9481 = vmatmul.msk.f32.gmra.mxu2 %vm2364_vm7, %v2935_v22  ;;  %v2941_v6 = vadd.f32 %v2940_v40, %v2884_v31  ;;  %v2472_v22 = vadd.f32 %v13139_v62, %v13065_v3  ;;  %v9547_v3 = vld [vmem:[%s17217_s4 + $0x378] sm:$0xff]  ;;  %v2473_v40 = vadd.f32 %v13139_v62, %v13084_v59  ;;  %v2474_v59 = vadd.f32 %v13139_v62, %v13107_v45 }
 0x680   : > { %4172 = vmatpush.msra.mxu3 %v12546_v41  ;;  %v2475_v45 = vadd.f32 %v13139_v62, %v13117_v44  ;;  %v2476_v44 = vadd.f32 %v13139_v62, %v13127_v11 }
 0x682   : > { %v2734_v12 = vpop.f32.mrf.mxu2  ;;  %4173 = vmatpush.msra.mxu3 %v12556_v37 }
 0x683   : > { %v13205_v23 = vadd.f32 %v2734_v12, %v2470_v24  ;;  %9569 = vmatmul.msk.f32.gmra.mxu3 %vm2207_vm4, %v9545_v61  ;;  %v9549_v61 = vld [vmem:[%s17217_s4 + $0x388] sm:$0xff] }
 0x684   : > { %4174 = vmatpush.msra.mxu3 %v12563_v43 }
 0x686   : > { %4175 = vmatpush.msra.mxu3 %v12572_v0  ;;  %v2887_v14 = vpop.f32.mrf.mxu3 }
 0x687   : > { %9482 = vmatmul.msk.f32.gmra.mxu2 %vm2364_vm7, %v2938_v18  ;;  %v2944_v12 = vadd.f32 %v2943_v50, %v2887_v14  ;;  %v3207_v18 = vpop.f32.mrf.mxu0 }
 0x688   : > { %4176 = vmatpush.msra.mxu3 %v12581_v2 }
 0x68a   : > { %v2737_v53 = vpop.f32.mrf.mxu2  ;;  %4177 = vmatpush.msra.mxu3 %v12591_v5 }
 0x68b   : > { %v13218_v49 = vadd.f32 %v2737_v53, %v2471_v63  ;;  %9570 = vmatmul.msk.f32.gmra.mxu3 %vm2207_vm4, %v9547_v3  ;;  %v9540_v53 = vld [vmem:[%s17217_s4 + $0x340] sm:$0xff] }
 0x68c   : > { %4178 = vmatpush.msra.mxu3 %v12598_v7 }
 0x68e   : > { %4179 = vmatpush.msra.mxu3 %v12607_v47  ;;  %v3142_v34 = vpop.f32.mrf.mxu3 }
 0x68f   : > { %9483 = vmatmul.msk.f32.gmra.mxu2 %vm2364_vm7, %v2941_v6  ;;  %v3199_v32 = vadd.f32 %v3198_v35, %v3142_v34  ;;  %v3210_v6 = vpop.f32.mrf.mxu0 }
 0x690   : > { %4180 = vmatpush.msra.mxu3 %v12616_v17 }
 0x691   : > { %9527 = vmatmul.msk.f32.vlgmr.msrb.gmra.mxu1 %vm2364_vm7, %v3199_v32  ;;  %v9542_v32 = vld [vmem:[%s17217_s4 + $0x350] sm:$0xff] }
 0x692   : > { %v2740_v31 = vpop.f32.mrf.mxu2  ;;  %9624 = vmatpush.msk.msrb.mxu1 %vm2247_vm3, %v13097_v13  ;;  %4181 = vmatpush.msra.mxu3 %v12626_v30 }
 0x693   : > { %v13231_v24 = vadd.f32 %v2740_v31, %v2472_v22  ;;  %9571 = vmatmul.msk.f32.gmra.mxu3 %vm2207_vm4, %v9549_v61  ;;  %v9551_v31 = vld [vmem:[%s17217_s4 + $0x398] sm:$0xff] }
 0x694   : > { %4012 = vmatpush.msrb.mxu1 %v13104_v28 }
 0x696   : > { %v3145_v35 = vpop.f32.mrf.mxu3 }
 0x697   : > { %9484 = vmatmul.msk.f32.gmra.mxu2 %vm2364_vm7, %v2944_v12  ;;  %v3202_v25 = vadd.f32 %v3201_v57, %v3145_v35  ;;  %v3213_v3 = vpop.f32.mrf.mxu0 }
 0x699   : > { %9528 = vmatmul.msk.f32.gmra.mxu1 %vm2364_vm7, %v3202_v25  ;;  %v9544_v25 = vld [vmem:[%s17217_s4 + $0x360] sm:$0xff] }
 0x69a   : > { %v2743_v14 = vpop.f32.mrf.mxu2 }
 0x69b   : > { %v13245_v63 = vadd.f32 %v2743_v14, %v2473_v40  ;;  %9572 = vmatmul.msk.f32.gmra.mxu3 %vm2207_vm4, %v9551_v31  ;;  %v9553_v14 = vld [vmem:[%s17217_s4 + $0x3a8] sm:$0xff]  ;;  %v9548_v31 = vld [vmem:[%s17217_s4 + $0x380] sm:$0xff] }
 0x69e   : > { %v3148_v34 = vpop.f32.mrf.mxu3 }
 0x69f   : > { %3432 = vmatmul.f32.vlgmr.msra.gmra.mxu2 %v9540_v53  ;;  %v3205_v57 = vadd.f32 %v3204_v10, %v3148_v34  ;;  %v3216_v34 = vpop.f32.mrf.mxu0 }
 0x6a1   : > { %9529 = vmatmul.msk.f32.gmra.mxu1 %vm2364_vm7, %v3205_v57  ;;  %v9546_v57 = vld [vmem:[%s17217_s4 + $0x370] sm:$0xff] }
 0x6a2   : > { %v2746_v50 = vpop.f32.mrf.mxu2 }
 0x6a3   : > { %v13257_v22 = vadd.f32 %v2746_v50, %v2474_v59  ;;  %9573 = vmatmul.msk.f32.gmra.mxu3 %vm2207_vm4, %v9553_v14  ;;  %v9555_v50 = vld [vmem:[%s17217_s4 + $0x3b8] sm:$0xff] }
 0x6a6   : > { %v3151_v12 = vpop.f32.mrf.mxu3 }
 0x6a7   : > { %3435 = vmatmul.f32.gmra.mxu2 %v9542_v32  ;;  %v3208_v10 = vadd.f32 %v3207_v18, %v3151_v12  ;;  %v3219_v12 = vpop.f32.mrf.mxu0 }
 0x6a9   : > { %9530 = vmatmul.msk.f32.gmra.mxu1 %vm2364_vm7, %v3208_v10 }
 0x6aa   : > { %v2749_v35 = vpop.f32.mrf.mxu2 }
 0x6ab   : > { %v13269_v40 = vadd.f32 %v2749_v35, %v2475_v45  ;;  %9574 = vmatmul.msk.f32.gmra.mxu3 %vm2207_vm4, %v9555_v50  ;;  %v9557_v45 = vld [vmem:[%s17217_s4 + $0x3c8] sm:$0xff] }
 0x6ae   : > { %v3154_v53 = vpop.f32.mrf.mxu3 }
 0x6af   : > { %3438 = vmatmul.f32.gmra.mxu2 %v9544_v25  ;;  %v3211_v18 = vadd.f32 %v3210_v6, %v3154_v53  ;;  %v9550_v25 = vld [vmem:[%s17217_s4 + $0x390] sm:$0xff]  ;;  %v3222_v14 = vpop.f32.mrf.mxu0  ;;  %v9559_v53 = vld [vmem:[%s17217_s4 + $0x3d8] sm:$0xff] }
 0x6b1   : > { %9531 = vmatmul.msk.f32.gmra.mxu1 %vm2364_vm7, %v3211_v18 }
 0x6b2   : > { %v2752_v61 = vpop.f32.mrf.mxu2 }
 0x6b3   : > { %v13281_v59 = vadd.f32 %v2752_v61, %v2476_v44  ;;  %9575 = vmatmul.msk.f32.gmra.mxu3 %vm2207_vm4, %v9557_v45 }
 0x6b6   : > { %v3157_v32 = vpop.f32.mrf.mxu3 }
 0x6b7   : > { %3441 = vmatmul.f32.gmra.mxu2 %v9546_v57  ;;  %v3214_v11 = vadd.f32 %v3213_v3, %v3157_v32  ;;  %v9561_v57 = vld [vmem:[%s17217_s4 + $0x3e8] sm:$0xff]  ;;  %v3225_v32 = vpop.f32.mrf.mxu0 }
 0x6b9   : > { %9532 = vmatmul.msk.f32.gmra.mxu1 %vm2364_vm7, %v3214_v11 }
 0x6ba   : > { %v3007_v62 = vpop.f32.mrf.mxu2 }
 0x6bb   : > { %v13292_v6 = vadd.f32 %v3007_v62, %v13147_v27  ;;  %9576 = vmatmul.msk.f32.gmra.mxu3 %vm2207_vm4, %v9559_v53 }
 0x6be   : > { %v3160_v10 = vpop.f32.mrf.mxu3 }
 0x6bf   : > { %3444 = vmatmul.f32.gmra.mxu2 %v9548_v31  ;;  %v3217_v3 = vadd.f32 %v3216_v34, %v3160_v10  ;;  %v9552_v34 = vld [vmem:[%s17217_s4 + $0x3a0] sm:$0xff]  ;;  %v9554_v31 = vld [vmem:[%s17217_s4 + $0x3b0] sm:$0xff] }
 0x6c1   : > { %9533 = vmatmul.msk.f32.gmra.mxu1 %vm2364_vm7, %v3217_v3 }
 0x6c2   : > { %v3010_v35 = vpop.f32.mrf.mxu2 }
 0x6c3   : > { %v13303_v27 = vadd.f32 %v3010_v35, %v13163_v52  ;;  %9577 = vmatmul.msk.f32.gmra.mxu3 %vm2207_vm4, %v9561_v57  ;;  %v3228_v35 = vpop.f32.mrf.mxu0 }
 0x6c6   : > { %v3163_v44 = vpop.f32.mrf.mxu3 }
 0x6c7   : > { %3447 = vmatmul.f32.gmra.mxu2 %v9550_v25  ;;  %v3220_v18 = vadd.f32 %v3219_v12, %v3163_v44  ;;  %v9563_v12 = vld [vmem:[%s17217_s4 + $0x3f8] sm:$0xff]  ;;  %v9556_v25 = vld [vmem:[%s17217_s4 + $0x3c0] sm:$0xff] }
 0x6c9   : > { %9534 = vmatmul.msk.f32.gmra.mxu1 %vm2364_vm7, %v3220_v18 }
 0x6ca   : > { %v3013_v61 = vpop.f32.mrf.mxu2 }
 0x6cb   : > { %v13314_v52 = vadd.f32 %v3013_v61, %v13171_v39  ;;  %9578 = vmatmul.msk.f32.gmra.mxu3 %vm2207_vm4, %v9563_v12  ;;  %v3231_v57 = vpop.f32.mrf.mxu0 }
 0x6ce   : > { %v3166_v50 = vpop.f32.mrf.mxu3 }
 0x6cf   : > { %3450 = vmatmul.f32.gmra.mxu2 %v9552_v34  ;;  %v3223_v11 = vadd.f32 %v3222_v14, %v3166_v50  ;;  %v9565_v14 = vld [vmem:[%s17217_s4 + $0x408] sm:$0xf]  ;;  %v9558_v34 = vld [vmem:[%s17217_s4 + $0x3d0] sm:$0xff] }
 0x6d1   : > { %9535 = vmatmul.msk.f32.gmra.mxu1 %vm2364_vm7, %v3223_v11 }
 0x6d2   : > { %v3016_v62 = vpop.f32.mrf.mxu2 }
 0x6d3   : > { %v13325_v39 = vadd.f32 %v3016_v62, %v13179_v1  ;;  %9579 = vmatmul.msk.f32.gmra.mxu3 %vm2207_vm4, %v9565_v14  ;;  %v9560_v62 = vld [vmem:[%s17217_s4 + $0x3e0] sm:$0xff] }
 0x6d4   : > { %v10316_v14 = vld [vmem:[%s17217_s4] sm:$0xff] }
 0x6d6   : > { %v3169_v45 = vpop.f32.mrf.mxu3 }
 0x6d7   : > { %3453 = vmatmul.f32.gmra.mxu2 %v9554_v31  ;;  %v3226_v10 = vadd.f32 %v3225_v32, %v3169_v45  ;;  %v3234_v31 = vpop.f32.mrf.mxu0 }
 0x6d9   : > { %9536 = vmatmul.msk.f32.gmra.mxu1 %vm2364_vm7, %v3226_v10 }
 0x6da   : > { %v3019_v3 = vpop.f32.mrf.mxu2 }
 0x6db   : > { %v13336_v1 = vadd.f32 %v3019_v3, %v13187_v36  ;;  %v9638_v36 = vld [vmem:[%s17218_s5 + $0x30] sm:$0x3f] }
 0x6dc   : > { %9639 = vmatpush.msk.msra.mxu2 %vm2404_vm6, %v9638_v36 }
 0x6de   : > { %v3172_v53 = vpop.f32.mrf.mxu3 }
 0x6df   : > { %3456 = vmatmul.f32.gmra.mxu2 %v9556_v25  ;;  %v3229_v44 = vadd.f32 %v3228_v35, %v3172_v53 }
 0x6e1   : > { %9537 = vmatmul.msk.f32.gmra.mxu1 %vm2364_vm7, %v3229_v44 }
 0x6e2   : > { %v3022_v18 = vpop.f32.mrf.mxu2 }
 0x6e3   : > { %v13347_v61 = vadd.f32 %v3022_v18, %v13196_v55  ;;  %v10317_v18 = vld [vmem:[%s17217_s4 + $0x10] sm:$0xff] }
 0x6e6   : > { %v3175_v50 = vpop.f32.mrf.mxu3 }
 0x6e7   : > { %3459 = vmatmul.f32.gmra.mxu2 %v9558_v34  ;;  %v3232_v32 = vadd.f32 %v3231_v57, %v3175_v50  ;;  %v10319_v57 = vld [vmem:[%s17217_s4 + $0x20] sm:$0xff]  ;;  %v10320_v50 = vld [vmem:[%s17217_s4 + $0x18] sm:$0xff] }
 0x6e9   : > { %9538 = vmatmul.msk.f32.gmra.mxu1 %vm2364_vm7, %v3232_v32 }
 0x6ea   : > { %v3025_v11 = vpop.f32.mrf.mxu2 }
 0x6eb   : > { %v13358_v55 = vadd.f32 %v3025_v11, %v13205_v23  ;;  %v9562_v23 = vld [vmem:[%s17217_s4 + $0x3f0] sm:$0xff] }
 0x6ee   : > { %v3178_v12 = vpop.f32.mrf.mxu3 }
 0x6ef   : > { %3462 = vmatmul.f32.gmra.mxu2 %v9560_v62  ;;  %v3235_v45 = vadd.f32 %v3234_v31, %v3178_v12  ;;  %v10321_v31 = vld [vmem:[%s17217_s4 + $0x30] sm:$0xff]  ;;  %v10322_v12 = vld [vmem:[%s17217_s4 + $0x28] sm:$0xff] }
 0x6f1   : > { %9539 = vmatmul.msk.f32.gmra.mxu1 %vm2364_vm7, %v3235_v45 }
 0x6f2   : > { %v3028_v10 = vpop.f32.mrf.mxu2 }
 0x6f3   : > { %v13365_v3 = vadd.f32 %v3028_v10, %v13218_v49  ;;  %v9564_v49 = vld [vmem:[%s17217_s4 + $0x400] sm:$0xf] }
 0x6f6   : > { %v3489_v36 = vpop.f32.mrf.mxu3 }
 0x6f7   : > { %3465 = vmatmul.f32.gmra.mxu2 %v9562_v23  ;;  %v10323_v23 = vld [vmem:[%s17217_s4 + $0x40] sm:$0xff] }
 0x6f9   : > { %3732 = vmatmul.f32.vlgmr.msra.gmra.mxu1 %v10316_v14  ;;  %v10324_v14 = vld [vmem:[%s17217_s4 + $0x38] sm:$0xff] }
 0x6fa   : > { %v3031_v35 = vpop.f32.mrf.mxu2 }
 0x6fb   : > { %v13372_v25 = vadd.f32 %v3031_v35, %v13231_v24  ;;  %v10318_v24 = vld [vmem:[%s17217_s4 + $0x8] sm:$0xff] }
 0x6fe   : > { %v3492_v11 = vpop.f32.mrf.mxu3 }
 0x6ff   : > { %3468 = vmatmul.f32.gmra.mxu2 %v9564_v49 }
 0x701   : > { %3735 = vmatmul.f32.gmra.mxu1 %v10317_v18  ;;  %v10325_v18 = vld [vmem:[%s17217_s4 + $0x50] sm:$0xff] }
 0x702   : > { %v3034_v53 = vpop.f32.mrf.mxu2 }
 0x703   : > { %v13381_v44 = vadd.f32 %v3034_v53, %v13245_v63 }
 0x706   : > { %v3495_v35 = vpop.f32.mrf.mxu3 }
 0x707   : > { %9596 = vmatmul.msk.f32.vlgmr.msrb.gmra.mxu2 %vm2207_vm4, %v10318_v24 }
 0x708   : > { %4391 = vmatpush.msrb.mxu2 %v12472_v21 }
 0x709   : > { %3738 = vmatmul.f32.gmra.mxu1 %v10319_v57 }
 0x70a   : > { %4392 = vmatpush.msrb.mxu2 %v12492_v54  ;;  %v3037_v34 = vpop.f32.mrf.mxu2 }
 0x70b   : > { %v13393_v63 = vadd.f32 %v3037_v34, %v13257_v22  ;;  %v10326_v34 = vld [vmem:[%s17217_s4 + $0x48] sm:$0xff] }
 0x70c   : > { %4393 = vmatpush.msrb.mxu2 %v12505_v42 }
 0x70e   : > { %4394 = vmatpush.msrb.mxu2 %v12519_v4  ;;  %v13405_v32 = vpop.f32.mrf.mxu1  ;;  %v3498_v24 = vpop.f32.mrf.mxu3 }
 0x70f   : > { %9597 = vmatmul.msk.f32.gmra.mxu2 %vm2207_vm4, %v10320_v50 }
 0x710   : > { %4395 = vmatpush.msrb.mxu2 %v12527_v48 }
 0x711   : > { %3741 = vmatmul.f32.gmra.mxu1 %v10321_v31  ;;  %v10328_v31 = vld [vmem:[%s17217_s4 + $0x58] sm:$0xff] }
 0x712   : > { %4396 = vmatpush.msrb.mxu2 %v12537_v9  ;;  %v3040_v22 = vpop.f32.mrf.mxu2 }
 0x713   : > { %v13409_v62 = vadd.f32 %v3040_v22, %v13269_v40  ;;  %v10327_v22 = vld [vmem:[%s17217_s4 + $0x60] sm:$0xff] }
 0x714   : > { %4397 = vmatpush.msrb.mxu2 %v12546_v41 }
 0x716   : > { %4398 = vmatpush.msrb.mxu2 %v12556_v37  ;;  %v13421_v45 = vpop.f32.mrf.mxu1 }
 0x717   : > { %9598 = vmatmul.msk.f32.gmra.mxu2 %vm2207_vm4, %v10322_v12 }
 0x718   : > { %4399 = vmatpush.msrb.mxu2 %v12563_v43 }
 0x719   : > { %3744 = vmatmul.f32.gmra.mxu1 %v10323_v23 }
 0x71a   : > { %4400 = vmatpush.msrb.mxu2 %v12572_v0  ;;  %v3043_v40 = vpop.f32.mrf.mxu2 }
 0x71b   : > { %v13425_v10 = vadd.f32 %v3043_v40, %v13281_v59  ;;  %v3501_v40 = vpop.f32.mrf.mxu3 }
 0x71c   : > { %4401 = vmatpush.msrb.mxu2 %v12581_v2 }
 0x71d   : > { %17463 = vst [vmem:[#allocation32_spill] sm:$0xff] %v13425_v10 }
 0x71e   : > { %4402 = vmatpush.msrb.mxu2 %v12591_v5  ;;  %v13437_v59 = vpop.f32.mrf.mxu1 }
 0x71f   : > { %9599 = vmatmul.msk.f32.gmra.mxu2 %vm2207_vm4, %v10324_v14 }
 0x720   : > { %4403 = vmatpush.msrb.mxu2 %v12598_v7 }
 0x721   : > { %3747 = vmatmul.f32.gmra.mxu1 %v10325_v18 }
 0x722   : > { %4404 = vmatpush.msrb.mxu2 %v12607_v47  ;;  %v3433_v49 = vpop.f32.mrf.mxu2 }
 0x723   : > { %v3490_v53 = vadd.f32 %v3489_v36, %v3433_v49  ;;  %v10330_v49 = vld [vmem:[%s17217_s4 + $0x68] sm:$0xff] }
 0x724   : > { %4405 = vmatpush.msrb.mxu2 %v12616_v17 }
 0x725   : > { %9582 = vmatmul.msk.f32.vlgmr.msrb.gmra.mxu0 %vm2364_vm7, %v3490_v53 }
 0x726   : > { %9653 = vmatpush.msk.msrb.mxu0 %vm2247_vm3, %v13097_v13  ;;  %4406 = vmatpush.msrb.mxu2 %v12626_v30  ;;  %v13453_v36 = vpop.f32.mrf.mxu1 }
 0x727   : > { %9600 = vmatmul.msk.f32.gmra.mxu2 %vm2207_vm4, %v10326_v34  ;;  %v3504_v34 = vpop.f32.mrf.mxu3 }
 0x728   : > { %4237 = vmatpush.msrb.mxu0 %v13104_v28 }
 0x729   : > { %3750 = vmatmul.f32.gmra.mxu1 %v10327_v22 }
 0x72a   : > { %v3436_v57 = vpop.f32.mrf.mxu2 }
 0x72b   : > { %v3493_v50 = vadd.f32 %v3492_v11, %v3436_v57  ;;  %v10329_v11 = vld [vmem:[%s17217_s4 + $0x70] sm:$0xff] }
 0x72d   : > { %9583 = vmatmul.msk.f32.gmra.mxu0 %vm2364_vm7, %v3493_v50  ;;  %v10332_v50 = vld [vmem:[%s17217_s4 + $0x78] sm:$0xff] }
 0x72e   : > { %v13463_v12 = vpop.f32.mrf.mxu1 }
 0x72f   : > { %9601 = vmatmul.msk.f32.gmra.mxu2 %vm2207_vm4, %v10328_v31 }
 0x731   : > { %3753 = vmatmul.f32.gmra.mxu1 %v10329_v11  ;;  %v3507_v11 = vpop.f32.mrf.mxu3 }
 0x732   : > { %v3439_v23 = vpop.f32.mrf.mxu2 }
 0x733   : > { %v3496_v14 = vadd.f32 %v3495_v35, %v3439_v23  ;;  %v10331_v35 = vld [vmem:[%s17217_s4 + $0x80] sm:$0xff] }
 0x735   : > { %9584 = vmatmul.msk.f32.gmra.mxu0 %vm2364_vm7, %v3496_v14  ;;  %v10333_v14 = vld [vmem:[%s17217_s4 + $0x90] sm:$0xff] }
 0x736   : > { %v13473_v53 = vpop.f32.mrf.mxu1 }
 0x737   : > { %9602 = vmatmul.msk.f32.gmra.mxu2 %vm2207_vm4, %v10330_v49  ;;  %v10334_v49 = vld [vmem:[%s17217_s4 + $0x88] sm:$0xff] }
 0x739   : > { %3756 = vmatmul.f32.gmra.mxu1 %v10331_v35  ;;  %v10335_v35 = vld [vmem:[%s17217_s4 + $0xa0] sm:$0xff] }
 0x73a   : > { %v3442_v18 = vpop.f32.mrf.mxu2 }
 0x73b   : > { %v3499_v57 = vadd.f32 %v3498_v24, %v3442_v18  ;;  %v9667_v24 = vld [vmem:[%s17218_s5 + $0x38] sm:$0x3f] }
 0x73c   : > { %9668 = vmatpush.msk.msra.mxu1 %vm2404_vm6, %v9667_v24 }
 0x73d   : > { %9585 = vmatmul.msk.f32.gmra.mxu0 %vm2364_vm7, %v3499_v57 }
 0x73e   : > { %v13483_v22 = vpop.f32.mrf.mxu1 }
 0x73f   : > { %9603 = vmatmul.msk.f32.gmra.mxu2 %vm2207_vm4, %v10332_v50  ;;  %v3510_v50 = vpop.f32.mrf.mxu3 }
 0x741   : > { %3759 = vmatmul.f32.gmra.mxu1 %v10333_v14 }
 0x742   : > { %v3445_v31 = vpop.f32.mrf.mxu2 }
 0x743   : > { %v3502_v23 = vadd.f32 %v3501_v40, %v3445_v31  ;;  %v10336_v31 = vld [vmem:[%s17217_s4 + $0x98] sm:$0xff] }
 0x745   : > { %9586 = vmatmul.msk.f32.gmra.mxu0 %vm2364_vm7, %v3502_v23 }
 0x746   : > { %v13497_v18 = vpop.f32.mrf.mxu1 }
 0x747   : > { %9604 = vmatmul.msk.f32.gmra.mxu2 %vm2207_vm4, %v10334_v49  ;;  %v10338_v49 = vld [vmem:[%s17217_s4 + $0xa8] sm:$0xff] }
 0x749   : > { %3762 = vmatmul.f32.gmra.mxu1 %v10335_v35 }
 0x74a   : > { %v3448_v57 = vpop.f32.mrf.mxu2 }
 0x74b   : > { %v3505_v40 = vadd.f32 %v3504_v34, %v3448_v57  ;;  %v10337_v34 = vld [vmem:[%s17217_s4 + $0xb0] sm:$0xff] }
 0x74d   : > { %9587 = vmatmul.msk.f32.gmra.mxu0 %vm2364_vm7, %v3505_v40  ;;  %v3513_v40 = vpop.f32.mrf.mxu3 }
 0x74e   : > { %v13507_v24 = vpop.f32.mrf.mxu1 }
 0x74f   : > { %9605 = vmatmul.msk.f32.gmra.mxu2 %vm2207_vm4, %v10336_v31 }
 0x751   : > { %3765 = vmatmul.f32.gmra.mxu1 %v10337_v34 }
 0x752   : > { %v3451_v23 = vpop.f32.mrf.mxu2 }
 0x753   : > { %v3508_v14 = vadd.f32 %v3507_v11, %v3451_v23  ;;  %v10339_v11 = vld [vmem:[%s17217_s4 + $0xc0] sm:$0xf]  ;;  %v10340_v23 = vld [vmem:[%s17217_s4 + $0xb8] sm:$0xff] }
 0x755   : > { %9588 = vmatmul.msk.f32.gmra.mxu0 %vm2364_vm7, %v3508_v14 }
 0x756   : > { %v13517_v57 = vpop.f32.mrf.mxu1 }
 0x757   : > { %9606 = vmatmul.msk.f32.gmra.mxu2 %vm2207_vm4, %v10338_v49  ;;  %v3516_v49 = vpop.f32.mrf.mxu3 }
 0x759   : > { %3768 = vmatmul.f32.gmra.mxu1 %v10339_v11 }
 0x75a   : > { %v3454_v35 = vpop.f32.mrf.mxu2 }
 0x75b   : > { %v3511_v31 = vadd.f32 %v3510_v50, %v3454_v35  ;;  %v10341_v50 = vld [vmem:[%s17217_s4 + $0xd8] sm:$0xff]  ;;  %v10342_v35 = vld [vmem:[%s17217_s4 + $0xc8] sm:$0xf] }
 0x75d   : > { %9589 = vmatmul.msk.f32.gmra.mxu0 %vm2364_vm7, %v3511_v31 }
 0x75e   : > { %v13527_v14 = vpop.f32.mrf.mxu1 }
 0x75f   : > { %9607 = vmatmul.msk.f32.gmra.mxu2 %vm2207_vm4, %v10340_v23  ;;  %v10344_v23 = vld [vmem:[%s17217_s4 + $0xf8] sm:$0xff] }
 0x761   : > { %9625 = vmatmul.msk.f32.vlgmr.msrb.gmra.mxu1 %vm2207_vm4, %v10341_v50 }
 0x762   : > { %v3457_v34 = vpop.f32.mrf.mxu2  ;;  %4616 = vmatpush.msrb.mxu1 %v12472_v21  ;;  %v10343_v21 = vld [vmem:[%s17217_s4 + $0xe8] sm:$0xff] }
 0x763   : > { %v3514_v10 = vadd.f32 %v3513_v40, %v3457_v34  ;;  %v10345_v34 = vld [vmem:[%s17217_s4 + $0x108] sm:$0xff] }
 0x764   : > { %4617 = vmatpush.msrb.mxu1 %v12492_v54  ;;  %v3519_v54 = vpop.f32.mrf.mxu3 }
 0x765   : > { %9590 = vmatmul.msk.f32.gmra.mxu0 %vm2364_vm7, %v3514_v10 }
 0x766   : > { %4618 = vmatpush.msrb.mxu1 %v12505_v42  ;;  %v13541_v40 = vpop.f32.mrf.mxu1 }
 0x767   : > { %9608 = vmatmul.msk.f32.gmra.mxu2 %vm2207_vm4, %v10342_v35 }
 0x768   : > { %4619 = vmatpush.msrb.mxu1 %v12519_v4 }
 0x769   : > { %9626 = vmatmul.msk.f32.gmra.mxu1 %vm2207_vm4, %v10343_v21  ;;  %v10349_v21 = vld [vmem:[%s17217_s4 + $0x138] sm:$0xff] }
 0x76a   : > { %v3460_v31 = vpop.f32.mrf.mxu2  ;;  %4620 = vmatpush.msrb.mxu1 %v12527_v48 }
 0x76b   : > { %v3517_v11 = vadd.f32 %v3516_v49, %v3460_v31  ;;  %v10346_v49 = vld [vmem:[%s17217_s4 + $0x118] sm:$0xff] }
 0x76c   : > { %4621 = vmatpush.msrb.mxu1 %v12537_v9  ;;  %v3522_v48 = vpop.f32.mrf.mxu3 }
 0x76d   : > { %9591 = vmatmul.msk.f32.gmra.mxu0 %vm2364_vm7, %v3517_v11 }
 0x76e   : > { %4622 = vmatpush.msrb.mxu1 %v12546_v41  ;;  %v13552_v42 = vpop.f32.mrf.mxu1 }
 0x770   : > { %4623 = vmatpush.msrb.mxu1 %v12556_v37 }
 0x771   : > { %9627 = vmatmul.msk.f32.gmra.mxu1 %vm2207_vm4, %v10344_v23 }
 0x772   : > { %v3463_v4 = vpop.f32.mrf.mxu2  ;;  %4624 = vmatpush.msrb.mxu1 %v12563_v43 }
 0x773   : > { %v3520_v10 = vadd.f32 %v3519_v54, %v3463_v4  ;;  %v10350_v54 = vld [vmem:[%s17217_s4 + $0xe0] sm:$0xff] }
 0x774   : > { %4625 = vmatpush.msrb.mxu1 %v12572_v0  ;;  %v3525_v43 = vpop.f32.mrf.mxu3 }
 0x775   : > { %9592 = vmatmul.msk.f32.gmra.mxu0 %vm2364_vm7, %v3520_v10 }
 0x776   : > { %4626 = vmatpush.msrb.mxu1 %v12581_v2  ;;  %v3733_v9 = vpop.f32.mrf.mxu1 }
 0x778   : > { %4627 = vmatpush.msrb.mxu1 %v12591_v5 }
 0x779   : > { %9628 = vmatmul.msk.f32.gmra.mxu1 %vm2207_vm4, %v10345_v34 }
 0x77a   : > { %v3466_v41 = vpop.f32.mrf.mxu2  ;;  %4628 = vmatpush.msrb.mxu1 %v12598_v7 }
 0x77b   : > { %v3523_v37 = vadd.f32 %v3522_v48, %v3466_v41  ;;  %v10351_v48 = vld [vmem:[%s17217_s4 + $0x148] sm:$0xff] }
 0x77c   : > { %4629 = vmatpush.msrb.mxu1 %v12607_v47  ;;  %v10347_v47 = vld [vmem:[%s17217_s4 + $0x128] sm:$0xff] }
 0x77d   : > { %9593 = vmatmul.msk.f32.gmra.mxu0 %vm2364_vm7, %v3523_v37 }
 0x77e   : > { %4630 = vmatpush.msrb.mxu1 %v12616_v17  ;;  %v3736_v0 = vpop.f32.mrf.mxu1  ;;  %v10348_v17 = vld [vmem:[%s17217_s4 + $0xd0] sm:$0xff] }
 0x780   : > { %4631 = vmatpush.msrb.mxu1 %v12626_v30 }
 0x781   : > { %9629 = vmatmul.msk.f32.gmra.mxu1 %vm2207_vm4, %v10346_v49 }
 0x782   : > { %v3469_v2 = vpop.f32.mrf.mxu2 }
 0x783   : > { %v3526_v5 = vadd.f32 %v3525_v43, %v3469_v2  ;;  %v10354_v2 = vld [vmem:[%s17217_s4 + $0x100] sm:$0xff] }
 0x785   : > { %9594 = vmatmul.msk.f32.gmra.mxu0 %vm2364_vm7, %v3526_v5 }
 0x786   : > { %v3739_v7 = vpop.f32.mrf.mxu1 }
 0x789   : > { %9630 = vmatmul.msk.f32.gmra.mxu1 %vm2207_vm4, %v10347_v47  ;;  %v10356_v47 = vld [vmem:[%s17217_s4 + $0x110] sm:$0xff] }
 0x78a   : > { %v3789_v50 = vpop.f32.mrf.mxu2 }
 0x78b   : > { %v3790_v35 = vadd.f32 %v3789_v50, %v3733_v9  ;;  %v10352_v9 = vld [vmem:[%s17217_s4 + $0xf0] sm:$0xff] }
 0x78d   : > { %9611 = vmatmul.msk.f32.vlgmr.msrb.gmra.mxu3 %vm2364_vm7, %v3790_v35  ;;  %3957 = vmatmul.f32.vlgmr.msra.gmra.mxu0 %v10348_v17  ;;  %v10355_v35 = vld [vmem:[%s17217_s4 + $0x168] sm:$0xff] }
 0x78e   : > { %9682 = vmatpush.msk.msrb.mxu3 %vm2247_vm3, %v13097_v13  ;;  %v3742_v30 = vpop.f32.mrf.mxu1 }
 0x790   : > { %4462 = vmatpush.msrb.mxu3 %v13104_v28 }
 0x791   : > { %9631 = vmatmul.msk.f32.gmra.mxu1 %vm2207_vm4, %v10349_v21  ;;  %v10358_v21 = vld [vmem:[%s17217_s4 + $0x120] sm:$0xff] }
 0x792   : > { %v3792_v31 = vpop.f32.mrf.mxu2 }
 0x793   : > { %v3793_v11 = vadd.f32 %v3792_v31, %v3736_v0  ;;  %v10353_v0 = vld [vmem:[%s17217_s4 + $0x158] sm:$0xff] }
 0x795   : > { %9612 = vmatmul.msk.f32.gmra.mxu3 %vm2364_vm7, %v3793_v11  ;;  %3960 = vmatmul.f32.gmra.mxu0 %v10350_v54  ;;  %v10357_v11 = vld [vmem:[%s17217_s4 + $0x178] sm:$0xff] }
 0x796   : > { %v3745_v4 = vpop.f32.mrf.mxu1 }
 0x799   : > { %9632 = vmatmul.msk.f32.gmra.mxu1 %vm2207_vm4, %v10351_v48  ;;  %v10359_v48 = vld [vmem:[%s17217_s4 + $0x188] sm:$0xff] }
 0x79a   : > { %v3795_v10 = vpop.f32.mrf.mxu2 }
 0x79b   : > { %v3796_v23 = vadd.f32 %v3795_v10, %v3739_v7 }
 0x79d   : > { %9613 = vmatmul.msk.f32.gmra.mxu3 %vm2364_vm7, %v3796_v23  ;;  %3963 = vmatmul.f32.gmra.mxu0 %v10352_v9  ;;  %v10360_v9 = vld [vmem:[%s17217_s4 + $0x130] sm:$0xff] }
 0x79e   : > { %v3748_v41 = vpop.f32.mrf.mxu1 }
 0x7a1   : > { %9633 = vmatmul.msk.f32.gmra.mxu1 %vm2207_vm4, %v10353_v0 }
 0x7a2   : > { %v13605_v37 = vpop.f32.mrf.mxu0  ;;  %v3798_v34 = vpop.f32.mrf.mxu2 }
 0x7a3   : > { %v3799_v43 = vadd.f32 %v3798_v34, %v3742_v30 }
 0x7a5   : > { %9614 = vmatmul.msk.f32.gmra.mxu3 %vm2364_vm7, %v3799_v43  ;;  %3966 = vmatmul.f32.gmra.mxu0 %v10354_v2  ;;  %v10361_v2 = vld [vmem:[%s17217_s4 + $0x198] sm:$0xf] }
 0x7a6   : > { %v3751_v50 = vpop.f32.mrf.mxu1 }
 0x7a9   : > { %9634 = vmatmul.msk.f32.gmra.mxu1 %vm2207_vm4, %v10355_v35 }
 0x7aa   : > { %v13615_v5 = vpop.f32.mrf.mxu0  ;;  %v3801_v49 = vpop.f32.mrf.mxu2 }
 0x7ab   : > { %v3802_v7 = vadd.f32 %v3801_v49, %v3745_v4  ;;  %v10362_v49 = vld [vmem:[%s17217_s4 + $0x140] sm:$0xff] }
 0x7ad   : > { %9615 = vmatmul.msk.f32.gmra.mxu3 %vm2364_vm7, %v3802_v7  ;;  %3969 = vmatmul.f32.gmra.mxu0 %v10356_v47 }
 0x7ae   : > { %v3754_v54 = vpop.f32.mrf.mxu1 }
 0x7b1   : > { %9635 = vmatmul.msk.f32.gmra.mxu1 %vm2207_vm4, %v10357_v11 }
 0x7b2   : > { %v13625_v17 = vpop.f32.mrf.mxu0  ;;  %v3804_v30 = vpop.f32.mrf.mxu2 }
 0x7b3   : > { %v3805_v31 = vadd.f32 %v3804_v30, %v3748_v41  ;;  %v10363_v30 = vld [vmem:[%s17217_s4 + $0x150] sm:$0xff] }
 0x7b5   : > { %9616 = vmatmul.msk.f32.gmra.mxu3 %vm2364_vm7, %v3805_v31  ;;  %3972 = vmatmul.f32.gmra.mxu0 %v10358_v21 }
 0x7b6   : > { %v3757_v41 = vpop.f32.mrf.mxu1 }
 0x7b9   : > { %9636 = vmatmul.msk.f32.gmra.mxu1 %vm2207_vm4, %v10359_v48 }
 0x7ba   : > { %v13635_v4 = vpop.f32.mrf.mxu0  ;;  %v3807_v10 = vpop.f32.mrf.mxu2 }
 0x7bb   : > { %v3808_v23 = vadd.f32 %v3807_v10, %v3751_v50 }
 0x7bd   : > { %9617 = vmatmul.msk.f32.gmra.mxu3 %vm2364_vm7, %v3808_v23  ;;  %3975 = vmatmul.f32.gmra.mxu0 %v10360_v9  ;;  %v10364_v23 = vld [vmem:[%s17217_s4 + $0x160] sm:$0xff] }
 0x7be   : > { %v3760_v7 = vpop.f32.mrf.mxu1 }
 0x7c1   : > { %9637 = vmatmul.msk.f32.gmra.mxu1 %vm2207_vm4, %v10361_v2 }
 0x7c2   : > { %v13645_v34 = vpop.f32.mrf.mxu0  ;;  %v3810_v43 = vpop.f32.mrf.mxu2 }
 0x7c3   : > { %v3811_v0 = vadd.f32 %v3810_v43, %v3754_v54  ;;  %v9696_v54 = vld [vmem:[%s17218_s5 + $0x40] sm:$0x3f]  ;;  %v10365_v43 = vld [vmem:[%s17217_s4 + $0x170] sm:$0xff] }
 0x7c4   : > { %9697 = vmatpush.msk.msra.mxu0 %vm2404_vm6, %v9696_v54  ;;  %v10367_v54 = vld [vmem:[%s17217_s4 + $0x190] sm:$0xf] }
 0x7c5   : > { %9618 = vmatmul.msk.f32.gmra.mxu3 %vm2364_vm7, %v3811_v0  ;;  %3978 = vmatmul.f32.gmra.mxu0 %v10362_v49 }
 0x7c6   : > { %v3763_v10 = vpop.f32.mrf.mxu1 }
 0x7ca   : > { %v13655_v50 = vpop.f32.mrf.mxu0  ;;  %v3813_v35 = vpop.f32.mrf.mxu2 }
 0x7cb   : > { %v3814_v47 = vadd.f32 %v3813_v35, %v3757_v41  ;;  %v10366_v35 = vld [vmem:[%s17217_s4 + $0x180] sm:$0xff] }
 0x7cd   : > { %9619 = vmatmul.msk.f32.gmra.mxu3 %vm2364_vm7, %v3814_v47  ;;  %3981 = vmatmul.f32.gmra.mxu0 %v10363_v30 }
 0x7ce   : > { %v3766_v0 = vpop.f32.mrf.mxu1 }
 0x7d2   : > { %v13661_v31 = vpop.f32.mrf.mxu0  ;;  %v3816_v11 = vpop.f32.mrf.mxu2 }
 0x7d3   : > { %v3817_v21 = vadd.f32 %v3816_v11, %v3760_v7 }
 0x7d5   : > { %9620 = vmatmul.msk.f32.gmra.mxu3 %vm2364_vm7, %v3817_v21  ;;  %3984 = vmatmul.f32.gmra.mxu0 %v10364_v23  ;;  %v17235_v23 = vrot.slane %v13078_v56, 4 }
 0x7d6   : > { %v3769_v47 = vpop.f32.mrf.mxu1 }
 0x7da   : > { %v13671_v48 = vpop.f32.mrf.mxu0  ;;  %v3819_v9 = vpop.f32.mrf.mxu2 }
 0x7db   : > { %v3820_v41 = vadd.f32 %v3819_v9, %v3763_v10 }
 0x7dd   : > { %9621 = vmatmul.msk.f32.gmra.mxu3 %vm2364_vm7, %v3820_v41  ;;  %3987 = vmatmul.f32.gmra.mxu0 %v10365_v43  ;;  %v4871_v41 = vrot.slane %v13082_v46, 4  ;;  %v10368_v43 = vld [vmem:[%s17217_s4 + $0x1a0] sm:$0xff]  ;;  %v4851_v46 = vrot.slane %v12401_v38, 4 }
 0x7de   : > { %v4014_v10 = vpop.f32.mrf.mxu1 }
 0x7e2   : > { %v13677_v2 = vpop.f32.mrf.mxu0  ;;  %v3822_v49 = vpop.f32.mrf.mxu2 }
 0x7e3   : > { %v3823_v7 = vadd.f32 %v3822_v49, %v3766_v0  ;;  %v10369_v0 = vld [vmem:[%s17217_s4 + $0x1a8] sm:$0xff]  ;;  %v13703_v49 = vsel %vm2247_vm3, %v4871_v41, %v17235_v23  ;;  %v10370_v23 = vld [vmem:[%s17217_s4 + $0x1b0] sm:$0xff] }
 0x7e5   : > { %9622 = vmatmul.msk.f32.gmra.mxu3 %vm2364_vm7, %v3823_v7  ;;  %3990 = vmatmul.f32.gmra.mxu0 %v10366_v35  ;;  %v4869_v7 = vrot.slane %v12415_v60, 4  ;;  %v4855_v60 = vrot.slane %v12386_v19, 4 }
 0x7e7   : > { %v13708_v35 = vsel %vm2247_vm3, %v4869_v7, %v4871_v41  ;;  %v4863_v41 = vrot.slane %v12345_v20, 4  ;;  %v4859_v20 = vrot.slane %v12365_v29, 4  ;;  %v10372_v29 = vld [vmem:[%s17217_s4 + $0x1c0] sm:$0xff] }
 0x7ea   : > { %v13683_v30 = vpop.f32.mrf.mxu0  ;;  %v3825_v11 = vpop.f32.mrf.mxu2 }
 0x7eb   : > { %v3826_v21 = vadd.f32 %v3825_v11, %v3769_v47  ;;  %v4867_v47 = vrot.slane %v12420_v8, 4  ;;  %v10371_v8 = vld [vmem:[%s17217_s4 + $0x1b8] sm:$0xff] }
 0x7ed   : > { %9623 = vmatmul.msk.f32.gmra.mxu3 %vm2364_vm7, %v3826_v21  ;;  %3993 = vmatmul.f32.gmra.mxu0 %v10367_v54  ;;  %v13713_v11 = vsel %vm2247_vm3, %v4867_v47, %v4869_v7  ;;  %v4865_v21 = vrot.slane %v12339_v51, 4  ;;  %v4861_v51 = vrot.slane %v12352_v16, 4 }
 0x7ef   : > { %v13728_v7 = vsel %vm2247_vm3, %v4863_v41, %v4865_v21 }
 0x7f2   : > { %v13690_v9 = vpop.f32.mrf.mxu0 }
 0x7f5   : > { %4182 = vmatmul.f32.vlgmr.msra.gmra.mxu3 %v10368_v43  ;;  %9654 = vmatmul.msk.f32.vlgmr.msrb.gmra.mxu0 %vm2207_vm4, %v10369_v0  ;;  %v4017_v43 = vpop.f32.mrf.mxu1  ;;  %v13720_v0 = vsel %vm2247_vm3, %v4865_v21, %v4867_v47  ;;  %v13737_v47 = vsel %vm2247_vm3, %v4861_v51, %v4863_v41  ;;  %v4857_v21 = vrot.slane %v12375_v15, 4  ;;  %v4853_v15 = vrot.slane %v12393_v33, 4 }
 0x7f6   : > { %4896 = vmatpush.msrb.mxu0 %v13703_v49 }
 0x7f7   : > { %v13766_v19 = vsel %vm2247_vm3, %v4853_v15, %v4855_v60 }
 0x7f8   : > { %4897 = vmatpush.msrb.mxu0 %v13708_v35 }
 0x7fa   : > { %4898 = vmatpush.msrb.mxu0 %v13713_v11  ;;  %v13717_v54 = vpop.f32.mrf.mxu0 }
 0x7fc   : > { %4899 = vmatpush.msrb.mxu0 %v13720_v0 }
 0x7fd   : > { %4185 = vmatmul.f32.gmra.mxu3 %v10370_v23  ;;  %9655 = vmatmul.msk.f32.gmra.mxu0 %vm2207_vm4, %v10371_v8  ;;  %v13742_v23 = vsel %vm2247_vm3, %v4859_v20, %v4861_v51  ;;  %v13749_v8 = vsel %vm2247_vm3, %v4857_v21, %v4859_v20  ;;  %v4020_v41 = vpop.f32.mrf.mxu1  ;;  %v13757_v51 = vsel %vm2247_vm3, %v4855_v60, %v4857_v21  ;;  %v10373_v20 = vld [vmem:[%s17217_s4 + $0x1c8] sm:$0xff]  ;;  %v4849_v21 = vrot.slane %v12413_v58, 4 }
 0x7fe   : > { %4900 = vmatpush.msrb.mxu0 %v13728_v7  ;;  %v3337_v60 = vadd.f32 %v13405_v32, %v13292_v6  ;;  %v17466_v32 = vld [vmem:[#allocation33_spill] sm:$0xff] }
 0x800   : > { %4901 = vmatpush.msrb.mxu0 %v13737_v47  ;;  %v3628_v6 = vadd.f32 %v13605_v37, %v3337_v60 }
 0x802   : > { %4902 = vmatpush.msrb.mxu0 %v13742_v23  ;;  %v13746_v16 = vpop.f32.mrf.mxu0 }
 0x803   : > { %17464 = vst [vmem:[#allocation8_spill] sm:$0xff] %v13746_v16  ;;  %v4847_v16 = vrot.slane %v12425_v26, 4  ;;  %v4843_v26 = vrot.slane %v17466_v32, 4 }
 0x804   : > { %4903 = vmatpush.msrb.mxu0 %v13749_v8 }
 0x805   : > { %4188 = vmatmul.f32.gmra.mxu3 %v10372_v29  ;;  %9656 = vmatmul.msk.f32.gmra.mxu0 %vm2207_vm4, %v10373_v20  ;;  %v13771_v29 = vsel %vm2247_vm3, %v4851_v46, %v4853_v15  ;;  %v13776_v20 = vsel %vm2247_vm3, %v4849_v21, %v4851_v46  ;;  %v10374_v15 = vld [vmem:[%s17217_s4 + $0x1d0] sm:$0xff]  ;;  %v13787_v58 = vsel %vm2247_vm3, %v4847_v16, %v4849_v21  ;;  %v10375_v21 = vld [vmem:[%s17217_s4 + $0x1d8] sm:$0xff] }
 0x806   : > { %4904 = vmatpush.msrb.mxu0 %v13757_v51 }
 0x808   : > { %4905 = vmatpush.msrb.mxu0 %v13766_v19 }
 0x80a   : > { %4906 = vmatpush.msrb.mxu0 %v13771_v29  ;;  %v3958_v33 = vpop.f32.mrf.mxu0 }
 0x80b   : > { %v4015_v56 = vadd.f32 %v4014_v10, %v3958_v33  ;;  %v17465_v33 = vld [vmem:[#allocation23_spill] sm:$0xff]  ;;  %v4023_v10 = vpop.f32.mrf.mxu1 }
 0x80c   : > { %4907 = vmatpush.msrb.mxu0 %v13776_v20  ;;  %v4845_v46 = vrot.slane %v17465_v33, 4 }
 0x80d   : > { %9640 = vmatmul.msk.f32.vlgmr.msra.gmra.mxu2 %vm2364_vm7, %v4015_v56  ;;  %4191 = vmatmul.f32.gmra.mxu3 %v10374_v15 }
 0x80e   : > { %9711 = vmatpush.msk.msra.mxu2 %vm2247_vm3, %v13097_v13  ;;  %4908 = vmatpush.msrb.mxu0 %v13787_v58  ;;  %v13795_v56 = vsel %vm2247_vm3, %v4845_v46, %v4847_v16  ;;  %v13807_v37 = vsel %vm2247_vm3, %v4843_v26, %v4845_v46  ;;  %v17467_v16 = vld [vmem:[#allocation40_spill] sm:$0xff]  ;;  %v10376_v46 = vld [vmem:[%s17217_s4 + $0x1e0] sm:$0xff] }
 0x80f   : > { %9657 = vmatmul.msk.f32.gmra.mxu0 %vm2207_vm4, %v10375_v21  ;;  %v4842_v60 = vrot.slane %v17467_v16, 4 }
 0x810   : > { %4687 = vmatpush.msra.mxu2 %v13104_v28  ;;  %4909 = vmatpush.msrb.mxu0 %v13795_v56  ;;  %v3889_v13 = vpop.f32.mrf.mxu3  ;;  %v3338_v28 = vadd.f32 %v13421_v45, %v13303_v27 }
 0x811   : > { %v13804_v15 = vadd.f32 %v3889_v13, %v3628_v6  ;;  %v13812_v38 = vsel %vm2247_vm3, %v4842_v60, %v4843_v26  ;;  %v10379_v60 = vld [vmem:[%s17217_s4 + $0x1f8] sm:$0xff] }
 0x812   : > { %4910 = vmatpush.msrb.mxu0 %v13807_v37  ;;  %v3961_v32 = vpop.f32.mrf.mxu0  ;;  %v3629_v6 = vadd.f32 %v13615_v5, %v3338_v28  ;;  %v10378_v5 = vld [vmem:[%s17217_s4 + $0x1f0] sm:$0xff] }
 0x813   : > { %v4018_v33 = vadd.f32 %v4017_v43, %v3961_v32  ;;  %v10377_v43 = vld [vmem:[%s17217_s4 + $0x1e8] sm:$0xff]  ;;  %v4026_v21 = vpop.f32.mrf.mxu1 }
 0x814   : > { %4911 = vmatpush.msrb.mxu0 %v13812_v38 }
 0x815   : > { %9641 = vmatmul.msk.f32.gmra.mxu2 %vm2364_vm7, %v4018_v33  ;;  %4194 = vmatmul.f32.gmra.mxu3 %v10376_v46  ;;  %v3339_v33 = vadd.f32 %v13437_v59, %v13314_v52  ;;  %v3340_v46 = vadd.f32 %v13453_v36, %v13325_v39 }
 0x817   : > { %9658 = vmatmul.msk.f32.gmra.mxu0 %vm2207_vm4, %v10377_v43  ;;  %v3630_v16 = vadd.f32 %v13625_v17, %v3339_v33  ;;  %v10380_v17 = vld [vmem:[%s17217_s4 + $0x200] sm:$0xff]  ;;  %v10381_v43 = vld [vmem:[%s17217_s4 + $0x208] sm:$0xff] }
 0x818   : > { %v3892_v26 = vpop.f32.mrf.mxu3 }
 0x819   : > { %v13826_v13 = vadd.f32 %v3892_v26, %v3629_v6  ;;  %v3631_v6 = vadd.f32 %v13635_v4, %v3340_v46  ;;  %v10382_v4 = vld [vmem:[%s17217_s4 + $0x210] sm:$0xff] }
 0x81a   : > { %v3964_v27 = vpop.f32.mrf.mxu0 }
 0x81b   : > { %v4021_v45 = vadd.f32 %v4020_v41, %v3964_v27  ;;  %v4029_v52 = vpop.f32.mrf.mxu1 }
 0x81d   : > { %9642 = vmatmul.msk.f32.gmra.mxu2 %vm2364_vm7, %v4021_v45  ;;  %4197 = vmatmul.f32.gmra.mxu3 %v10378_v5  ;;  %v3341_v45 = vadd.f32 %v13463_v12, %v13336_v1  ;;  %v10383_v5 = vld [vmem:[%s17217_s4 + $0x218] sm:$0xff]  ;;  %v3342_v12 = vadd.f32 %v13473_v53, %v13347_v61 }
 0x81f   : > { %9659 = vmatmul.msk.f32.gmra.mxu0 %vm2207_vm4, %v10379_v60  ;;  %v3632_v33 = vadd.f32 %v13645_v34, %v3341_v45  ;;  %v10384_v34 = vld [vmem:[%s17217_s4 + $0x220] sm:$0xff]  ;;  %v3344_v45 = vadd.f32 %v13497_v18, %v13365_v3 }
 0x820   : > { %v3895_v32 = vpop.f32.mrf.mxu3 }
 0x821   : > { %v13839_v41 = vadd.f32 %v3895_v32, %v3630_v16 }
 0x822   : > { %v3967_v28 = vpop.f32.mrf.mxu0 }
 0x823   : > { %v4024_v59 = vadd.f32 %v4023_v10, %v3967_v28  ;;  %v4032_v36 = vpop.f32.mrf.mxu1  ;;  %v3633_v28 = vadd.f32 %v13655_v50, %v3342_v12  ;;  %v3343_v50 = vadd.f32 %v13483_v22, %v13358_v55 }
 0x825   : > { %9643 = vmatmul.msk.f32.gmra.mxu2 %vm2364_vm7, %v4024_v59  ;;  %4200 = vmatmul.f32.gmra.mxu3 %v10380_v17  ;;  %v10385_v59 = vld [vmem:[%s17217_s4 + $0x228] sm:$0xff] }
 0x826   : > { %v9725_v17 = vld [vmem:[%s17218_s5 + $0x48] sm:$0x3f] }
 0x827   : > { %9660 = vmatmul.msk.f32.gmra.mxu0 %vm2207_vm4, %v10381_v43  ;;  %9726 = vmatpush.msk.msra.mxu3 %vm2404_vm6, %v9725_v17  ;;  %v3634_v43 = vadd.f32 %v13661_v31, %v3343_v50  ;;  %v10388_v31 = vld [vmem:[%s17217_s4 + $0x240] sm:$0xff] }
 0x828   : > { %v3898_v26 = vpop.f32.mrf.mxu3 }
 0x829   : > { %v13852_v10 = vadd.f32 %v3898_v26, %v3631_v6  ;;  %v10386_v6 = vld [vmem:[%s17217_s4 + $0x230] sm:$0xff]  ;;  %v10387_v26 = vld [vmem:[%s17217_s4 + $0x238] sm:$0xff] }
 0x82a   : > { %v3970_v27 = vpop.f32.mrf.mxu0 }
 0x82b   : > { %v4027_v39 = vadd.f32 %v4026_v21, %v3970_v27  ;;  %v4035_v32 = vpop.f32.mrf.mxu1 }
 0x82d   : > { %9644 = vmatmul.msk.f32.gmra.mxu2 %vm2364_vm7, %v4027_v39  ;;  %4203 = vmatmul.f32.gmra.mxu3 %v10382_v4  ;;  %v3635_v4 = vadd.f32 %v13671_v48, %v3344_v45  ;;  %v10390_v48 = vld [vmem:[%s17217_s4 + $0x250] sm:$0xff] }
 0x82f   : > { %9661 = vmatmul.msk.f32.gmra.mxu0 %vm2207_vm4, %v10383_v5 }
 0x830   : > { %v3901_v21 = vpop.f32.mrf.mxu3 }
 0x831   : > { %v13865_v16 = vadd.f32 %v3901_v21, %v3632_v33  ;;  %v10389_v33 = vld [vmem:[%s17217_s4 + $0x248] sm:$0xff] }
 0x832   : > { %v3973_v60 = vpop.f32.mrf.mxu0 }
 0x833   : > { %v4030_v1 = vadd.f32 %v4029_v52, %v3973_v60  ;;  %v4038_v39 = vpop.f32.mrf.mxu1 }
 0x835   : > { %9645 = vmatmul.msk.f32.gmra.mxu2 %vm2364_vm7, %v4030_v1  ;;  %4206 = vmatmul.f32.gmra.mxu3 %v10384_v34  ;;  %v3345_v1 = vadd.f32 %v13507_v24, %v13372_v25  ;;  %v10391_v34 = vld [vmem:[%s17217_s4 + $0x258] sm:$0xff] }
 0x837   : > { %9662 = vmatmul.msk.f32.gmra.mxu0 %vm2207_vm4, %v10385_v59  ;;  %v3636_v12 = vadd.f32 %v13677_v2, %v3345_v1  ;;  %v10392_v2 = vld [vmem:[%s17217_s4 + $0x260] sm:$0xf] }
 0x838   : > { %v3904_v52 = vpop.f32.mrf.mxu3  ;;  %v17471_v1 = vld [vmem:[#allocation51_spill] sm:$0xff] }
 0x839   : > { %v13878_v46 = vadd.f32 %v3904_v52, %v3633_v28  ;;  %v3346_v52 = vadd.f32 %v13517_v57, %v13381_v44  ;;  %v3347_v57 = vadd.f32 %v13527_v14, %v13393_v63 }
 0x83a   : > { %v3976_v61 = vpop.f32.mrf.mxu0 }
 0x83b   : > { %v4033_v53 = vadd.f32 %v4032_v36, %v3976_v61  ;;  %v4041_v3 = vpop.f32.mrf.mxu1  ;;  %v3637_v61 = vadd.f32 %v13683_v30, %v3346_v52  ;;  %v10394_v30 = vld [vmem:[%s17217_s4 + $0x278] sm:$0xff] }
 0x83d   : > { %9646 = vmatmul.msk.f32.gmra.mxu2 %vm2364_vm7, %v4033_v53  ;;  %4209 = vmatmul.f32.gmra.mxu3 %v10386_v6  ;;  %v10393_v53 = vld [vmem:[%s17217_s4 + $0x268] sm:$0xf] }
 0x83f   : > { %9663 = vmatmul.msk.f32.gmra.mxu0 %vm2207_vm4, %v10387_v26  ;;  %v3638_v26 = vadd.f32 %v13690_v9, %v3347_v57  ;;  %v10395_v9 = vld [vmem:[%s17217_s4 + $0x288] sm:$0xff] }
 0x840   : > { %v3907_v27 = vpop.f32.mrf.mxu3  ;;  %v10398_v57 = vld [vmem:[%s17217_s4 + $0x2a8] sm:$0xff] }
 0x841   : > { %v13895_v36 = vadd.f32 %v3907_v27, %v3634_v43 }
 0x842   : > { %v3979_v55 = vpop.f32.mrf.mxu0 }
 0x843   : > { %v4036_v22 = vadd.f32 %v4035_v32, %v3979_v55  ;;  %v4044_v24 = vpop.f32.mrf.mxu1  ;;  %v3348_v55 = vadd.f32 %v13541_v40, %v13409_v62 }
 0x845   : > { %9647 = vmatmul.msk.f32.gmra.mxu2 %vm2364_vm7, %v4036_v22  ;;  %4212 = vmatmul.f32.gmra.mxu3 %v10388_v31  ;;  %v3639_v22 = vadd.f32 %v13717_v54, %v3348_v55  ;;  %v17472_v54 = vld [vmem:[#allocation32_spill] sm:$0xff] }
 0x847   : > { %9664 = vmatmul.msk.f32.gmra.mxu0 %vm2207_vm4, %v10389_v33  ;;  %v17469_v33 = vld [vmem:[#allocation39_spill] sm:$0xff] }
 0x848   : > { %v3910_v5 = vpop.f32.mrf.mxu3 }
 0x849   : > { %v13908_v21 = vadd.f32 %v3910_v5, %v3635_v4  ;;  %v17468_v4 = vld [vmem:[#allocation14_spill] sm:$0xff] }
 0x84a   : > { %v3982_v60 = vpop.f32.mrf.mxu0  ;;  %v1702_v5 = vadd.f32 %v17469_v33, %v17468_v4  ;;  %v10401_v33 = vld [vmem:[%s17217_s4 + $0x290] sm:$0xff] }
 0x84b   : > { %v4039_v18 = vadd.f32 %v4038_v39, %v3982_v60  ;;  %v4047_v43 = vpop.f32.mrf.mxu1  ;;  %v17470_v60 = vld [vmem:[#allocation54_spill] sm:$0xff] }
 0x84d   : > { %9648 = vmatmul.msk.f32.gmra.mxu2 %vm2364_vm7, %v4039_v18  ;;  %4215 = vmatmul.f32.gmra.mxu3 %v10390_v48 }
 0x84f   : > { %9665 = vmatmul.msk.f32.gmra.mxu0 %vm2207_vm4, %v10391_v34  ;;  %v10396_v34 = vld [vmem:[%s17217_s4 + $0x298] sm:$0xff] }
 0x850   : > { %v3913_v32 = vpop.f32.mrf.mxu3 }
 0x851   : > { %v13921_v28 = vadd.f32 %v3913_v32, %v3636_v12  ;;  %v3349_v12 = vadd.f32 %v13552_v42, %v17472_v54  ;;  %v17473_v32 = vld [vmem:[#allocation87_spill] sm:$0xff] }
 0x852   : > { %v3985_v59 = vpop.f32.mrf.mxu0 }
 0x853   : > { %v4042_v25 = vadd.f32 %v4041_v3, %v3985_v59  ;;  %v4050_v31 = vpop.f32.mrf.mxu1  ;;  %v1794_v3 = vadd.f32 %v17470_v60, %v1702_v5  ;;  %v10402_v5 = vld [vmem:[%s17217_s4 + $0x2c8] sm:$0xff] }
 0x855   : > { %9649 = vmatmul.msk.f32.gmra.mxu2 %vm2364_vm7, %v4042_v25  ;;  %4218 = vmatmul.f32.gmra.mxu3 %v10392_v2  ;;  %v1886_v48 = vadd.f32 %v17471_v1, %v1794_v3  ;;  %v17474_v25 = vld [vmem:[#allocation8_spill] sm:$0xff]  ;;  %v17475_v2 = vld [vmem:[#allocation42_spill] sm:$0xff] }
 0x856   : > { %v10404_v1 = vld [vmem:[%s17217_s4 + $0x2d8] sm:$0xff] }
 0x857   : > { %9666 = vmatmul.msk.f32.gmra.mxu0 %vm2207_vm4, %v10393_v53  ;;  %v1978_v59 = vadd.f32 %v17473_v32, %v1886_v48 }
 0x858   : > { %v3916_v17 = vpop.f32.mrf.mxu3 }
 0x859   : > { %v13934_v50 = vadd.f32 %v3916_v17, %v3637_v61  ;;  %v2070_v61 = vadd.f32 %v17475_v2, %v1978_v59  ;;  %v17476_v17 = vld [vmem:[#allocation31_spill] sm:$0xff]  ;;  %v10405_v59 = vld [vmem:[%s17217_s4 + $0x2b0] sm:$0xff] }
 0x85a   : > { %v3988_v6 = vpop.f32.mrf.mxu0 }
 0x85b   : > { %v4045_v44 = vadd.f32 %v4044_v24, %v3988_v6  ;;  %v3640_v24 = vadd.f32 %v17474_v25, %v3349_v12  ;;  %v13985_v6 = vadd.f32 %v17476_v17, %v2070_v61  ;;  %v10406_v25 = vld [vmem:[%s17217_s4 + $0x2e8] sm:$0xff]  ;;  %v10408_v17 = vld [vmem:[%s17217_s4 + $0x2f8] sm:$0xff] }
 0x85d   : > { %9650 = vmatmul.msk.f32.gmra.mxu2 %vm2364_vm7, %v4045_v44  ;;  %9683 = vmatmul.msk.f32.vlgmr.msrb.gmra.mxu3 %vm2207_vm4, %v10394_v30  ;;  %17477 = vst [vmem:[#allocation17_spill] sm:$0xff] %v13985_v6  ;;  %v10397_v44 = vld [vmem:[%s17217_s4 + $0x270] sm:$0xff] }
 0x85e   : > { %5121 = vmatpush.msrb.mxu3 %v13703_v49 }
 0x860   : > { %5122 = vmatpush.msrb.mxu3 %v13708_v35  ;;  %v3919_v27 = vpop.f32.mrf.mxu3 }
 0x861   : > { %v13946_v39 = vadd.f32 %v3919_v27, %v3638_v26  ;;  %v13997_v26 = vrot.slane %v13985_v6, 4 }
 0x862   : > { %5123 = vmatpush.msrb.mxu3 %v13713_v11  ;;  %v3991_v63 = vpop.f32.mrf.mxu0 }
 0x863   : > { %v4048_v14 = vadd.f32 %v4047_v43, %v3991_v63  ;;  %v10399_v63 = vld [vmem:[%s17217_s4 + $0x280] sm:$0xff] }
 0x864   : > { %5124 = vmatpush.msrb.mxu3 %v13720_v0 }
 0x865   : > { %9651 = vmatmul.msk.f32.gmra.mxu2 %vm2364_vm7, %v4048_v14  ;;  %9684 = vmatmul.msk.f32.gmra.mxu3 %vm2207_vm4, %v10395_v9  ;;  %v17478_v14 = vld [vmem:[#allocation9_spill] sm:$0xff] }
 0x866   : > { %5125 = vmatpush.msrb.mxu3 %v13728_v7  ;;  %v17479_v55 = vrot.slane %v17478_v14, 4 }
 0x868   : > { %5126 = vmatpush.msrb.mxu3 %v13737_v47  ;;  %v3922_v45 = vpop.f32.mrf.mxu3  ;;  %v14011_v9 = vsel %vm2247_vm3, %v17479_v55, %v13997_v26 }
 0x869   : > { %v13962_v62 = vadd.f32 %v3922_v45, %v3639_v22  ;;  %v10400_v22 = vld [vmem:[%s17217_s4 + $0x2b8] sm:$0xff] }
 0x86a   : > { %5127 = vmatpush.msrb.mxu3 %v13742_v23  ;;  %v3994_v40 = vpop.f32.mrf.mxu0 }
 0x86b   : > { %v4051_v18 = vadd.f32 %v4050_v31, %v3994_v40 }
 0x86c   : > { %5128 = vmatpush.msrb.mxu3 %v13749_v8 }
 0x86d   : > { %9652 = vmatmul.msk.f32.gmra.mxu2 %vm2364_vm7, %v4051_v18  ;;  %9685 = vmatmul.msk.f32.gmra.mxu3 %vm2207_vm4, %v10396_v34  ;;  %v10403_v18 = vld [vmem:[%s17217_s4 + $0x2a0] sm:$0xff] }
 0x86e   : > { %5129 = vmatpush.msrb.mxu3 %v13757_v51 }
 0x870   : > { %5130 = vmatpush.msrb.mxu3 %v13766_v19  ;;  %v3925_v52 = vpop.f32.mrf.mxu3 }
 0x871   : > { %v13980_v42 = vadd.f32 %v3925_v52, %v3640_v24 }
 0x872   : > { %5131 = vmatpush.msrb.mxu3 %v13771_v29  ;;  %v4239_v53 = vpop.f32.mrf.mxu0 }
 0x874   : > { %5132 = vmatpush.msrb.mxu3 %v13776_v20 }
 0x875   : > { %4407 = vmatmul.f32.vlgmr.msrb.gmra.mxu2 %v10397_v44  ;;  %9686 = vmatmul.msk.f32.gmra.mxu3 %vm2207_vm4, %v10398_v57 }
 0x876   : > { %5133 = vmatpush.msrb.mxu3 %v13787_v58 }
 0x878   : > { %5134 = vmatpush.msrb.mxu3 %v13795_v56  ;;  %v4183_v30 = vpop.f32.mrf.mxu3 }
 0x879   : > { %v4240_v43 = vadd.f32 %v4239_v53, %v4183_v30  ;;  %v10407_v53 = vld [vmem:[%s17217_s4 + $0x2c0] sm:$0xff] }
 0x87a   : > { %5135 = vmatpush.msrb.mxu3 %v13807_v37  ;;  %v4242_v27 = vpop.f32.mrf.mxu0 }
 0x87b   : > { %9669 = vmatmul.msk.f32.vlgmr.msra.gmra.mxu1 %vm2364_vm7, %v4240_v43 }
 0x87c   : > { %9740 = vmatpush.msk.msra.mxu1 %vm2247_vm3, %v13997_v26  ;;  %5136 = vmatpush.msrb.mxu3 %v13812_v38 }
 0x87d   : > { %4410 = vmatmul.f32.gmra.mxu2 %v10399_v63  ;;  %9687 = vmatmul.msk.f32.gmra.mxu3 %vm2207_vm4, %v10400_v22  ;;  %v10410_v63 = vld [vmem:[%s17217_s4 + $0x308] sm:$0xff] }
 0x87e   : > { %4967 = vmatpush.msra.mxu1 %v14011_v9 }
 0x880   : > { %v4186_v45 = vpop.f32.mrf.mxu3 }
 0x881   : > { %v4243_v31 = vadd.f32 %v4242_v27, %v4186_v45  ;;  %v10409_v27 = vld [vmem:[%s17217_s4 + $0x2d0] sm:$0xff] }
 0x882   : > { %v4245_v4 = vpop.f32.mrf.mxu0 }
 0x883   : > { %9670 = vmatmul.msk.f32.gmra.mxu1 %vm2364_vm7, %v4243_v31 }
 0x885   : > { %4413 = vmatmul.f32.gmra.mxu2 %v10401_v33  ;;  %9688 = vmatmul.msk.f32.gmra.mxu3 %vm2207_vm4, %v10402_v5  ;;  %v10412_v33 = vld [vmem:[%s17217_s4 + $0x318] sm:$0xff] }
 0x888   : > { %v4189_v40 = vpop.f32.mrf.mxu3 }
 0x889   : > { %v4246_v60 = vadd.f32 %v4245_v4, %v4189_v40  ;;  %v10411_v4 = vld [vmem:[%s17217_s4 + $0x2e0] sm:$0xff] }
 0x88b   : > { %9671 = vmatmul.msk.f32.gmra.mxu1 %vm2364_vm7, %v4246_v60 }
 0x88c   : > { %v4248_v3 = vpop.f32.mrf.mxu0 }
 0x88d   : > { %4416 = vmatmul.f32.gmra.mxu2 %v10403_v18  ;;  %9689 = vmatmul.msk.f32.gmra.mxu3 %vm2207_vm4, %v10404_v1  ;;  %v10413_v18 = vld [vmem:[%s17217_s4 + $0x2f0] sm:$0xff]  ;;  %v10414_v1 = vld [vmem:[%s17217_s4 + $0x328] sm:$0xff] }
 0x890   : > { %v4114_v48 = vpop.f32.mrf.mxu2  ;;  %v4192_v54 = vpop.f32.mrf.mxu3 }
 0x891   : > { %v14035_v12 = vadd.f32 %v4114_v48, %v13804_v15  ;;  %v4249_v34 = vadd.f32 %v4248_v3, %v4192_v54 }
 0x893   : > { %9672 = vmatmul.msk.f32.gmra.mxu1 %vm2364_vm7, %v4249_v34 }
 0x894   : > { %v4251_v32 = vpop.f32.mrf.mxu0 }
 0x895   : > { %4419 = vmatmul.f32.gmra.mxu2 %v10405_v59  ;;  %9690 = vmatmul.msk.f32.gmra.mxu3 %vm2207_vm4, %v10406_v25  ;;  %v10415_v25 = vld [vmem:[%s17217_s4 + $0x300] sm:$0xff] }
 0x898   : > { %v4117_v24 = vpop.f32.mrf.mxu2  ;;  %v4195_v52 = vpop.f32.mrf.mxu3 }
 0x899   : > { %v14046_v15 = vadd.f32 %v4117_v24, %v13826_v13  ;;  %v4252_v2 = vadd.f32 %v4251_v32, %v4195_v52  ;;  %v9754_v32 = vld [vmem:[%s17218_s5 + $0x50] sm:$0x3f] }
 0x89a   : > { %9755 = vmatpush.msk.msrb.mxu2 %vm2404_vm6, %v9754_v32  ;;  %v10424_v32 = vld [vmem:[%s17217_s4 + $0x368] sm:$0xff] }
 0x89b   : > { %9673 = vmatmul.msk.f32.gmra.mxu1 %vm2364_vm7, %v4252_v2 }
 0x89c   : > { %v4254_v61 = vpop.f32.mrf.mxu0 }
 0x89d   : > { %4422 = vmatmul.f32.gmra.mxu2 %v10407_v53  ;;  %9691 = vmatmul.msk.f32.gmra.mxu3 %vm2207_vm4, %v10408_v17  ;;  %v10417_v17 = vld [vmem:[%s17217_s4 + $0x310] sm:$0xff] }
 0x8a0   : > { %v4120_v44 = vpop.f32.mrf.mxu2  ;;  %v4198_v57 = vpop.f32.mrf.mxu3 }
 0x8a1   : > { %v14057_v13 = vadd.f32 %v4120_v44, %v13839_v41  ;;  %v4255_v30 = vadd.f32 %v4254_v61, %v4198_v57 }
 0x8a3   : > { %9674 = vmatmul.msk.f32.gmra.mxu1 %vm2364_vm7, %v4255_v30 }
 0x8a4   : > { %v4257_v43 = vpop.f32.mrf.mxu0 }
 0x8a5   : > { %4425 = vmatmul.f32.gmra.mxu2 %v10409_v27  ;;  %9692 = vmatmul.msk.f32.gmra.mxu3 %vm2207_vm4, %v10410_v63 }
 0x8a8   : > { %v4123_v55 = vpop.f32.mrf.mxu2  ;;  %v4201_v22 = vpop.f32.mrf.mxu3 }
 0x8a9   : > { %v14068_v41 = vadd.f32 %v4123_v55, %v13852_v10  ;;  %v4258_v45 = vadd.f32 %v4257_v43, %v4201_v22 }
 0x8ab   : > { %9675 = vmatmul.msk.f32.gmra.mxu1 %vm2364_vm7, %v4258_v45 }
 0x8ac   : > { %v4260_v31 = vpop.f32.mrf.mxu0 }
 0x8ad   : > { %4428 = vmatmul.f32.gmra.mxu2 %v10411_v4  ;;  %9693 = vmatmul.msk.f32.gmra.mxu3 %vm2207_vm4, %v10412_v33 }
 0x8b0   : > { %v4126_v5 = vpop.f32.mrf.mxu2  ;;  %v4204_v40 = vpop.f32.mrf.mxu3 }
 0x8b1   : > { %v14079_v10 = vadd.f32 %v4126_v5, %v13865_v16  ;;  %v4261_v60 = vadd.f32 %v4260_v31, %v4204_v40 }
 0x8b3   : > { %9676 = vmatmul.msk.f32.gmra.mxu1 %vm2364_vm7, %v4261_v60 }
 0x8b4   : > { %v4263_v3 = vpop.f32.mrf.mxu0 }
 0x8b5   : > { %4431 = vmatmul.f32.gmra.mxu2 %v10413_v18  ;;  %9694 = vmatmul.msk.f32.gmra.mxu3 %vm2207_vm4, %v10414_v1  ;;  %v10422_v1 = vld [vmem:[%s17217_s4 + $0x358] sm:$0xff] }
 0x8b8   : > { %v4129_v48 = vpop.f32.mrf.mxu2  ;;  %v4207_v54 = vpop.f32.mrf.mxu3 }
 0x8b9   : > { %v14090_v16 = vadd.f32 %v4129_v48, %v13878_v46  ;;  %v4264_v34 = vadd.f32 %v4263_v3, %v4207_v54  ;;  %v10416_v46 = vld [vmem:[%s17217_s4 + $0x338] sm:$0xf] }
 0x8bb   : > { %9677 = vmatmul.msk.f32.gmra.mxu1 %vm2364_vm7, %v4264_v34  ;;  %v10423_v34 = vld [vmem:[%s17217_s4 + $0x350] sm:$0xff] }
 0x8bc   : > { %v4266_v59 = vpop.f32.mrf.mxu0 }
 0x8bd   : > { %4434 = vmatmul.f32.gmra.mxu2 %v10415_v25  ;;  %9695 = vmatmul.msk.f32.gmra.mxu3 %vm2207_vm4, %v10416_v46  ;;  %v10425_v46 = vld [vmem:[%s17217_s4 + $0x360] sm:$0xff] }
 0x8c0   : > { %v4132_v24 = vpop.f32.mrf.mxu2  ;;  %v4210_v52 = vpop.f32.mrf.mxu3 }
 0x8c1   : > { %v14105_v2 = vadd.f32 %v4132_v24, %v13895_v36  ;;  %v4267_v61 = vadd.f32 %v4266_v59, %v4210_v52  ;;  %v10418_v36 = vld [vmem:[%s17217_s4 + $0x320] sm:$0xff]  ;;  %v10426_v24 = vld [vmem:[%s17217_s4 + $0x378] sm:$0xff] }
 0x8c3   : > { %9678 = vmatmul.msk.f32.gmra.mxu1 %vm2364_vm7, %v4267_v61 }
 0x8c4   : > { %v4269_v53 = vpop.f32.mrf.mxu0 }
 0x8c5   : > { %4437 = vmatmul.f32.gmra.mxu2 %v10417_v17 }
 0x8c8   : > { %v4135_v44 = vpop.f32.mrf.mxu2  ;;  %v4213_v57 = vpop.f32.mrf.mxu3 }
 0x8c9   : > { %v14112_v30 = vadd.f32 %v4135_v44, %v13908_v21  ;;  %v4270_v43 = vadd.f32 %v4269_v53, %v4213_v57  ;;  %v10419_v21 = vld [vmem:[%s17217_s4 + $0x330] sm:$0xf]  ;;  %v10428_v44 = vld [vmem:[%s17217_s4 + $0x388] sm:$0xff] }
 0x8ca   : > { %v10427_v53 = vld [vmem:[%s17217_s4 + $0x370] sm:$0xff] }
 0x8cb   : > { %9679 = vmatmul.msk.f32.gmra.mxu1 %vm2364_vm7, %v4270_v43 }
 0x8cc   : > { %v4272_v27 = vpop.f32.mrf.mxu0 }
 0x8cd   : > { %4440 = vmatmul.f32.gmra.mxu2 %v10418_v36  ;;  %v10429_v36 = vld [vmem:[%s17217_s4 + $0x380] sm:$0xff] }
 0x8d0   : > { %v4138_v63 = vpop.f32.mrf.mxu2  ;;  %v4216_v55 = vpop.f32.mrf.mxu3 }
 0x8d1   : > { %v14119_v22 = vadd.f32 %v4138_v63, %v13921_v28  ;;  %v4273_v45 = vadd.f32 %v4272_v27, %v4216_v55  ;;  %v10420_v28 = vld [vmem:[%s17217_s4 + $0x348] sm:$0xff]  ;;  %v10430_v63 = vld [vmem:[%s17217_s4 + $0x398] sm:$0xff] }
 0x8d3   : > { %9680 = vmatmul.msk.f32.gmra.mxu1 %vm2364_vm7, %v4273_v45 }
 0x8d4   : > { %v4275_v31 = vpop.f32.mrf.mxu0 }
 0x8d5   : > { %4443 = vmatmul.f32.gmra.mxu2 %v10419_v21 }
 0x8d8   : > { %v4141_v4 = vpop.f32.mrf.mxu2  ;;  %v4219_v33 = vpop.f32.mrf.mxu3 }
 0x8d9   : > { %v14126_v5 = vadd.f32 %v4141_v4, %v13934_v50  ;;  %v4276_v40 = vadd.f32 %v4275_v31, %v4219_v33  ;;  %v10421_v50 = vld [vmem:[%s17217_s4 + $0x340] sm:$0xff]  ;;  %v10431_v4 = vld [vmem:[%s17217_s4 + $0x390] sm:$0xff]  ;;  %v10432_v33 = vld [vmem:[%s17217_s4 + $0x3a8] sm:$0xff] }
 0x8db   : > { %9681 = vmatmul.msk.f32.gmra.mxu1 %vm2364_vm7, %v4276_v40 }
 0x8dd   : > { %9712 = vmatmul.msk.f32.vlgmr.msra.gmra.mxu2 %vm2207_vm4, %v10420_v28 }
 0x8de   : > { %5346 = vmatpush.msra.mxu2 %v13703_v49 }
 0x8e0   : > { %5347 = vmatpush.msra.mxu2 %v13708_v35  ;;  %v4144_v60 = vpop.f32.mrf.mxu2  ;;  %v4464_v3 = vpop.f32.mrf.mxu3 }
 0x8e1   : > { %v14136_v18 = vadd.f32 %v4144_v60, %v13946_v39 }
 0x8e2   : > { %5348 = vmatpush.msra.mxu2 %v13713_v11 }
 0x8e3   : > { %4632 = vmatmul.f32.vlgmr.msrb.gmra.mxu1 %v10421_v50  ;;  %v10433_v50 = vld [vmem:[%s17217_s4 + $0x3a0] sm:$0xff] }
 0x8e4   : > { %5349 = vmatpush.msra.mxu2 %v13720_v0 }
 0x8e5   : > { %9713 = vmatmul.msk.f32.gmra.mxu2 %vm2207_vm4, %v10422_v1  ;;  %v10434_v1 = vld [vmem:[%s17217_s4 + $0x3b8] sm:$0xff] }
 0x8e6   : > { %5350 = vmatpush.msra.mxu2 %v13728_v7 }
 0x8e8   : > { %5351 = vmatpush.msra.mxu2 %v13737_v47  ;;  %v4147_v39 = vpop.f32.mrf.mxu2  ;;  %v4467_v48 = vpop.f32.mrf.mxu3 }
 0x8e9   : > { %v14150_v54 = vadd.f32 %v4147_v39, %v13962_v62 }
 0x8ea   : > { %5352 = vmatpush.msra.mxu2 %v13742_v23 }
 0x8eb   : > { %4635 = vmatmul.f32.gmra.mxu1 %v10423_v34 }
 0x8ec   : > { %5353 = vmatpush.msra.mxu2 %v13749_v8 }
 0x8ed   : > { %9714 = vmatmul.msk.f32.gmra.mxu2 %vm2207_vm4, %v10424_v32 }
 0x8ee   : > { %5354 = vmatpush.msra.mxu2 %v13757_v51 }
 0x8f0   : > { %5355 = vmatpush.msra.mxu2 %v13766_v19  ;;  %v4150_v62 = vpop.f32.mrf.mxu2  ;;  %v4470_v25 = vpop.f32.mrf.mxu3 }
 0x8f1   : > { %v14164_v59 = vadd.f32 %v4150_v62, %v13980_v42  ;;  %v10435_v62 = vld [vmem:[%s17217_s4 + $0x3b0] sm:$0xff] }
 0x8f2   : > { %5356 = vmatpush.msra.mxu2 %v13771_v29 }
 0x8f3   : > { %4638 = vmatmul.f32.gmra.mxu1 %v10425_v46 }
 0x8f4   : > { %5357 = vmatpush.msra.mxu2 %v13776_v20 }
 0x8f5   : > { %9715 = vmatmul.msk.f32.gmra.mxu2 %vm2207_vm4, %v10426_v24 }
 0x8f6   : > { %5358 = vmatpush.msra.mxu2 %v13787_v58 }
 0x8f8   : > { %5359 = vmatpush.msra.mxu2 %v13795_v56  ;;  %v14177_v42 = vpop.f32.mrf.mxu1  ;;  %v4408_v52 = vpop.f32.mrf.mxu2 }
 0x8f9   : > { %v4465_v61 = vadd.f32 %v4464_v3, %v4408_v52  ;;  %v4473_v17 = vpop.f32.mrf.mxu3 }
 0x8fa   : > { %5360 = vmatpush.msra.mxu2 %v13807_v37 }
 0x8fb   : > { %9698 = vmatmul.msk.f32.vlgmr.msra.gmra.mxu0 %vm2364_vm7, %v4465_v61  ;;  %4641 = vmatmul.f32.gmra.mxu1 %v10427_v53  ;;  %v10437_v61 = vld [vmem:[%s17217_s4 + $0x3c0] sm:$0xff] }
 0x8fc   : > { %9769 = vmatpush.msk.msra.mxu0 %vm2247_vm3, %v13997_v26  ;;  %5361 = vmatpush.msra.mxu2 %v13812_v38 }
 0x8fd   : > { %9716 = vmatmul.msk.f32.gmra.mxu2 %vm2207_vm4, %v10428_v44 }
 0x8fe   : > { %5192 = vmatpush.msra.mxu0 %v14011_v9 }
 0x900   : > { %v14192_v57 = vpop.f32.mrf.mxu1  ;;  %v4411_v43 = vpop.f32.mrf.mxu2 }
 0x901   : > { %v4468_v27 = vadd.f32 %v4467_v48, %v4411_v43  ;;  %v4476_v55 = vpop.f32.mrf.mxu3 }
 0x903   : > { %9699 = vmatmul.msk.f32.gmra.mxu0 %vm2364_vm7, %v4468_v27  ;;  %4644 = vmatmul.f32.gmra.mxu1 %v10429_v36  ;;  %v9783_v36 = vld [vmem:[%s17218_s5 + $0x58] sm:$0x3f] }
 0x904   : > { %9784 = vmatpush.msk.msrb.mxu1 %vm2404_vm6, %v9783_v36 }
 0x905   : > { %9717 = vmatmul.msk.f32.gmra.mxu2 %vm2207_vm4, %v10430_v63  ;;  %v10439_v63 = vld [vmem:[%s17217_s4 + $0x3d0] sm:$0xff] }
 0x908   : > { %v14202_v45 = vpop.f32.mrf.mxu1  ;;  %v4414_v21 = vpop.f32.mrf.mxu2 }
 0x909   : > { %v4471_v31 = vadd.f32 %v4470_v25, %v4414_v21  ;;  %v4479_v40 = vpop.f32.mrf.mxu3  ;;  %v10436_v25 = vld [vmem:[%s17217_s4 + $0x3c8] sm:$0xff] }
 0x90b   : > { %9700 = vmatmul.msk.f32.gmra.mxu0 %vm2364_vm7, %v4471_v31  ;;  %4647 = vmatmul.f32.gmra.mxu1 %v10431_v4 }
 0x90d   : > { %9718 = vmatmul.msk.f32.gmra.mxu2 %vm2207_vm4, %v10432_v33 }
 0x910   : > { %v14212_v28 = vpop.f32.mrf.mxu1  ;;  %v4417_v60 = vpop.f32.mrf.mxu2 }
 0x911   : > { %v4474_v3 = vadd.f32 %v4473_v17, %v4417_v60  ;;  %v4482_v32 = vpop.f32.mrf.mxu3  ;;  %v10438_v17 = vld [vmem:[%s17217_s4 + $0x3d8] sm:$0xff] }
 0x912   : > { %v10442_v60 = vld [vmem:[%s17217_s4 + $0x3f8] sm:$0xff] }
 0x913   : > { %9701 = vmatmul.msk.f32.gmra.mxu0 %vm2364_vm7, %v4474_v3  ;;  %4650 = vmatmul.f32.gmra.mxu1 %v10433_v50 }
 0x915   : > { %9719 = vmatmul.msk.f32.gmra.mxu2 %vm2207_vm4, %v10434_v1 }
 0x918   : > { %v14222_v39 = vpop.f32.mrf.mxu1  ;;  %v4420_v48 = vpop.f32.mrf.mxu2 }
 0x919   : > { %v4477_v34 = vadd.f32 %v4476_v55, %v4420_v48  ;;  %v4485_v53 = vpop.f32.mrf.mxu3  ;;  %v10440_v55 = vld [vmem:[%s17217_s4 + $0x3e8] sm:$0xff] }
 0x91b   : > { %9702 = vmatmul.msk.f32.gmra.mxu0 %vm2364_vm7, %v4477_v34  ;;  %4653 = vmatmul.f32.gmra.mxu1 %v10435_v62  ;;  %v10443_v34 = vld [vmem:[%s17217_s4 + $0x3f0] sm:$0xff] }
 0x91d   : > { %9720 = vmatmul.msk.f32.gmra.mxu2 %vm2207_vm4, %v10436_v25 }
 0x920   : > { %v14232_v46 = vpop.f32.mrf.mxu1  ;;  %v4423_v24 = vpop.f32.mrf.mxu2 }
 0x921   : > { %v4480_v52 = vadd.f32 %v4479_v40, %v4423_v24  ;;  %v4488_v21 = vpop.f32.mrf.mxu3  ;;  %v10441_v40 = vld [vmem:[%s17217_s4 + $0x3e0] sm:$0xff] }
 0x923   : > { %9703 = vmatmul.msk.f32.gmra.mxu0 %vm2364_vm7, %v4480_v52  ;;  %4656 = vmatmul.f32.gmra.mxu1 %v10437_v61  ;;  %v10445_v61 = vld [vmem:[%s17217_s4 + $0x400] sm:$0xf] }
 0x925   : > { %9721 = vmatmul.msk.f32.gmra.mxu2 %vm2207_vm4, %v10438_v17 }
 0x928   : > { %v14242_v44 = vpop.f32.mrf.mxu1  ;;  %v4426_v43 = vpop.f32.mrf.mxu2 }
 0x929   : > { %v4483_v27 = vadd.f32 %v4482_v32, %v4426_v43  ;;  %v4491_v3 = vpop.f32.mrf.mxu3  ;;  %v10444_v32 = vld [vmem:[%s17217_s4 + $0x408] sm:$0xf] }
 0x92b   : > { %9704 = vmatmul.msk.f32.gmra.mxu0 %vm2364_vm7, %v4483_v27  ;;  %4659 = vmatmul.f32.gmra.mxu1 %v10439_v63  ;;  %v10446_v27 = vld [vmem:[%s17217_s4 + $0x8] sm:$0xff] }
 0x92d   : > { %9722 = vmatmul.msk.f32.gmra.mxu2 %vm2207_vm4, %v10440_v55 }
 0x930   : > { %v14256_v31 = vpop.f32.mrf.mxu1  ;;  %v4429_v4 = vpop.f32.mrf.mxu2 }
 0x931   : > { %v4486_v33 = vadd.f32 %v4485_v53, %v4429_v4  ;;  %v4494_v52 = vpop.f32.mrf.mxu3  ;;  %v10447_v4 = vld [vmem:[%s17217_s4 + $0x18] sm:$0xff] }
 0x933   : > { %9705 = vmatmul.msk.f32.gmra.mxu0 %vm2364_vm7, %v4486_v33  ;;  %4662 = vmatmul.f32.gmra.mxu1 %v10441_v40 }
 0x935   : > { %9723 = vmatmul.msk.f32.gmra.mxu2 %vm2207_vm4, %v10442_v60 }
 0x938   : > { %v14266_v50 = vpop.f32.mrf.mxu1  ;;  %v4432_v1 = vpop.f32.mrf.mxu2 }
 0x939   : > { %v4489_v48 = vadd.f32 %v4488_v21, %v4432_v1  ;;  %v4497_v36 = vpop.f32.mrf.mxu3  ;;  %v10448_v1 = vld [vmem:[%s17217_s4 + $0x28] sm:$0xff] }
 0x93b   : > { %9706 = vmatmul.msk.f32.gmra.mxu0 %vm2364_vm7, %v4489_v48  ;;  %4665 = vmatmul.f32.gmra.mxu1 %v10443_v34 }
 0x93d   : > { %9724 = vmatmul.msk.f32.gmra.mxu2 %vm2207_vm4, %v10444_v32 }
 0x940   : > { %v14276_v62 = vpop.f32.mrf.mxu1  ;;  %v4435_v25 = vpop.f32.mrf.mxu2 }
 0x941   : > { %v4492_v24 = vadd.f32 %v4491_v3, %v4435_v25  ;;  %v4500_v33 = vpop.f32.mrf.mxu3  ;;  %v10449_v25 = vld [vmem:[%s17217_s4] sm:$0xff] }
 0x943   : > { %9707 = vmatmul.msk.f32.gmra.mxu0 %vm2364_vm7, %v4492_v24  ;;  %4668 = vmatmul.f32.gmra.mxu1 %v10445_v61  ;;  %v10450_v24 = vld [vmem:[%s17217_s4 + $0x38] sm:$0xff] }
 0x948   : > { %v14282_v53 = vpop.f32.mrf.mxu1  ;;  %v4438_v17 = vpop.f32.mrf.mxu2 }
 0x949   : > { %v4495_v43 = vadd.f32 %v4494_v52, %v4438_v17 }
 0x94b   : > { %9708 = vmatmul.msk.f32.gmra.mxu0 %vm2364_vm7, %v4495_v43  ;;  %9741 = vmatmul.msk.f32.vlgmr.msra.gmra.mxu1 %vm2207_vm4, %v10446_v27  ;;  %v10451_v43 = vld [vmem:[%s17217_s4 + $0x10] sm:$0xff]  ;;  %v10452_v27 = vld [vmem:[%s17217_s4 + $0x48] sm:$0xff] }
 0x94c   : > { %5571 = vmatpush.msra.mxu1 %v13703_v49 }
 0x94e   : > { %5572 = vmatpush.msra.mxu1 %v13708_v35 }
 0x950   : > { %5573 = vmatpush.msra.mxu1 %v13713_v11  ;;  %v14292_v63 = vpop.f32.mrf.mxu1  ;;  %v4441_v55 = vpop.f32.mrf.mxu2 }
 0x951   : > { %v4498_v21 = vadd.f32 %v4497_v36, %v4441_v55 }
 0x952   : > { %5574 = vmatpush.msra.mxu1 %v13720_v0 }
 0x953   : > { %9709 = vmatmul.msk.f32.gmra.mxu0 %vm2364_vm7, %v4498_v21  ;;  %9742 = vmatmul.msk.f32.gmra.mxu1 %vm2207_vm4, %v10447_v4  ;;  %v10453_v4 = vld [vmem:[%s17217_s4 + $0x20] sm:$0xff] }
 0x954   : > { %5575 = vmatpush.msra.mxu1 %v13728_v7 }
 0x956   : > { %5576 = vmatpush.msra.mxu1 %v13737_v47 }
 0x958   : > { %5577 = vmatpush.msra.mxu1 %v13742_v23  ;;  %v14303_v40 = vpop.f32.mrf.mxu1  ;;  %v4444_v60 = vpop.f32.mrf.mxu2 }
 0x959   : > { %17480 = vst [vmem:[#allocation71_spill] sm:$0xff] %v14303_v40  ;;  %v4501_v3 = vadd.f32 %v4500_v33, %v4444_v60  ;;  %v10454_v33 = vld [vmem:[%s17217_s4 + $0x58] sm:$0xff] }
 0x95a   : > { %5578 = vmatpush.msra.mxu1 %v13749_v8 }
 0x95b   : > { %9710 = vmatmul.msk.f32.gmra.mxu0 %vm2364_vm7, %v4501_v3  ;;  %9743 = vmatmul.msk.f32.gmra.mxu1 %vm2207_vm4, %v10448_v1 }
 0x95c   : > { %5579 = vmatpush.msra.mxu1 %v13757_v51 }
 0x95e   : > { %5580 = vmatpush.msra.mxu1 %v13766_v19 }
 0x960   : > { %5581 = vmatpush.msra.mxu1 %v13771_v29  ;;  %v4633_v48 = vpop.f32.mrf.mxu1  ;;  %v4689_v34 = vpop.f32.mrf.mxu2 }
 0x961   : > { %v4690_v32 = vadd.f32 %v4689_v34, %v4633_v48  ;;  %v10455_v34 = vld [vmem:[%s17217_s4 + $0x30] sm:$0xff] }
 0x962   : > { %5582 = vmatpush.msra.mxu1 %v13776_v20 }
 0x963   : > { %9727 = vmatmul.msk.f32.vlgmr.msra.gmra.mxu3 %vm2364_vm7, %v4690_v32  ;;  %4912 = vmatmul.f32.vlgmr.msrb.gmra.mxu0 %v10449_v25  ;;  %v10456_v32 = vld [vmem:[%s17217_s4 + $0x68] sm:$0xff] }
 0x964   : > { %9798 = vmatpush.msk.msra.mxu3 %vm2247_vm3, %v13997_v26  ;;  %5583 = vmatpush.msra.mxu1 %v13787_v58 }
 0x965   : > { %9744 = vmatmul.msk.f32.gmra.mxu1 %vm2207_vm4, %v10450_v24 }
 0x966   : > { %5417 = vmatpush.msra.mxu3 %v14011_v9  ;;  %5584 = vmatpush.msra.mxu1 %v13795_v56 }
 0x968   : > { %5585 = vmatpush.msra.mxu1 %v13807_v37  ;;  %v4636_v52 = vpop.f32.mrf.mxu1  ;;  %v4692_v61 = vpop.f32.mrf.mxu2 }
 0x969   : > { %v4693_v17 = vadd.f32 %v4692_v61, %v4636_v52 }
 0x96a   : > { %5586 = vmatpush.msra.mxu1 %v13812_v38 }
 0x96b   : > { %9728 = vmatmul.msk.f32.gmra.mxu3 %vm2364_vm7, %v4693_v17  ;;  %4915 = vmatmul.f32.gmra.mxu0 %v10451_v43  ;;  %v10457_v17 = vld [vmem:[%s17217_s4 + $0x40] sm:$0xff]  ;;  %v10458_v43 = vld [vmem:[%s17217_s4 + $0x78] sm:$0xff] }
 0x96d   : > { %9745 = vmatmul.msk.f32.gmra.mxu1 %vm2207_vm4, %v10452_v27 }
 0x970   : > { %v4639_v36 = vpop.f32.mrf.mxu1  ;;  %v4695_v55 = vpop.f32.mrf.mxu2 }
 0x971   : > { %v4696_v21 = vadd.f32 %v4695_v55, %v4639_v36 }
 0x973   : > { %9729 = vmatmul.msk.f32.gmra.mxu3 %vm2364_vm7, %v4696_v21  ;;  %4918 = vmatmul.f32.gmra.mxu0 %v10453_v4  ;;  %v10459_v4 = vld [vmem:[%s17217_s4 + $0x50] sm:$0xff] }
 0x975   : > { %9746 = vmatmul.msk.f32.gmra.mxu1 %vm2207_vm4, %v10454_v33  ;;  %v10460_v33 = vld [vmem:[%s17217_s4 + $0x88] sm:$0xff] }
 0x978   : > { %v14346_v60 = vpop.f32.mrf.mxu0  ;;  %v4642_v3 = vpop.f32.mrf.mxu1 }
 0x979   : > { %v4698_v1 = vpop.f32.mrf.mxu2 }
 0x97a   : > { %v4699_v48 = vadd.f32 %v4698_v1, %v4642_v3 }
 0x97b   : > { %4921 = vmatmul.f32.gmra.mxu0 %v10455_v34 }
 0x97c   : > { %9730 = vmatmul.msk.f32.gmra.mxu3 %vm2364_vm7, %v4699_v48 }
 0x97d   : > { %9747 = vmatmul.msk.f32.gmra.mxu1 %vm2207_vm4, %v10456_v32  ;;  %v10461_v32 = vld [vmem:[%s17217_s4 + $0x60] sm:$0xff] }
 0x980   : > { %v14356_v25 = vpop.f32.mrf.mxu0  ;;  %v4645_v24 = vpop.f32.mrf.mxu1 }
 0x981   : > { %v4701_v52 = vpop.f32.mrf.mxu2 }
 0x982   : > { %v4702_v61 = vadd.f32 %v4701_v52, %v4645_v24  ;;  %v10462_v24 = vld [vmem:[%s17217_s4 + $0x98] sm:$0xff] }
 0x983   : > { %4924 = vmatmul.f32.gmra.mxu0 %v10457_v17 }
 0x984   : > { %9731 = vmatmul.msk.f32.gmra.mxu3 %vm2364_vm7, %v4702_v61 }
 0x985   : > { %9748 = vmatmul.msk.f32.gmra.mxu1 %vm2207_vm4, %v10458_v43 }
 0x988   : > { %v14366_v27 = vpop.f32.mrf.mxu0  ;;  %v4648_v36 = vpop.f32.mrf.mxu1 }
 0x989   : > { %v4704_v55 = vpop.f32.mrf.mxu2 }
 0x98a   : > { %v4705_v21 = vadd.f32 %v4704_v55, %v4648_v36  ;;  %v10463_v36 = vld [vmem:[%s17217_s4 + $0x70] sm:$0xff]  ;;  %v10464_v55 = vld [vmem:[%s17217_s4 + $0xa8] sm:$0xff] }
 0x98b   : > { %4927 = vmatmul.f32.gmra.mxu0 %v10459_v4 }
 0x98c   : > { %9732 = vmatmul.msk.f32.gmra.mxu3 %vm2364_vm7, %v4705_v21 }
 0x98d   : > { %9749 = vmatmul.msk.f32.gmra.mxu1 %vm2207_vm4, %v10460_v33 }
 0x990   : > { %v14376_v3 = vpop.f32.mrf.mxu0  ;;  %v4651_v1 = vpop.f32.mrf.mxu1 }
 0x991   : > { %v4707_v48 = vpop.f32.mrf.mxu2 }
 0x992   : > { %v4708_v34 = vadd.f32 %v4707_v48, %v4651_v1  ;;  %v10465_v48 = vld [vmem:[%s17217_s4 + $0x80] sm:$0xff] }
 0x993   : > { %4930 = vmatmul.f32.gmra.mxu0 %v10461_v32 }
 0x994   : > { %9733 = vmatmul.msk.f32.gmra.mxu3 %vm2364_vm7, %v4708_v34  ;;  %v10466_v34 = vld [vmem:[%s17217_s4 + $0xb8] sm:$0xff] }
 0x995   : > { %9750 = vmatmul.msk.f32.gmra.mxu1 %vm2207_vm4, %v10462_v24 }
 0x998   : > { %v14386_v52 = vpop.f32.mrf.mxu0  ;;  %v4654_v61 = vpop.f32.mrf.mxu1 }
 0x999   : > { %v4710_v17 = vpop.f32.mrf.mxu2 }
 0x99a   : > { %v4711_v43 = vadd.f32 %v4710_v17, %v4654_v61  ;;  %v9812_v17 = vld [vmem:[%s17218_s5 + $0x60] sm:$0x3f] }
 0x99b   : > { %4933 = vmatmul.f32.gmra.mxu0 %v10463_v36  ;;  %v10467_v36 = vld [vmem:[%s17217_s4 + $0x90] sm:$0xff] }
 0x99c   : > { %9734 = vmatmul.msk.f32.gmra.mxu3 %vm2364_vm7, %v4711_v43  ;;  %9813 = vmatpush.msk.msrb.mxu0 %vm2404_vm6, %v9812_v17 }
 0x99d   : > { %9751 = vmatmul.msk.f32.gmra.mxu1 %vm2207_vm4, %v10464_v55  ;;  %v10468_v55 = vld [vmem:[%s17217_s4 + $0xc8] sm:$0xf] }
 0x9a0   : > { %v14396_v21 = vpop.f32.mrf.mxu0  ;;  %v4657_v4 = vpop.f32.mrf.mxu1 }
 0x9a1   : > { %v4713_v33 = vpop.f32.mrf.mxu2 }
 0x9a2   : > { %v4714_v1 = vadd.f32 %v4713_v33, %v4657_v4 }
 0x9a3   : > { %4936 = vmatmul.f32.gmra.mxu0 %v10465_v48 }
 0x9a4   : > { %9735 = vmatmul.msk.f32.gmra.mxu3 %vm2364_vm7, %v4714_v1 }
 0x9a5   : > { %9752 = vmatmul.msk.f32.gmra.mxu1 %vm2207_vm4, %v10466_v34  ;;  %v10469_v34 = vld [vmem:[%s17217_s4 + $0xa0] sm:$0xff] }
 0x9a8   : > { %v14406_v32 = vpop.f32.mrf.mxu0  ;;  %v4660_v24 = vpop.f32.mrf.mxu1 }
 0x9a9   : > { %v4716_v61 = vpop.f32.mrf.mxu2 }
 0x9aa   : > { %v4717_v43 = vadd.f32 %v4716_v61, %v4660_v24 }
 0x9ab   : > { %4939 = vmatmul.f32.gmra.mxu0 %v10467_v36  ;;  %v10470_v36 = vld [vmem:[%s17217_s4 + $0xb0] sm:$0xff] }
 0x9ac   : > { %9736 = vmatmul.msk.f32.gmra.mxu3 %vm2364_vm7, %v4717_v43 }
 0x9ad   : > { %9753 = vmatmul.msk.f32.gmra.mxu1 %vm2207_vm4, %v10468_v55 }
 0x9b0   : > { %v14420_v4 = vpop.f32.mrf.mxu0  ;;  %v4663_v33 = vpop.f32.mrf.mxu1 }
 0x9b1   : > { %v4719_v1 = vpop.f32.mrf.mxu2 }
 0x9b2   : > { %v4720_v48 = vadd.f32 %v4719_v1, %v4663_v33 }
 0x9b3   : > { %4942 = vmatmul.f32.gmra.mxu0 %v10469_v34 }
 0x9b4   : > { %9737 = vmatmul.msk.f32.gmra.mxu3 %vm2364_vm7, %v4720_v48  ;;  %v10471_v48 = vld [vmem:[%s17217_s4 + $0xc0] sm:$0xf] }
 0x9b8   : > { %v14426_v24 = vpop.f32.mrf.mxu0  ;;  %v4666_v61 = vpop.f32.mrf.mxu1 }
 0x9b9   : > { %v4722_v17 = vpop.f32.mrf.mxu2 }
 0x9ba   : > { %v4723_v43 = vadd.f32 %v4722_v17, %v4666_v61  ;;  %v10472_v17 = vld [vmem:[%s17217_s4 + $0xd8] sm:$0xff] }
 0x9bb   : > { %4945 = vmatmul.f32.gmra.mxu0 %v10470_v36 }
 0x9bc   : > { %9738 = vmatmul.msk.f32.gmra.mxu3 %vm2364_vm7, %v4723_v43  ;;  %v10473_v43 = vld [vmem:[%s17217_s4 + $0xd0] sm:$0xff] }
 0x9c0   : > { %v14432_v55 = vpop.f32.mrf.mxu0  ;;  %v4669_v33 = vpop.f32.mrf.mxu1 }
 0x9c1   : > { %v4725_v1 = vpop.f32.mrf.mxu2 }
 0x9c2   : > { %v4726_v40 = vadd.f32 %v4725_v1, %v4669_v33  ;;  %v10474_v33 = vld [vmem:[%s17217_s4 + $0xe8] sm:$0xff]  ;;  %v10475_v1 = vld [vmem:[%s17217_s4 + $0xe0] sm:$0xff] }
 0x9c3   : > { %4948 = vmatmul.f32.gmra.mxu0 %v10471_v48 }
 0x9c4   : > { %9739 = vmatmul.msk.f32.gmra.mxu3 %vm2364_vm7, %v4726_v40 }
 0x9c8   : > { %v14438_v34 = vpop.f32.mrf.mxu0  ;;  %v4969_v61 = vpop.f32.mrf.mxu1 }
 0x9cb   : > { %9770 = vmatmul.msk.f32.vlgmr.msra.gmra.mxu0 %vm2207_vm4, %v10472_v17 }
 0x9cc   : > { %5137 = vmatmul.f32.vlgmr.msrb.gmra.mxu3 %v10473_v43  ;;  %5796 = vmatpush.msra.mxu0 %v13703_v49  ;;  %v4380_v43 = vadd.f32 %v14202_v45, %v14057_v13 }
 0x9ce   : > { %5797 = vmatpush.msra.mxu0 %v13708_v35 }
 0x9d0   : > { %5798 = vmatpush.msra.mxu0 %v13713_v11  ;;  %v14450_v40 = vpop.f32.mrf.mxu0  ;;  %v4972_v36 = vpop.f32.mrf.mxu1  ;;  %v10476_v11 = vld [vmem:[%s17217_s4 + $0xf8] sm:$0xff] }
 0x9d2   : > { %5799 = vmatpush.msra.mxu0 %v13720_v0  ;;  %v10477_v0 = vld [vmem:[%s17217_s4 + $0xf0] sm:$0xff] }
 0x9d3   : > { %9771 = vmatmul.msk.f32.gmra.mxu0 %vm2207_vm4, %v10474_v33  ;;  %v4605_v33 = vadd.f32 %v14366_v27, %v4380_v43  ;;  %v10485_v27 = vld [vmem:[%s17217_s4 + $0x138] sm:$0xff]  ;;  %v10491_v43 = vld [vmem:[%s17217_s4 + $0x168] sm:$0xff] }
 0x9d4   : > { %5140 = vmatmul.f32.gmra.mxu3 %v10475_v1  ;;  %5800 = vmatpush.msra.mxu0 %v13728_v7 }
 0x9d6   : > { %5801 = vmatpush.msra.mxu0 %v13737_v47 }
 0x9d8   : > { %5802 = vmatpush.msra.mxu0 %v13742_v23  ;;  %v14463_v49 = vpop.f32.mrf.mxu0  ;;  %v4975_v35 = vpop.f32.mrf.mxu1  ;;  %v4378_v23 = vadd.f32 %v14177_v42, %v14035_v12 }
 0x9da   : > { %5803 = vmatpush.msra.mxu0 %v13749_v8  ;;  %v10478_v8 = vld [vmem:[%s17217_s4 + $0x108] sm:$0xff] }
 0x9db   : > { %9772 = vmatmul.msk.f32.gmra.mxu0 %vm2207_vm4, %v10476_v11 }
 0x9dc   : > { %5143 = vmatmul.f32.gmra.mxu3 %v10477_v0  ;;  %5804 = vmatpush.msra.mxu0 %v13757_v51  ;;  %v4381_v0 = vadd.f32 %v14212_v28, %v14068_v41  ;;  %v4382_v41 = vadd.f32 %v14222_v39, %v14079_v10  ;;  %v10486_v28 = vld [vmem:[%s17217_s4 + $0x140] sm:$0xff]  ;;  %v4383_v10 = vadd.f32 %v14232_v46, %v14090_v16  ;;  %v10488_v39 = vld [vmem:[%s17217_s4 + $0x150] sm:$0xff]  ;;  %v9841_v16 = vld [vmem:[%s17218_s5 + $0x68] sm:$0x3f] }
 0x9dd   : > { %9842 = vmatpush.msk.msrb.mxu3 %vm2404_vm6, %v9841_v16  ;;  %v4384_v46 = vadd.f32 %v14242_v44, %v14105_v2  ;;  %v4385_v2 = vadd.f32 %v14256_v31, %v14112_v30  ;;  %v10492_v44 = vld [vmem:[%s17217_s4 + $0x170] sm:$0xff]  ;;  %v10497_v16 = vld [vmem:[%s17217_s4 + $0x198] sm:$0xf] }
 0x9de   : > { %5805 = vmatpush.msra.mxu0 %v13766_v19  ;;  %v10479_v19 = vld [vmem:[%s17217_s4 + $0x100] sm:$0xff] }
 0x9e0   : > { %5806 = vmatpush.msra.mxu0 %v13771_v29  ;;  %v4913_v7 = vpop.f32.mrf.mxu0  ;;  %v4603_v29 = vadd.f32 %v14346_v60, %v4378_v23 }
 0x9e1   : > { %v4970_v47 = vadd.f32 %v4969_v61, %v4913_v7  ;;  %v4379_v61 = vadd.f32 %v14192_v57, %v14046_v15  ;;  %v10484_v7 = vld [vmem:[%s17217_s4 + $0x130] sm:$0xff] }
 0x9e2   : > { %5807 = vmatpush.msra.mxu0 %v13776_v20  ;;  %v4978_v51 = vpop.f32.mrf.mxu1 }
 0x9e3   : > { %9756 = vmatmul.msk.f32.vlgmr.msrb.gmra.mxu2 %vm2364_vm7, %v4970_v47  ;;  %9773 = vmatmul.msk.f32.gmra.mxu0 %vm2207_vm4, %v10478_v8  ;;  %v4606_v47 = vadd.f32 %v14376_v3, %v4381_v0  ;;  %v10487_v3 = vld [vmem:[%s17217_s4 + $0x148] sm:$0xff] }
 0x9e4   : > { %5146 = vmatmul.f32.gmra.mxu3 %v10479_v19  ;;  %9827 = vmatpush.msk.msrb.mxu2 %vm2247_vm3, %v13997_v26 }
 0x9e5   : > { %5808 = vmatpush.msra.mxu0 %v13787_v58  ;;  %v10480_v58 = vld [vmem:[%s17217_s4 + $0x110] sm:$0xff] }
 0x9e6   : > { %5642 = vmatpush.msrb.mxu2 %v14011_v9  ;;  %v4789_v20 = vpop.f32.mrf.mxu3 }
 0x9e7   : > { %5809 = vmatpush.msra.mxu0 %v13795_v56  ;;  %v14493_v12 = vadd.f32 %v4789_v20, %v4603_v29  ;;  %v10481_v56 = vld [vmem:[%s17217_s4 + $0x118] sm:$0xff]  ;;  %v4607_v20 = vadd.f32 %v14386_v52, %v4382_v41 }
 0x9e8   : > { %v4916_v42 = vpop.f32.mrf.mxu0  ;;  %v17484_v41 = vld [vmem:[#allocation53_spill] sm:$0xff] }
 0x9e9   : > { %5810 = vmatpush.msra.mxu0 %v13807_v37  ;;  %v4973_v48 = vadd.f32 %v4972_v36, %v4916_v42  ;;  %v4604_v37 = vadd.f32 %v14356_v25, %v4379_v61  ;;  %v10482_v36 = vld [vmem:[%s17217_s4 + $0x120] sm:$0xff]  ;;  %v10483_v25 = vld [vmem:[%s17217_s4 + $0x128] sm:$0xff] }
 0x9ea   : > { %v4981_v17 = vpop.f32.mrf.mxu1 }
 0x9eb   : > { %5811 = vmatpush.msra.mxu0 %v13812_v38  ;;  %9757 = vmatmul.msk.f32.gmra.mxu2 %vm2364_vm7, %v4973_v48 }
 0x9ec   : > { %5149 = vmatmul.f32.gmra.mxu3 %v10480_v58  ;;  %9774 = vmatmul.msk.f32.gmra.mxu0 %vm2207_vm4, %v10481_v56  ;;  %v10489_v56 = vld [vmem:[%s17217_s4 + $0x158] sm:$0xff] }
 0x9ee   : > { %v4792_v60 = vpop.f32.mrf.mxu3 }
 0x9ef   : > { %v14508_v15 = vadd.f32 %v4792_v60, %v4604_v37  ;;  %v4608_v37 = vadd.f32 %v14396_v21, %v4383_v10  ;;  %v10490_v21 = vld [vmem:[%s17217_s4 + $0x160] sm:$0xff] }
 0x9f0   : > { %v4919_v38 = vpop.f32.mrf.mxu0 }
 0x9f1   : > { %v4976_v57 = vadd.f32 %v4975_v35, %v4919_v38 }
 0x9f2   : > { %v4984_v13 = vpop.f32.mrf.mxu1 }
 0x9f3   : > { %9758 = vmatmul.msk.f32.gmra.mxu2 %vm2364_vm7, %v4976_v57 }
 0x9f4   : > { %5152 = vmatmul.f32.gmra.mxu3 %v10482_v36  ;;  %9775 = vmatmul.msk.f32.gmra.mxu0 %vm2207_vm4, %v10483_v25  ;;  %v4609_v36 = vadd.f32 %v14406_v32, %v4384_v46  ;;  %v10493_v32 = vld [vmem:[%s17217_s4 + $0x178] sm:$0xff] }
 0x9f6   : > { %v4795_v1 = vpop.f32.mrf.mxu3 }
 0x9f7   : > { %v14521_v35 = vadd.f32 %v4795_v1, %v4605_v33 }
 0x9f8   : > { %v4922_v11 = vpop.f32.mrf.mxu0 }
 0x9f9   : > { %v4979_v45 = vadd.f32 %v4978_v51, %v4922_v11 }
 0x9fa   : > { %v4987_v29 = vpop.f32.mrf.mxu1 }
 0x9fb   : > { %9759 = vmatmul.msk.f32.gmra.mxu2 %vm2364_vm7, %v4979_v45  ;;  %v4610_v45 = vadd.f32 %v14420_v4, %v4385_v2  ;;  %v10494_v4 = vld [vmem:[%s17217_s4 + $0x180] sm:$0xff] }
 0x9fc   : > { %5155 = vmatmul.f32.gmra.mxu3 %v10484_v7  ;;  %9776 = vmatmul.msk.f32.gmra.mxu0 %vm2207_vm4, %v10485_v27  ;;  %v17481_v7 = vld [vmem:[#allocation16_spill] sm:$0xff]  ;;  %v17482_v27 = vld [vmem:[#allocation41_spill] sm:$0xff] }
 0x9ff   : > { %v4798_v23 = vpop.f32.mrf.mxu3 }
 0xa00   : > { %v14534_v8 = vadd.f32 %v4798_v23, %v4606_v47  ;;  %v4925_v19 = vpop.f32.mrf.mxu0  ;;  %v1705_v47 = vadd.f32 %v17482_v27, %v17481_v7 }
 0xa01   : > { %v4982_v51 = vadd.f32 %v4981_v17, %v4925_v19 }
 0xa02   : > { %v4990_v52 = vpop.f32.mrf.mxu1 }
 0xa03   : > { %9760 = vmatmul.msk.f32.gmra.mxu2 %vm2364_vm7, %v4982_v51  ;;  %v17483_v51 = vld [vmem:[#allocation56_spill] sm:$0xff] }
 0xa04   : > { %5158 = vmatmul.f32.gmra.mxu3 %v10486_v28  ;;  %9777 = vmatmul.msk.f32.gmra.mxu0 %vm2207_vm4, %v10487_v3  ;;  %v4386_v3 = vadd.f32 %v14266_v50, %v14119_v22 }
 0xa07   : > { %v4801_v42 = vpop.f32.mrf.mxu3 }
 0xa08   : > { %v14547_v48 = vadd.f32 %v4801_v42, %v4607_v20  ;;  %v4928_v61 = vpop.f32.mrf.mxu0  ;;  %v10495_v20 = vld [vmem:[%s17217_s4 + $0x188] sm:$0xff]  ;;  %v17485_v42 = vld [vmem:[#allocation34_spill] sm:$0xff] }
 0xa09   : > { %v4985_v58 = vadd.f32 %v4984_v13, %v4928_v61 }
 0xa0a   : > { %v4993_v25 = vpop.f32.mrf.mxu1 }
 0xa0b   : > { %9761 = vmatmul.msk.f32.gmra.mxu2 %vm2364_vm7, %v4985_v58  ;;  %v4611_v58 = vadd.f32 %v14426_v24, %v4386_v3  ;;  %v10496_v24 = vld [vmem:[%s17217_s4 + $0x190] sm:$0xf] }
 0xa0c   : > { %5161 = vmatmul.f32.gmra.mxu3 %v10488_v39  ;;  %9778 = vmatmul.msk.f32.gmra.mxu0 %vm2207_vm4, %v10489_v56  ;;  %v17486_v39 = vld [vmem:[#allocation78_spill] sm:$0xff] }
 0xa0f   : > { %v4804_v60 = vpop.f32.mrf.mxu3 }
 0xa10   : > { %v14560_v17 = vadd.f32 %v4804_v60, %v4608_v37  ;;  %v4931_v38 = vpop.f32.mrf.mxu0  ;;  %v17487_v60 = vld [vmem:[#allocation84_spill] sm:$0xff] }
 0xa11   : > { %v4988_v57 = vadd.f32 %v4987_v29, %v4931_v38  ;;  %v1797_v29 = vadd.f32 %v17483_v51, %v1705_v47  ;;  %v17490_v47 = vld [vmem:[#allocation89_spill] sm:$0xff] }
 0xa12   : > { %v4996_v31 = vpop.f32.mrf.mxu1 }
 0xa13   : > { %9762 = vmatmul.msk.f32.gmra.mxu2 %vm2364_vm7, %v4988_v57  ;;  %v1889_v28 = vadd.f32 %v17484_v41, %v1797_v29  ;;  %v4387_v57 = vadd.f32 %v14276_v62, %v14126_v5  ;;  %v6052_v62 = vrot.slane %v13985_v6, 2  ;;  %v4389_v29 = vadd.f32 %v14292_v63, %v14150_v54 }
 0xa14   : > { %5164 = vmatmul.f32.gmra.mxu3 %v10490_v21  ;;  %9779 = vmatmul.msk.f32.gmra.mxu0 %vm2207_vm4, %v10491_v43 }
 0xa15   : > { %v1981_v61 = vadd.f32 %v17485_v42, %v1889_v28  ;;  %v4612_v46 = vadd.f32 %v14432_v55, %v4387_v57  ;;  %v17492_v28 = vld [vmem:[#allocation92_spill] sm:$0xff] }
 0xa16   : > { %v6042_v3 = vrot.slane %v17492_v28, 2 }
 0xa17   : > { %v4807_v33 = vpop.f32.mrf.mxu3  ;;  %v2073_v56 = vadd.f32 %v17486_v39, %v1981_v61  ;;  %v17493_v61 = vld [vmem:[#allocation93_spill] sm:$0xff] }
 0xa18   : > { %v14577_v1 = vadd.f32 %v4807_v33, %v4609_v36  ;;  %v4934_v11 = vpop.f32.mrf.mxu0  ;;  %v4388_v33 = vadd.f32 %v14282_v53, %v14136_v18  ;;  %v17489_v53 = vld [vmem:[#allocation19_spill] sm:$0xff]  ;;  %v6040_v54 = vrot.slane %v17493_v61, 2 }
 0xa19   : > { %v4991_v13 = vadd.f32 %v4990_v52, %v4934_v11  ;;  %v14613_v38 = vadd.f32 %v17487_v60, %v2073_v56  ;;  %v10498_v11 = vld [vmem:[%s17217_s4 + $0x1a8] sm:$0xff] }
 0xa1a   : > { %v4999_v37 = vpop.f32.mrf.mxu1  ;;  %v14682_v39 = vsel %vm2404_vm6, %v6040_v54, %v6042_v3  ;;  %v17495_v60 = vld [vmem:[#allocation91_spill] sm:$0xff] }
 0xa1b   : > { %9763 = vmatmul.msk.f32.gmra.mxu2 %vm2364_vm7, %v4991_v13  ;;  %17488 = vst [vmem:[#allocation80_spill] sm:$0xff] %v14613_v38  ;;  %v6050_v13 = vrot.slane %v17478_v14, 2  ;;  %v6036_v57 = vrot.slane %v17495_v60, 2 }
 0xa1c   : > { %5167 = vmatmul.f32.gmra.mxu3 %v10492_v44  ;;  %9780 = vmatmul.msk.f32.gmra.mxu0 %vm2207_vm4, %v10493_v32  ;;  %v4613_v44 = vadd.f32 %v14438_v34, %v4388_v33  ;;  %v6048_v32 = vrot.slane %v17489_v53, 2 }
 0xa1d   : > { %v14645_v18 = vsel %vm2404_vm6, %v6050_v13, %v6052_v62 }
 0xa1e   : > { %v14652_v7 = vsel %vm2404_vm6, %v6048_v32, %v6050_v13 }
 0xa1f   : > { %v4810_v0 = vpop.f32.mrf.mxu3 }
 0xa20   : > { %v14592_v23 = vadd.f32 %v4810_v0, %v4610_v45  ;;  %v4937_v30 = vpop.f32.mrf.mxu0 }
 0xa21   : > { %v4994_v19 = vadd.f32 %v4993_v25, %v4937_v30  ;;  %v6054_v25 = vrot.slane %v14613_v38, 2  ;;  %v6046_v30 = vrot.slane %v17490_v47, 2 }
 0xa22   : > { %v5002_v2 = vpop.f32.mrf.mxu1 }
 0xa23   : > { %9764 = vmatmul.msk.f32.gmra.mxu2 %vm2364_vm7, %v4994_v19  ;;  %v14639_v55 = vsel %vm2404_vm6, %v6052_v62, %v6054_v25  ;;  %v14657_v34 = vsel %vm2404_vm6, %v6046_v30, %v6048_v32  ;;  %v17491_v19 = vld [vmem:[#allocation90_spill] sm:$0xff]  ;;  %v17499_v32 = vld [vmem:[#allocation47_spill] sm:$0xff] }
 0xa24   : > { %5170 = vmatmul.f32.gmra.mxu3 %v10494_v4  ;;  %9781 = vmatmul.msk.f32.gmra.mxu0 %vm2207_vm4, %v10495_v20  ;;  %v6044_v51 = vrot.slane %v17491_v19, 2  ;;  %v10499_v4 = vld [vmem:[%s17217_s4 + $0x1b8] sm:$0xff]  ;;  %v4614_v20 = vadd.f32 %v14450_v40, %v4389_v29 }
 0xa26   : > { %v14665_v41 = vsel %vm2404_vm6, %v6044_v51, %v6046_v30  ;;  %v14675_v42 = vsel %vm2404_vm6, %v6042_v3, %v6044_v51  ;;  %v17500_v30 = vld [vmem:[#allocation35_spill] sm:$0xff]  ;;  %v17501_v3 = vld [vmem:[#allocation82_spill] sm:$0xff] }
 0xa27   : > { %v4813_v10 = vpop.f32.mrf.mxu3  ;;  %v10501_v51 = vld [vmem:[%s17217_s4 + $0x1a0] sm:$0xff] }
 0xa28   : > { %v14609_v52 = vadd.f32 %v4813_v10, %v4611_v58  ;;  %v4940_v22 = vpop.f32.mrf.mxu0 }
 0xa29   : > { %v4997_v50 = vadd.f32 %v4996_v31, %v4940_v22  ;;  %v17494_v22 = vld [vmem:[#allocation94_spill] sm:$0xff] }
 0xa2a   : > { %v5005_v63 = vpop.f32.mrf.mxu1 }
 0xa2b   : > { %9765 = vmatmul.msk.f32.gmra.mxu2 %vm2364_vm7, %v4997_v50  ;;  %v6038_v50 = vrot.slane %v17494_v22, 2 }
 0xa2c   : > { %5173 = vmatmul.f32.gmra.mxu3 %v10496_v24  ;;  %9782 = vmatmul.msk.f32.gmra.mxu0 %vm2207_vm4, %v10497_v16  ;;  %v17496_v24 = vld [vmem:[#allocation71_spill] sm:$0xff] }
 0xa2d   : > { %v4390_v16 = vadd.f32 %v17496_v24, %v14164_v59 }
 0xa2f   : > { %v4816_v21 = vpop.f32.mrf.mxu3  ;;  %v4615_v62 = vadd.f32 %v14463_v49, %v4390_v16 }
 0xa30   : > { %v14625_v43 = vadd.f32 %v4816_v21, %v4612_v46  ;;  %v4943_v36 = vpop.f32.mrf.mxu0  ;;  %v14695_v46 = vsel %vm2404_vm6, %v6036_v57, %v6038_v50  ;;  %v17497_v21 = vld [vmem:[#allocation36_spill] sm:$0xff] }
 0xa31   : > { %v5000_v5 = vadd.f32 %v4999_v37, %v4943_v36  ;;  %v14687_v37 = vsel %vm2404_vm6, %v6038_v50, %v6040_v54  ;;  %v6034_v36 = vrot.slane %v17497_v21, 2 }
 0xa33   : > { %9766 = vmatmul.msk.f32.gmra.mxu2 %vm2364_vm7, %v5000_v5  ;;  %v10500_v5 = vld [vmem:[%s17217_s4 + $0x1c8] sm:$0xff]  ;;  %v14705_v33 = vsel %vm2404_vm6, %v6034_v36, %v6036_v57 }
 0xa34   : > { %9799 = vmatmul.msk.f32.vlgmr.msra.gmra.mxu3 %vm2207_vm4, %v10498_v11  ;;  %v17498_v11 = vld [vmem:[#allocation44_spill] sm:$0xff]  ;;  %v17503_v57 = vld [vmem:[#allocation23_spill] sm:$0xff] }
 0xa35   : > { %6077 = vmatpush.msra.mxu3 %v14639_v55  ;;  %v6032_v59 = vrot.slane %v17498_v11, 2  ;;  %v6023_v24 = vrot.slane %v17503_v57, 2 }
 0xa37   : > { %6078 = vmatpush.msra.mxu3 %v14645_v18  ;;  %v4819_v45 = vpop.f32.mrf.mxu3 }
 0xa38   : > { %v14649_v0 = vadd.f32 %v4819_v45, %v4613_v44  ;;  %v4946_v27 = vpop.f32.mrf.mxu0  ;;  %v14712_v44 = vsel %vm2404_vm6, %v6032_v59, %v6034_v36  ;;  %v6030_v45 = vrot.slane %v17499_v32, 2 }
 0xa39   : > { %6079 = vmatpush.msra.mxu3 %v14652_v7  ;;  %v5003_v31 = vadd.f32 %v5002_v2, %v4946_v27 }
 0xa3a   : > { %v14717_v49 = vsel %vm2404_vm6, %v6030_v45, %v6032_v59 }
 0xa3b   : > { %6080 = vmatpush.msra.mxu3 %v14657_v34  ;;  %9767 = vmatmul.msk.f32.gmra.mxu2 %vm2364_vm7, %v5003_v31  ;;  %v6028_v31 = vrot.slane %v17500_v30, 2 }
 0xa3c   : > { %9800 = vmatmul.msk.f32.gmra.mxu3 %vm2207_vm4, %v10499_v4  ;;  %v6026_v4 = vrot.slane %v17501_v3, 2 }
 0xa3d   : > { %6081 = vmatpush.msra.mxu3 %v14665_v41  ;;  %v14725_v29 = vsel %vm2404_vm6, %v6028_v31, %v6030_v45 }
 0xa3e   : > { %v14734_v54 = vsel %vm2404_vm6, %v6026_v4, %v6028_v31 }
 0xa3f   : > { %6082 = vmatpush.msra.mxu3 %v14675_v42  ;;  %v4822_v58 = vpop.f32.mrf.mxu3 }
 0xa40   : > { %v14679_v10 = vadd.f32 %v4822_v58, %v4614_v20  ;;  %v4949_v56 = vpop.f32.mrf.mxu0  ;;  %v10502_v20 = vld [vmem:[%s17217_s4 + $0x1d8] sm:$0xff] }
 0xa41   : > { %6083 = vmatpush.msra.mxu3 %v14682_v39  ;;  %v5006_v40 = vadd.f32 %v5005_v63, %v4949_v56  ;;  %v17502_v63 = vld [vmem:[#allocation11_spill] sm:$0xff] }
 0xa42   : > { %v6024_v58 = vrot.slane %v17502_v63, 2 }
 0xa43   : > { %6084 = vmatpush.msra.mxu3 %v14687_v37  ;;  %9768 = vmatmul.msk.f32.gmra.mxu2 %vm2364_vm7, %v5006_v40 }
 0xa44   : > { %9801 = vmatmul.msk.f32.gmra.mxu3 %vm2207_vm4, %v10500_v5  ;;  %v14739_v40 = vsel %vm2404_vm6, %v6024_v58, %v6026_v4  ;;  %v14745_v36 = vsel %vm2404_vm6, %v6023_v24, %v6024_v58  ;;  %v10503_v5 = vld [vmem:[%s17217_s4 + $0x1b0] sm:$0xff]  ;;  %v10509_v24 = vld [vmem:[%s17217_s4 + $0x1e0] sm:$0xff] }
 0xa45   : > { %6085 = vmatpush.msra.mxu3 %v14695_v46 }
 0xa47   : > { %6086 = vmatpush.msra.mxu3 %v14705_v33  ;;  %v4825_v13 = vpop.f32.mrf.mxu3 }
 0xa48   : > { %v14709_v2 = vadd.f32 %v4825_v13, %v4615_v62  ;;  %v5194_v27 = vpop.f32.mrf.mxu0  ;;  %v10504_v62 = vld [vmem:[%s17217_s4 + $0x1e8] sm:$0xff] }
 0xa49   : > { %6087 = vmatpush.msra.mxu3 %v14712_v44 }
 0xa4b   : > { %6088 = vmatpush.msra.mxu3 %v14717_v49  ;;  %5362 = vmatmul.f32.vlgmr.msra.gmra.mxu2 %v10501_v51 }
 0xa4c   : > { %9802 = vmatmul.msk.f32.gmra.mxu3 %vm2207_vm4, %v10502_v20  ;;  %v10508_v20 = vld [vmem:[%s17217_s4 + $0x208] sm:$0xff] }
 0xa4d   : > { %6089 = vmatpush.msra.mxu3 %v14725_v29 }
 0xa4f   : > { %6090 = vmatpush.msra.mxu3 %v14734_v54  ;;  %v5138_v56 = vpop.f32.mrf.mxu3 }
 0xa50   : > { %v5195_v50 = vadd.f32 %v5194_v27, %v5138_v56  ;;  %v5197_v16 = vpop.f32.mrf.mxu0  ;;  %v10506_v27 = vld [vmem:[%s17217_s4 + $0x1f8] sm:$0xff] }
 0xa51   : > { %6091 = vmatpush.msra.mxu3 %v14739_v40 }
 0xa52   : > { %9785 = vmatmul.msk.f32.vlgmr.msrb.gmra.mxu1 %vm2364_vm7, %v5195_v50 }
 0xa53   : > { %9856 = vmatpush.msk.msrb.mxu1 %vm2247_vm3, %v13997_v26  ;;  %6092 = vmatpush.msra.mxu3 %v14745_v36  ;;  %v10505_v26 = vld [vmem:[%s17217_s4 + $0x1c0] sm:$0xff] }
 0xa54   : > { %5365 = vmatmul.f32.gmra.mxu2 %v10503_v5  ;;  %9803 = vmatmul.msk.f32.gmra.mxu3 %vm2207_vm4, %v10504_v62 }
 0xa55   : > { %5867 = vmatpush.msrb.mxu1 %v14011_v9  ;;  %v10507_v9 = vld [vmem:[%s17217_s4 + $0x1d0] sm:$0xff] }
 0xa57   : > { %v5141_v59 = vpop.f32.mrf.mxu3 }
 0xa58   : > { %v5198_v13 = vadd.f32 %v5197_v16, %v5141_v59  ;;  %v5200_v45 = vpop.f32.mrf.mxu0  ;;  %v10510_v16 = vld [vmem:[%s17217_s4 + $0x218] sm:$0xff] }
 0xa5a   : > { %9786 = vmatmul.msk.f32.gmra.mxu1 %vm2364_vm7, %v5198_v13 }
 0xa5c   : > { %5368 = vmatmul.f32.gmra.mxu2 %v10505_v26  ;;  %9804 = vmatmul.msk.f32.gmra.mxu3 %vm2207_vm4, %v10506_v27  ;;  %v10512_v26 = vld [vmem:[%s17217_s4 + $0x228] sm:$0xff] }
 0xa5f   : > { %v5144_v31 = vpop.f32.mrf.mxu3 }
 0xa60   : > { %v5201_v51 = vadd.f32 %v5200_v45, %v5144_v31  ;;  %v5203_v4 = vpop.f32.mrf.mxu0  ;;  %v10511_v45 = vld [vmem:[%s17217_s4 + $0x1f0] sm:$0xff] }
 0xa62   : > { %9787 = vmatmul.msk.f32.gmra.mxu1 %vm2364_vm7, %v5201_v51 }
 0xa64   : > { %5371 = vmatmul.f32.gmra.mxu2 %v10507_v9  ;;  %9805 = vmatmul.msk.f32.gmra.mxu3 %vm2207_vm4, %v10508_v20  ;;  %v10513_v9 = vld [vmem:[%s17217_s4 + $0x200] sm:$0xff]  ;;  %v10514_v20 = vld [vmem:[%s17217_s4 + $0x238] sm:$0xff] }
 0xa66   : > { %v5069_v63 = vpop.f32.mrf.mxu2 }
 0xa67   : > { %v14775_v58 = vadd.f32 %v5069_v63, %v14493_v12  ;;  %v5147_v56 = vpop.f32.mrf.mxu3 }
 0xa68   : > { %v5204_v50 = vadd.f32 %v5203_v4, %v5147_v56 }
 0xa69   : > { %v5206_v57 = vpop.f32.mrf.mxu0 }
 0xa6a   : > { %9788 = vmatmul.msk.f32.gmra.mxu1 %vm2364_vm7, %v5204_v50 }
 0xa6c   : > { %5374 = vmatmul.f32.gmra.mxu2 %v10509_v24  ;;  %9806 = vmatmul.msk.f32.gmra.mxu3 %vm2207_vm4, %v10510_v16  ;;  %v10515_v24 = vld [vmem:[%s17217_s4 + $0x210] sm:$0xff]  ;;  %v10516_v16 = vld [vmem:[%s17217_s4 + $0x248] sm:$0xff] }
 0xa6e   : > { %v5072_v5 = vpop.f32.mrf.mxu2 }
 0xa6f   : > { %v14786_v12 = vadd.f32 %v5072_v5, %v14508_v15  ;;  %v5150_v62 = vpop.f32.mrf.mxu3 }
 0xa70   : > { %v5207_v59 = vadd.f32 %v5206_v57, %v5150_v62 }
 0xa71   : > { %v5209_v13 = vpop.f32.mrf.mxu0 }
 0xa72   : > { %9789 = vmatmul.msk.f32.gmra.mxu1 %vm2364_vm7, %v5207_v59 }
 0xa74   : > { %5377 = vmatmul.f32.gmra.mxu2 %v10511_v45  ;;  %9807 = vmatmul.msk.f32.gmra.mxu3 %vm2207_vm4, %v10512_v26  ;;  %v10517_v45 = vld [vmem:[%s17217_s4 + $0x220] sm:$0xff]  ;;  %v10518_v26 = vld [vmem:[%s17217_s4 + $0x258] sm:$0xff] }
 0xa76   : > { %v5075_v27 = vpop.f32.mrf.mxu2 }
 0xa77   : > { %v14797_v15 = vadd.f32 %v5075_v27, %v14521_v35  ;;  %v5153_v31 = vpop.f32.mrf.mxu3 }
 0xa78   : > { %v5210_v51 = vadd.f32 %v5209_v13, %v5153_v31 }
 0xa79   : > { %v5212_v4 = vpop.f32.mrf.mxu0 }
 0xa7a   : > { %9790 = vmatmul.msk.f32.gmra.mxu1 %vm2364_vm7, %v5210_v51 }
 0xa7c   : > { %5380 = vmatmul.f32.gmra.mxu2 %v10513_v9  ;;  %9808 = vmatmul.msk.f32.gmra.mxu3 %vm2207_vm4, %v10514_v20  ;;  %v9870_v9 = vld [vmem:[%s17218_s5 + $0x70] sm:$0x3f] }
 0xa7d   : > { %9871 = vmatpush.msk.msra.mxu2 %vm2404_vm6, %v9870_v9  ;;  %v10519_v20 = vld [vmem:[%s17217_s4 + $0x230] sm:$0xff] }
 0xa7e   : > { %v5078_v63 = vpop.f32.mrf.mxu2 }
 0xa7f   : > { %v14808_v35 = vadd.f32 %v5078_v63, %v14534_v8  ;;  %v5156_v56 = vpop.f32.mrf.mxu3 }
 0xa80   : > { %v5213_v50 = vadd.f32 %v5212_v4, %v5156_v56 }
 0xa81   : > { %v5215_v57 = vpop.f32.mrf.mxu0 }
 0xa82   : > { %9791 = vmatmul.msk.f32.gmra.mxu1 %vm2364_vm7, %v5213_v50 }
 0xa84   : > { %5383 = vmatmul.f32.gmra.mxu2 %v10515_v24  ;;  %9809 = vmatmul.msk.f32.gmra.mxu3 %vm2207_vm4, %v10516_v16  ;;  %v10521_v16 = vld [vmem:[%s17217_s4 + $0x240] sm:$0xff] }
 0xa86   : > { %v5081_v5 = vpop.f32.mrf.mxu2 }
 0xa87   : > { %v14819_v8 = vadd.f32 %v5081_v5, %v14547_v48  ;;  %v5159_v62 = vpop.f32.mrf.mxu3 }
 0xa88   : > { %v5216_v59 = vadd.f32 %v5215_v57, %v5159_v62 }
 0xa89   : > { %v5218_v13 = vpop.f32.mrf.mxu0 }
 0xa8a   : > { %9792 = vmatmul.msk.f32.gmra.mxu1 %vm2364_vm7, %v5216_v59 }
 0xa8c   : > { %5386 = vmatmul.f32.gmra.mxu2 %v10517_v45  ;;  %9810 = vmatmul.msk.f32.gmra.mxu3 %vm2207_vm4, %v10518_v26  ;;  %v10522_v45 = vld [vmem:[%s17217_s4 + $0x250] sm:$0xff] }
 0xa8e   : > { %v5084_v27 = vpop.f32.mrf.mxu2 }
 0xa8f   : > { %v14830_v48 = vadd.f32 %v5084_v27, %v14560_v17  ;;  %v5162_v31 = vpop.f32.mrf.mxu3  ;;  %v10520_v17 = vld [vmem:[%s17217_s4 + $0x268] sm:$0xf] }
 0xa90   : > { %v5219_v51 = vadd.f32 %v5218_v13, %v5162_v31 }
 0xa91   : > { %v5221_v4 = vpop.f32.mrf.mxu0 }
 0xa92   : > { %9793 = vmatmul.msk.f32.gmra.mxu1 %vm2364_vm7, %v5219_v51 }
 0xa94   : > { %5389 = vmatmul.f32.gmra.mxu2 %v10519_v20  ;;  %9811 = vmatmul.msk.f32.gmra.mxu3 %vm2207_vm4, %v10520_v17 }
 0xa96   : > { %v5087_v63 = vpop.f32.mrf.mxu2 }
 0xa97   : > { %v14845_v56 = vadd.f32 %v5087_v63, %v14577_v1  ;;  %v5165_v50 = vpop.f32.mrf.mxu3 }
 0xa98   : > { %v5222_v57 = vadd.f32 %v5221_v4, %v5165_v50 }
 0xa99   : > { %v5224_v24 = vpop.f32.mrf.mxu0 }
 0xa9a   : > { %9794 = vmatmul.msk.f32.gmra.mxu1 %vm2364_vm7, %v5222_v57 }
 0xa9c   : > { %5392 = vmatmul.f32.gmra.mxu2 %v10521_v16  ;;  %v10526_v16 = vld [vmem:[%s17217_s4 + $0x288] sm:$0xff] }
 0xa9e   : > { %v5090_v5 = vpop.f32.mrf.mxu2 }
 0xa9f   : > { %v14852_v62 = vadd.f32 %v5090_v5, %v14592_v23  ;;  %v5168_v59 = vpop.f32.mrf.mxu3  ;;  %v10523_v23 = vld [vmem:[%s17217_s4 + $0x260] sm:$0xf] }
 0xaa0   : > { %v5225_v13 = vadd.f32 %v5224_v24, %v5168_v59  ;;  %v10525_v24 = vld [vmem:[%s17217_s4 + $0x270] sm:$0xff]  ;;  %v17504_v5 = vld [vmem:[#allocation18_spill] sm:$0xff]  ;;  %v17505_v59 = vld [vmem:[#allocation43_spill] sm:$0xff] }
 0xaa1   : > { %v5227_v1 = vpop.f32.mrf.mxu0 }
 0xaa2   : > { %9795 = vmatmul.msk.f32.gmra.mxu1 %vm2364_vm7, %v5225_v13  ;;  %v1708_v13 = vadd.f32 %v17505_v59, %v17504_v5  ;;  %v17510_v5 = vld [vmem:[#allocation83_spill] sm:$0xff] }
 0xaa4   : > { %5395 = vmatmul.f32.gmra.mxu2 %v10522_v45 }
 0xaa6   : > { %v5093_v26 = vpop.f32.mrf.mxu2 }
 0xaa7   : > { %v14859_v27 = vadd.f32 %v5093_v26, %v14609_v52  ;;  %v5171_v31 = vpop.f32.mrf.mxu3  ;;  %v10524_v52 = vld [vmem:[%s17217_s4 + $0x278] sm:$0xff] }
 0xaa8   : > { %v5228_v51 = vadd.f32 %v5227_v1, %v5171_v31  ;;  %v17506_v26 = vld [vmem:[#allocation58_spill] sm:$0xff] }
 0xaa9   : > { %v5230_v4 = vpop.f32.mrf.mxu0  ;;  %v1800_v31 = vadd.f32 %v17506_v26, %v1708_v13  ;;  %v10530_v13 = vld [vmem:[%s17217_s4 + $0x2a8] sm:$0xff] }
 0xaaa   : > { %9796 = vmatmul.msk.f32.gmra.mxu1 %vm2364_vm7, %v5228_v51  ;;  %v10527_v51 = vld [vmem:[%s17217_s4 + $0x280] sm:$0xff] }
 0xaac   : > { %5398 = vmatmul.f32.gmra.mxu2 %v10523_v23  ;;  %v17507_v23 = vld [vmem:[#allocation55_spill] sm:$0xff] }
 0xaae   : > { %v5096_v9 = vpop.f32.mrf.mxu2 }
 0xaaf   : > { %v14866_v20 = vadd.f32 %v5096_v9, %v14625_v43  ;;  %v5174_v17 = vpop.f32.mrf.mxu3  ;;  %v10528_v9 = vld [vmem:[%s17217_s4 + $0x298] sm:$0xff] }
 0xab0   : > { %v5231_v63 = vadd.f32 %v5230_v4, %v5174_v17  ;;  %v1892_v4 = vadd.f32 %v17507_v23, %v1800_v31  ;;  %v10531_v23 = vld [vmem:[%s17217_s4 + $0x2a0] sm:$0xff] }
 0xab2   : > { %9797 = vmatmul.msk.f32.gmra.mxu1 %vm2364_vm7, %v5231_v63 }
 0xab4   : > { %9828 = vmatmul.msk.f32.vlgmr.msrb.gmra.mxu2 %vm2207_vm4, %v10524_v52  ;;  %v17509_v52 = vld [vmem:[#allocation88_spill] sm:$0xff] }
 0xab5   : > { %6302 = vmatpush.msrb.mxu2 %v14639_v55 }
 0xab6   : > { %v5099_v50 = vpop.f32.mrf.mxu2 }
 0xab7   : > { %6303 = vmatpush.msrb.mxu2 %v14645_v18  ;;  %v14876_v57 = vadd.f32 %v5099_v50, %v14649_v0  ;;  %v5419_v43 = vpop.f32.mrf.mxu3 }
 0xab9   : > { %6304 = vmatpush.msrb.mxu2 %v14652_v7 }
 0xaba   : > { %5587 = vmatmul.f32.vlgmr.msra.gmra.mxu1 %v10525_v24 }
 0xabb   : > { %6305 = vmatpush.msrb.mxu2 %v14657_v34 }
 0xabc   : > { %9829 = vmatmul.msk.f32.gmra.mxu2 %vm2207_vm4, %v10526_v16 }
 0xabd   : > { %6306 = vmatpush.msrb.mxu2 %v14665_v41 }
 0xabe   : > { %v5102_v0 = vpop.f32.mrf.mxu2 }
 0xabf   : > { %6307 = vmatpush.msrb.mxu2 %v14675_v42  ;;  %v14892_v1 = vadd.f32 %v5102_v0, %v14679_v10  ;;  %v5422_v45 = vpop.f32.mrf.mxu3  ;;  %v17508_v10 = vld [vmem:[#allocation85_spill] sm:$0xff] }
 0xac0   : > { %v1984_v17 = vadd.f32 %v17508_v10, %v1892_v4  ;;  %v10529_v0 = vld [vmem:[%s17217_s4 + $0x290] sm:$0xff] }
 0xac1   : > { %6308 = vmatpush.msrb.mxu2 %v14682_v39 }
 0xac2   : > { %5590 = vmatmul.f32.gmra.mxu1 %v10527_v51  ;;  %v2076_v50 = vadd.f32 %v17509_v52, %v1984_v17  ;;  %v10533_v52 = vld [vmem:[%s17217_s4 + $0x2b0] sm:$0xff] }
 0xac3   : > { %6309 = vmatpush.msrb.mxu2 %v14687_v37 }
 0xac4   : > { %9830 = vmatmul.msk.f32.gmra.mxu2 %vm2207_vm4, %v10528_v9  ;;  %v14917_v59 = vadd.f32 %v17510_v5, %v2076_v50  ;;  %v10532_v9 = vld [vmem:[%s17217_s4 + $0x2b8] sm:$0xff] }
 0xac5   : > { %6310 = vmatpush.msrb.mxu2 %v14695_v46 }
 0xac6   : > { %v5105_v63 = vpop.f32.mrf.mxu2  ;;  %17511 = vst [vmem:[#allocation30_spill] sm:$0xff] %v14917_v59  ;;  %v14929_v51 = vrot.slane %v14917_v59, 2 }
 0xac7   : > { %6311 = vmatpush.msrb.mxu2 %v14705_v33  ;;  %v14910_v24 = vadd.f32 %v5105_v63, %v14709_v2  ;;  %v5425_v16 = vpop.f32.mrf.mxu3 }
 0xac9   : > { %6312 = vmatpush.msrb.mxu2 %v14712_v44 }
 0xaca   : > { %5593 = vmatmul.f32.gmra.mxu1 %v10529_v0 }
 0xacb   : > { %6313 = vmatpush.msrb.mxu2 %v14717_v49 }
 0xacc   : > { %9831 = vmatmul.msk.f32.gmra.mxu2 %vm2207_vm4, %v10530_v13 }
 0xacd   : > { %6314 = vmatpush.msrb.mxu2 %v14725_v29 }
 0xace   : > { %v5363_v2 = vpop.f32.mrf.mxu2 }
 0xacf   : > { %6315 = vmatpush.msrb.mxu2 %v14734_v54  ;;  %v14926_v26 = vpop.f32.mrf.mxu1  ;;  %v5420_v31 = vadd.f32 %v5419_v43, %v5363_v2  ;;  %v5428_v4 = vpop.f32.mrf.mxu3  ;;  %v14943_v43 = vsel %vm2404_vm6, %v6054_v25, %v14929_v51  ;;  %v10534_v25 = vld [vmem:[%s17217_s4 + $0x2c8] sm:$0xff]  ;;  %v10536_v2 = vld [vmem:[%s17217_s4 + $0x2d8] sm:$0xff] }
 0xad1   : > { %6316 = vmatpush.msrb.mxu2 %v14739_v40  ;;  %9814 = vmatmul.msk.f32.vlgmr.msrb.gmra.mxu0 %vm2364_vm7, %v5420_v31 }
 0xad2   : > { %5596 = vmatmul.f32.gmra.mxu1 %v10531_v23  ;;  %9885 = vmatpush.msk.msrb.mxu0 %vm2247_vm3, %v14929_v51 }
 0xad3   : > { %6317 = vmatpush.msrb.mxu2 %v14745_v36 }
 0xad4   : > { %9832 = vmatmul.msk.f32.gmra.mxu2 %vm2207_vm4, %v10532_v9  ;;  %6148 = vmatpush.msrb.mxu0 %v14943_v43 }
 0xad7   : > { %v14950_v10 = vpop.f32.mrf.mxu1  ;;  %v5366_v17 = vpop.f32.mrf.mxu2 }
 0xad8   : > { %v5423_v63 = vadd.f32 %v5422_v45, %v5366_v17  ;;  %v5431_v50 = vpop.f32.mrf.mxu3  ;;  %v10535_v45 = vld [vmem:[%s17217_s4 + $0x2c0] sm:$0xff] }
 0xada   : > { %9815 = vmatmul.msk.f32.gmra.mxu0 %vm2364_vm7, %v5423_v63  ;;  %5599 = vmatmul.f32.gmra.mxu1 %v10533_v52  ;;  %v10538_v63 = vld [vmem:[%s17217_s4 + $0x2e8] sm:$0xff] }
 0xadc   : > { %9833 = vmatmul.msk.f32.gmra.mxu2 %vm2207_vm4, %v10534_v25 }
 0xadf   : > { %v14960_v0 = vpop.f32.mrf.mxu1  ;;  %v5369_v5 = vpop.f32.mrf.mxu2 }
 0xae0   : > { %v5426_v13 = vadd.f32 %v5425_v16, %v5369_v5  ;;  %v5434_v31 = vpop.f32.mrf.mxu3  ;;  %v10537_v16 = vld [vmem:[%s17217_s4 + $0x2d0] sm:$0xff] }
 0xae2   : > { %9816 = vmatmul.msk.f32.gmra.mxu0 %vm2364_vm7, %v5426_v13  ;;  %5602 = vmatmul.f32.gmra.mxu1 %v10535_v45  ;;  %v10540_v45 = vld [vmem:[%s17217_s4 + $0x2f8] sm:$0xff] }
 0xae4   : > { %9834 = vmatmul.msk.f32.gmra.mxu2 %vm2207_vm4, %v10536_v2 }
 0xae7   : > { %v14970_v23 = vpop.f32.mrf.mxu1  ;;  %v5372_v9 = vpop.f32.mrf.mxu2 }
 0xae8   : > { %v5429_v17 = vadd.f32 %v5428_v4, %v5372_v9  ;;  %v5437_v13 = vpop.f32.mrf.mxu3  ;;  %v10539_v4 = vld [vmem:[%s17217_s4 + $0x2e0] sm:$0xff] }
 0xaea   : > { %9817 = vmatmul.msk.f32.gmra.mxu0 %vm2364_vm7, %v5429_v17  ;;  %5605 = vmatmul.f32.gmra.mxu1 %v10537_v16 }
 0xaec   : > { %9835 = vmatmul.msk.f32.gmra.mxu2 %vm2207_vm4, %v10538_v63  ;;  %v10542_v63 = vld [vmem:[%s17217_s4 + $0x308] sm:$0xff] }
 0xaef   : > { %v14980_v52 = vpop.f32.mrf.mxu1  ;;  %v5375_v25 = vpop.f32.mrf.mxu2 }
 0xaf0   : > { %v5432_v5 = vadd.f32 %v5431_v50, %v5375_v25  ;;  %v10541_v50 = vld [vmem:[%s17217_s4 + $0x2f0] sm:$0xff]  ;;  %v5440_v16 = vpop.f32.mrf.mxu3 }
 0xaf2   : > { %9818 = vmatmul.msk.f32.gmra.mxu0 %vm2364_vm7, %v5432_v5  ;;  %5608 = vmatmul.f32.gmra.mxu1 %v10539_v4 }
 0xaf4   : > { %9836 = vmatmul.msk.f32.gmra.mxu2 %vm2207_vm4, %v10540_v45  ;;  %v10543_v45 = vld [vmem:[%s17217_s4 + $0x300] sm:$0xff] }
 0xaf7   : > { %v14990_v2 = vpop.f32.mrf.mxu1  ;;  %v5378_v9 = vpop.f32.mrf.mxu2 }
 0xaf8   : > { %v5435_v17 = vadd.f32 %v5434_v31, %v5378_v9  ;;  %v9899_v31 = vld [vmem:[%s17218_s5 + $0x78] sm:$0x3f] }
 0xaf9   : > { %9900 = vmatpush.msk.msra.mxu1 %vm2404_vm6, %v9899_v31  ;;  %v10544_v9 = vld [vmem:[%s17217_s4 + $0x318] sm:$0xff] }
 0xafa   : > { %9819 = vmatmul.msk.f32.gmra.mxu0 %vm2364_vm7, %v5435_v17  ;;  %5611 = vmatmul.f32.gmra.mxu1 %v10541_v50 }
 0xafc   : > { %9837 = vmatmul.msk.f32.gmra.mxu2 %vm2207_vm4, %v10542_v63 }
 0xaff   : > { %v15000_v25 = vpop.f32.mrf.mxu1  ;;  %v5381_v5 = vpop.f32.mrf.mxu2 }
 0xb00   : > { %v5438_v4 = vadd.f32 %v5437_v13, %v5381_v5  ;;  %v5443_v13 = vpop.f32.mrf.mxu3  ;;  %v10545_v5 = vld [vmem:[%s17217_s4 + $0x310] sm:$0xff] }
 0xb02   : > { %9820 = vmatmul.msk.f32.gmra.mxu0 %vm2364_vm7, %v5438_v4  ;;  %5614 = vmatmul.f32.gmra.mxu1 %v10543_v45  ;;  %v10546_v4 = vld [vmem:[%s17217_s4 + $0x328] sm:$0xff] }
 0xb04   : > { %9838 = vmatmul.msk.f32.gmra.mxu2 %vm2207_vm4, %v10544_v9 }
 0xb07   : > { %v15014_v17 = vpop.f32.mrf.mxu1  ;;  %v5384_v50 = vpop.f32.mrf.mxu2 }
 0xb08   : > { %v5441_v63 = vadd.f32 %v5440_v16, %v5384_v50  ;;  %v5446_v31 = vpop.f32.mrf.mxu3  ;;  %v10547_v16 = vld [vmem:[%s17217_s4 + $0x320] sm:$0xff]  ;;  %v10548_v50 = vld [vmem:[%s17217_s4 + $0x338] sm:$0xf] }
 0xb0a   : > { %9821 = vmatmul.msk.f32.gmra.mxu0 %vm2364_vm7, %v5441_v63  ;;  %5617 = vmatmul.f32.gmra.mxu1 %v10545_v5 }
 0xb0c   : > { %9839 = vmatmul.msk.f32.gmra.mxu2 %vm2207_vm4, %v10546_v4 }
 0xb0f   : > { %v15024_v45 = vpop.f32.mrf.mxu1  ;;  %v5387_v9 = vpop.f32.mrf.mxu2 }
 0xb10   : > { %v5444_v3 = vadd.f32 %v5443_v13, %v5387_v9  ;;  %v5449_v30 = vpop.f32.mrf.mxu3 }
 0xb12   : > { %9822 = vmatmul.msk.f32.gmra.mxu0 %vm2364_vm7, %v5444_v3  ;;  %5620 = vmatmul.f32.gmra.mxu1 %v10547_v16  ;;  %v10549_v3 = vld [vmem:[%s17217_s4 + $0x330] sm:$0xf] }
 0xb14   : > { %9840 = vmatmul.msk.f32.gmra.mxu2 %vm2207_vm4, %v10548_v50  ;;  %v10550_v50 = vld [vmem:[%s17217_s4 + $0x348] sm:$0xff] }
 0xb17   : > { %v15034_v63 = vpop.f32.mrf.mxu1  ;;  %v5390_v5 = vpop.f32.mrf.mxu2 }
 0xb18   : > { %v5447_v4 = vadd.f32 %v5446_v31, %v5390_v5  ;;  %v5452_v31 = vpop.f32.mrf.mxu3 }
 0xb1a   : > { %9823 = vmatmul.msk.f32.gmra.mxu0 %vm2364_vm7, %v5447_v4  ;;  %5623 = vmatmul.f32.gmra.mxu1 %v10549_v3 }
 0xb1f   : > { %v15040_v13 = vpop.f32.mrf.mxu1  ;;  %v5393_v9 = vpop.f32.mrf.mxu2 }
 0xb20   : > { %v5450_v16 = vadd.f32 %v5449_v30, %v5393_v9  ;;  %v10551_v30 = vld [vmem:[%s17217_s4 + $0x358] sm:$0xff]  ;;  %v5455_v9 = vpop.f32.mrf.mxu3 }
 0xb22   : > { %9824 = vmatmul.msk.f32.gmra.mxu0 %vm2364_vm7, %v5450_v16  ;;  %9857 = vmatmul.msk.f32.vlgmr.msrb.gmra.mxu1 %vm2207_vm4, %v10550_v50 }
 0xb23   : > { %6527 = vmatpush.msrb.mxu1 %v14639_v55 }
 0xb25   : > { %6528 = vmatpush.msrb.mxu1 %v14645_v18 }
 0xb27   : > { %6529 = vmatpush.msrb.mxu1 %v14652_v7  ;;  %v15050_v5 = vpop.f32.mrf.mxu1  ;;  %v5396_v4 = vpop.f32.mrf.mxu2 }
 0xb28   : > { %v5453_v3 = vadd.f32 %v5452_v31, %v5396_v4  ;;  %v10552_v4 = vld [vmem:[%s17217_s4 + $0x368] sm:$0xff] }
 0xb29   : > { %6530 = vmatpush.msrb.mxu1 %v14657_v34 }
 0xb2a   : > { %9825 = vmatmul.msk.f32.gmra.mxu0 %vm2364_vm7, %v5453_v3  ;;  %9858 = vmatmul.msk.f32.gmra.mxu1 %vm2207_vm4, %v10551_v30 }
 0xb2b   : > { %6531 = vmatpush.msrb.mxu1 %v14665_v41 }
 0xb2d   : > { %6532 = vmatpush.msrb.mxu1 %v14675_v42 }
 0xb2f   : > { %6533 = vmatpush.msrb.mxu1 %v14682_v39  ;;  %v15061_v16 = vpop.f32.mrf.mxu1  ;;  %v5399_v50 = vpop.f32.mrf.mxu2 }
 0xb30   : > { %v5456_v31 = vadd.f32 %v5455_v9, %v5399_v50  ;;  %v10553_v9 = vld [vmem:[%s17217_s4 + $0x340] sm:$0xff]  ;;  %v10554_v50 = vld [vmem:[%s17217_s4 + $0x378] sm:$0xff] }
 0xb31   : > { %6534 = vmatpush.msrb.mxu1 %v14687_v37 }
 0xb32   : > { %9826 = vmatmul.msk.f32.gmra.mxu0 %vm2364_vm7, %v5456_v31  ;;  %9859 = vmatmul.msk.f32.gmra.mxu1 %vm2207_vm4, %v10552_v4 }
 0xb33   : > { %6535 = vmatpush.msrb.mxu1 %v14695_v46 }
 0xb35   : > { %6536 = vmatpush.msrb.mxu1 %v14705_v33 }
 0xb37   : > { %6537 = vmatpush.msrb.mxu1 %v14712_v44  ;;  %v5588_v3 = vpop.f32.mrf.mxu1  ;;  %v5644_v30 = vpop.f32.mrf.mxu2 }
 0xb38   : > { %v5645_v32 = vadd.f32 %v5644_v30, %v5588_v3  ;;  %v10555_v3 = vld [vmem:[%s17217_s4 + $0x350] sm:$0xff]  ;;  %v10556_v30 = vld [vmem:[%s17217_s4 + $0x388] sm:$0xff] }
 0xb39   : > { %6538 = vmatpush.msrb.mxu1 %v14717_v49 }
 0xb3a   : > { %9843 = vmatmul.msk.f32.vlgmr.msrb.gmra.mxu3 %vm2364_vm7, %v5645_v32  ;;  %5812 = vmatmul.f32.vlgmr.msra.gmra.mxu0 %v10553_v9 }
 0xb3b   : > { %9914 = vmatpush.msk.msrb.mxu3 %vm2247_vm3, %v14929_v51  ;;  %6539 = vmatpush.msrb.mxu1 %v14725_v29 }
 0xb3c   : > { %9860 = vmatmul.msk.f32.gmra.mxu1 %vm2207_vm4, %v10554_v50 }
 0xb3d   : > { %6373 = vmatpush.msrb.mxu3 %v14943_v43  ;;  %6540 = vmatpush.msrb.mxu1 %v14734_v54 }
 0xb3f   : > { %6541 = vmatpush.msrb.mxu1 %v14739_v40  ;;  %v5591_v32 = vpop.f32.mrf.mxu1  ;;  %v5647_v31 = vpop.f32.mrf.mxu2 }
 0xb40   : > { %v5648_v4 = vadd.f32 %v5647_v31, %v5591_v32  ;;  %v10557_v32 = vld [vmem:[%s17217_s4 + $0x360] sm:$0xff]  ;;  %v10558_v31 = vld [vmem:[%s17217_s4 + $0x398] sm:$0xff] }
 0xb41   : > { %6542 = vmatpush.msrb.mxu1 %v14745_v36 }
 0xb42   : > { %9844 = vmatmul.msk.f32.gmra.mxu3 %vm2364_vm7, %v5648_v4  ;;  %5815 = vmatmul.f32.gmra.mxu0 %v10555_v3 }
 0xb44   : > { %9861 = vmatmul.msk.f32.gmra.mxu1 %vm2207_vm4, %v10556_v30 }
 0xb47   : > { %v5594_v9 = vpop.f32.mrf.mxu1  ;;  %v5650_v50 = vpop.f32.mrf.mxu2 }
 0xb48   : > { %v5651_v11 = vadd.f32 %v5650_v50, %v5594_v9  ;;  %v10560_v9 = vld [vmem:[%s17217_s4 + $0x3a8] sm:$0xff] }
 0xb4a   : > { %9845 = vmatmul.msk.f32.gmra.mxu3 %vm2364_vm7, %v5651_v11  ;;  %5818 = vmatmul.f32.gmra.mxu0 %v10557_v32  ;;  %v10559_v11 = vld [vmem:[%s17217_s4 + $0x370] sm:$0xff] }
 0xb4c   : > { %9862 = vmatmul.msk.f32.gmra.mxu1 %vm2207_vm4, %v10558_v31 }
 0xb4e   : > { %v15104_v4 = vpop.f32.mrf.mxu0 }
 0xb4f   : > { %v5597_v3 = vpop.f32.mrf.mxu1  ;;  %v5653_v30 = vpop.f32.mrf.mxu2 }
 0xb50   : > { %v5654_v21 = vadd.f32 %v5653_v30, %v5597_v3  ;;  %v10562_v3 = vld [vmem:[%s17217_s4 + $0x3b8] sm:$0xff] }
 0xb52   : > { %9846 = vmatmul.msk.f32.gmra.mxu3 %vm2364_vm7, %v5654_v21  ;;  %5821 = vmatmul.f32.gmra.mxu0 %v10559_v11  ;;  %v10561_v21 = vld [vmem:[%s17217_s4 + $0x380] sm:$0xff] }
 0xb54   : > { %9863 = vmatmul.msk.f32.gmra.mxu1 %vm2207_vm4, %v10560_v9 }
 0xb57   : > { %v15114_v50 = vpop.f32.mrf.mxu0  ;;  %v5600_v32 = vpop.f32.mrf.mxu1 }
 0xb58   : > { %v5656_v31 = vpop.f32.mrf.mxu2 }
 0xb59   : > { %v5657_v60 = vadd.f32 %v5656_v31, %v5600_v32  ;;  %v10563_v32 = vld [vmem:[%s17217_s4 + $0x390] sm:$0xff] }
 0xb5a   : > { %5824 = vmatmul.f32.gmra.mxu0 %v10561_v21 }
 0xb5b   : > { %9847 = vmatmul.msk.f32.gmra.mxu3 %vm2364_vm7, %v5657_v60  ;;  %v10564_v60 = vld [vmem:[%s17217_s4 + $0x3c8] sm:$0xff] }
 0xb5c   : > { %9864 = vmatmul.msk.f32.gmra.mxu1 %vm2207_vm4, %v10562_v3 }
 0xb5f   : > { %v15124_v30 = vpop.f32.mrf.mxu0  ;;  %v5603_v11 = vpop.f32.mrf.mxu1 }
 0xb60   : > { %v5659_v9 = vpop.f32.mrf.mxu2 }
 0xb61   : > { %v5660_v22 = vadd.f32 %v5659_v9, %v5603_v11  ;;  %v10565_v11 = vld [vmem:[%s17217_s4 + $0x3a0] sm:$0xff] }
 0xb62   : > { %5827 = vmatmul.f32.gmra.mxu0 %v10563_v32 }
 0xb63   : > { %9848 = vmatmul.msk.f32.gmra.mxu3 %vm2364_vm7, %v5660_v22  ;;  %v10566_v22 = vld [vmem:[%s17217_s4 + $0x3d8] sm:$0xff] }
 0xb64   : > { %9865 = vmatmul.msk.f32.gmra.mxu1 %vm2207_vm4, %v10564_v60 }
 0xb67   : > { %v15134_v31 = vpop.f32.mrf.mxu0  ;;  %v5606_v21 = vpop.f32.mrf.mxu1 }
 0xb68   : > { %v5662_v3 = vpop.f32.mrf.mxu2 }
 0xb69   : > { %v5663_v61 = vadd.f32 %v5662_v3, %v5606_v21  ;;  %v10567_v21 = vld [vmem:[%s17217_s4 + $0x3b0] sm:$0xff] }
 0xb6a   : > { %5830 = vmatmul.f32.gmra.mxu0 %v10565_v11 }
 0xb6b   : > { %9849 = vmatmul.msk.f32.gmra.mxu3 %vm2364_vm7, %v5663_v61  ;;  %v10568_v61 = vld [vmem:[%s17217_s4 + $0x3e8] sm:$0xff] }
 0xb6c   : > { %9866 = vmatmul.msk.f32.gmra.mxu1 %vm2207_vm4, %v10566_v22 }
 0xb6f   : > { %v15144_v9 = vpop.f32.mrf.mxu0  ;;  %v5609_v32 = vpop.f32.mrf.mxu1 }
 0xb70   : > { %v5665_v60 = vpop.f32.mrf.mxu2 }
 0xb71   : > { %v5666_v28 = vadd.f32 %v5665_v60, %v5609_v32  ;;  %v10569_v32 = vld [vmem:[%s17217_s4 + $0x3c0] sm:$0xff] }
 0xb72   : > { %5833 = vmatmul.f32.gmra.mxu0 %v10567_v21 }
 0xb73   : > { %9850 = vmatmul.msk.f32.gmra.mxu3 %vm2364_vm7, %v5666_v28  ;;  %v10570_v28 = vld [vmem:[%s17217_s4 + $0x3f8] sm:$0xff] }
 0xb74   : > { %9867 = vmatmul.msk.f32.gmra.mxu1 %vm2207_vm4, %v10568_v61 }
 0xb77   : > { %v15154_v3 = vpop.f32.mrf.mxu0  ;;  %v5612_v11 = vpop.f32.mrf.mxu1 }
 0xb78   : > { %v5668_v22 = vpop.f32.mrf.mxu2 }
 0xb79   : > { %v5669_v19 = vadd.f32 %v5668_v22, %v5612_v11  ;;  %v9928_v11 = vld [vmem:[%s17218_s5 + $0x80] sm:$0x3f] }
 0xb7a   : > { %5836 = vmatmul.f32.gmra.mxu0 %v10569_v32  ;;  %v10572_v32 = vld [vmem:[%s17217_s4 + $0x408] sm:$0xf] }
 0xb7b   : > { %9851 = vmatmul.msk.f32.gmra.mxu3 %vm2364_vm7, %v5669_v19  ;;  %9929 = vmatpush.msk.msra.mxu0 %vm2404_vm6, %v9928_v11  ;;  %v10571_v19 = vld [vmem:[%s17217_s4 + $0x3d0] sm:$0xff] }
 0xb7c   : > { %9868 = vmatmul.msk.f32.gmra.mxu1 %vm2207_vm4, %v10570_v28 }
 0xb7f   : > { %v15164_v60 = vpop.f32.mrf.mxu0  ;;  %v5615_v21 = vpop.f32.mrf.mxu1 }
 0xb80   : > { %v5671_v61 = vpop.f32.mrf.mxu2 }
 0xb81   : > { %v5672_v22 = vadd.f32 %v5671_v61, %v5615_v21  ;;  %v10573_v61 = vld [vmem:[%s17217_s4 + $0x3e0] sm:$0xff] }
 0xb82   : > { %5839 = vmatmul.f32.gmra.mxu0 %v10571_v19 }
 0xb83   : > { %9852 = vmatmul.msk.f32.gmra.mxu3 %vm2364_vm7, %v5672_v22 }
 0xb84   : > { %9869 = vmatmul.msk.f32.gmra.mxu1 %vm2207_vm4, %v10572_v32  ;;  %v10574_v32 = vld [vmem:[%s17217_s4 + $0x3f0] sm:$0xff] }
 0xb87   : > { %v15178_v28 = vpop.f32.mrf.mxu0  ;;  %v5618_v47 = vpop.f32.mrf.mxu1 }
 0xb88   : > { %v5674_v53 = vpop.f32.mrf.mxu2 }
 0xb89   : > { %v5675_v21 = vadd.f32 %v5674_v53, %v5618_v47 }
 0xb8a   : > { %5842 = vmatmul.f32.gmra.mxu0 %v10573_v61 }
 0xb8b   : > { %9853 = vmatmul.msk.f32.gmra.mxu3 %vm2364_vm7, %v5675_v21  ;;  %v10575_v21 = vld [vmem:[%s17217_s4 + $0x400] sm:$0xf] }
 0xb8f   : > { %v15184_v11 = vpop.f32.mrf.mxu0  ;;  %v5621_v22 = vpop.f32.mrf.mxu1 }
 0xb90   : > { %v5677_v19 = vpop.f32.mrf.mxu2 }
 0xb91   : > { %v5678_v14 = vadd.f32 %v5677_v19, %v5621_v22  ;;  %v10576_v19 = vld [vmem:[%s17217_s4 + $0x8] sm:$0xff] }
 0xb92   : > { %5845 = vmatmul.f32.gmra.mxu0 %v10574_v32  ;;  %v10578_v32 = vld [vmem:[%s17217_s4 + $0x18] sm:$0xff] }
 0xb93   : > { %9854 = vmatmul.msk.f32.gmra.mxu3 %vm2364_vm7, %v5678_v14 }
 0xb97   : > { %v15190_v53 = vpop.f32.mrf.mxu0  ;;  %v5624_v47 = vpop.f32.mrf.mxu1 }
 0xb98   : > { %v5680_v6 = vpop.f32.mrf.mxu2 }
 0xb99   : > { %v5681_v38 = vadd.f32 %v5680_v6, %v5624_v47  ;;  %v10577_v6 = vld [vmem:[%s17217_s4] sm:$0xff]  ;;  %v10579_v47 = vld [vmem:[%s17217_s4 + $0x10] sm:$0xff] }
 0xb9a   : > { %5848 = vmatmul.f32.gmra.mxu0 %v10575_v21 }
 0xb9b   : > { %9855 = vmatmul.msk.f32.gmra.mxu3 %vm2364_vm7, %v5681_v38 }
 0xb9f   : > { %v15196_v61 = vpop.f32.mrf.mxu0  ;;  %v5869_v22 = vpop.f32.mrf.mxu1 }
 0xba2   : > { %9886 = vmatmul.msk.f32.vlgmr.msrb.gmra.mxu0 %vm2207_vm4, %v10576_v19 }
 0xba3   : > { %6093 = vmatmul.f32.vlgmr.msra.gmra.mxu3 %v10577_v6  ;;  %6752 = vmatpush.msrb.mxu0 %v14639_v55  ;;  %v10580_v6 = vld [vmem:[%s17217_s4 + $0x28] sm:$0xff] }
 0xba5   : > { %6753 = vmatpush.msrb.mxu0 %v14645_v18 }
 0xba7   : > { %6754 = vmatpush.msrb.mxu0 %v14652_v7  ;;  %v15208_v14 = vpop.f32.mrf.mxu0  ;;  %v5872_v38 = vpop.f32.mrf.mxu1 }
 0xba9   : > { %6755 = vmatpush.msrb.mxu0 %v14657_v34 }
 0xbaa   : > { %9887 = vmatmul.msk.f32.gmra.mxu0 %vm2207_vm4, %v10578_v32  ;;  %v10581_v32 = vld [vmem:[%s17217_s4 + $0x20] sm:$0xff] }
 0xbab   : > { %6096 = vmatmul.f32.gmra.mxu3 %v10579_v47  ;;  %6756 = vmatpush.msrb.mxu0 %v14665_v41 }
 0xbad   : > { %6757 = vmatpush.msrb.mxu0 %v14675_v42 }
 0xbaf   : > { %6758 = vmatpush.msrb.mxu0 %v14682_v39  ;;  %v15221_v21 = vpop.f32.mrf.mxu0  ;;  %v5875_v19 = vpop.f32.mrf.mxu1 }
 0xbb0   : > { %17512 = vst [vmem:[#allocation29_spill] sm:$0xff] %v15221_v21  ;;  %v5333_v21 = vadd.f32 %v14926_v26, %v14775_v58 }
 0xbb1   : > { %6759 = vmatpush.msrb.mxu0 %v14687_v37 }
 0xbb2   : > { %9888 = vmatmul.msk.f32.gmra.mxu0 %vm2207_vm4, %v10580_v6  ;;  %v10582_v6 = vld [vmem:[%s17217_s4 + $0x38] sm:$0xff] }
 0xbb3   : > { %6099 = vmatmul.f32.gmra.mxu3 %v10581_v32  ;;  %6760 = vmatpush.msrb.mxu0 %v14695_v46  ;;  %v10583_v32 = vld [vmem:[%s17217_s4 + $0x30] sm:$0xff] }
 0xbb5   : > { %6761 = vmatpush.msrb.mxu0 %v14705_v33 }
 0xbb7   : > { %6762 = vmatpush.msrb.mxu0 %v14712_v44  ;;  %v5813_v47 = vpop.f32.mrf.mxu0 }
 0xbb8   : > { %v5870_v59 = vadd.f32 %v5869_v22, %v5813_v47  ;;  %v5558_v47 = vadd.f32 %v15104_v4, %v5333_v21  ;;  %v10584_v4 = vld [vmem:[%s17217_s4 + $0x40] sm:$0xff]  ;;  %v10585_v21 = vld [vmem:[%s17217_s4 + $0x48] sm:$0xff] }
 0xbb9   : > { %6763 = vmatpush.msrb.mxu0 %v14717_v49  ;;  %v5878_v22 = vpop.f32.mrf.mxu1 }
 0xbba   : > { %9872 = vmatmul.msk.f32.vlgmr.msra.gmra.mxu2 %vm2364_vm7, %v5870_v59  ;;  %9889 = vmatmul.msk.f32.gmra.mxu0 %vm2207_vm4, %v10582_v6 }
 0xbbb   : > { %6102 = vmatmul.f32.gmra.mxu3 %v10583_v32  ;;  %9943 = vmatpush.msk.msra.mxu2 %vm2247_vm3, %v14929_v51  ;;  %v5334_v32 = vadd.f32 %v14950_v10, %v14786_v12 }
 0xbbc   : > { %6764 = vmatpush.msrb.mxu0 %v14725_v29 }
 0xbbd   : > { %6598 = vmatpush.msra.mxu2 %v14943_v43  ;;  %v5744_v58 = vpop.f32.mrf.mxu3 }
 0xbbe   : > { %6765 = vmatpush.msrb.mxu0 %v14734_v54  ;;  %v15251_v59 = vadd.f32 %v5744_v58, %v5558_v47 }
 0xbbf   : > { %v5816_v26 = vpop.f32.mrf.mxu0 }
 0xbc0   : > { %6766 = vmatpush.msrb.mxu0 %v14739_v40  ;;  %v5873_v6 = vadd.f32 %v5872_v38, %v5816_v26  ;;  %v5559_v38 = vadd.f32 %v15114_v50, %v5334_v32  ;;  %v10587_v50 = vld [vmem:[%s17217_s4 + $0x58] sm:$0xff] }
 0xbc1   : > { %v5881_v58 = vpop.f32.mrf.mxu1 }
 0xbc2   : > { %6767 = vmatpush.msrb.mxu0 %v14745_v36  ;;  %9873 = vmatmul.msk.f32.gmra.mxu2 %vm2364_vm7, %v5873_v6  ;;  %v5335_v6 = vadd.f32 %v14960_v0, %v14797_v15 }
 0xbc3   : > { %6105 = vmatmul.f32.gmra.mxu3 %v10584_v4  ;;  %9890 = vmatmul.msk.f32.gmra.mxu0 %vm2207_vm4, %v10585_v21  ;;  %v10586_v4 = vld [vmem:[%s17217_s4 + $0x50] sm:$0xff] }
 0xbc4   : > { %v5560_v32 = vadd.f32 %v15124_v30, %v5335_v6  ;;  %v10589_v30 = vld [vmem:[%s17217_s4 + $0x68] sm:$0xff] }
 0xbc5   : > { %v5747_v47 = vpop.f32.mrf.mxu3 }
 0xbc6   : > { %v15266_v12 = vadd.f32 %v5747_v47, %v5559_v38  ;;  %v5336_v47 = vadd.f32 %v14970_v23, %v14808_v35 }
 0xbc7   : > { %v5819_v10 = vpop.f32.mrf.mxu0 }
 0xbc8   : > { %v5876_v26 = vadd.f32 %v5875_v19, %v5819_v10  ;;  %v10588_v10 = vld [vmem:[%s17217_s4 + $0x60] sm:$0xff] }
 0xbc9   : > { %v5884_v15 = vpop.f32.mrf.mxu1 }
 0xbca   : > { %9874 = vmatmul.msk.f32.gmra.mxu2 %vm2364_vm7, %v5876_v26  ;;  %v5561_v26 = vadd.f32 %v15134_v31, %v5336_v47  ;;  %v10591_v31 = vld [vmem:[%s17217_s4 + $0x78] sm:$0xff] }
 0xbcb   : > { %6108 = vmatmul.f32.gmra.mxu3 %v10586_v4  ;;  %9891 = vmatmul.msk.f32.gmra.mxu0 %vm2207_vm4, %v10587_v50  ;;  %v5337_v50 = vadd.f32 %v14980_v52, %v14819_v8  ;;  %v5338_v8 = vadd.f32 %v14990_v2, %v14830_v48  ;;  %v10592_v52 = vld [vmem:[%s17217_s4 + $0x80] sm:$0xff]  ;;  %v9957_v48 = vld [vmem:[%s17218_s5 + $0x88] sm:$0x3f]  ;;  %v5339_v2 = vadd.f32 %v15000_v25, %v14845_v56 }
 0xbcc   : > { %9958 = vmatpush.msk.msra.mxu3 %vm2404_vm6, %v9957_v48  ;;  %v5340_v56 = vadd.f32 %v15014_v17, %v14852_v62  ;;  %v10596_v25 = vld [vmem:[%s17217_s4 + $0xa0] sm:$0xff]  ;;  %v5341_v62 = vadd.f32 %v15024_v45, %v14859_v27  ;;  %v10598_v17 = vld [vmem:[%s17217_s4 + $0xb0] sm:$0xff]  ;;  %v5342_v27 = vadd.f32 %v15034_v63, %v14866_v20  ;;  %v5343_v20 = vadd.f32 %v15040_v13, %v14876_v57  ;;  %v10602_v63 = vld [vmem:[%s17217_s4 + $0xd8] sm:$0xff] }
 0xbcd   : > { %v5750_v21 = vpop.f32.mrf.mxu3  ;;  %v10600_v45 = vld [vmem:[%s17217_s4 + $0xc0] sm:$0xf]  ;;  %v5344_v13 = vadd.f32 %v15050_v5, %v14892_v1  ;;  %v5345_v5 = vadd.f32 %v15061_v16, %v14910_v24  ;;  %v10605_v24 = vld [vmem:[%s17217_s4 + $0xd0] sm:$0xff] }
 0xbce   : > { %v15279_v19 = vadd.f32 %v5750_v21, %v5560_v32  ;;  %v10590_v32 = vld [vmem:[%s17217_s4 + $0x70] sm:$0xff]  ;;  %v5562_v21 = vadd.f32 %v15144_v9, %v5337_v50 }
 0xbcf   : > { %v5822_v38 = vpop.f32.mrf.mxu0 }
 0xbd0   : > { %v5879_v0 = vadd.f32 %v5878_v22, %v5822_v38 }
 0xbd1   : > { %v5887_v23 = vpop.f32.mrf.mxu1 }
 0xbd2   : > { %9875 = vmatmul.msk.f32.gmra.mxu2 %vm2364_vm7, %v5879_v0 }
 0xbd3   : > { %6111 = vmatmul.f32.gmra.mxu3 %v10588_v10  ;;  %9892 = vmatmul.msk.f32.gmra.mxu0 %vm2207_vm4, %v10589_v30  ;;  %v10593_v10 = vld [vmem:[%s17217_s4 + $0x88] sm:$0xff]  ;;  %v5563_v30 = vadd.f32 %v15154_v3, %v5338_v8  ;;  %v10594_v3 = vld [vmem:[%s17217_s4 + $0x90] sm:$0xff] }
 0xbd5   : > { %v5753_v6 = vpop.f32.mrf.mxu3 }
 0xbd6   : > { %v15292_v22 = vadd.f32 %v5753_v6, %v5561_v26 }
 0xbd7   : > { %v5825_v4 = vpop.f32.mrf.mxu0 }
 0xbd8   : > { %v5882_v35 = vadd.f32 %v5881_v58, %v5825_v4 }
 0xbd9   : > { %v5890_v9 = vpop.f32.mrf.mxu1 }
 0xbda   : > { %9876 = vmatmul.msk.f32.gmra.mxu2 %vm2364_vm7, %v5882_v35  ;;  %v10595_v35 = vld [vmem:[%s17217_s4 + $0x98] sm:$0xff] }
 0xbdb   : > { %6114 = vmatmul.f32.gmra.mxu3 %v10590_v32  ;;  %9893 = vmatmul.msk.f32.gmra.mxu0 %vm2207_vm4, %v10591_v31 }
 0xbde   : > { %v5756_v58 = vpop.f32.mrf.mxu3 }
 0xbdf   : > { %v15305_v38 = vadd.f32 %v5756_v58, %v5562_v21  ;;  %v5828_v0 = vpop.f32.mrf.mxu0 }
 0xbe0   : > { %v5885_v47 = vadd.f32 %v5884_v15, %v5828_v0  ;;  %v5565_v0 = vadd.f32 %v15178_v28, %v5340_v56  ;;  %v10599_v28 = vld [vmem:[%s17217_s4 + $0xb8] sm:$0xff] }
 0xbe1   : > { %v5893_v50 = vpop.f32.mrf.mxu1 }
 0xbe2   : > { %9877 = vmatmul.msk.f32.gmra.mxu2 %vm2364_vm7, %v5885_v47 }
 0xbe3   : > { %6117 = vmatmul.f32.gmra.mxu3 %v10592_v52  ;;  %9894 = vmatmul.msk.f32.gmra.mxu0 %vm2207_vm4, %v10593_v10 }
 0xbe6   : > { %v5759_v15 = vpop.f32.mrf.mxu3 }
 0xbe7   : > { %v15318_v26 = vadd.f32 %v5759_v15, %v5563_v30  ;;  %v5831_v6 = vpop.f32.mrf.mxu0  ;;  %v5566_v30 = vadd.f32 %v15184_v11, %v5341_v62  ;;  %v10601_v11 = vld [vmem:[%s17217_s4 + $0xc8] sm:$0xf] }
 0xbe8   : > { %v5888_v4 = vadd.f32 %v5887_v23, %v5831_v6  ;;  %v5564_v23 = vadd.f32 %v15164_v60, %v5339_v2  ;;  %v10597_v60 = vld [vmem:[%s17217_s4 + $0xa8] sm:$0xff] }
 0xbe9   : > { %v5896_v10 = vpop.f32.mrf.mxu1 }
 0xbea   : > { %9878 = vmatmul.msk.f32.gmra.mxu2 %vm2364_vm7, %v5888_v4 }
 0xbeb   : > { %6120 = vmatmul.f32.gmra.mxu3 %v10594_v3  ;;  %9895 = vmatmul.msk.f32.gmra.mxu0 %vm2207_vm4, %v10595_v35  ;;  %v5567_v3 = vadd.f32 %v15190_v53, %v5342_v27  ;;  %v5568_v53 = vadd.f32 %v15196_v61, %v5343_v20  ;;  %v10613_v27 = vld [vmem:[%s17217_s4 + $0x110] sm:$0xff]  ;;  %v10616_v20 = vld [vmem:[%s17217_s4 + $0x158] sm:$0xff] }
 0xbee   : > { %v5762_v32 = vpop.f32.mrf.mxu3 }
 0xbef   : > { %v15335_v31 = vadd.f32 %v5762_v32, %v5564_v23  ;;  %v5834_v21 = vpop.f32.mrf.mxu0 }
 0xbf0   : > { %v5891_v58 = vadd.f32 %v5890_v9, %v5834_v21 }
 0xbf1   : > { %v5899_v2 = vpop.f32.mrf.mxu1 }
 0xbf2   : > { %9879 = vmatmul.msk.f32.gmra.mxu2 %vm2364_vm7, %v5891_v58 }
 0xbf3   : > { %6123 = vmatmul.f32.gmra.mxu3 %v10596_v25  ;;  %9896 = vmatmul.msk.f32.gmra.mxu0 %vm2207_vm4, %v10597_v60 }
 0xbf6   : > { %v5765_v47 = vpop.f32.mrf.mxu3 }
 0xbf7   : > { %v15348_v8 = vadd.f32 %v5765_v47, %v5565_v0  ;;  %v5837_v52 = vpop.f32.mrf.mxu0 }
 0xbf8   : > { %v5894_v9 = vadd.f32 %v5893_v50, %v5837_v52  ;;  %v10610_v52 = vld [vmem:[%s17217_s4 + $0x128] sm:$0xff] }
 0xbf9   : > { %v5902_v21 = vpop.f32.mrf.mxu1 }
 0xbfa   : > { %9880 = vmatmul.msk.f32.gmra.mxu2 %vm2364_vm7, %v5894_v9 }
 0xbfb   : > { %6126 = vmatmul.f32.gmra.mxu3 %v10598_v17  ;;  %9897 = vmatmul.msk.f32.gmra.mxu0 %vm2207_vm4, %v10599_v28  ;;  %v10611_v17 = vld [vmem:[%s17217_s4 + $0x100] sm:$0xff]  ;;  %v10612_v28 = vld [vmem:[%s17217_s4 + $0x138] sm:$0xff] }
 0xbfe   : > { %v5768_v15 = vpop.f32.mrf.mxu3 }
 0xbff   : > { %v15361_v6 = vadd.f32 %v5768_v15, %v5566_v30  ;;  %v5840_v4 = vpop.f32.mrf.mxu0 }
 0xc00   : > { %v5897_v48 = vadd.f32 %v5896_v10, %v5840_v4 }
 0xc01   : > { %v5905_v61 = vpop.f32.mrf.mxu1 }
 0xc02   : > { %9881 = vmatmul.msk.f32.gmra.mxu2 %vm2364_vm7, %v5897_v48 }
 0xc03   : > { %6129 = vmatmul.f32.gmra.mxu3 %v10600_v45  ;;  %9898 = vmatmul.msk.f32.gmra.mxu0 %vm2207_vm4, %v10601_v11  ;;  %v10614_v45 = vld [vmem:[%s17217_s4 + $0x148] sm:$0xff] }
 0xc06   : > { %v5771_v35 = vpop.f32.mrf.mxu3 }
 0xc07   : > { %v15374_v23 = vadd.f32 %v5771_v35, %v5567_v3  ;;  %v5843_v50 = vpop.f32.mrf.mxu0 }
 0xc08   : > { %v5900_v32 = vadd.f32 %v5899_v2, %v5843_v50 }
 0xc0a   : > { %9882 = vmatmul.msk.f32.gmra.mxu2 %vm2364_vm7, %v5900_v32  ;;  %v10615_v32 = vld [vmem:[%s17217_s4 + $0x120] sm:$0xff] }
 0xc0b   : > { %9915 = vmatmul.msk.f32.vlgmr.msrb.gmra.mxu3 %vm2207_vm4, %v10602_v63 }
 0xc0c   : > { %6977 = vmatpush.msrb.mxu3 %v14639_v55  ;;  %v10603_v55 = vld [vmem:[%s17217_s4 + $0xe8] sm:$0xff] }
 0xc0e   : > { %6978 = vmatpush.msrb.mxu3 %v14645_v18  ;;  %v5774_v58 = vpop.f32.mrf.mxu3  ;;  %v5569_v18 = vadd.f32 %v15208_v14, %v5344_v13 }
 0xc0f   : > { %v15386_v56 = vadd.f32 %v5774_v58, %v5568_v53  ;;  %v5846_v25 = vpop.f32.mrf.mxu0 }
 0xc10   : > { %6979 = vmatpush.msrb.mxu3 %v14652_v7  ;;  %v5903_v57 = vadd.f32 %v5902_v21, %v5846_v25  ;;  %v10617_v25 = vld [vmem:[%s17217_s4 + $0x130] sm:$0xff] }
 0xc12   : > { %6980 = vmatpush.msrb.mxu3 %v14657_v34  ;;  %9883 = vmatmul.msk.f32.gmra.mxu2 %vm2364_vm7, %v5903_v57  ;;  %v10618_v57 = vld [vmem:[%s17217_s4 + $0x168] sm:$0xff] }
 0xc13   : > { %9916 = vmatmul.msk.f32.gmra.mxu3 %vm2207_vm4, %v10603_v55 }
 0xc14   : > { %6981 = vmatpush.msrb.mxu3 %v14665_v41  ;;  %v10604_v41 = vld [vmem:[%s17217_s4 + $0xf8] sm:$0xff] }
 0xc16   : > { %6982 = vmatpush.msrb.mxu3 %v14675_v42  ;;  %v5777_v7 = vpop.f32.mrf.mxu3  ;;  %v17513_v42 = vld [vmem:[#allocation29_spill] sm:$0xff] }
 0xc17   : > { %v15400_v34 = vadd.f32 %v5777_v7, %v5569_v18  ;;  %v5849_v60 = vpop.f32.mrf.mxu0  ;;  %v5570_v14 = vadd.f32 %v17513_v42, %v5345_v5  ;;  %v10619_v7 = vld [vmem:[%s17217_s4 + $0x140] sm:$0xff] }
 0xc18   : > { %6983 = vmatpush.msrb.mxu3 %v14682_v39  ;;  %v5906_v1 = vadd.f32 %v5905_v61, %v5849_v60  ;;  %v10620_v60 = vld [vmem:[%s17217_s4 + $0x178] sm:$0xff] }
 0xc1a   : > { %6984 = vmatpush.msrb.mxu3 %v14687_v37  ;;  %9884 = vmatmul.msk.f32.gmra.mxu2 %vm2364_vm7, %v5906_v1 }
 0xc1b   : > { %9917 = vmatmul.msk.f32.gmra.mxu3 %vm2207_vm4, %v10604_v41 }
 0xc1c   : > { %6985 = vmatpush.msrb.mxu3 %v14695_v46  ;;  %v10606_v46 = vld [vmem:[%s17217_s4 + $0x108] sm:$0xff] }
 0xc1e   : > { %6986 = vmatpush.msrb.mxu3 %v14705_v33  ;;  %v5780_v39 = vpop.f32.mrf.mxu3 }
 0xc1f   : > { %v15414_v0 = vadd.f32 %v5780_v39, %v5570_v14  ;;  %v6150_v37 = vpop.f32.mrf.mxu0  ;;  %v10621_v14 = vld [vmem:[%s17217_s4 + $0x150] sm:$0xff]  ;;  %v10622_v39 = vld [vmem:[%s17217_s4 + $0x188] sm:$0xff] }
 0xc20   : > { %6987 = vmatpush.msrb.mxu3 %v14712_v44 }
 0xc22   : > { %6988 = vmatpush.msrb.mxu3 %v14717_v49  ;;  %6318 = vmatmul.f32.vlgmr.msrb.gmra.mxu2 %v10605_v24  ;;  %v10607_v49 = vld [vmem:[%s17217_s4 + $0xe0] sm:$0xff] }
 0xc23   : > { %9918 = vmatmul.msk.f32.gmra.mxu3 %vm2207_vm4, %v10606_v46 }
 0xc24   : > { %6989 = vmatpush.msrb.mxu3 %v14725_v29  ;;  %v10608_v29 = vld [vmem:[%s17217_s4 + $0x118] sm:$0xff] }
 0xc26   : > { %6990 = vmatpush.msrb.mxu3 %v14734_v54  ;;  %v6094_v33 = vpop.f32.mrf.mxu3 }
 0xc27   : > { %v6151_v16 = vadd.f32 %v6150_v37, %v6094_v33  ;;  %v6153_v44 = vpop.f32.mrf.mxu0 }
 0xc28   : > { %6991 = vmatpush.msrb.mxu3 %v14739_v40 }
 0xc29   : > { %9901 = vmatmul.msk.f32.vlgmr.msra.gmra.mxu1 %vm2364_vm7, %v6151_v16  ;;  %v9986_v16 = vld [vmem:[%s17218_s5 + $0x90] sm:$0x3f] }
 0xc2a   : > { %9972 = vmatpush.msk.msra.mxu1 %vm2247_vm3, %v14929_v51  ;;  %6992 = vmatpush.msrb.mxu3 %v14745_v36  ;;  %v10609_v36 = vld [vmem:[%s17217_s4 + $0xf0] sm:$0xff] }
 0xc2b   : > { %6321 = vmatmul.f32.gmra.mxu2 %v10607_v49  ;;  %9919 = vmatmul.msk.f32.gmra.mxu3 %vm2207_vm4, %v10608_v29 }
 0xc2c   : > { %6823 = vmatpush.msra.mxu1 %v14943_v43  ;;  %9987 = vmatpush.msk.msrb.mxu2 %vm2404_vm6, %v9986_v16 }
 0xc2e   : > { %v6097_v54 = vpop.f32.mrf.mxu3 }
 0xc2f   : > { %v6154_v40 = vadd.f32 %v6153_v44, %v6097_v54  ;;  %v6156_v47 = vpop.f32.mrf.mxu0  ;;  %v10623_v44 = vld [vmem:[%s17217_s4 + $0x160] sm:$0xff] }
 0xc31   : > { %9902 = vmatmul.msk.f32.gmra.mxu1 %vm2364_vm7, %v6154_v40 }
 0xc33   : > { %6324 = vmatmul.f32.gmra.mxu2 %v10609_v36  ;;  %9920 = vmatmul.msk.f32.gmra.mxu3 %vm2207_vm4, %v10610_v52  ;;  %v10625_v36 = vld [vmem:[%s17217_s4 + $0x170] sm:$0xff] }
 0xc36   : > { %v6100_v10 = vpop.f32.mrf.mxu3 }
 0xc37   : > { %v6157_v9 = vadd.f32 %v6156_v47, %v6100_v10  ;;  %v6159_v62 = vpop.f32.mrf.mxu0 }
 0xc39   : > { %9903 = vmatmul.msk.f32.gmra.mxu1 %vm2364_vm7, %v6157_v9 }
 0xc3b   : > { %6327 = vmatmul.f32.gmra.mxu2 %v10611_v17  ;;  %9921 = vmatmul.msk.f32.gmra.mxu3 %vm2207_vm4, %v10612_v28  ;;  %v10626_v17 = vld [vmem:[%s17217_s4 + $0x180] sm:$0xff] }
 0xc3d   : > { %v5969_v30 = vpop.f32.mrf.mxu2 }
 0xc3e   : > { %v15457_v15 = vadd.f32 %v5969_v30, %v15251_v59  ;;  %v6103_v4 = vpop.f32.mrf.mxu3 }
 0xc3f   : > { %v6160_v48 = vadd.f32 %v6159_v62, %v6103_v4 }
 0xc40   : > { %v6162_v2 = vpop.f32.mrf.mxu0 }
 0xc41   : > { %9904 = vmatmul.msk.f32.gmra.mxu1 %vm2364_vm7, %v6160_v48 }
 0xc43   : > { %6330 = vmatmul.f32.gmra.mxu2 %v10613_v27  ;;  %9922 = vmatmul.msk.f32.gmra.mxu3 %vm2207_vm4, %v10614_v45 }
 0xc45   : > { %v5972_v11 = vpop.f32.mrf.mxu2 }
 0xc46   : > { %v15468_v59 = vadd.f32 %v5972_v11, %v15266_v12  ;;  %v6106_v3 = vpop.f32.mrf.mxu3 }
 0xc47   : > { %v6163_v35 = vadd.f32 %v6162_v2, %v6106_v3 }
 0xc48   : > { %v6165_v50 = vpop.f32.mrf.mxu0 }
 0xc49   : > { %9905 = vmatmul.msk.f32.gmra.mxu1 %vm2364_vm7, %v6163_v35  ;;  %v17514_v35 = vld [vmem:[#allocation30_spill] sm:$0xff] }
 0xc4b   : > { %6333 = vmatmul.f32.gmra.mxu2 %v10615_v32  ;;  %9923 = vmatmul.msk.f32.gmra.mxu3 %vm2207_vm4, %v10616_v20  ;;  %v17515_v32 = vld [vmem:[#allocation80_spill] sm:$0xff] }
 0xc4d   : > { %v5975_v63 = vpop.f32.mrf.mxu2 }
 0xc4e   : > { %v15479_v12 = vadd.f32 %v5975_v63, %v15279_v19  ;;  %v6109_v21 = vpop.f32.mrf.mxu3  ;;  %v17516_v63 = vld [vmem:[#allocation17_spill] sm:$0xff] }
 0xc4f   : > { %v6166_v53 = vadd.f32 %v6165_v50, %v6109_v21  ;;  %v10629_v21 = vld [vmem:[%s17217_s4 + $0x1a0] sm:$0xff] }
 0xc50   : > { %v6168_v58 = vpop.f32.mrf.mxu0 }
 0xc51   : > { %9906 = vmatmul.msk.f32.gmra.mxu1 %vm2364_vm7, %v6166_v53  ;;  %v17517_v53 = vld [vmem:[#allocation9_spill] sm:$0xff] }
 0xc53   : > { %6336 = vmatmul.f32.gmra.mxu2 %v10617_v25  ;;  %9924 = vmatmul.msk.f32.gmra.mxu3 %vm2207_vm4, %v10618_v57  ;;  %v17518_v25 = vld [vmem:[#allocation19_spill] sm:$0xff]  ;;  %v17519_v57 = vld [vmem:[#allocation89_spill] sm:$0xff] }
 0xc55   : > { %v5978_v13 = vpop.f32.mrf.mxu2 }
 0xc56   : > { %v15490_v19 = vadd.f32 %v5978_v13, %v15292_v22  ;;  %v6112_v55 = vpop.f32.mrf.mxu3 }
 0xc57   : > { %v6169_v18 = vadd.f32 %v6168_v58, %v6112_v55  ;;  %v10630_v58 = vld [vmem:[%s17217_s4 + $0x1b8] sm:$0xff] }
 0xc58   : > { %v6171_v61 = vpop.f32.mrf.mxu0 }
 0xc59   : > { %9907 = vmatmul.msk.f32.gmra.mxu1 %vm2364_vm7, %v6169_v18  ;;  %v17520_v18 = vld [vmem:[#allocation90_spill] sm:$0xff] }
 0xc5b   : > { %6339 = vmatmul.f32.gmra.mxu2 %v10619_v7  ;;  %9925 = vmatmul.msk.f32.gmra.mxu3 %vm2207_vm4, %v10620_v60  ;;  %v17521_v7 = vld [vmem:[#allocation92_spill] sm:$0xff] }
 0xc5c   : > { %v10632_v60 = vld [vmem:[%s17217_s4 + $0x1c8] sm:$0xff] }
 0xc5d   : > { %v5981_v1 = vpop.f32.mrf.mxu2 }
 0xc5e   : > { %v15501_v22 = vadd.f32 %v5981_v1, %v15305_v38  ;;  %v6115_v5 = vpop.f32.mrf.mxu3  ;;  %v17522_v1 = vld [vmem:[#allocation93_spill] sm:$0xff] }
 0xc5f   : > { %v6172_v41 = vadd.f32 %v6171_v61, %v6115_v5  ;;  %v10631_v61 = vld [vmem:[%s17217_s4 + $0x1b0] sm:$0xff]  ;;  %v17523_v5 = vld [vmem:[#allocation94_spill] sm:$0xff] }
 0xc60   : > { %v6174_v42 = vpop.f32.mrf.mxu0 }
 0xc61   : > { %9908 = vmatmul.msk.f32.gmra.mxu1 %vm2364_vm7, %v6172_v41 }
 0xc63   : > { %6342 = vmatmul.f32.gmra.mxu2 %v10621_v14  ;;  %9926 = vmatmul.msk.f32.gmra.mxu3 %vm2207_vm4, %v10622_v39  ;;  %v17524_v14 = vld [vmem:[#allocation91_spill] sm:$0xff] }
 0xc64   : > { %v10633_v39 = vld [vmem:[%s17217_s4 + $0x1c0] sm:$0xff] }
 0xc65   : > { %v5984_v37 = vpop.f32.mrf.mxu2 }
 0xc66   : > { %v15512_v38 = vadd.f32 %v5984_v37, %v15318_v26  ;;  %v6118_v24 = vpop.f32.mrf.mxu3  ;;  %v10624_v26 = vld [vmem:[%s17217_s4 + $0x198] sm:$0xf]  ;;  %v17525_v37 = vld [vmem:[#allocation36_spill] sm:$0xff] }
 0xc67   : > { %v6175_v46 = vadd.f32 %v6174_v42, %v6118_v24  ;;  %v10634_v24 = vld [vmem:[%s17217_s4 + $0x1d8] sm:$0xff] }
 0xc68   : > { %v6177_v33 = vpop.f32.mrf.mxu0 }
 0xc69   : > { %9909 = vmatmul.msk.f32.gmra.mxu1 %vm2364_vm7, %v6175_v46  ;;  %v17526_v46 = vld [vmem:[#allocation44_spill] sm:$0xff] }
 0xc6b   : > { %6345 = vmatmul.f32.gmra.mxu2 %v10623_v44  ;;  %9927 = vmatmul.msk.f32.gmra.mxu3 %vm2207_vm4, %v10624_v26  ;;  %v17528_v26 = vld [vmem:[#allocation35_spill] sm:$0xff] }
 0xc6d   : > { %v5987_v49 = vpop.f32.mrf.mxu2 }
 0xc6e   : > { %v15527_v29 = vadd.f32 %v5987_v49, %v15335_v31  ;;  %v6121_v54 = vpop.f32.mrf.mxu3  ;;  %v10635_v49 = vld [vmem:[%s17217_s4 + $0x1d0] sm:$0xff] }
 0xc6f   : > { %v6178_v40 = vadd.f32 %v6177_v33, %v6121_v54  ;;  %v17527_v33 = vld [vmem:[#allocation47_spill] sm:$0xff] }
 0xc70   : > { %v6180_v47 = vpop.f32.mrf.mxu0 }
 0xc71   : > { %9910 = vmatmul.msk.f32.gmra.mxu1 %vm2364_vm7, %v6178_v40  ;;  %v17529_v40 = vld [vmem:[#allocation82_spill] sm:$0xff] }
 0xc73   : > { %6348 = vmatmul.f32.gmra.mxu2 %v10625_v36 }
 0xc75   : > { %v5990_v52 = vpop.f32.mrf.mxu2 }
 0xc76   : > { %v15534_v10 = vadd.f32 %v5990_v52, %v15348_v8  ;;  %v6124_v9 = vpop.f32.mrf.mxu3  ;;  %v10627_v8 = vld [vmem:[%s17217_s4 + $0x190] sm:$0xf] }
 0xc77   : > { %v6181_v62 = vadd.f32 %v6180_v47, %v6124_v9  ;;  %v10636_v47 = vld [vmem:[%s17217_s4 + $0x1e8] sm:$0xff] }
 0xc78   : > { %v6183_v31 = vpop.f32.mrf.mxu0 }
 0xc79   : > { %9911 = vmatmul.msk.f32.gmra.mxu1 %vm2364_vm7, %v6181_v62  ;;  %v10638_v62 = vld [vmem:[%s17217_s4 + $0x1f8] sm:$0xff] }
 0xc7b   : > { %6351 = vmatmul.f32.gmra.mxu2 %v10626_v17 }
 0xc7d   : > { %v5993_v28 = vpop.f32.mrf.mxu2 }
 0xc7e   : > { %v15541_v30 = vadd.f32 %v5993_v28, %v15361_v6  ;;  %v6127_v4 = vpop.f32.mrf.mxu3  ;;  %v10628_v6 = vld [vmem:[%s17217_s4 + $0x1a8] sm:$0xff] }
 0xc7f   : > { %v6184_v48 = vadd.f32 %v6183_v31, %v6127_v4  ;;  %v10639_v4 = vld [vmem:[%s17217_s4 + $0x1f0] sm:$0xff] }
 0xc80   : > { %v6186_v2 = vpop.f32.mrf.mxu0 }
 0xc81   : > { %9912 = vmatmul.msk.f32.gmra.mxu1 %vm2364_vm7, %v6184_v48  ;;  %v10640_v48 = vld [vmem:[%s17217_s4 + $0x208] sm:$0xff] }
 0xc83   : > { %6354 = vmatmul.f32.gmra.mxu2 %v10627_v8 }
 0xc85   : > { %v5996_v27 = vpop.f32.mrf.mxu2 }
 0xc86   : > { %v15548_v45 = vadd.f32 %v5996_v27, %v15374_v23  ;;  %v6130_v11 = vpop.f32.mrf.mxu3 }
 0xc87   : > { %v6187_v3 = vadd.f32 %v6186_v2, %v6130_v11 }
 0xc89   : > { %9913 = vmatmul.msk.f32.gmra.mxu1 %vm2364_vm7, %v6187_v3  ;;  %v10641_v3 = vld [vmem:[%s17217_s4 + $0x200] sm:$0xff] }
 0xc8b   : > { %9944 = vmatmul.msk.f32.vlgmr.msra.gmra.mxu2 %vm2207_vm4, %v10628_v6  ;;  %v10642_v6 = vld [vmem:[%s17217_s4 + $0x218] sm:$0xff] }
 0xc8c   : > { %7205 = vmatpush.msra.mxu2 %v17514_v35 }
 0xc8d   : > { %v5999_v50 = vpop.f32.mrf.mxu2 }
 0xc8e   : > { %7206 = vmatpush.msra.mxu2 %v17515_v32  ;;  %v15558_v20 = vadd.f32 %v5999_v50, %v15386_v56  ;;  %v6375_v23 = vpop.f32.mrf.mxu3 }
 0xc90   : > { %7207 = vmatpush.msra.mxu2 %v17516_v63 }
 0xc91   : > { %6543 = vmatmul.f32.vlgmr.msrb.gmra.mxu1 %v10629_v21 }
 0xc92   : > { %7208 = vmatpush.msra.mxu2 %v17517_v53 }
 0xc93   : > { %9945 = vmatmul.msk.f32.gmra.mxu2 %vm2207_vm4, %v10630_v58 }
 0xc94   : > { %7209 = vmatpush.msra.mxu2 %v17518_v25 }
 0xc95   : > { %v6002_v56 = vpop.f32.mrf.mxu2 }
 0xc96   : > { %7210 = vmatpush.msra.mxu2 %v17519_v57  ;;  %v15572_v13 = vadd.f32 %v6002_v56, %v15400_v34  ;;  %v6378_v55 = vpop.f32.mrf.mxu3  ;;  %v10643_v56 = vld [vmem:[%s17217_s4 + $0x210] sm:$0xff] }
 0xc98   : > { %7211 = vmatpush.msra.mxu2 %v17520_v18 }
 0xc99   : > { %6546 = vmatmul.f32.gmra.mxu1 %v10631_v61 }
 0xc9a   : > { %7212 = vmatpush.msra.mxu2 %v17521_v7 }
 0xc9b   : > { %9946 = vmatmul.msk.f32.gmra.mxu2 %vm2207_vm4, %v10632_v60 }
 0xc9c   : > { %7213 = vmatpush.msra.mxu2 %v17522_v1 }
 0xc9d   : > { %v6005_v34 = vpop.f32.mrf.mxu2 }
 0xc9e   : > { %7214 = vmatpush.msra.mxu2 %v17523_v5  ;;  %v15586_v41 = vadd.f32 %v6005_v34, %v15414_v0  ;;  %v6381_v42 = vpop.f32.mrf.mxu3 }
 0xca0   : > { %7215 = vmatpush.msra.mxu2 %v17524_v14 }
 0xca1   : > { %6549 = vmatmul.f32.gmra.mxu1 %v10633_v39 }
 0xca2   : > { %7216 = vmatpush.msra.mxu2 %v17525_v37 }
 0xca3   : > { %9947 = vmatmul.msk.f32.gmra.mxu2 %vm2207_vm4, %v10634_v24  ;;  %v10646_v24 = vld [vmem:[%s17217_s4 + $0x238] sm:$0xff] }
 0xca4   : > { %7217 = vmatpush.msra.mxu2 %v17526_v46 }
 0xca5   : > { %v6319_v0 = vpop.f32.mrf.mxu2 }
 0xca6   : > { %7218 = vmatpush.msra.mxu2 %v17527_v33  ;;  %v15599_v16 = vpop.f32.mrf.mxu1  ;;  %v6376_v44 = vadd.f32 %v6375_v23, %v6319_v0  ;;  %v6384_v54 = vpop.f32.mrf.mxu3 }
 0xca8   : > { %7219 = vmatpush.msra.mxu2 %v17528_v26  ;;  %9930 = vmatmul.msk.f32.vlgmr.msra.gmra.mxu0 %vm2364_vm7, %v6376_v44 }
 0xca9   : > { %6552 = vmatmul.f32.gmra.mxu1 %v10635_v49  ;;  %10001 = vmatpush.msk.msra.mxu0 %vm2247_vm3, %v14929_v51  ;;  %v10637_v51 = vld [vmem:[%s17217_s4 + $0x1e0] sm:$0xff] }
 0xcaa   : > { %7220 = vmatpush.msra.mxu2 %v17529_v40 }
 0xcab   : > { %9948 = vmatmul.msk.f32.gmra.mxu2 %vm2207_vm4, %v10636_v47  ;;  %7048 = vmatpush.msra.mxu0 %v14943_v43  ;;  %v10647_v47 = vld [vmem:[%s17217_s4 + $0x230] sm:$0xff] }
 0xcae   : > { %v15614_v36 = vpop.f32.mrf.mxu1  ;;  %v6322_v52 = vpop.f32.mrf.mxu2 }
 0xcaf   : > { %v6379_v9 = vadd.f32 %v6378_v55, %v6322_v52  ;;  %v6387_v31 = vpop.f32.mrf.mxu3  ;;  %v10644_v55 = vld [vmem:[%s17217_s4 + $0x228] sm:$0xff] }
 0xcb0   : > { %v10648_v52 = vld [vmem:[%s17217_s4 + $0x248] sm:$0xff] }
 0xcb1   : > { %9931 = vmatmul.msk.f32.gmra.mxu0 %vm2364_vm7, %v6379_v9  ;;  %6555 = vmatmul.f32.gmra.mxu1 %v10637_v51 }
 0xcb3   : > { %9949 = vmatmul.msk.f32.gmra.mxu2 %vm2207_vm4, %v10638_v62 }
 0xcb6   : > { %v15624_v17 = vpop.f32.mrf.mxu1  ;;  %v6325_v43 = vpop.f32.mrf.mxu2 }
 0xcb7   : > { %v6382_v28 = vadd.f32 %v6381_v42, %v6325_v43  ;;  %v6390_v8 = vpop.f32.mrf.mxu3  ;;  %v10645_v42 = vld [vmem:[%s17217_s4 + $0x220] sm:$0xff] }
 0xcb8   : > { %v10649_v43 = vld [vmem:[%s17217_s4 + $0x240] sm:$0xff] }
 0xcb9   : > { %9932 = vmatmul.msk.f32.gmra.mxu0 %vm2364_vm7, %v6382_v28  ;;  %6558 = vmatmul.f32.gmra.mxu1 %v10639_v4  ;;  %v10650_v28 = vld [vmem:[%s17217_s4 + $0x258] sm:$0xff] }
 0xcbb   : > { %9950 = vmatmul.msk.f32.gmra.mxu2 %vm2207_vm4, %v10640_v48 }
 0xcbe   : > { %v15634_v2 = vpop.f32.mrf.mxu1  ;;  %v6328_v27 = vpop.f32.mrf.mxu2 }
 0xcbf   : > { %v6385_v11 = vadd.f32 %v6384_v54, %v6328_v27  ;;  %v6393_v58 = vpop.f32.mrf.mxu3  ;;  %v10015_v54 = vld [vmem:[%s17218_s5 + $0x98] sm:$0x3f] }
 0xcc0   : > { %10016 = vmatpush.msk.msrb.mxu1 %vm2404_vm6, %v10015_v54  ;;  %v10655_v54 = vld [vmem:[%s17217_s4 + $0x288] sm:$0xff] }
 0xcc1   : > { %9933 = vmatmul.msk.f32.gmra.mxu0 %vm2364_vm7, %v6385_v11  ;;  %6561 = vmatmul.f32.gmra.mxu1 %v10641_v3  ;;  %v10651_v11 = vld [vmem:[%s17217_s4 + $0x250] sm:$0xff]  ;;  %v10652_v3 = vld [vmem:[%s17217_s4 + $0x268] sm:$0xf] }
 0xcc3   : > { %9951 = vmatmul.msk.f32.gmra.mxu2 %vm2207_vm4, %v10642_v6 }
 0xcc6   : > { %v15644_v50 = vpop.f32.mrf.mxu1  ;;  %v6331_v23 = vpop.f32.mrf.mxu2 }
 0xcc7   : > { %v6388_v21 = vadd.f32 %v6387_v31, %v6331_v23  ;;  %v6396_v39 = vpop.f32.mrf.mxu3 }
 0xcc9   : > { %9934 = vmatmul.msk.f32.gmra.mxu0 %vm2364_vm7, %v6388_v21  ;;  %6564 = vmatmul.f32.gmra.mxu1 %v10643_v56  ;;  %v10653_v56 = vld [vmem:[%s17217_s4 + $0x260] sm:$0xf] }
 0xccb   : > { %9952 = vmatmul.msk.f32.gmra.mxu2 %vm2207_vm4, %v10644_v55 }
 0xcce   : > { %v15654_v61 = vpop.f32.mrf.mxu1  ;;  %v6334_v60 = vpop.f32.mrf.mxu2 }
 0xccf   : > { %v6391_v34 = vadd.f32 %v6390_v8, %v6334_v60  ;;  %v6399_v9 = vpop.f32.mrf.mxu3 }
 0xcd1   : > { %9935 = vmatmul.msk.f32.gmra.mxu0 %vm2364_vm7, %v6391_v34  ;;  %6567 = vmatmul.f32.gmra.mxu1 %v10645_v42  ;;  %v10654_v42 = vld [vmem:[%s17217_s4 + $0x278] sm:$0xff] }
 0xcd3   : > { %9953 = vmatmul.msk.f32.gmra.mxu2 %vm2207_vm4, %v10646_v24 }
 0xcd6   : > { %v15664_v0 = vpop.f32.mrf.mxu1  ;;  %v6337_v44 = vpop.f32.mrf.mxu2 }
 0xcd7   : > { %v6394_v49 = vadd.f32 %v6393_v58, %v6337_v44  ;;  %v6402_v4 = vpop.f32.mrf.mxu3 }
 0xcd9   : > { %9936 = vmatmul.msk.f32.gmra.mxu0 %vm2364_vm7, %v6394_v49  ;;  %6570 = vmatmul.f32.gmra.mxu1 %v10647_v47  ;;  %v17530_v47 = vld [vmem:[#allocation22_spill] sm:$0xff] }
 0xcdb   : > { %9954 = vmatmul.msk.f32.gmra.mxu2 %vm2207_vm4, %v10648_v52  ;;  %v17531_v52 = vld [vmem:[#allocation49_spill] sm:$0xff] }
 0xcde   : > { %v15678_v51 = vpop.f32.mrf.mxu1  ;;  %v6340_v62 = vpop.f32.mrf.mxu2 }
 0xcdf   : > { %v6397_v31 = vadd.f32 %v6396_v39, %v6340_v62  ;;  %v6405_v58 = vpop.f32.mrf.mxu3 }
 0xce1   : > { %9937 = vmatmul.msk.f32.gmra.mxu0 %vm2364_vm7, %v6397_v31  ;;  %6573 = vmatmul.f32.gmra.mxu1 %v10649_v43  ;;  %v17532_v31 = vld [vmem:[#allocation20_spill] sm:$0xff]  ;;  %v17533_v43 = vld [vmem:[#allocation46_spill] sm:$0xff] }
 0xce3   : > { %9955 = vmatmul.msk.f32.gmra.mxu2 %vm2207_vm4, %v10650_v28  ;;  %v1711_v28 = vadd.f32 %v17533_v43, %v17532_v31 }
 0xce6   : > { %v15688_v48 = vpop.f32.mrf.mxu1  ;;  %v6343_v8 = vpop.f32.mrf.mxu2 }
 0xce7   : > { %v6400_v27 = vadd.f32 %v6399_v9, %v6343_v8  ;;  %v6408_v39 = vpop.f32.mrf.mxu3  ;;  %v1714_v9 = vadd.f32 %v17531_v52, %v17530_v47  ;;  %v17540_v47 = vld [vmem:[#allocation86_spill] sm:$0xff] }
 0xce9   : > { %9938 = vmatmul.msk.f32.gmra.mxu0 %vm2364_vm7, %v6400_v27  ;;  %6576 = vmatmul.f32.gmra.mxu1 %v10651_v11 }
 0xceb   : > { %9956 = vmatmul.msk.f32.gmra.mxu2 %vm2207_vm4, %v10652_v3 }
 0xcee   : > { %v15698_v6 = vpop.f32.mrf.mxu1  ;;  %v6346_v23 = vpop.f32.mrf.mxu2 }
 0xcef   : > { %v6403_v21 = vadd.f32 %v6402_v4, %v6346_v23  ;;  %v6411_v62 = vpop.f32.mrf.mxu3  ;;  %v17534_v4 = vld [vmem:[#allocation64_spill] sm:$0xff]  ;;  %v17535_v23 = vld [vmem:[#allocation61_spill] sm:$0xff] }
 0xcf0   : > { %v1806_v8 = vadd.f32 %v17534_v4, %v1714_v9  ;;  %v17541_v9 = vld [vmem:[#allocation74_spill] sm:$0xff]  ;;  %v17542_v4 = vld [vmem:[#allocation15_spill] sm:$0xff] }
 0xcf1   : > { %9939 = vmatmul.msk.f32.gmra.mxu0 %vm2364_vm7, %v6403_v21  ;;  %6579 = vmatmul.f32.gmra.mxu1 %v10653_v56  ;;  %v1803_v21 = vadd.f32 %v17535_v23, %v1711_v28 }
 0xcf6   : > { %v15704_v55 = vpop.f32.mrf.mxu1  ;;  %v6349_v60 = vpop.f32.mrf.mxu2 }
 0xcf7   : > { %v6406_v34 = vadd.f32 %v6405_v58, %v6349_v60  ;;  %v17536_v58 = vld [vmem:[#allocation60_spill] sm:$0xff]  ;;  %v10656_v60 = vld [vmem:[%s17217_s4 + $0x298] sm:$0xff] }
 0xcf8   : > { %v1898_v56 = vadd.f32 %v17536_v58, %v1806_v8 }
 0xcf9   : > { %9940 = vmatmul.msk.f32.gmra.mxu0 %vm2364_vm7, %v6406_v34  ;;  %9973 = vmatmul.msk.f32.vlgmr.msra.gmra.mxu1 %vm2207_vm4, %v10654_v42  ;;  %v17537_v34 = vld [vmem:[#allocation57_spill] sm:$0xff] }
 0xcfa   : > { %7430 = vmatpush.msra.mxu1 %v17514_v35  ;;  %v1895_v42 = vadd.f32 %v17537_v34, %v1803_v21  ;;  %v10658_v21 = vld [vmem:[%s17217_s4 + $0x2a8] sm:$0xff]  ;;  %v10659_v34 = vld [vmem:[%s17217_s4 + $0x280] sm:$0xff] }
 0xcfc   : > { %7431 = vmatpush.msra.mxu1 %v17515_v32 }
 0xcfe   : > { %7432 = vmatpush.msra.mxu1 %v17516_v63  ;;  %v15714_v24 = vpop.f32.mrf.mxu1  ;;  %v6352_v44 = vpop.f32.mrf.mxu2 }
 0xcff   : > { %v6409_v49 = vadd.f32 %v6408_v39, %v6352_v44  ;;  %v17538_v39 = vld [vmem:[#allocation21_spill] sm:$0xff] }
 0xd00   : > { %7433 = vmatpush.msra.mxu1 %v17517_v53  ;;  %v1990_v44 = vadd.f32 %v17538_v39, %v1898_v56 }
 0xd01   : > { %9941 = vmatmul.msk.f32.gmra.mxu0 %vm2364_vm7, %v6409_v49  ;;  %9974 = vmatmul.msk.f32.gmra.mxu1 %vm2207_vm4, %v10655_v54  ;;  %v17539_v49 = vld [vmem:[#allocation10_spill] sm:$0xff] }
 0xd02   : > { %7434 = vmatpush.msra.mxu1 %v17518_v25  ;;  %v1987_v54 = vadd.f32 %v17539_v49, %v1895_v42  ;;  %v2082_v52 = vadd.f32 %v17540_v47, %v1990_v44  ;;  %v10660_v42 = vld [vmem:[%s17217_s4 + $0x2b8] sm:$0xff]  ;;  %v10662_v47 = vld [vmem:[%s17217_s4 + $0x2c8] sm:$0xff] }
 0xd04   : > { %7435 = vmatpush.msra.mxu1 %v17519_v57  ;;  %v15749_v8 = vadd.f32 %v17542_v4, %v2082_v52 }
 0xd06   : > { %7436 = vmatpush.msra.mxu1 %v17520_v18  ;;  %v15730_v27 = vpop.f32.mrf.mxu1  ;;  %v6355_v11 = vpop.f32.mrf.mxu2 }
 0xd07   : > { %v6412_v3 = vadd.f32 %v6411_v62, %v6355_v11  ;;  %v2079_v62 = vadd.f32 %v17541_v9, %v1987_v54  ;;  %v10657_v11 = vld [vmem:[%s17217_s4 + $0x270] sm:$0xff] }
 0xd08   : > { %7437 = vmatpush.msra.mxu1 %v17521_v7  ;;  %v10661_v54 = vld [vmem:[%s17217_s4 + $0x290] sm:$0xff] }
 0xd09   : > { %9942 = vmatmul.msk.f32.gmra.mxu0 %vm2364_vm7, %v6412_v3  ;;  %9975 = vmatmul.msk.f32.gmra.mxu1 %vm2207_vm4, %v10656_v60  ;;  %v17543_v3 = vld [vmem:[#allocation7_spill] sm:$0xff] }
 0xd0a   : > { %7438 = vmatpush.msra.mxu1 %v17522_v1  ;;  %v15757_v23 = vadd.f32 %v17543_v3, %v2079_v62 }
 0xd0c   : > { %7439 = vmatpush.msra.mxu1 %v17523_v5 }
 0xd0e   : > { %7440 = vmatpush.msra.mxu1 %v17524_v14  ;;  %v6544_v31 = vpop.f32.mrf.mxu1  ;;  %v6600_v43 = vpop.f32.mrf.mxu2 }
 0xd0f   : > { %v6601_v28 = vadd.f32 %v6600_v43, %v6544_v31  ;;  %v10663_v43 = vld [vmem:[%s17217_s4 + $0x2a0] sm:$0xff] }
 0xd10   : > { %7441 = vmatpush.msra.mxu1 %v17525_v37 }
 0xd11   : > { %9959 = vmatmul.msk.f32.vlgmr.msra.gmra.mxu3 %vm2364_vm7, %v6601_v28  ;;  %6768 = vmatmul.f32.vlgmr.msrb.gmra.mxu0 %v10657_v11  ;;  %v10664_v28 = vld [vmem:[%s17217_s4 + $0x2d8] sm:$0xff] }
 0xd12   : > { %10030 = vmatpush.msk.msra.mxu3 %vm2247_vm3, %v15749_v8  ;;  %7442 = vmatpush.msra.mxu1 %v17526_v46 }
 0xd13   : > { %9976 = vmatmul.msk.f32.gmra.mxu1 %vm2207_vm4, %v10658_v21 }
 0xd14   : > { %7276 = vmatpush.msra.mxu3 %v15757_v23  ;;  %7443 = vmatpush.msra.mxu1 %v17527_v33 }
 0xd16   : > { %7444 = vmatpush.msra.mxu1 %v17528_v26  ;;  %v6547_v58 = vpop.f32.mrf.mxu1  ;;  %v6603_v56 = vpop.f32.mrf.mxu2 }
 0xd17   : > { %v6604_v60 = vadd.f32 %v6603_v56, %v6547_v58  ;;  %v10665_v58 = vld [vmem:[%s17217_s4 + $0x2b0] sm:$0xff]  ;;  %v10666_v56 = vld [vmem:[%s17217_s4 + $0x2e8] sm:$0xff] }
 0xd18   : > { %7445 = vmatpush.msra.mxu1 %v17529_v40 }
 0xd19   : > { %9960 = vmatmul.msk.f32.gmra.mxu3 %vm2364_vm7, %v6604_v60  ;;  %6771 = vmatmul.f32.gmra.mxu0 %v10659_v34 }
 0xd1b   : > { %9977 = vmatmul.msk.f32.gmra.mxu1 %vm2207_vm4, %v10660_v42 }
 0xd1e   : > { %v6550_v39 = vpop.f32.mrf.mxu1  ;;  %v6606_v44 = vpop.f32.mrf.mxu2 }
 0xd1f   : > { %v6607_v49 = vadd.f32 %v6606_v44, %v6550_v39  ;;  %v10667_v44 = vld [vmem:[%s17217_s4 + $0x2c0] sm:$0xff] }
 0xd21   : > { %9961 = vmatmul.msk.f32.gmra.mxu3 %vm2364_vm7, %v6607_v49  ;;  %6774 = vmatmul.f32.gmra.mxu0 %v10661_v54  ;;  %v10668_v49 = vld [vmem:[%s17217_s4 + $0x2f8] sm:$0xff] }
 0xd23   : > { %9978 = vmatmul.msk.f32.gmra.mxu1 %vm2207_vm4, %v10662_v47 }
 0xd25   : > { %v15786_v52 = vpop.f32.mrf.mxu0 }
 0xd26   : > { %v6553_v9 = vpop.f32.mrf.mxu1  ;;  %v6609_v62 = vpop.f32.mrf.mxu2 }
 0xd27   : > { %v6610_v31 = vadd.f32 %v6609_v62, %v6553_v9 }
 0xd29   : > { %9962 = vmatmul.msk.f32.gmra.mxu3 %vm2364_vm7, %v6610_v31  ;;  %6777 = vmatmul.f32.gmra.mxu0 %v10663_v43  ;;  %v10669_v31 = vld [vmem:[%s17217_s4 + $0x2d0] sm:$0xff]  ;;  %v10670_v43 = vld [vmem:[%s17217_s4 + $0x308] sm:$0xff] }
 0xd2b   : > { %9979 = vmatmul.msk.f32.gmra.mxu1 %vm2207_vm4, %v10664_v28 }
 0xd2e   : > { %v15796_v4 = vpop.f32.mrf.mxu0  ;;  %v6556_v11 = vpop.f32.mrf.mxu1 }
 0xd2f   : > { %v6612_v3 = vpop.f32.mrf.mxu2 }
 0xd30   : > { %v6613_v21 = vadd.f32 %v6612_v3, %v6556_v11 }
 0xd31   : > { %6780 = vmatmul.f32.gmra.mxu0 %v10665_v58  ;;  %v10671_v58 = vld [vmem:[%s17217_s4 + $0x2e0] sm:$0xff] }
 0xd32   : > { %9963 = vmatmul.msk.f32.gmra.mxu3 %vm2364_vm7, %v6613_v21 }
 0xd33   : > { %9980 = vmatmul.msk.f32.gmra.mxu1 %vm2207_vm4, %v10666_v56  ;;  %v10672_v56 = vld [vmem:[%s17217_s4 + $0x318] sm:$0xff] }
 0xd36   : > { %v15806_v60 = vpop.f32.mrf.mxu0  ;;  %v6559_v34 = vpop.f32.mrf.mxu1 }
 0xd37   : > { %v6615_v42 = vpop.f32.mrf.mxu2 }
 0xd38   : > { %v6616_v39 = vadd.f32 %v6615_v42, %v6559_v34 }
 0xd39   : > { %6783 = vmatmul.f32.gmra.mxu0 %v10667_v44 }
 0xd3a   : > { %9964 = vmatmul.msk.f32.gmra.mxu3 %vm2364_vm7, %v6616_v39 }
 0xd3b   : > { %9981 = vmatmul.msk.f32.gmra.mxu1 %vm2207_vm4, %v10668_v49  ;;  %v10673_v49 = vld [vmem:[%s17217_s4 + $0x2f0] sm:$0xff] }
 0xd3e   : > { %v15816_v54 = vpop.f32.mrf.mxu0  ;;  %v6562_v47 = vpop.f32.mrf.mxu1 }
 0xd3f   : > { %v6618_v9 = vpop.f32.mrf.mxu2 }
 0xd40   : > { %v6619_v62 = vadd.f32 %v6618_v9, %v6562_v47  ;;  %v10674_v47 = vld [vmem:[%s17217_s4 + $0x328] sm:$0xff] }
 0xd41   : > { %6786 = vmatmul.f32.gmra.mxu0 %v10669_v31 }
 0xd42   : > { %9965 = vmatmul.msk.f32.gmra.mxu3 %vm2364_vm7, %v6619_v62 }
 0xd43   : > { %9982 = vmatmul.msk.f32.gmra.mxu1 %vm2207_vm4, %v10670_v43  ;;  %v10044_v43 = vld [vmem:[%s17218_s5 + $0xa0] sm:$0x3f] }
 0xd44   : > { %10045 = vmatpush.msk.msrb.mxu0 %vm2404_vm6, %v10044_v43  ;;  %v10678_v43 = vld [vmem:[%s17217_s4 + $0x320] sm:$0xff] }
 0xd46   : > { %v15826_v28 = vpop.f32.mrf.mxu0  ;;  %v6565_v11 = vpop.f32.mrf.mxu1 }
 0xd47   : > { %v6621_v3 = vpop.f32.mrf.mxu2 }
 0xd48   : > { %v6622_v21 = vadd.f32 %v6621_v3, %v6565_v11  ;;  %v10675_v3 = vld [vmem:[%s17217_s4 + $0x300] sm:$0xff] }
 0xd49   : > { %6789 = vmatmul.f32.gmra.mxu0 %v10671_v58 }
 0xd4a   : > { %9966 = vmatmul.msk.f32.gmra.mxu3 %vm2364_vm7, %v6622_v21  ;;  %v10676_v21 = vld [vmem:[%s17217_s4 + $0x338] sm:$0xf] }
 0xd4b   : > { %9983 = vmatmul.msk.f32.gmra.mxu1 %vm2207_vm4, %v10672_v56 }
 0xd4e   : > { %v15836_v34 = vpop.f32.mrf.mxu0  ;;  %v6568_v42 = vpop.f32.mrf.mxu1 }
 0xd4f   : > { %v6624_v39 = vpop.f32.mrf.mxu2 }
 0xd50   : > { %v6625_v44 = vadd.f32 %v6624_v39, %v6568_v42 }
 0xd51   : > { %6792 = vmatmul.f32.gmra.mxu0 %v10673_v49 }
 0xd52   : > { %9967 = vmatmul.msk.f32.gmra.mxu3 %vm2364_vm7, %v6625_v44  ;;  %v10677_v44 = vld [vmem:[%s17217_s4 + $0x310] sm:$0xff] }
 0xd53   : > { %9984 = vmatmul.msk.f32.gmra.mxu1 %vm2207_vm4, %v10674_v47 }
 0xd56   : > { %v15846_v9 = vpop.f32.mrf.mxu0  ;;  %v6571_v62 = vpop.f32.mrf.mxu1 }
 0xd57   : > { %v6627_v31 = vpop.f32.mrf.mxu2 }
 0xd58   : > { %v6628_v11 = vadd.f32 %v6627_v31, %v6571_v62 }
 0xd59   : > { %6795 = vmatmul.f32.gmra.mxu0 %v10675_v3 }
 0xd5a   : > { %9968 = vmatmul.msk.f32.gmra.mxu3 %vm2364_vm7, %v6628_v11 }
 0xd5b   : > { %9985 = vmatmul.msk.f32.gmra.mxu1 %vm2207_vm4, %v10676_v21 }
 0xd5e   : > { %v15860_v58 = vpop.f32.mrf.mxu0  ;;  %v6574_v56 = vpop.f32.mrf.mxu1 }
 0xd5f   : > { %v6630_v42 = vpop.f32.mrf.mxu2 }
 0xd60   : > { %v6631_v39 = vadd.f32 %v6630_v42, %v6574_v56  ;;  %v10679_v42 = vld [vmem:[%s17217_s4 + $0x330] sm:$0xf] }
 0xd61   : > { %6798 = vmatmul.f32.gmra.mxu0 %v10677_v44 }
 0xd62   : > { %9969 = vmatmul.msk.f32.gmra.mxu3 %vm2364_vm7, %v6631_v39 }
 0xd66   : > { %v15866_v49 = vpop.f32.mrf.mxu0  ;;  %v6577_v47 = vpop.f32.mrf.mxu1 }
 0xd67   : > { %v6633_v62 = vpop.f32.mrf.mxu2 }
 0xd68   : > { %v6634_v31 = vadd.f32 %v6633_v62, %v6577_v47  ;;  %v10680_v47 = vld [vmem:[%s17217_s4 + $0x348] sm:$0xff]  ;;  %v10681_v62 = vld [vmem:[%s17217_s4 + $0x340] sm:$0xff] }
 0xd69   : > { %6801 = vmatmul.f32.gmra.mxu0 %v10678_v43 }
 0xd6a   : > { %9970 = vmatmul.msk.f32.gmra.mxu3 %vm2364_vm7, %v6634_v31 }
 0xd6e   : > { %v15872_v11 = vpop.f32.mrf.mxu0  ;;  %v6580_v3 = vpop.f32.mrf.mxu1 }
 0xd6f   : > { %v6636_v21 = vpop.f32.mrf.mxu2 }
 0xd70   : > { %v6637_v56 = vadd.f32 %v6636_v21, %v6580_v3  ;;  %v10682_v3 = vld [vmem:[%s17217_s4 + $0x358] sm:$0xff]  ;;  %v10683_v21 = vld [vmem:[%s17217_s4 + $0x350] sm:$0xff] }
 0xd71   : > { %6804 = vmatmul.f32.gmra.mxu0 %v10679_v42 }
 0xd72   : > { %9971 = vmatmul.msk.f32.gmra.mxu3 %vm2364_vm7, %v6637_v56 }
 0xd76   : > { %v15878_v39 = vpop.f32.mrf.mxu0  ;;  %v6825_v44 = vpop.f32.mrf.mxu1 }
 0xd79   : > { %10002 = vmatmul.msk.f32.vlgmr.msra.gmra.mxu0 %vm2207_vm4, %v10680_v47  ;;  %v10684_v47 = vld [vmem:[%s17217_s4 + $0x368] sm:$0xff] }
 0xd7a   : > { %6993 = vmatmul.f32.vlgmr.msrb.gmra.mxu3 %v10681_v62  ;;  %7655 = vmatpush.msra.mxu0 %v17514_v35  ;;  %v10685_v62 = vld [vmem:[%s17217_s4 + $0x360] sm:$0xff] }
 0xd7c   : > { %7656 = vmatpush.msra.mxu0 %v17515_v32 }
 0xd7e   : > { %7657 = vmatpush.msra.mxu0 %v17516_v63  ;;  %v15890_v31 = vpop.f32.mrf.mxu0  ;;  %v6828_v43 = vpop.f32.mrf.mxu1 }
 0xd80   : > { %7658 = vmatpush.msra.mxu0 %v17517_v53 }
 0xd81   : > { %10003 = vmatmul.msk.f32.gmra.mxu0 %vm2207_vm4, %v10682_v3 }
 0xd82   : > { %6996 = vmatmul.f32.gmra.mxu3 %v10683_v21  ;;  %7659 = vmatpush.msra.mxu0 %v17518_v25 }
 0xd84   : > { %7660 = vmatpush.msra.mxu0 %v17519_v57 }
 0xd86   : > { %7661 = vmatpush.msra.mxu0 %v17520_v18  ;;  %v15903_v56 = vpop.f32.mrf.mxu0  ;;  %v6831_v42 = vpop.f32.mrf.mxu1 }
 0xd87   : > { %17544 = vst [vmem:[#allocation28_spill] sm:$0xff] %v15903_v56  ;;  %v6289_v56 = vadd.f32 %v15599_v16, %v15457_v15 }
 0xd88   : > { %7662 = vmatpush.msra.mxu0 %v17521_v7 }
 0xd89   : > { %10004 = vmatmul.msk.f32.gmra.mxu0 %vm2207_vm4, %v10684_v47  ;;  %v10686_v47 = vld [vmem:[%s17217_s4 + $0x378] sm:$0xff] }
 0xd8a   : > { %6999 = vmatmul.f32.gmra.mxu3 %v10685_v62  ;;  %7663 = vmatpush.msra.mxu0 %v17522_v1  ;;  %v10687_v62 = vld [vmem:[%s17217_s4 + $0x370] sm:$0xff] }
 0xd8c   : > { %7664 = vmatpush.msra.mxu0 %v17523_v5 }
 0xd8e   : > { %7665 = vmatpush.msra.mxu0 %v17524_v14  ;;  %v6769_v3 = vpop.f32.mrf.mxu0 }
 0xd8f   : > { %v6826_v21 = vadd.f32 %v6825_v44, %v6769_v3  ;;  %v6514_v3 = vadd.f32 %v15786_v52, %v6289_v56  ;;  %v10688_v52 = vld [vmem:[%s17217_s4 + $0x380] sm:$0xff]  ;;  %v10689_v56 = vld [vmem:[%s17217_s4 + $0x388] sm:$0xff] }
 0xd90   : > { %7666 = vmatpush.msra.mxu0 %v17525_v37  ;;  %v6834_v44 = vpop.f32.mrf.mxu1 }
 0xd91   : > { %9988 = vmatmul.msk.f32.vlgmr.msrb.gmra.mxu2 %vm2364_vm7, %v6826_v21  ;;  %10005 = vmatmul.msk.f32.gmra.mxu0 %vm2207_vm4, %v10686_v47 }
 0xd92   : > { %7002 = vmatmul.f32.gmra.mxu3 %v10687_v62  ;;  %10059 = vmatpush.msk.msrb.mxu2 %vm2247_vm3, %v15749_v8  ;;  %v6290_v62 = vadd.f32 %v15614_v36, %v15468_v59 }
 0xd93   : > { %7667 = vmatpush.msra.mxu0 %v17526_v46 }
 0xd94   : > { %7501 = vmatpush.msrb.mxu2 %v15757_v23  ;;  %v6700_v15 = vpop.f32.mrf.mxu3 }
 0xd95   : > { %7668 = vmatpush.msra.mxu0 %v17527_v33  ;;  %v15933_v16 = vadd.f32 %v6700_v15, %v6514_v3 }
 0xd96   : > { %v6772_v21 = vpop.f32.mrf.mxu0 }
 0xd97   : > { %7669 = vmatpush.msra.mxu0 %v17528_v26  ;;  %v6829_v47 = vadd.f32 %v6828_v43, %v6772_v21  ;;  %v6515_v43 = vadd.f32 %v15796_v4, %v6290_v62  ;;  %v10691_v4 = vld [vmem:[%s17217_s4 + $0x398] sm:$0xff] }
 0xd98   : > { %v6837_v15 = vpop.f32.mrf.mxu1 }
 0xd99   : > { %7670 = vmatpush.msra.mxu0 %v17529_v40  ;;  %9989 = vmatmul.msk.f32.gmra.mxu2 %vm2364_vm7, %v6829_v47  ;;  %v6291_v47 = vadd.f32 %v15624_v17, %v15479_v12 }
 0xd9a   : > { %7005 = vmatmul.f32.gmra.mxu3 %v10688_v52  ;;  %10006 = vmatmul.msk.f32.gmra.mxu0 %vm2207_vm4, %v10689_v56  ;;  %v10690_v52 = vld [vmem:[%s17217_s4 + $0x390] sm:$0xff] }
 0xd9b   : > { %v6516_v62 = vadd.f32 %v15806_v60, %v6291_v47  ;;  %v10693_v60 = vld [vmem:[%s17217_s4 + $0x3a8] sm:$0xff] }
 0xd9c   : > { %v6703_v3 = vpop.f32.mrf.mxu3 }
 0xd9d   : > { %v15948_v59 = vadd.f32 %v6703_v3, %v6515_v43  ;;  %v6292_v3 = vadd.f32 %v15634_v2, %v15490_v19 }
 0xd9e   : > { %v6775_v36 = vpop.f32.mrf.mxu0 }
 0xd9f   : > { %v6832_v21 = vadd.f32 %v6831_v42, %v6775_v36  ;;  %v10692_v36 = vld [vmem:[%s17217_s4 + $0x3a0] sm:$0xff] }
 0xda0   : > { %v6840_v12 = vpop.f32.mrf.mxu1 }
 0xda1   : > { %9990 = vmatmul.msk.f32.gmra.mxu2 %vm2364_vm7, %v6832_v21  ;;  %v6517_v21 = vadd.f32 %v15816_v54, %v6292_v3  ;;  %v10695_v54 = vld [vmem:[%s17217_s4 + $0x3b8] sm:$0xff] }
 0xda2   : > { %7008 = vmatmul.f32.gmra.mxu3 %v10690_v52  ;;  %10007 = vmatmul.msk.f32.gmra.mxu0 %vm2207_vm4, %v10691_v4  ;;  %v6293_v4 = vadd.f32 %v15644_v50, %v15501_v22  ;;  %v6294_v22 = vadd.f32 %v15654_v61, %v15512_v38  ;;  %v10696_v50 = vld [vmem:[%s17217_s4 + $0x3c0] sm:$0xff]  ;;  %v10073_v38 = vld [vmem:[%s17218_s5 + $0xa8] sm:$0x3f]  ;;  %v6295_v61 = vadd.f32 %v15664_v0, %v15527_v29 }
 0xda3   : > { %10074 = vmatpush.msk.msrb.mxu3 %vm2404_vm6, %v10073_v38  ;;  %v6296_v29 = vadd.f32 %v15678_v51, %v15534_v10  ;;  %v10700_v0 = vld [vmem:[%s17217_s4 + $0x3e0] sm:$0xff]  ;;  %v6297_v10 = vadd.f32 %v15688_v48, %v15541_v30  ;;  %v10702_v51 = vld [vmem:[%s17217_s4 + $0x3f0] sm:$0xff]  ;;  %v6298_v30 = vadd.f32 %v15698_v6, %v15548_v45  ;;  %v6299_v45 = vadd.f32 %v15704_v55, %v15558_v20  ;;  %v10706_v6 = vld [vmem:[%s17217_s4 + $0x8] sm:$0xff] }
 0xda4   : > { %v6706_v56 = vpop.f32.mrf.mxu3  ;;  %v10704_v48 = vld [vmem:[%s17217_s4 + $0x400] sm:$0xf]  ;;  %v6300_v55 = vadd.f32 %v15714_v24, %v15572_v13  ;;  %v6301_v24 = vadd.f32 %v15730_v27, %v15586_v41  ;;  %v10710_v27 = vld [vmem:[%s17217_s4 + $0x38] sm:$0xff] }
 0xda5   : > { %v15961_v42 = vadd.f32 %v6706_v56, %v6516_v62  ;;  %v10694_v62 = vld [vmem:[%s17217_s4 + $0x3b0] sm:$0xff]  ;;  %v6518_v56 = vadd.f32 %v15826_v28, %v6293_v4  ;;  %v10709_v41 = vld [vmem:[%s17217_s4] sm:$0xff] }
 0xda6   : > { %v6778_v43 = vpop.f32.mrf.mxu0 }
 0xda7   : > { %v6835_v17 = vadd.f32 %v6834_v44, %v6778_v43 }
 0xda8   : > { %v6843_v2 = vpop.f32.mrf.mxu1 }
 0xda9   : > { %9991 = vmatmul.msk.f32.gmra.mxu2 %vm2364_vm7, %v6835_v17 }
 0xdaa   : > { %7011 = vmatmul.f32.gmra.mxu3 %v10692_v36  ;;  %10008 = vmatmul.msk.f32.gmra.mxu0 %vm2207_vm4, %v10693_v60  ;;  %v10697_v36 = vld [vmem:[%s17217_s4 + $0x3c8] sm:$0xff]  ;;  %v6519_v60 = vadd.f32 %v15836_v34, %v6294_v22  ;;  %v10698_v34 = vld [vmem:[%s17217_s4 + $0x3d0] sm:$0xff] }
 0xdac   : > { %v6709_v47 = vpop.f32.mrf.mxu3 }
 0xdad   : > { %v15974_v44 = vadd.f32 %v6709_v47, %v6517_v21 }
 0xdae   : > { %v6781_v52 = vpop.f32.mrf.mxu0 }
 0xdaf   : > { %v6838_v19 = vadd.f32 %v6837_v15, %v6781_v52 }
 0xdb0   : > { %v6846_v28 = vpop.f32.mrf.mxu1 }
 0xdb1   : > { %9992 = vmatmul.msk.f32.gmra.mxu2 %vm2364_vm7, %v6838_v19  ;;  %v10699_v19 = vld [vmem:[%s17217_s4 + $0x3d8] sm:$0xff] }
 0xdb2   : > { %7014 = vmatmul.f32.gmra.mxu3 %v10694_v62  ;;  %10009 = vmatmul.msk.f32.gmra.mxu0 %vm2207_vm4, %v10695_v54 }
 0xdb5   : > { %v6712_v15 = vpop.f32.mrf.mxu3 }
 0xdb6   : > { %v15987_v43 = vadd.f32 %v6712_v15, %v6518_v56  ;;  %v6784_v17 = vpop.f32.mrf.mxu0 }
 0xdb7   : > { %v6841_v3 = vadd.f32 %v6840_v12, %v6784_v17  ;;  %v6521_v17 = vadd.f32 %v15860_v58, %v6296_v29  ;;  %v10703_v58 = vld [vmem:[%s17217_s4 + $0x3f8] sm:$0xff] }
 0xdb8   : > { %v6849_v4 = vpop.f32.mrf.mxu1 }
 0xdb9   : > { %9993 = vmatmul.msk.f32.gmra.mxu2 %vm2364_vm7, %v6841_v3 }
 0xdba   : > { %7017 = vmatmul.f32.gmra.mxu3 %v10696_v50  ;;  %10010 = vmatmul.msk.f32.gmra.mxu0 %vm2207_vm4, %v10697_v36 }
 0xdbd   : > { %v6715_v12 = vpop.f32.mrf.mxu3 }
 0xdbe   : > { %v16000_v21 = vadd.f32 %v6715_v12, %v6519_v60  ;;  %v6787_v47 = vpop.f32.mrf.mxu0  ;;  %v6522_v60 = vadd.f32 %v15866_v49, %v6297_v10  ;;  %v10705_v49 = vld [vmem:[%s17217_s4 + $0x408] sm:$0xf] }
 0xdbf   : > { %v6844_v52 = vadd.f32 %v6843_v2, %v6787_v47  ;;  %v6520_v2 = vadd.f32 %v15846_v9, %v6295_v61  ;;  %v10701_v9 = vld [vmem:[%s17217_s4 + $0x3e8] sm:$0xff] }
 0xdc0   : > { %v6852_v36 = vpop.f32.mrf.mxu1 }
 0xdc1   : > { %9994 = vmatmul.msk.f32.gmra.mxu2 %vm2364_vm7, %v6844_v52 }
 0xdc2   : > { %7020 = vmatmul.f32.gmra.mxu3 %v10698_v34  ;;  %10011 = vmatmul.msk.f32.gmra.mxu0 %vm2207_vm4, %v10699_v19  ;;  %v6523_v34 = vadd.f32 %v15872_v11, %v6298_v30  ;;  %v6524_v11 = vadd.f32 %v15878_v39, %v6299_v45  ;;  %v10707_v39 = vld [vmem:[%s17217_s4 + $0x18] sm:$0xff]  ;;  %v10712_v30 = vld [vmem:[%s17217_s4 + $0x48] sm:$0xff] }
 0xdc5   : > { %v6718_v62 = vpop.f32.mrf.mxu3 }
 0xdc6   : > { %v16017_v54 = vadd.f32 %v6718_v62, %v6520_v2  ;;  %v6790_v56 = vpop.f32.mrf.mxu0 }
 0xdc7   : > { %v6847_v15 = vadd.f32 %v6846_v28, %v6790_v56 }
 0xdc8   : > { %v6855_v61 = vpop.f32.mrf.mxu1 }
 0xdc9   : > { %9995 = vmatmul.msk.f32.gmra.mxu2 %vm2364_vm7, %v6847_v15 }
 0xdca   : > { %7023 = vmatmul.f32.gmra.mxu3 %v10700_v0  ;;  %10012 = vmatmul.msk.f32.gmra.mxu0 %vm2207_vm4, %v10701_v9  ;;  %v6525_v9 = vadd.f32 %v15890_v31, %v6300_v55  ;;  %v10708_v31 = vld [vmem:[%s17217_s4 + $0x28] sm:$0xff] }
 0xdcd   : > { %v6721_v3 = vpop.f32.mrf.mxu3 }
 0xdce   : > { %v16030_v22 = vadd.f32 %v6721_v3, %v6521_v17  ;;  %v6793_v50 = vpop.f32.mrf.mxu0 }
 0xdcf   : > { %v6850_v28 = vadd.f32 %v6849_v4, %v6793_v50 }
 0xdd0   : > { %v6858_v56 = vpop.f32.mrf.mxu1 }
 0xdd1   : > { %9996 = vmatmul.msk.f32.gmra.mxu2 %vm2364_vm7, %v6850_v28  ;;  %v17545_v28 = vld [vmem:[#allocation28_spill] sm:$0xff] }
 0xdd2   : > { %7026 = vmatmul.f32.gmra.mxu3 %v10702_v51  ;;  %10013 = vmatmul.msk.f32.gmra.mxu0 %vm2207_vm4, %v10703_v58  ;;  %v6526_v10 = vadd.f32 %v17545_v28, %v6301_v24  ;;  %v10720_v28 = vld [vmem:[%s17217_s4 + $0x88] sm:$0xff] }
 0xdd5   : > { %v6724_v12 = vpop.f32.mrf.mxu3 }
 0xdd6   : > { %v16043_v47 = vadd.f32 %v6724_v12, %v6522_v60  ;;  %v6796_v52 = vpop.f32.mrf.mxu0 }
 0xdd7   : > { %v6853_v38 = vadd.f32 %v6852_v36, %v6796_v52 }
 0xdd8   : > { %v6861_v17 = vpop.f32.mrf.mxu1 }
 0xdd9   : > { %9997 = vmatmul.msk.f32.gmra.mxu2 %vm2364_vm7, %v6853_v38 }
 0xdda   : > { %7029 = vmatmul.f32.gmra.mxu3 %v10704_v48  ;;  %10014 = vmatmul.msk.f32.gmra.mxu0 %vm2207_vm4, %v10705_v49 }
 0xddd   : > { %v6727_v19 = vpop.f32.mrf.mxu3 }
 0xdde   : > { %v16056_v2 = vadd.f32 %v6727_v19, %v6523_v34  ;;  %v6799_v4 = vpop.f32.mrf.mxu0  ;;  %v10713_v19 = vld [vmem:[%s17217_s4 + $0x20] sm:$0xff] }
 0xddf   : > { %v6856_v62 = vadd.f32 %v6855_v61, %v6799_v4  ;;  %v10711_v61 = vld [vmem:[%s17217_s4 + $0x10] sm:$0xff]  ;;  %v10714_v4 = vld [vmem:[%s17217_s4 + $0x58] sm:$0xff] }
 0xde1   : > { %9998 = vmatmul.msk.f32.gmra.mxu2 %vm2364_vm7, %v6856_v62 }
 0xde2   : > { %10031 = vmatmul.msk.f32.vlgmr.msra.gmra.mxu3 %vm2207_vm4, %v10706_v6 }
 0xde3   : > { %7880 = vmatpush.msra.mxu3 %v17514_v35 }
 0xde5   : > { %7881 = vmatpush.msra.mxu3 %v17515_v32  ;;  %v6730_v15 = vpop.f32.mrf.mxu3 }
 0xde6   : > { %v16068_v29 = vadd.f32 %v6730_v15, %v6524_v11  ;;  %v6802_v0 = vpop.f32.mrf.mxu0  ;;  %v10716_v11 = vld [vmem:[%s17217_s4 + $0x68] sm:$0xff] }
 0xde7   : > { %7882 = vmatpush.msra.mxu3 %v17516_v63  ;;  %v6859_v20 = vadd.f32 %v6858_v56, %v6802_v0  ;;  %v10715_v56 = vld [vmem:[%s17217_s4 + $0x30] sm:$0xff] }
 0xde9   : > { %7883 = vmatpush.msra.mxu3 %v17517_v53  ;;  %9999 = vmatmul.msk.f32.gmra.mxu2 %vm2364_vm7, %v6859_v20 }
 0xdea   : > { %10032 = vmatmul.msk.f32.gmra.mxu3 %vm2207_vm4, %v10707_v39 }
 0xdeb   : > { %7884 = vmatpush.msra.mxu3 %v17518_v25 }
 0xded   : > { %7885 = vmatpush.msra.mxu3 %v17519_v57  ;;  %v6733_v3 = vpop.f32.mrf.mxu3 }
 0xdee   : > { %v16082_v50 = vadd.f32 %v6733_v3, %v6525_v9  ;;  %v6805_v36 = vpop.f32.mrf.mxu0  ;;  %v10717_v9 = vld [vmem:[%s17217_s4 + $0x40] sm:$0xff] }
 0xdef   : > { %7886 = vmatpush.msra.mxu3 %v17520_v18  ;;  %v6862_v13 = vadd.f32 %v6861_v17, %v6805_v36  ;;  %v10718_v17 = vld [vmem:[%s17217_s4 + $0x78] sm:$0xff] }
 0xdf1   : > { %7887 = vmatpush.msra.mxu3 %v17521_v7  ;;  %10000 = vmatmul.msk.f32.gmra.mxu2 %vm2364_vm7, %v6862_v13 }
 0xdf2   : > { %10033 = vmatmul.msk.f32.gmra.mxu3 %vm2207_vm4, %v10708_v31  ;;  %v10719_v31 = vld [vmem:[%s17217_s4 + $0x50] sm:$0xff] }
 0xdf3   : > { %7888 = vmatpush.msra.mxu3 %v17522_v1 }
 0xdf5   : > { %7889 = vmatpush.msra.mxu3 %v17523_v5  ;;  %v6736_v51 = vpop.f32.mrf.mxu3 }
 0xdf6   : > { %v16096_v58 = vadd.f32 %v6736_v51, %v6526_v10  ;;  %v7050_v60 = vpop.f32.mrf.mxu0 }
 0xdf7   : > { %7890 = vmatpush.msra.mxu3 %v17524_v14 }
 0xdf9   : > { %7891 = vmatpush.msra.mxu3 %v17525_v37  ;;  %7221 = vmatmul.f32.vlgmr.msra.gmra.mxu2 %v10709_v41 }
 0xdfa   : > { %10034 = vmatmul.msk.f32.gmra.mxu3 %vm2207_vm4, %v10710_v27  ;;  %v10721_v27 = vld [vmem:[%s17217_s4 + $0x60] sm:$0xff] }
 0xdfb   : > { %7892 = vmatpush.msra.mxu3 %v17526_v46 }
 0xdfd   : > { %7893 = vmatpush.msra.mxu3 %v17527_v33  ;;  %v6994_v12 = vpop.f32.mrf.mxu3 }
 0xdfe   : > { %v7051_v52 = vadd.f32 %v7050_v60, %v6994_v12  ;;  %v7053_v38 = vpop.f32.mrf.mxu0  ;;  %v10722_v12 = vld [vmem:[%s17217_s4 + $0x98] sm:$0xff] }
 0xdff   : > { %7894 = vmatpush.msra.mxu3 %v17528_v26 }
 0xe00   : > { %10017 = vmatmul.msk.f32.vlgmr.msrb.gmra.mxu1 %vm2364_vm7, %v7051_v52 }
 0xe01   : > { %10088 = vmatpush.msk.msrb.mxu1 %vm2247_vm3, %v15749_v8  ;;  %7895 = vmatpush.msra.mxu3 %v17529_v40 }
 0xe02   : > { %7224 = vmatmul.f32.gmra.mxu2 %v10711_v61  ;;  %10035 = vmatmul.msk.f32.gmra.mxu3 %vm2207_vm4, %v10712_v30 }
 0xe03   : > { %7726 = vmatpush.msrb.mxu1 %v15757_v23 }
 0xe05   : > { %v6997_v48 = vpop.f32.mrf.mxu3 }
 0xe06   : > { %v7054_v49 = vadd.f32 %v7053_v38, %v6997_v48  ;;  %v7056_v34 = vpop.f32.mrf.mxu0  ;;  %v10723_v48 = vld [vmem:[%s17217_s4 + $0x70] sm:$0xff] }
 0xe08   : > { %10018 = vmatmul.msk.f32.gmra.mxu1 %vm2364_vm7, %v7054_v49  ;;  %v10724_v49 = vld [vmem:[%s17217_s4 + $0xa8] sm:$0xff] }
 0xe0a   : > { %7227 = vmatmul.f32.gmra.mxu2 %v10713_v19  ;;  %10036 = vmatmul.msk.f32.gmra.mxu3 %vm2207_vm4, %v10714_v4 }
 0xe0d   : > { %v7000_v62 = vpop.f32.mrf.mxu3 }
 0xe0e   : > { %v7057_v45 = vadd.f32 %v7056_v34, %v7000_v62  ;;  %v7059_v6 = vpop.f32.mrf.mxu0 }
 0xe10   : > { %10019 = vmatmul.msk.f32.gmra.mxu1 %vm2364_vm7, %v7057_v45  ;;  %v10725_v45 = vld [vmem:[%s17217_s4 + $0x80] sm:$0xff] }
 0xe12   : > { %7230 = vmatmul.f32.gmra.mxu2 %v10715_v56  ;;  %10037 = vmatmul.msk.f32.gmra.mxu3 %vm2207_vm4, %v10716_v11 }
 0xe14   : > { %v6925_v15 = vpop.f32.mrf.mxu2 }
 0xe15   : > { %v16139_v0 = vadd.f32 %v6925_v15, %v15933_v16  ;;  %v7003_v20 = vpop.f32.mrf.mxu3 }
 0xe16   : > { %v7060_v55 = vadd.f32 %v7059_v6, %v7003_v20  ;;  %v10726_v6 = vld [vmem:[%s17217_s4 + $0xb8] sm:$0xff] }
 0xe17   : > { %v7062_v39 = vpop.f32.mrf.mxu0 }
 0xe18   : > { %10020 = vmatmul.msk.f32.gmra.mxu1 %vm2364_vm7, %v7060_v55  ;;  %v10102_v55 = vld [vmem:[%s17218_s5 + $0xb0] sm:$0x3f] }
 0xe19   : > { %10103 = vmatpush.msk.msra.mxu2 %vm2404_vm6, %v10102_v55  ;;  %v10743_v55 = vld [vmem:[%s17217_s4 + $0x120] sm:$0xff] }
 0xe1a   : > { %7233 = vmatmul.f32.gmra.mxu2 %v10717_v9  ;;  %10038 = vmatmul.msk.f32.gmra.mxu3 %vm2207_vm4, %v10718_v17 }
 0xe1c   : > { %v6928_v3 = vpop.f32.mrf.mxu2 }
 0xe1d   : > { %v16150_v16 = vadd.f32 %v6928_v3, %v15948_v59  ;;  %v7006_v36 = vpop.f32.mrf.mxu3 }
 0xe1e   : > { %v7063_v13 = vadd.f32 %v7062_v39, %v7006_v36  ;;  %v10727_v39 = vld [vmem:[%s17217_s4 + $0x90] sm:$0xff] }
 0xe1f   : > { %v7065_v24 = vpop.f32.mrf.mxu0 }
 0xe20   : > { %10021 = vmatmul.msk.f32.gmra.mxu1 %vm2364_vm7, %v7063_v13 }
 0xe22   : > { %7236 = vmatmul.f32.gmra.mxu2 %v10719_v31  ;;  %10039 = vmatmul.msk.f32.gmra.mxu3 %vm2207_vm4, %v10720_v28 }
 0xe24   : > { %v6931_v10 = vpop.f32.mrf.mxu2 }
 0xe25   : > { %v16161_v59 = vadd.f32 %v6931_v10, %v15961_v42  ;;  %v7009_v51 = vpop.f32.mrf.mxu3 }
 0xe26   : > { %v7066_v60 = vadd.f32 %v7065_v24, %v7009_v51  ;;  %v10729_v24 = vld [vmem:[%s17217_s4 + $0xa0] sm:$0xff] }
 0xe27   : > { %v7068_v41 = vpop.f32.mrf.mxu0 }
 0xe28   : > { %10022 = vmatmul.msk.f32.gmra.mxu1 %vm2364_vm7, %v7066_v60  ;;  %v10730_v60 = vld [vmem:[%s17217_s4 + $0xb0] sm:$0xff] }
 0xe2a   : > { %7239 = vmatmul.f32.gmra.mxu2 %v10721_v27  ;;  %10040 = vmatmul.msk.f32.gmra.mxu3 %vm2207_vm4, %v10722_v12 }
 0xe2c   : > { %v6934_v52 = vpop.f32.mrf.mxu2 }
 0xe2d   : > { %v16172_v42 = vadd.f32 %v6934_v52, %v15974_v44  ;;  %v7012_v38 = vpop.f32.mrf.mxu3 }
 0xe2e   : > { %v7069_v61 = vadd.f32 %v7068_v41, %v7012_v38 }
 0xe2f   : > { %v7071_v30 = vpop.f32.mrf.mxu0 }
 0xe30   : > { %10023 = vmatmul.msk.f32.gmra.mxu1 %vm2364_vm7, %v7069_v61 }
 0xe32   : > { %7242 = vmatmul.f32.gmra.mxu2 %v10723_v48  ;;  %10041 = vmatmul.msk.f32.gmra.mxu3 %vm2207_vm4, %v10724_v49 }
 0xe34   : > { %v6937_v34 = vpop.f32.mrf.mxu2 }
 0xe35   : > { %v16183_v44 = vadd.f32 %v6937_v34, %v15987_v43  ;;  %v7015_v19 = vpop.f32.mrf.mxu3 }
 0xe36   : > { %v7072_v4 = vadd.f32 %v7071_v30, %v7015_v19 }
 0xe37   : > { %v7074_v62 = vpop.f32.mrf.mxu0 }
 0xe38   : > { %10024 = vmatmul.msk.f32.gmra.mxu1 %vm2364_vm7, %v7072_v4  ;;  %v10733_v4 = vld [vmem:[%s17217_s4 + $0xd0] sm:$0xff] }
 0xe3a   : > { %7245 = vmatmul.f32.gmra.mxu2 %v10725_v45  ;;  %10042 = vmatmul.msk.f32.gmra.mxu3 %vm2207_vm4, %v10726_v6  ;;  %v10741_v6 = vld [vmem:[%s17217_s4 + $0x110] sm:$0xff] }
 0xe3c   : > { %v6940_v56 = vpop.f32.mrf.mxu2 }
 0xe3d   : > { %v16194_v43 = vadd.f32 %v6940_v56, %v16000_v21  ;;  %v7018_v11 = vpop.f32.mrf.mxu3  ;;  %v10728_v21 = vld [vmem:[%s17217_s4 + $0xc8] sm:$0xf] }
 0xe3e   : > { %v7075_v15 = vadd.f32 %v7074_v62, %v7018_v11 }
 0xe3f   : > { %v7077_v20 = vpop.f32.mrf.mxu0 }
 0xe40   : > { %10025 = vmatmul.msk.f32.gmra.mxu1 %vm2364_vm7, %v7075_v15 }
 0xe42   : > { %7248 = vmatmul.f32.gmra.mxu2 %v10727_v39  ;;  %10043 = vmatmul.msk.f32.gmra.mxu3 %vm2207_vm4, %v10728_v21  ;;  %v10744_v39 = vld [vmem:[%s17217_s4 + $0x138] sm:$0xff] }
 0xe44   : > { %v6943_v9 = vpop.f32.mrf.mxu2 }
 0xe45   : > { %v16209_v17 = vadd.f32 %v6943_v9, %v16017_v54  ;;  %v7021_v3 = vpop.f32.mrf.mxu3 }
 0xe46   : > { %v7078_v36 = vadd.f32 %v7077_v20, %v7021_v3 }
 0xe47   : > { %v7080_v13 = vpop.f32.mrf.mxu0 }
 0xe48   : > { %10026 = vmatmul.msk.f32.gmra.mxu1 %vm2364_vm7, %v7078_v36 }
 0xe4a   : > { %7251 = vmatmul.f32.gmra.mxu2 %v10729_v24  ;;  %v10746_v24 = vld [vmem:[%s17217_s4 + $0x148] sm:$0xff] }
 0xe4c   : > { %v6946_v31 = vpop.f32.mrf.mxu2 }
 0xe4d   : > { %v16216_v28 = vadd.f32 %v6946_v31, %v16030_v22  ;;  %v7024_v10 = vpop.f32.mrf.mxu3  ;;  %v10731_v22 = vld [vmem:[%s17217_s4 + $0xc0] sm:$0xf] }
 0xe4e   : > { %v7081_v51 = vadd.f32 %v7080_v13, %v7024_v10  ;;  %v10745_v13 = vld [vmem:[%s17217_s4 + $0x130] sm:$0xff] }
 0xe4f   : > { %v7083_v54 = vpop.f32.mrf.mxu0 }
 0xe50   : > { %10027 = vmatmul.msk.f32.gmra.mxu1 %vm2364_vm7, %v7081_v51 }
 0xe52   : > { %7254 = vmatmul.f32.gmra.mxu2 %v10730_v60  ;;  %v10747_v60 = vld [vmem:[%s17217_s4 + $0x140] sm:$0xff] }
 0xe54   : > { %v6949_v41 = vpop.f32.mrf.mxu2 }
 0xe55   : > { %v16223_v27 = vadd.f32 %v6949_v41, %v16043_v47  ;;  %v7027_v12 = vpop.f32.mrf.mxu3  ;;  %v10732_v47 = vld [vmem:[%s17217_s4 + $0xd8] sm:$0xff] }
 0xe56   : > { %v7084_v52 = vadd.f32 %v7083_v54, %v7027_v12  ;;  %v10748_v41 = vld [vmem:[%s17217_s4 + $0x158] sm:$0xff] }
 0xe57   : > { %v7086_v38 = vpop.f32.mrf.mxu0 }
 0xe58   : > { %10028 = vmatmul.msk.f32.gmra.mxu1 %vm2364_vm7, %v7084_v52 }
 0xe5a   : > { %7257 = vmatmul.f32.gmra.mxu2 %v10731_v22 }
 0xe5c   : > { %v6952_v61 = vpop.f32.mrf.mxu2 }
 0xe5d   : > { %v16230_v30 = vadd.f32 %v6952_v61, %v16056_v2  ;;  %v7030_v48 = vpop.f32.mrf.mxu3 }
 0xe5e   : > { %v7087_v49 = vadd.f32 %v7086_v38, %v7030_v48  ;;  %v10749_v38 = vld [vmem:[%s17217_s4 + $0x150] sm:$0xff]  ;;  %v10750_v48 = vld [vmem:[%s17217_s4 + $0x168] sm:$0xff] }
 0xe60   : > { %10029 = vmatmul.msk.f32.gmra.mxu1 %vm2364_vm7, %v7087_v49 }
 0xe62   : > { %10060 = vmatmul.msk.f32.vlgmr.msrb.gmra.mxu2 %vm2207_vm4, %v10732_v47 }
 0xe63   : > { %8105 = vmatpush.msrb.mxu2 %v17514_v35  ;;  %v10734_v35 = vld [vmem:[%s17217_s4 + $0xe8] sm:$0xff] }
 0xe64   : > { %v6955_v34 = vpop.f32.mrf.mxu2 }
 0xe65   : > { %8106 = vmatpush.msrb.mxu2 %v17515_v32  ;;  %v16240_v19 = vadd.f32 %v6955_v34, %v16068_v29  ;;  %v7278_v2 = vpop.f32.mrf.mxu3 }
 0xe67   : > { %8107 = vmatpush.msrb.mxu2 %v17516_v63 }
 0xe68   : > { %7446 = vmatmul.f32.vlgmr.msra.gmra.mxu1 %v10733_v4  ;;  %v10752_v4 = vld [vmem:[%s17217_s4 + $0x178] sm:$0xff] }
 0xe69   : > { %8108 = vmatpush.msrb.mxu2 %v17517_v53  ;;  %v10735_v53 = vld [vmem:[%s17217_s4 + $0xe0] sm:$0xff] }
 0xe6a   : > { %10061 = vmatmul.msk.f32.gmra.mxu2 %vm2207_vm4, %v10734_v35 }
 0xe6b   : > { %8109 = vmatpush.msrb.mxu2 %v17518_v25  ;;  %v10736_v25 = vld [vmem:[%s17217_s4 + $0xf8] sm:$0xff] }
 0xe6c   : > { %v6958_v32 = vpop.f32.mrf.mxu2 }
 0xe6d   : > { %8110 = vmatpush.msrb.mxu2 %v17519_v57  ;;  %v16254_v63 = vadd.f32 %v6958_v32, %v16082_v50  ;;  %v7281_v29 = vpop.f32.mrf.mxu3 }
 0xe6f   : > { %8111 = vmatpush.msrb.mxu2 %v17520_v18 }
 0xe70   : > { %7449 = vmatmul.f32.gmra.mxu1 %v10735_v53 }
 0xe71   : > { %8112 = vmatpush.msrb.mxu2 %v17521_v7  ;;  %v10737_v7 = vld [vmem:[%s17217_s4 + $0xf0] sm:$0xff] }
 0xe72   : > { %10062 = vmatmul.msk.f32.gmra.mxu2 %vm2207_vm4, %v10736_v25  ;;  %v10753_v25 = vld [vmem:[%s17217_s4 + $0x170] sm:$0xff] }
 0xe73   : > { %8113 = vmatpush.msrb.mxu2 %v17522_v1  ;;  %v10738_v1 = vld [vmem:[%s17217_s4 + $0x108] sm:$0xff] }
 0xe74   : > { %v6961_v57 = vpop.f32.mrf.mxu2 }
 0xe75   : > { %8114 = vmatpush.msrb.mxu2 %v17523_v5  ;;  %v16268_v18 = vadd.f32 %v6961_v57, %v16096_v58  ;;  %v7284_v50 = vpop.f32.mrf.mxu3  ;;  %v10754_v57 = vld [vmem:[%s17217_s4 + $0x188] sm:$0xff] }
 0xe77   : > { %8115 = vmatpush.msrb.mxu2 %v17524_v14 }
 0xe78   : > { %7452 = vmatmul.f32.gmra.mxu1 %v10737_v7 }
 0xe79   : > { %8116 = vmatpush.msrb.mxu2 %v17525_v37  ;;  %v10739_v37 = vld [vmem:[%s17217_s4 + $0x100] sm:$0xff] }
 0xe7a   : > { %10063 = vmatmul.msk.f32.gmra.mxu2 %vm2207_vm4, %v10738_v1 }
 0xe7b   : > { %8117 = vmatpush.msrb.mxu2 %v17526_v46  ;;  %v10740_v46 = vld [vmem:[%s17217_s4 + $0x118] sm:$0xff] }
 0xe7c   : > { %v7222_v5 = vpop.f32.mrf.mxu2 }
 0xe7d   : > { %8118 = vmatpush.msrb.mxu2 %v17527_v33  ;;  %v16281_v58 = vpop.f32.mrf.mxu1  ;;  %v7279_v14 = vadd.f32 %v7278_v2, %v7222_v5  ;;  %v7287_v62 = vpop.f32.mrf.mxu3  ;;  %v10751_v2 = vld [vmem:[%s17217_s4 + $0x160] sm:$0xff] }
 0xe7f   : > { %8119 = vmatpush.msrb.mxu2 %v17528_v26  ;;  %10046 = vmatmul.msk.f32.vlgmr.msrb.gmra.mxu0 %vm2364_vm7, %v7279_v14  ;;  %v10755_v14 = vld [vmem:[%s17217_s4 + $0x180] sm:$0xff] }
 0xe80   : > { %7455 = vmatmul.f32.gmra.mxu1 %v10739_v37  ;;  %10117 = vmatpush.msk.msrb.mxu0 %vm2247_vm3, %v15749_v8  ;;  %v10756_v37 = vld [vmem:[%s17217_s4 + $0x198] sm:$0xf] }
 0xe81   : > { %8120 = vmatpush.msrb.mxu2 %v17529_v40  ;;  %v10742_v40 = vld [vmem:[%s17217_s4 + $0x128] sm:$0xff] }
 0xe82   : > { %10064 = vmatmul.msk.f32.gmra.mxu2 %vm2207_vm4, %v10740_v46  ;;  %7951 = vmatpush.msrb.mxu0 %v15757_v23 }
 0xe85   : > { %v16296_v33 = vpop.f32.mrf.mxu1  ;;  %v7225_v26 = vpop.f32.mrf.mxu2 }
 0xe86   : > { %v7282_v45 = vadd.f32 %v7281_v29, %v7225_v26  ;;  %v7290_v56 = vpop.f32.mrf.mxu3 }
 0xe88   : > { %10047 = vmatmul.msk.f32.gmra.mxu0 %vm2364_vm7, %v7282_v45  ;;  %7458 = vmatmul.f32.gmra.mxu1 %v10741_v6  ;;  %v10757_v6 = vld [vmem:[%s17217_s4 + $0x190] sm:$0xf] }
 0xe8a   : > { %10065 = vmatmul.msk.f32.gmra.mxu2 %vm2207_vm4, %v10742_v40 }
 0xe8d   : > { %v16306_v11 = vpop.f32.mrf.mxu1  ;;  %v7228_v15 = vpop.f32.mrf.mxu2 }
 0xe8e   : > { %v7285_v20 = vadd.f32 %v7284_v50, %v7228_v15  ;;  %v7293_v21 = vpop.f32.mrf.mxu3 }
 0xe90   : > { %10048 = vmatmul.msk.f32.gmra.mxu0 %vm2364_vm7, %v7285_v20  ;;  %7461 = vmatmul.f32.gmra.mxu1 %v10743_v55  ;;  %v10758_v20 = vld [vmem:[%s17217_s4 + $0x1a8] sm:$0xff] }
 0xe92   : > { %10066 = vmatmul.msk.f32.gmra.mxu2 %vm2207_vm4, %v10744_v39 }
 0xe95   : > { %v16316_v9 = vpop.f32.mrf.mxu1  ;;  %v7231_v3 = vpop.f32.mrf.mxu2 }
 0xe96   : > { %v7288_v36 = vadd.f32 %v7287_v62, %v7231_v3  ;;  %v7296_v54 = vpop.f32.mrf.mxu3 }
 0xe98   : > { %10049 = vmatmul.msk.f32.gmra.mxu0 %vm2364_vm7, %v7288_v36  ;;  %7464 = vmatmul.f32.gmra.mxu1 %v10745_v13  ;;  %v10759_v36 = vld [vmem:[%s17217_s4 + $0x1b8] sm:$0xff] }
 0xe9a   : > { %10067 = vmatmul.msk.f32.gmra.mxu2 %vm2207_vm4, %v10746_v24 }
 0xe9d   : > { %v16326_v31 = vpop.f32.mrf.mxu1  ;;  %v7234_v10 = vpop.f32.mrf.mxu2 }
 0xe9e   : > { %v7291_v51 = vadd.f32 %v7290_v56, %v7234_v10  ;;  %v7299_v61 = vpop.f32.mrf.mxu3 }
 0xea0   : > { %10050 = vmatmul.msk.f32.gmra.mxu0 %vm2364_vm7, %v7291_v51  ;;  %7467 = vmatmul.f32.gmra.mxu1 %v10747_v60 }
 0xea2   : > { %10068 = vmatmul.msk.f32.gmra.mxu2 %vm2207_vm4, %v10748_v41 }
 0xea5   : > { %v16336_v12 = vpop.f32.mrf.mxu1  ;;  %v7237_v52 = vpop.f32.mrf.mxu2 }
 0xea6   : > { %v7294_v22 = vadd.f32 %v7293_v21, %v7237_v52  ;;  %v7302_v35 = vpop.f32.mrf.mxu3 }
 0xea8   : > { %10051 = vmatmul.msk.f32.gmra.mxu0 %vm2364_vm7, %v7294_v22  ;;  %7470 = vmatmul.f32.gmra.mxu1 %v10749_v38  ;;  %v10761_v22 = vld [vmem:[%s17217_s4 + $0x1a0] sm:$0xff]  ;;  %v10762_v38 = vld [vmem:[%s17217_s4 + $0x1d8] sm:$0xff] }
 0xeaa   : > { %10069 = vmatmul.msk.f32.gmra.mxu2 %vm2207_vm4, %v10750_v48 }
 0xead   : > { %v16346_v49 = vpop.f32.mrf.mxu1  ;;  %v7240_v47 = vpop.f32.mrf.mxu2 }
 0xeae   : > { %v7297_v34 = vadd.f32 %v7296_v54, %v7240_v47  ;;  %v7305_v50 = vpop.f32.mrf.mxu3  ;;  %v10760_v54 = vld [vmem:[%s17217_s4 + $0x1c8] sm:$0xff] }
 0xeb0   : > { %10052 = vmatmul.msk.f32.gmra.mxu0 %vm2364_vm7, %v7297_v34  ;;  %7473 = vmatmul.f32.gmra.mxu1 %v10751_v2  ;;  %v10763_v34 = vld [vmem:[%s17217_s4 + $0x1b0] sm:$0xff] }
 0xeb2   : > { %10070 = vmatmul.msk.f32.gmra.mxu2 %vm2207_vm4, %v10752_v4 }
 0xeb5   : > { %v16356_v32 = vpop.f32.mrf.mxu1  ;;  %v7243_v29 = vpop.f32.mrf.mxu2 }
 0xeb6   : > { %v7300_v53 = vadd.f32 %v7299_v61, %v7243_v29  ;;  %v7308_v45 = vpop.f32.mrf.mxu3  ;;  %v10766_v29 = vld [vmem:[%s17217_s4 + $0x1f8] sm:$0xff] }
 0xeb8   : > { %10053 = vmatmul.msk.f32.gmra.mxu0 %vm2364_vm7, %v7300_v53  ;;  %7476 = vmatmul.f32.gmra.mxu1 %v10753_v25 }
 0xeba   : > { %10071 = vmatmul.msk.f32.gmra.mxu2 %vm2207_vm4, %v10754_v57 }
 0xebd   : > { %v16366_v7 = vpop.f32.mrf.mxu1  ;;  %v7246_v1 = vpop.f32.mrf.mxu2 }
 0xebe   : > { %v7303_v5 = vadd.f32 %v7302_v35, %v7246_v1  ;;  %v7311_v55 = vpop.f32.mrf.mxu3  ;;  %v10767_v1 = vld [vmem:[%s17217_s4 + $0x1d0] sm:$0xff] }
 0xec0   : > { %10054 = vmatmul.msk.f32.gmra.mxu0 %vm2364_vm7, %v7303_v5  ;;  %7479 = vmatmul.f32.gmra.mxu1 %v10755_v14  ;;  %v10768_v5 = vld [vmem:[%s17217_s4 + $0x208] sm:$0xff] }
 0xec2   : > { %10072 = vmatmul.msk.f32.gmra.mxu2 %vm2207_vm4, %v10756_v37 }
 0xec5   : > { %v16376_v62 = vpop.f32.mrf.mxu1  ;;  %v7249_v46 = vpop.f32.mrf.mxu2 }
 0xec6   : > { %v7306_v26 = vadd.f32 %v7305_v50, %v7249_v46  ;;  %v7314_v13 = vpop.f32.mrf.mxu3 }
 0xec8   : > { %10055 = vmatmul.msk.f32.gmra.mxu0 %vm2364_vm7, %v7306_v26  ;;  %7482 = vmatmul.f32.gmra.mxu1 %v10757_v6  ;;  %v10770_v6 = vld [vmem:[%s17217_s4 + $0x218] sm:$0xff] }
 0xecd   : > { %v16382_v40 = vpop.f32.mrf.mxu1  ;;  %v7252_v56 = vpop.f32.mrf.mxu2 }
 0xece   : > { %v7309_v15 = vadd.f32 %v7308_v45, %v7252_v56  ;;  %v10769_v45 = vld [vmem:[%s17217_s4 + $0x1e0] sm:$0xff] }
 0xed0   : > { %10056 = vmatmul.msk.f32.gmra.mxu0 %vm2364_vm7, %v7309_v15  ;;  %10089 = vmatmul.msk.f32.vlgmr.msrb.gmra.mxu1 %vm2207_vm4, %v10758_v20 }
 0xed5   : > { %v16389_v39 = vpop.f32.mrf.mxu1  ;;  %v7255_v21 = vpop.f32.mrf.mxu2 }
 0xed6   : > { %v7312_v3 = vadd.f32 %v7311_v55, %v7255_v21  ;;  %v10771_v21 = vld [vmem:[%s17217_s4 + $0x1f0] sm:$0xff] }
 0xed8   : > { %10057 = vmatmul.msk.f32.gmra.mxu0 %vm2364_vm7, %v7312_v3  ;;  %10090 = vmatmul.msk.f32.gmra.mxu1 %vm2207_vm4, %v10759_v36  ;;  %v10772_v3 = vld [vmem:[%s17217_s4 + $0x228] sm:$0xff] }
 0xedd   : > { %v16396_v24 = vpop.f32.mrf.mxu1  ;;  %v7258_v10 = vpop.f32.mrf.mxu2 }
 0xede   : > { %v7315_v51 = vadd.f32 %v7314_v13, %v7258_v10 }
 0xee0   : > { %10058 = vmatmul.msk.f32.gmra.mxu0 %vm2364_vm7, %v7315_v51  ;;  %10091 = vmatmul.msk.f32.gmra.mxu1 %vm2207_vm4, %v10760_v54  ;;  %v10773_v54 = vld [vmem:[%s17217_s4 + $0x200] sm:$0xff] }
 0xee5   : > { %v7447_v60 = vpop.f32.mrf.mxu1  ;;  %v7503_v41 = vpop.f32.mrf.mxu2 }
 0xee6   : > { %v7504_v52 = vadd.f32 %v7503_v41, %v7447_v60  ;;  %v10774_v60 = vld [vmem:[%s17217_s4 + $0x238] sm:$0xff] }
 0xee8   : > { %10075 = vmatmul.msk.f32.vlgmr.msrb.gmra.mxu3 %vm2364_vm7, %v7504_v52  ;;  %7671 = vmatmul.f32.vlgmr.msra.gmra.mxu0 %v10761_v22 }
 0xee9   : > { %10146 = vmatpush.msk.msrb.mxu3 %vm2247_vm3, %v15749_v8  ;;  %10092 = vmatmul.msk.f32.gmra.mxu1 %vm2207_vm4, %v10762_v38  ;;  %v10764_v8 = vld [vmem:[%s17217_s4 + $0x1e8] sm:$0xff] }
 0xeeb   : > { %8176 = vmatpush.msrb.mxu3 %v15757_v23  ;;  %v10765_v23 = vld [vmem:[%s17217_s4 + $0x1c0] sm:$0xff] }
 0xeed   : > { %v7450_v61 = vpop.f32.mrf.mxu1  ;;  %v7506_v48 = vpop.f32.mrf.mxu2 }
 0xeee   : > { %v7507_v47 = vadd.f32 %v7506_v48, %v7450_v61  ;;  %v10775_v61 = vld [vmem:[%s17217_s4 + $0x210] sm:$0xff]  ;;  %v10776_v48 = vld [vmem:[%s17217_s4 + $0x248] sm:$0xff] }
 0xef0   : > { %10076 = vmatmul.msk.f32.gmra.mxu3 %vm2364_vm7, %v7507_v47  ;;  %7674 = vmatmul.f32.gmra.mxu0 %v10763_v34 }
 0xef1   : > { %10093 = vmatmul.msk.f32.gmra.mxu1 %vm2207_vm4, %v10764_v8 }
 0xef5   : > { %v7453_v2 = vpop.f32.mrf.mxu1  ;;  %v7509_v4 = vpop.f32.mrf.mxu2 }
 0xef6   : > { %v7510_v35 = vadd.f32 %v7509_v4, %v7453_v2  ;;  %v10777_v4 = vld [vmem:[%s17217_s4 + $0x220] sm:$0xff] }
 0xef8   : > { %10077 = vmatmul.msk.f32.gmra.mxu3 %vm2364_vm7, %v7510_v35  ;;  %7677 = vmatmul.f32.gmra.mxu0 %v10765_v23  ;;  %v10778_v35 = vld [vmem:[%s17217_s4 + $0x258] sm:$0xff] }
 0xef9   : > { %10094 = vmatmul.msk.f32.gmra.mxu1 %vm2207_vm4, %v10766_v29 }
 0xefc   : > { %v16430_v53 = vpop.f32.mrf.mxu0 }
 0xefd   : > { %v7456_v25 = vpop.f32.mrf.mxu1  ;;  %v7512_v57 = vpop.f32.mrf.mxu2 }
 0xefe   : > { %v7513_v50 = vadd.f32 %v7512_v57, %v7456_v25 }
 0xf00   : > { %10078 = vmatmul.msk.f32.gmra.mxu3 %vm2364_vm7, %v7513_v50  ;;  %7680 = vmatmul.f32.gmra.mxu0 %v10767_v1  ;;  %v10779_v50 = vld [vmem:[%s17217_s4 + $0x230] sm:$0xff]  ;;  %v10780_v1 = vld [vmem:[%s17217_s4 + $0x268] sm:$0xf] }
 0xf01   : > { %10095 = vmatmul.msk.f32.gmra.mxu1 %vm2207_vm4, %v10768_v5 }
 0xf05   : > { %v16440_v14 = vpop.f32.mrf.mxu0  ;;  %v7459_v37 = vpop.f32.mrf.mxu1 }
 0xf06   : > { %v7515_v46 = vpop.f32.mrf.mxu2 }
 0xf07   : > { %v7516_v26 = vadd.f32 %v7515_v46, %v7459_v37 }
 0xf08   : > { %7683 = vmatmul.f32.gmra.mxu0 %v10769_v45  ;;  %v10781_v45 = vld [vmem:[%s17217_s4 + $0x240] sm:$0xff] }
 0xf09   : > { %10079 = vmatmul.msk.f32.gmra.mxu3 %vm2364_vm7, %v7516_v26  ;;  %10096 = vmatmul.msk.f32.gmra.mxu1 %vm2207_vm4, %v10770_v6 }
 0xf0d   : > { %v16450_v56 = vpop.f32.mrf.mxu0  ;;  %v7462_v15 = vpop.f32.mrf.mxu1 }
 0xf0e   : > { %v7518_v20 = vpop.f32.mrf.mxu2 }
 0xf0f   : > { %v7519_v55 = vadd.f32 %v7518_v20, %v7462_v15 }
 0xf10   : > { %7686 = vmatmul.f32.gmra.mxu0 %v10771_v21  ;;  %v10782_v21 = vld [vmem:[%s17217_s4 + $0x250] sm:$0xff] }
 0xf11   : > { %10080 = vmatmul.msk.f32.gmra.mxu3 %vm2364_vm7, %v7519_v55  ;;  %10097 = vmatmul.msk.f32.gmra.mxu1 %vm2207_vm4, %v10772_v3 }
 0xf15   : > { %v16460_v36 = vpop.f32.mrf.mxu0  ;;  %v7465_v13 = vpop.f32.mrf.mxu1 }
 0xf16   : > { %v7521_v10 = vpop.f32.mrf.mxu2 }
 0xf17   : > { %v7522_v51 = vadd.f32 %v7521_v10, %v7465_v13 }
 0xf18   : > { %7689 = vmatmul.f32.gmra.mxu0 %v10773_v54  ;;  %v10783_v54 = vld [vmem:[%s17217_s4 + $0x260] sm:$0xf] }
 0xf19   : > { %10081 = vmatmul.msk.f32.gmra.mxu3 %vm2364_vm7, %v7522_v51  ;;  %10098 = vmatmul.msk.f32.gmra.mxu1 %vm2207_vm4, %v10774_v60 }
 0xf1d   : > { %v16470_v41 = vpop.f32.mrf.mxu0  ;;  %v7468_v52 = vpop.f32.mrf.mxu1 }
 0xf1e   : > { %v7524_v22 = vpop.f32.mrf.mxu2 }
 0xf1f   : > { %v7525_v38 = vadd.f32 %v7524_v22, %v7468_v52  ;;  %v10784_v22 = vld [vmem:[%s17217_s4 + $0x278] sm:$0xff] }
 0xf20   : > { %7692 = vmatmul.f32.gmra.mxu0 %v10775_v61 }
 0xf21   : > { %10082 = vmatmul.msk.f32.gmra.mxu3 %vm2364_vm7, %v7525_v38  ;;  %10099 = vmatmul.msk.f32.gmra.mxu1 %vm2207_vm4, %v10776_v48  ;;  %v10785_v38 = vld [vmem:[%s17217_s4 + $0x270] sm:$0xff] }
 0xf25   : > { %v16480_v47 = vpop.f32.mrf.mxu0  ;;  %v7471_v34 = vpop.f32.mrf.mxu1 }
 0xf26   : > { %v7527_v8 = vpop.f32.mrf.mxu2 }
 0xf27   : > { %v7528_v2 = vadd.f32 %v7527_v8, %v7471_v34  ;;  %v10786_v34 = vld [vmem:[%s17217_s4 + $0x288] sm:$0xff]  ;;  %v10787_v8 = vld [vmem:[%s17217_s4 + $0x280] sm:$0xff] }
 0xf28   : > { %7695 = vmatmul.f32.gmra.mxu0 %v10777_v4 }
 0xf29   : > { %10083 = vmatmul.msk.f32.gmra.mxu3 %vm2364_vm7, %v7528_v2  ;;  %10100 = vmatmul.msk.f32.gmra.mxu1 %vm2207_vm4, %v10778_v35  ;;  %v10788_v35 = vld [vmem:[%s17217_s4 + $0x298] sm:$0xff] }
 0xf2d   : > { %v16490_v23 = vpop.f32.mrf.mxu0  ;;  %v7474_v29 = vpop.f32.mrf.mxu1 }
 0xf2e   : > { %v7530_v25 = vpop.f32.mrf.mxu2 }
 0xf2f   : > { %v7531_v57 = vadd.f32 %v7530_v25, %v7474_v29  ;;  %v10789_v29 = vld [vmem:[%s17217_s4 + $0x290] sm:$0xff] }
 0xf30   : > { %7698 = vmatmul.f32.gmra.mxu0 %v10779_v50  ;;  %v7189_v50 = vadd.f32 %v16281_v58, %v16139_v0 }
 0xf31   : > { %10084 = vmatmul.msk.f32.gmra.mxu3 %vm2364_vm7, %v7531_v57  ;;  %10101 = vmatmul.msk.f32.gmra.mxu1 %vm2207_vm4, %v10780_v1  ;;  %v10790_v1 = vld [vmem:[%s17217_s4 + $0x2a8] sm:$0xff] }
 0xf35   : > { %v16500_v5 = vpop.f32.mrf.mxu0  ;;  %v7477_v37 = vpop.f32.mrf.mxu1 }
 0xf36   : > { %v7533_v46 = vpop.f32.mrf.mxu2 }
 0xf37   : > { %v7534_v26 = vadd.f32 %v7533_v46, %v7477_v37  ;;  %v10791_v37 = vld [vmem:[%s17217_s4 + $0x2a0] sm:$0xff] }
 0xf38   : > { %7701 = vmatmul.f32.gmra.mxu0 %v10781_v45 }
 0xf39   : > { %10085 = vmatmul.msk.f32.gmra.mxu3 %vm2364_vm7, %v7534_v26  ;;  %v7417_v26 = vadd.f32 %v16430_v53, %v7189_v50  ;;  %v10793_v53 = vld [vmem:[%s17217_s4 + $0x2b0] sm:$0xff]  ;;  %v10798_v50 = vld [vmem:[%s17217_s4 + $0x2e8] sm:$0xff] }
 0xf3d   : > { %v16506_v6 = vpop.f32.mrf.mxu0  ;;  %v7480_v15 = vpop.f32.mrf.mxu1 }
 0xf3e   : > { %v7536_v20 = vpop.f32.mrf.mxu2 }
 0xf3f   : > { %v7537_v55 = vadd.f32 %v7536_v20, %v7480_v15  ;;  %v7190_v20 = vadd.f32 %v16296_v33, %v16150_v16 }
 0xf40   : > { %7704 = vmatmul.f32.gmra.mxu0 %v10782_v21 }
 0xf41   : > { %10086 = vmatmul.msk.f32.gmra.mxu3 %vm2364_vm7, %v7537_v55  ;;  %v10792_v55 = vld [vmem:[%s17217_s4 + $0x2b8] sm:$0xff]  ;;  %v7418_v21 = vadd.f32 %v16440_v14, %v7190_v20  ;;  %v10795_v14 = vld [vmem:[%s17217_s4 + $0x2c0] sm:$0xff] }
 0xf45   : > { %v16512_v3 = vpop.f32.mrf.mxu0  ;;  %v7483_v13 = vpop.f32.mrf.mxu1 }
 0xf46   : > { %v7539_v10 = vpop.f32.mrf.mxu2 }
 0xf47   : > { %v7540_v51 = vadd.f32 %v7539_v10, %v7483_v13 }
 0xf48   : > { %7707 = vmatmul.f32.gmra.mxu0 %v10783_v54  ;;  %v7191_v54 = vadd.f32 %v16306_v11, %v16161_v59 }
 0xf49   : > { %10087 = vmatmul.msk.f32.gmra.mxu3 %vm2364_vm7, %v7540_v51 }
 0xf4d   : > { %v16518_v60 = vpop.f32.mrf.mxu0  ;;  %v7728_v52 = vpop.f32.mrf.mxu1 }
 0xf50   : > { %10118 = vmatmul.msk.f32.vlgmr.msrb.gmra.mxu0 %vm2207_vm4, %v10784_v22  ;;  %v7419_v22 = vadd.f32 %v16450_v56, %v7191_v54  ;;  %v10797_v56 = vld [vmem:[%s17217_s4 + $0x2d0] sm:$0xff] }
 0xf51   : > { %7896 = vmatmul.f32.vlgmr.msra.gmra.mxu3 %v10785_v38 }
 0xf55   : > { %v16527_v61 = vpop.f32.mrf.mxu0  ;;  %v7731_v48 = vpop.f32.mrf.mxu1 }
 0xf58   : > { %10119 = vmatmul.msk.f32.gmra.mxu0 %vm2207_vm4, %v10786_v34 }
 0xf59   : > { %7899 = vmatmul.f32.gmra.mxu3 %v10787_v8  ;;  %v7192_v8 = vadd.f32 %v16316_v9, %v16172_v42 }
 0xf5d   : > { %v16536_v2 = vpop.f32.mrf.mxu0  ;;  %v7734_v4 = vpop.f32.mrf.mxu1 }
 0xf60   : > { %10120 = vmatmul.msk.f32.gmra.mxu0 %vm2207_vm4, %v10788_v35  ;;  %v7420_v35 = vadd.f32 %v16460_v36, %v7192_v8  ;;  %v10799_v36 = vld [vmem:[%s17217_s4 + $0x2e0] sm:$0xff] }
 0xf61   : > { %7902 = vmatmul.f32.gmra.mxu3 %v10789_v29 }
 0xf65   : > { %v7672_v25 = vpop.f32.mrf.mxu0 }
 0xf66   : > { %v7729_v57 = vadd.f32 %v7728_v52, %v7672_v25  ;;  %v7737_v46 = vpop.f32.mrf.mxu1  ;;  %v10794_v52 = vld [vmem:[%s17217_s4 + $0x2c8] sm:$0xff] }
 0xf68   : > { %10104 = vmatmul.msk.f32.vlgmr.msra.gmra.mxu2 %vm2364_vm7, %v7729_v57  ;;  %10121 = vmatmul.msk.f32.gmra.mxu0 %vm2207_vm4, %v10790_v1  ;;  %v7193_v1 = vadd.f32 %v16326_v31, %v16183_v44  ;;  %v7194_v44 = vadd.f32 %v16336_v12, %v16194_v43  ;;  %v10801_v31 = vld [vmem:[%s17217_s4 + $0x2f0] sm:$0xff]  ;;  %v7195_v43 = vadd.f32 %v16346_v49, %v16209_v17  ;;  %v10803_v12 = vld [vmem:[%s17217_s4 + $0x300] sm:$0xff] }
 0xf69   : > { %7905 = vmatmul.f32.gmra.mxu3 %v10791_v37  ;;  %v7196_v17 = vadd.f32 %v16356_v32, %v16216_v28  ;;  %v10805_v49 = vld [vmem:[%s17217_s4 + $0x310] sm:$0xff]  ;;  %v7197_v28 = vadd.f32 %v16366_v7, %v16223_v27  ;;  %v10807_v32 = vld [vmem:[%s17217_s4 + $0x320] sm:$0xff]  ;;  %v7198_v27 = vadd.f32 %v16376_v62, %v16230_v30  ;;  %v7199_v30 = vadd.f32 %v16382_v40, %v16240_v19  ;;  %v10811_v19 = vld [vmem:[%s17217_s4 + $0x358] sm:$0xff] }
 0xf6a   : > { %v7421_v37 = vadd.f32 %v16470_v41, %v7193_v1  ;;  %v7422_v20 = vadd.f32 %v16480_v47, %v7194_v44  ;;  %v7423_v47 = vadd.f32 %v16490_v23, %v7195_v43  ;;  %v10809_v7 = vld [vmem:[%s17217_s4 + $0x330] sm:$0xf] }
 0xf6b   : > { %v7603_v45 = vpop.f32.mrf.mxu3  ;;  %v7424_v23 = vadd.f32 %v16500_v5, %v7196_v17  ;;  %v7425_v5 = vadd.f32 %v16506_v6, %v7197_v28  ;;  %v7426_v6 = vadd.f32 %v16512_v3, %v7198_v27  ;;  %v10810_v3 = vld [vmem:[%s17217_s4 + $0x348] sm:$0xff] }
 0xf6c   : > { %v16556_v15 = vadd.f32 %v7603_v45, %v7417_v26 }
 0xf6d   : > { %v7675_v0 = vpop.f32.mrf.mxu0 }
 0xf6e   : > { %v7732_v58 = vadd.f32 %v7731_v48, %v7675_v0  ;;  %v7740_v10 = vpop.f32.mrf.mxu1 }
 0xf70   : > { %10105 = vmatmul.msk.f32.gmra.mxu2 %vm2364_vm7, %v7732_v58  ;;  %10122 = vmatmul.msk.f32.gmra.mxu0 %vm2207_vm4, %v10792_v55  ;;  %v10800_v58 = vld [vmem:[%s17217_s4 + $0x2f8] sm:$0xff] }
 0xf71   : > { %7908 = vmatmul.f32.gmra.mxu3 %v10793_v53 }
 0xf73   : > { %v7606_v13 = vpop.f32.mrf.mxu3 }
 0xf74   : > { %v16569_v51 = vadd.f32 %v7606_v13, %v7418_v21 }
 0xf75   : > { %v7678_v16 = vpop.f32.mrf.mxu0 }
 0xf76   : > { %v7735_v33 = vadd.f32 %v7734_v4, %v7678_v16  ;;  %v7743_v59 = vpop.f32.mrf.mxu1  ;;  %v10796_v4 = vld [vmem:[%s17217_s4 + $0x2d8] sm:$0xff] }
 0xf78   : > { %10106 = vmatmul.msk.f32.gmra.mxu2 %vm2364_vm7, %v7735_v33  ;;  %10123 = vmatmul.msk.f32.gmra.mxu0 %vm2207_vm4, %v10794_v52 }
 0xf79   : > { %7911 = vmatmul.f32.gmra.mxu3 %v10795_v14 }
 0xf7b   : > { %v7609_v38 = vpop.f32.mrf.mxu3 }
 0xf7c   : > { %v16582_v48 = vadd.f32 %v7609_v38, %v7419_v22  ;;  %v10804_v22 = vld [vmem:[%s17217_s4 + $0x318] sm:$0xff] }
 0xf7d   : > { %v7681_v34 = vpop.f32.mrf.mxu0 }
 0xf7e   : > { %v7738_v11 = vadd.f32 %v7737_v46, %v7681_v34  ;;  %v7746_v9 = vpop.f32.mrf.mxu1 }
 0xf80   : > { %10107 = vmatmul.msk.f32.gmra.mxu2 %vm2364_vm7, %v7738_v11  ;;  %10124 = vmatmul.msk.f32.gmra.mxu0 %vm2207_vm4, %v10796_v4  ;;  %v10806_v4 = vld [vmem:[%s17217_s4 + $0x328] sm:$0xff] }
 0xf81   : > { %7914 = vmatmul.f32.gmra.mxu3 %v10797_v56 }
 0xf83   : > { %v7612_v29 = vpop.f32.mrf.mxu3 }
 0xf84   : > { %v16595_v25 = vadd.f32 %v7612_v29, %v7420_v35 }
 0xf85   : > { %v7684_v57 = vpop.f32.mrf.mxu0 }
 0xf86   : > { %v7741_v42 = vadd.f32 %v7740_v10, %v7684_v57  ;;  %v7749_v41 = vpop.f32.mrf.mxu1  ;;  %v10802_v10 = vld [vmem:[%s17217_s4 + $0x308] sm:$0xff] }
 0xf88   : > { %10108 = vmatmul.msk.f32.gmra.mxu2 %vm2364_vm7, %v7741_v42  ;;  %10125 = vmatmul.msk.f32.gmra.mxu0 %vm2207_vm4, %v10798_v50 }
 0xf89   : > { %7917 = vmatmul.f32.gmra.mxu3 %v10799_v36 }
 0xf8c   : > { %v7615_v46 = vpop.f32.mrf.mxu3 }
 0xf8d   : > { %v16608_v26 = vadd.f32 %v7615_v46, %v7421_v37  ;;  %v7687_v45 = vpop.f32.mrf.mxu0  ;;  %v10131_v37 = vld [vmem:[%s17218_s5 + $0xb8] sm:$0x3f] }
 0xf8e   : > { %v7744_v0 = vadd.f32 %v7743_v59, %v7687_v45  ;;  %v7752_v16 = vpop.f32.mrf.mxu1  ;;  %10132 = vmatpush.msk.msra.mxu1 %vm2404_vm6, %v10131_v37  ;;  %v7427_v45 = vadd.f32 %v16518_v60, %v7199_v30 }
 0xf90   : > { %10109 = vmatmul.msk.f32.gmra.mxu2 %vm2364_vm7, %v7744_v0  ;;  %10126 = vmatmul.msk.f32.gmra.mxu0 %vm2207_vm4, %v10800_v58 }
 0xf91   : > { %7920 = vmatmul.f32.gmra.mxu3 %v10801_v31 }
 0xf94   : > { %v7618_v55 = vpop.f32.mrf.mxu3 }
 0xf95   : > { %v16621_v53 = vadd.f32 %v7618_v55, %v7422_v20  ;;  %v7690_v21 = vpop.f32.mrf.mxu0 }
 0xf96   : > { %v7747_v13 = vadd.f32 %v7746_v9, %v7690_v21  ;;  %v7755_v11 = vpop.f32.mrf.mxu1  ;;  %v10808_v9 = vld [vmem:[%s17217_s4 + $0x338] sm:$0xf] }
 0xf98   : > { %10110 = vmatmul.msk.f32.gmra.mxu2 %vm2364_vm7, %v7747_v13  ;;  %10127 = vmatmul.msk.f32.gmra.mxu0 %vm2207_vm4, %v10802_v10  ;;  %v7201_v10 = vadd.f32 %v16396_v24, %v16268_v18  ;;  %v10814_v18 = vld [vmem:[%s17217_s4 + $0x378] sm:$0xff] }
 0xf99   : > { %7923 = vmatmul.f32.gmra.mxu3 %v10803_v12 }
 0xf9c   : > { %v7621_v33 = vpop.f32.mrf.mxu3 }
 0xf9d   : > { %v16634_v54 = vadd.f32 %v7621_v33, %v7423_v47  ;;  %v7693_v52 = vpop.f32.mrf.mxu0  ;;  %v10813_v47 = vld [vmem:[%s17217_s4 + $0x340] sm:$0xff] }
 0xf9e   : > { %v7750_v14 = vadd.f32 %v7749_v41, %v7693_v52  ;;  %v7758_v42 = vpop.f32.mrf.mxu1  ;;  %v7200_v41 = vadd.f32 %v16389_v39, %v16254_v63  ;;  %v10812_v63 = vld [vmem:[%s17217_s4 + $0x368] sm:$0xff]  ;;  %v7429_v39 = vadd.f32 %v16536_v2, %v7201_v10  ;;  %v10815_v2 = vld [vmem:[%s17217_s4 + $0x350] sm:$0xff]  ;;  %v10830_v10 = vld [vmem:[%s17217_s4 + $0x3f8] sm:$0xff] }
 0xf9f   : > { %v10816_v52 = vld [vmem:[%s17217_s4 + $0x388] sm:$0xff] }
 0xfa0   : > { %10111 = vmatmul.msk.f32.gmra.mxu2 %vm2364_vm7, %v7750_v14  ;;  %10128 = vmatmul.msk.f32.gmra.mxu0 %vm2207_vm4, %v10804_v22  ;;  %v7428_v40 = vadd.f32 %v16527_v61, %v7200_v41  ;;  %v10827_v41 = vld [vmem:[%s17217_s4 + $0x3b0] sm:$0xff] }
 0xfa1   : > { %7926 = vmatmul.f32.gmra.mxu3 %v10805_v49  ;;  %v10817_v49 = vld [vmem:[%s17217_s4 + $0x360] sm:$0xff] }
 0xfa4   : > { %v7624_v38 = vpop.f32.mrf.mxu3 }
 0xfa5   : > { %v16647_v34 = vadd.f32 %v7624_v38, %v7424_v23  ;;  %v7696_v59 = vpop.f32.mrf.mxu0  ;;  %v10818_v23 = vld [vmem:[%s17217_s4 + $0x398] sm:$0xff] }
 0xfa6   : > { %v7753_v8 = vadd.f32 %v7752_v16, %v7696_v59  ;;  %v7761_v62 = vpop.f32.mrf.mxu1 }
 0xfa8   : > { %10112 = vmatmul.msk.f32.gmra.mxu2 %vm2364_vm7, %v7753_v8  ;;  %10129 = vmatmul.msk.f32.gmra.mxu0 %vm2207_vm4, %v10806_v4  ;;  %v10819_v8 = vld [vmem:[%s17217_s4 + $0x370] sm:$0xff]  ;;  %v10820_v4 = vld [vmem:[%s17217_s4 + $0x3a8] sm:$0xff] }
 0xfa9   : > { %7929 = vmatmul.f32.gmra.mxu3 %v10807_v32 }
 0xfac   : > { %v7627_v56 = vpop.f32.mrf.mxu3 }
 0xfad   : > { %v16660_v35 = vadd.f32 %v7627_v56, %v7425_v5  ;;  %v7699_v29 = vpop.f32.mrf.mxu0 }
 0xfae   : > { %v7756_v57 = vadd.f32 %v7755_v11, %v7699_v29  ;;  %v7764_v20 = vpop.f32.mrf.mxu1 }
 0xfb0   : > { %10113 = vmatmul.msk.f32.gmra.mxu2 %vm2364_vm7, %v7756_v57  ;;  %10130 = vmatmul.msk.f32.gmra.mxu0 %vm2207_vm4, %v10808_v9  ;;  %v10821_v57 = vld [vmem:[%s17217_s4 + $0x380] sm:$0xff] }
 0xfb1   : > { %7932 = vmatmul.f32.gmra.mxu3 %v10809_v7 }
 0xfb4   : > { %v7630_v50 = vpop.f32.mrf.mxu3 }
 0xfb5   : > { %v16673_v1 = vadd.f32 %v7630_v50, %v7426_v6  ;;  %v7702_v36 = vpop.f32.mrf.mxu0  ;;  %v10823_v50 = vld [vmem:[%s17217_s4 + $0x390] sm:$0xff] }
 0xfb6   : > { %v7759_v46 = vadd.f32 %v7758_v42, %v7702_v36  ;;  %v10822_v42 = vld [vmem:[%s17217_s4 + $0x3b8] sm:$0xff]  ;;  %v10824_v36 = vld [vmem:[%s17217_s4 + $0x3c8] sm:$0xff] }
 0xfb8   : > { %10114 = vmatmul.msk.f32.gmra.mxu2 %vm2364_vm7, %v7759_v46 }
 0xfb9   : > { %10147 = vmatmul.msk.f32.vlgmr.msrb.gmra.mxu3 %vm2207_vm4, %v10810_v3  ;;  %v10826_v3 = vld [vmem:[%s17217_s4 + $0x3d8] sm:$0xff] }
 0xfbc   : > { %v7633_v0 = vpop.f32.mrf.mxu3 }
 0xfbd   : > { %v16687_v58 = vadd.f32 %v7633_v0, %v7427_v45  ;;  %v7705_v44 = vpop.f32.mrf.mxu0 }
 0xfbe   : > { %v7762_v31 = vadd.f32 %v7761_v62, %v7705_v44  ;;  %v10825_v62 = vld [vmem:[%s17217_s4 + $0x3a0] sm:$0xff] }
 0xfc0   : > { %10115 = vmatmul.msk.f32.gmra.mxu2 %vm2364_vm7, %v7762_v31 }
 0xfc1   : > { %10148 = vmatmul.msk.f32.gmra.mxu3 %vm2207_vm4, %v10811_v19  ;;  %v10828_v19 = vld [vmem:[%s17217_s4 + $0x3e8] sm:$0xff] }
 0xfc4   : > { %v7636_v60 = vpop.f32.mrf.mxu3 }
 0xfc5   : > { %v16697_v55 = vadd.f32 %v7636_v60, %v7428_v40  ;;  %v7708_v21 = vpop.f32.mrf.mxu0 }
 0xfc6   : > { %v7765_v13 = vadd.f32 %v7764_v20, %v7708_v21 }
 0xfc8   : > { %10116 = vmatmul.msk.f32.gmra.mxu2 %vm2364_vm7, %v7765_v13  ;;  %v10829_v13 = vld [vmem:[%s17217_s4 + $0x3c0] sm:$0xff] }
 0xfc9   : > { %10149 = vmatmul.msk.f32.gmra.mxu3 %vm2207_vm4, %v10812_v63 }
 0xfcc   : > { %v7639_v61 = vpop.f32.mrf.mxu3 }
 0xfcd   : > { %v16707_v43 = vadd.f32 %v7639_v61, %v7429_v39  ;;  %v7953_v12 = vpop.f32.mrf.mxu0 }
 0xfd0   : > { %8121 = vmatmul.f32.vlgmr.msrb.gmra.mxu2 %v10813_v47  ;;  %v10831_v47 = vld [vmem:[%s17217_s4 + $0x3d0] sm:$0xff] }
 0xfd1   : > { %10150 = vmatmul.msk.f32.gmra.mxu3 %vm2207_vm4, %v10814_v18  ;;  %v10832_v18 = vld [vmem:[%s17217_s4 + $0x408] sm:$0xf] }
 0xfd4   : > { %v7897_v24 = vpop.f32.mrf.mxu3 }
 0xfd5   : > { %v7954_v16 = vadd.f32 %v7953_v12, %v7897_v24  ;;  %v7956_v33 = vpop.f32.mrf.mxu0 }
 0xfd7   : > { %10133 = vmatmul.msk.f32.vlgmr.msra.gmra.mxu1 %vm2364_vm7, %v7954_v16 }
 0xfd8   : > { %8124 = vmatmul.f32.gmra.mxu2 %v10815_v2 }
 0xfd9   : > { %10151 = vmatmul.msk.f32.gmra.mxu3 %vm2207_vm4, %v10816_v52  ;;  %v10833_v52 = vld [vmem:[%s17217_s4 + $0x3e0] sm:$0xff] }
 0xfdc   : > { %v7900_v14 = vpop.f32.mrf.mxu3 }
 0xfdd   : > { %v7957_v22 = vadd.f32 %v7956_v33, %v7900_v14  ;;  %v7959_v17 = vpop.f32.mrf.mxu0 }
 0xfdf   : > { %10134 = vmatmul.msk.f32.gmra.mxu1 %vm2364_vm7, %v7957_v22 }
 0xfe0   : > { %8127 = vmatmul.f32.gmra.mxu2 %v10817_v49  ;;  %v10834_v49 = vld [vmem:[%s17217_s4 + $0x3f0] sm:$0xff] }
 0xfe1   : > { %10152 = vmatmul.msk.f32.gmra.mxu3 %vm2207_vm4, %v10818_v23 }
 0xfe4   : > { %v7903_v38 = vpop.f32.mrf.mxu3 }
 0xfe5   : > { %v7960_v59 = vadd.f32 %v7959_v17, %v7903_v38  ;;  %v7962_v11 = vpop.f32.mrf.mxu0 }
 0xfe7   : > { %10135 = vmatmul.msk.f32.gmra.mxu1 %vm2364_vm7, %v7960_v59 }
 0xfe8   : > { %8130 = vmatmul.f32.gmra.mxu2 %v10819_v8  ;;  %v10835_v8 = vld [vmem:[%s17217_s4 + $0x400] sm:$0xf] }
 0xfe9   : > { %10153 = vmatmul.msk.f32.gmra.mxu3 %vm2207_vm4, %v10820_v4 }
 0xfeb   : > { %v7828_v28 = vpop.f32.mrf.mxu2 }
 0xfec   : > { %v16741_v32 = vadd.f32 %v7828_v28, %v16556_v15  ;;  %v7906_v5 = vpop.f32.mrf.mxu3 }
 0xfed   : > { %v7963_v56 = vadd.f32 %v7962_v11, %v7906_v5  ;;  %v7965_v29 = vpop.f32.mrf.mxu0 }
 0xfef   : > { %10136 = vmatmul.msk.f32.gmra.mxu1 %vm2364_vm7, %v7963_v56 }
 0xff0   : > { %8133 = vmatmul.f32.gmra.mxu2 %v10821_v57 }
 0xff1   : > { %10154 = vmatmul.msk.f32.gmra.mxu3 %vm2207_vm4, %v10822_v42 }
 0xff3   : > { %v7831_v9 = vpop.f32.mrf.mxu2 }
 0xff4   : > { %v16752_v15 = vadd.f32 %v7831_v9, %v16569_v51  ;;  %v7909_v27 = vpop.f32.mrf.mxu3 }
 0xff5   : > { %v7966_v7 = vadd.f32 %v7965_v29, %v7909_v27  ;;  %v7968_v6 = vpop.f32.mrf.mxu0  ;;  %v10160_v29 = vld [vmem:[%s17218_s5 + $0xc0] sm:$0x3f] }
 0xff6   : > { %10161 = vmatpush.msk.msra.mxu0 %vm2404_vm6, %v10160_v29 }
 0xff7   : > { %10137 = vmatmul.msk.f32.gmra.mxu1 %vm2364_vm7, %v7966_v7 }
 0xff8   : > { %8136 = vmatmul.f32.gmra.mxu2 %v10823_v50 }
 0xff9   : > { %10155 = vmatmul.msk.f32.gmra.mxu3 %vm2207_vm4, %v10824_v36 }
 0xffb   : > { %v16762_v37 = vpop.f32.mrf.mxu2 }
 0xffc   : > { %v7912_v51 = vpop.f32.mrf.mxu3 }
 0xffd   : > { %v7969_v46 = vadd.f32 %v7968_v6, %v7912_v51  ;;  %v7971_v30 = vpop.f32.mrf.mxu0 }
 0xfff   : > { %10138 = vmatmul.msk.f32.gmra.mxu1 %vm2364_vm7, %v7969_v46 }
0x1000   : > { %8139 = vmatmul.f32.gmra.mxu2 %v10825_v62 }
0x1001   : > { %10156 = vmatmul.msk.f32.gmra.mxu3 %vm2207_vm4, %v10826_v3 }
0x1003   : > { %v16772_v45 = vpop.f32.mrf.mxu2 }
0x1004   : > { %v7915_v0 = vpop.f32.mrf.mxu3 }
0x1005   : > { %v7972_v44 = vadd.f32 %v7971_v30, %v7915_v0  ;;  %v7974_v31 = vpop.f32.mrf.mxu0 }
0x1007   : > { %10139 = vmatmul.msk.f32.gmra.mxu1 %vm2364_vm7, %v7972_v44 }
0x1008   : > { %8142 = vmatmul.f32.gmra.mxu2 %v10827_v41 }
0x1009   : > { %10157 = vmatmul.msk.f32.gmra.mxu3 %vm2207_vm4, %v10828_v19 }
0x100b   : > { %v16782_v40 = vpop.f32.mrf.mxu2 }
0x100c   : > { %v7918_v20 = vpop.f32.mrf.mxu3 }
0x100d   : > { %v7975_v60 = vadd.f32 %v7974_v31, %v7918_v20  ;;  %v7977_v21 = vpop.f32.mrf.mxu0 }
0x100f   : > { %10140 = vmatmul.msk.f32.gmra.mxu1 %vm2364_vm7, %v7975_v60 }
0x1010   : > { %8145 = vmatmul.f32.gmra.mxu2 %v10829_v13 }
0x1011   : > { %10158 = vmatmul.msk.f32.gmra.mxu3 %vm2207_vm4, %v10830_v10 }
0x1013   : > { %v16792_v63 = vpop.f32.mrf.mxu2 }
0x1014   : > { %v7921_v39 = vpop.f32.mrf.mxu3 }
0x1015   : > { %v7978_v61 = vadd.f32 %v7977_v21, %v7921_v39  ;;  %v7980_v12 = vpop.f32.mrf.mxu0 }
0x1017   : > { %10141 = vmatmul.msk.f32.gmra.mxu1 %vm2364_vm7, %v7978_v61 }
0x1018   : > { %8148 = vmatmul.f32.gmra.mxu2 %v10831_v47 }
0x1019   : > { %10159 = vmatmul.msk.f32.gmra.mxu3 %vm2207_vm4, %v10832_v18 }
0x101b   : > { %v16802_v24 = vpop.f32.mrf.mxu2 }
0x101c   : > { %v7924_v16 = vpop.f32.mrf.mxu3 }
0x101d   : > { %v7981_v33 = vadd.f32 %v7980_v12, %v7924_v16  ;;  %v7983_v2 = vpop.f32.mrf.mxu0  ;;  %v7871_v12 = vadd.f32 %v16782_v40, %v16608_v26 }
0x101f   : > { %10142 = vmatmul.msk.f32.gmra.mxu1 %vm2364_vm7, %v7981_v33 }
0x1020   : > { %8151 = vmatmul.f32.gmra.mxu2 %v10833_v52 }
0x1023   : > { %v16808_v14 = vpop.f32.mrf.mxu2 }
0x1024   : > { %v7927_v22 = vpop.f32.mrf.mxu3 }
0x1025   : > { %v7984_v17 = vadd.f32 %v7983_v2, %v7927_v22  ;;  %v7986_v23 = vpop.f32.mrf.mxu0 }
0x1027   : > { %10143 = vmatmul.msk.f32.gmra.mxu1 %vm2364_vm7, %v7984_v17 }
0x1028   : > { %8154 = vmatmul.f32.gmra.mxu2 %v10834_v49 }
0x102b   : > { %v16814_v38 = vpop.f32.mrf.mxu2 }
0x102c   : > { %v7930_v59 = vpop.f32.mrf.mxu3 }
0x102d   : > { %v7987_v11 = vadd.f32 %v7986_v23, %v7930_v59  ;;  %v7989_v4 = vpop.f32.mrf.mxu0 }
0x102f   : > { %10144 = vmatmul.msk.f32.gmra.mxu1 %vm2364_vm7, %v7987_v11 }
0x1030   : > { %8157 = vmatmul.f32.gmra.mxu2 %v10835_v8 }
0x1033   : > { %v16820_v28 = vpop.f32.mrf.mxu2 }
0x1034   : > { %v7933_v5 = vpop.f32.mrf.mxu3 }
0x1035   : > { %v7990_v56 = vadd.f32 %v7989_v4, %v7933_v5 }
0x1037   : > { %10145 = vmatmul.msk.f32.gmra.mxu1 %vm2364_vm7, %v7990_v56 }
0x103b   : > { %v7858_v57 = vpop.f32.mrf.mxu2 }
0x103c   : > { %v16828_v42 = vadd.f32 %v7858_v57, %v16687_v58  ;;  %v8178_v9 = vpop.f32.mrf.mxu3 }
0x1043   : > { %v7861_v27 = vpop.f32.mrf.mxu2 }
0x1044   : > { %v16831_v7 = vadd.f32 %v7861_v27, %v16697_v55  ;;  %v8181_v6 = vpop.f32.mrf.mxu3 }
0x104b   : > { %v7864_v50 = vpop.f32.mrf.mxu2 }
0x104c   : > { %v16834_v36 = vadd.f32 %v7864_v50, %v16707_v43  ;;  %v8184_v51 = vpop.f32.mrf.mxu3  ;;  %v7869_v43 = vadd.f32 %v16762_v37, %v16582_v48 }
0x1053   : > { %v8122_v46 = vpop.f32.mrf.mxu2 }
0x1054   : > { %v8053_v30 = vpop.f32.mrf.mxu1  ;;  %v8179_v62 = vadd.f32 %v8178_v9, %v8122_v46  ;;  %v8187_v58 = vpop.f32.mrf.mxu3 }
0x1055   : > { %v16837_v3 = vadd.f32 %v8053_v30, %v16741_v32  ;;  %v7870_v32 = vadd.f32 %v16772_v45, %v16595_v25  ;;  %v7872_v25 = vadd.f32 %v16792_v63, %v16621_v53 }
0x1056   : > { %10162 = vmatmul.msk.f32.vlgmr.msra.gmra.mxu0 %vm2364_vm7, %v8179_v62 }
0x105b   : > { %v8125_v0 = vpop.f32.mrf.mxu2 }
0x105c   : > { %v8056_v44 = vpop.f32.mrf.mxu1  ;;  %v8182_v31 = vadd.f32 %v8181_v6, %v8125_v0  ;;  %v8190_v41 = vpop.f32.mrf.mxu3 }
0x105d   : > { %v8093_v55 = vadd.f32 %v8056_v44, %v16752_v15 }
0x105e   : > { %10163 = vmatmul.msk.f32.gmra.mxu0 %vm2364_vm7, %v8182_v31 }
0x1063   : > { %v8128_v19 = vpop.f32.mrf.mxu2 }
0x1064   : > { %v8059_v20 = vpop.f32.mrf.mxu1  ;;  %v8185_v60 = vadd.f32 %v8184_v51, %v8128_v19  ;;  %v8193_v10 = vpop.f32.mrf.mxu3 }
0x1065   : > { %v8094_v21 = vadd.f32 %v8059_v20, %v7869_v43 }
0x1066   : > { %10164 = vmatmul.msk.f32.gmra.mxu0 %vm2364_vm7, %v8185_v60 }
0x106b   : > { %v8131_v13 = vpop.f32.mrf.mxu2 }
0x106c   : > { %v8062_v39 = vpop.f32.mrf.mxu1  ;;  %v8188_v61 = vadd.f32 %v8187_v58, %v8131_v13  ;;  %v8196_v16 = vpop.f32.mrf.mxu3 }
0x106d   : > { %v8095_v15 = vadd.f32 %v8062_v39, %v7870_v32 }
0x106e   : > { %10165 = vmatmul.msk.f32.gmra.mxu0 %vm2364_vm7, %v8188_v61 }
0x1073   : > { %v8134_v48 = vpop.f32.mrf.mxu2 }
0x1074   : > { %v8065_v37 = vpop.f32.mrf.mxu1  ;;  %v8191_v47 = vadd.f32 %v8190_v41, %v8134_v48  ;;  %v8199_v22 = vpop.f32.mrf.mxu3 }
0x1075   : > { %v8096_v18 = vadd.f32 %v8065_v37, %v7871_v12 }
0x1076   : > { %10166 = vmatmul.msk.f32.gmra.mxu0 %vm2364_vm7, %v8191_v47 }
0x107b   : > { %v8137_v45 = vpop.f32.mrf.mxu2 }
0x107c   : > { %v8068_v33 = vpop.f32.mrf.mxu1  ;;  %v8194_v2 = vadd.f32 %v8193_v10, %v8137_v45  ;;  %v8202_v26 = vpop.f32.mrf.mxu3 }
0x107d   : > { %v8097_v52 = vadd.f32 %v8068_v33, %v7872_v25 }
0x107e   : > { %10167 = vmatmul.msk.f32.gmra.mxu0 %vm2364_vm7, %v8194_v2 }
0x1083   : > { %v8140_v17 = vpop.f32.mrf.mxu2 }
0x1084   : > { %v8197_v49 = vadd.f32 %v8196_v16, %v8140_v17  ;;  %v8205_v11 = vpop.f32.mrf.mxu3  ;;  %v8071_v41 = vpop.f32.mrf.mxu1 }
0x1086   : > { %10168 = vmatmul.msk.f32.gmra.mxu0 %vm2364_vm7, %v8197_v49 }
0x108b   : > { %v8143_v40 = vpop.f32.mrf.mxu2 }
0x108c   : > { %v8200_v23 = vadd.f32 %v8199_v22, %v8143_v40  ;;  %v8208_v4 = vpop.f32.mrf.mxu3  ;;  %v8074_v32 = vpop.f32.mrf.mxu1 }
0x108e   : > { %10169 = vmatmul.msk.f32.gmra.mxu0 %vm2364_vm7, %v8200_v23 }
0x1093   : > { %v8146_v59 = vpop.f32.mrf.mxu2 }
0x1094   : > { %v8203_v8 = vadd.f32 %v8202_v26, %v8146_v59  ;;  %v8211_v29 = vpop.f32.mrf.mxu3  ;;  %v8077_v10 = vpop.f32.mrf.mxu1  ;;  %v7874_v26 = vadd.f32 %v16808_v14, %v16647_v34  ;;  %v10182_v14 = vld [vmem:[%s17221_s8 + $0x18] sm:$0xff] }
0x1095   : > { %8439 = vmatpush.msra.mxu3 %v10182_v14  ;;  %v10230_v14 = vld [vmem:[%s17221_s8 + $0x118] sm:$0xff] }
0x1096   : > { %10170 = vmatmul.msk.f32.gmra.mxu0 %vm2364_vm7, %v8203_v8 }
0x109b   : > { %v8149_v53 = vpop.f32.mrf.mxu2 }
0x109c   : > { %v8206_v63 = vadd.f32 %v8205_v11, %v8149_v53  ;;  %v8214_v27 = vpop.f32.mrf.mxu3 }
0x109e   : > { %10171 = vmatmul.msk.f32.gmra.mxu0 %vm2364_vm7, %v8206_v63 }
0x10a3   : > { %v8152_v5 = vpop.f32.mrf.mxu2 }
0x10a4   : > { %v8209_v56 = vadd.f32 %v8208_v4, %v8152_v5  ;;  %v10224_v5 = vld [vmem:[%s17221_s8 + $0xf8] sm:$0xff] }
0x10a5   : > { %8817 = vmatpush.msrb.mxu0 %v10224_v5 }
0x10a6   : > { %10172 = vmatmul.msk.f32.gmra.mxu0 %vm2364_vm7, %v8209_v56  ;;  %v10181_v56 = vld [vmem:[%s17221_s8 + $0x10] sm:$0xff] }
0x10a7   : > { %8440 = vmatpush.msra.mxu3 %v10181_v56 }
0x10ab   : > { %v8155_v57 = vpop.f32.mrf.mxu2 }
0x10ac   : > { %v8212_v9 = vadd.f32 %v8211_v29, %v8155_v57  ;;  %v10184_v29 = vld [vmem:[%s17221_s8 + $0x20] sm:$0xff] }
0x10ae   : > { %10173 = vmatmul.msk.f32.gmra.mxu0 %vm2364_vm7, %v8212_v9 }
0x10b3   : > { %v8158_v6 = vpop.f32.mrf.mxu2 }
0x10b4   : > { %v8215_v50 = vadd.f32 %v8214_v27, %v8158_v6  ;;  %v8343_v6 = vld [vmem:[%s17220_s7] sm:$0xff] }
0x10b6   : > { %10174 = vmatmul.msk.f32.gmra.mxu0 %vm2364_vm7, %v8215_v50  ;;  %v8344_v50 = vld [vmem:[%s17220_s7 + $0x8] sm:$0xff] }
0x10d3   : > { %v8278_v51 = vpop.f32.mrf.mxu0 }
0x10d4   : > { %v16862_v46 = vadd.f32 %v8278_v51, %v16837_v3  ;;  %v8080_v3 = vpop.f32.mrf.mxu1  ;;  %v8345_v51 = vld [vmem:[%s17220_s7 + $0x10] sm:$0xff] }
0x10d6   : > { %v8330_v27 = vmax.f32 %v16862_v46, 0.0  ;;  %v8346_v46 = vld [vmem:[%s17220_s7 + $0x18] sm:$0x1] }
0x10db   : > { %v8281_v30 = vpop.f32.mrf.mxu0 }
0x10dc   : > { %v16864_v62 = vadd.f32 %v8281_v30, %v8093_v55  ;;  %v8083_v12 = vpop.f32.mrf.mxu1  ;;  %v8394_v30 = vld [vmem:[%s17221_s8 + $0x8] sm:$0xff] }
0x10dd   : > { %v8102_v45 = vadd.f32 %v8083_v12, %v16828_v42  ;;  %v10199_v12 = vld [vmem:[%s17221_s8 + $0x70] sm:$0xff] }
0x10de   : > { %v8331_v9 = vmax.f32 %v16864_v62, 0.0  ;;  %v8393_v62 = vld [vmem:[%s17221_s8] sm:$0xff] }
0x10e3   : > { %v8284_v58 = vpop.f32.mrf.mxu0 }
0x10e4   : > { %v16866_v0 = vadd.f32 %v8284_v58, %v8094_v21  ;;  %v8086_v37 = vpop.f32.mrf.mxu1  ;;  %v10188_v58 = vld [vmem:[%s17221_s8 + $0x38] sm:$0xff] }
0x10e5   : > { %8493 = vmatpush.msrb.mxu3 %v10188_v58 }
0x10e6   : > { %v8332_v57 = vmax.f32 %v16866_v0, 0.0  ;;  %v10187_v0 = vld [vmem:[%s17221_s8 + $0x30] sm:$0xff] }
0x10e7   : > { %8494 = vmatpush.msrb.mxu3 %v10187_v0 }
0x10eb   : > { %v8287_v44 = vpop.f32.mrf.mxu0 }
0x10ec   : > { %v16868_v31 = vadd.f32 %v8287_v44, %v8095_v15  ;;  %v8089_v47 = vpop.f32.mrf.mxu1  ;;  %v8103_v15 = vadd.f32 %v8086_v37, %v16831_v7  ;;  %v10197_v44 = vld [vmem:[%s17221_s8 + $0x68] sm:$0xff] }
0x10ed   : > { %v8104_v16 = vadd.f32 %v8089_v47, %v16834_v36  ;;  %v10215_v37 = vld [vmem:[%s17221_s8 + $0xc8] sm:$0xff]  ;;  %v10235_v47 = vld [vmem:[%s17221_s8 + $0x130] sm:$0xff] }
0x10ee   : > { %v8333_v4 = vmax.f32 %v16868_v31, 0.0  ;;  %v10191_v31 = vld [vmem:[%s17221_s8 + $0x48] sm:$0xff] }
0x10f3   : > { %v8290_v43 = vpop.f32.mrf.mxu0 }
0x10f4   : > { %v8321_v19 = vadd.f32 %v8290_v43, %v8096_v18  ;;  %v7876_v18 = vadd.f32 %v16820_v28, %v16673_v1  ;;  %v7873_v1 = vadd.f32 %v16802_v24, %v16634_v54  ;;  %v8099_v28 = vadd.f32 %v8074_v32, %v7874_v26  ;;  %v10185_v54 = vld [vmem:[%s17221_s8 + $0x28] sm:$0xff]  ;;  %v10190_v43 = vld [vmem:[%s17221_s8 + $0x40] sm:$0xff] }
0x10f5   : > { %8466 = vmatpush.msra.mxu2 %v10185_v54 }
0x10f6   : > { %v8101_v22 = vadd.f32 %v8080_v3, %v7876_v18  ;;  %v8098_v59 = vadd.f32 %v8071_v41, %v7873_v1  ;;  %v8334_v63 = vmax.f32 %v8321_v19, 0.0  ;;  %v10196_v41 = vld [vmem:[%s17221_s8 + $0x60] sm:$0xff]  ;;  %v10223_v19 = vld [vmem:[%s17221_s8 + $0xf0] sm:$0xff]  ;;  %v10209_v18 = vld [vmem:[%s17221_s8 + $0xa8] sm:$0xff] }
0x10f7   : > { %8467 = vmatpush.msra.mxu2 %v10184_v29  ;;  %8818 = vmatpush.msrb.mxu0 %v10223_v19  ;;  %v10205_v3 = vld [vmem:[%s17221_s8 + $0x90] sm:$0xff]  ;;  %v10212_v1 = vld [vmem:[%s17221_s8 + $0xb8] sm:$0xff]  ;;  %v10233_v29 = vld [vmem:[%s17221_s8 + $0x128] sm:$0xff] }
0x10f9   : > { %8520 = vmatpush.msrb.mxu2 %v10191_v31 }
0x10fb   : > { %v8293_v20 = vpop.f32.mrf.mxu0  ;;  %8521 = vmatpush.msrb.mxu2 %v10190_v43 }
0x10fc   : > { %v8322_v60 = vadd.f32 %v8293_v20, %v8097_v52  ;;  %v7875_v52 = vadd.f32 %v16814_v38, %v16660_v35  ;;  %v10206_v20 = vld [vmem:[%s17221_s8 + $0x98] sm:$0xff] }
0x10fe   : > { %v8100_v7 = vadd.f32 %v8077_v10, %v7875_v52  ;;  %v8335_v53 = vmax.f32 %v8322_v60, 0.0  ;;  %v10194_v10 = vld [vmem:[%s17221_s8 + $0x58] sm:$0xff]  ;;  %v10208_v52 = vld [vmem:[%s17221_s8 + $0xa0] sm:$0xff] }
0x1103   : > { %v8296_v13 = vpop.f32.mrf.mxu0 }
0x1104   : > { %v8323_v11 = vadd.f32 %v8296_v13, %v8098_v59  ;;  %v10211_v59 = vld [vmem:[%s17221_s8 + $0xb0] sm:$0xff] }
0x1106   : > { %v8336_v24 = vmax.f32 %v8323_v11, 0.0 }
0x110b   : > { %v8299_v39 = vpop.f32.mrf.mxu0 }
0x110c   : > { %v8324_v35 = vadd.f32 %v8299_v39, %v8099_v28  ;;  %v10200_v39 = vld [vmem:[%s17221_s8 + $0x78] sm:$0xff] }
0x110d   : > { %v10218_v28 = vld [vmem:[%s17221_s8 + $0xd8] sm:$0xff] }
0x110e   : > { %v8337_v34 = vmax.f32 %v8324_v35, 0.0  ;;  %v10217_v35 = vld [vmem:[%s17221_s8 + $0xd0] sm:$0xff] }
0x1113   : > { %v8302_v61 = vpop.f32.mrf.mxu0 }
0x1114   : > { %v8325_v42 = vadd.f32 %v8302_v61, %v8100_v7  ;;  %v10193_v61 = vld [vmem:[%s17221_s8 + $0x50] sm:$0xff] }
0x1115   : > { %v10247_v7 = vld [vmem:[%s17221_s8 + $0x170] sm:$0xff] }
0x1116   : > { %v8338_v8 = vmax.f32 %v8325_v42, 0.0 }
0x111b   : > { %v8305_v55 = vpop.f32.mrf.mxu0 }
0x111c   : > { %v8326_v40 = vadd.f32 %v8305_v55, %v8101_v22  ;;  %v10236_v55 = vld [vmem:[%s17221_s8 + $0x138] sm:$0xff] }
0x111d   : > { %8925 = vmatpush.msra.mxu0 %v10236_v55  ;;  %v9079_v55 = vld [vmem:[%s17223_s10 + $0x58] sm:$0xff] }
0x111e   : > { %v8339_v38 = vmax.f32 %v8326_v40, 0.0 }
0x111f   : > { %8926 = vmatpush.msra.mxu0 %v10235_v47  ;;  %v9077_v47 = vld [vmem:[%s17223_s10 + $0x48] sm:$0xff] }
0x1123   : > { %v8308_v48 = vpop.f32.mrf.mxu0 }
0x1124   : > { %v8327_v17 = vadd.f32 %v8308_v48, %v8102_v45  ;;  %v10214_v45 = vld [vmem:[%s17221_s8 + $0xc0] sm:$0xff] }
0x1126   : > { %v8340_v23 = vmax.f32 %v8327_v17, 0.0  ;;  %v10248_v17 = vld [vmem:[%s17221_s8 + $0x178] sm:$0xff] }
0x112b   : > { %v8311_v21 = vpop.f32.mrf.mxu0 }
0x112c   : > { %v8328_v33 = vadd.f32 %v8311_v21, %v8103_v15 }
0x112e   : > { %v8341_v36 = vmax.f32 %v8328_v33, 0.0 }
0x1133   : > { %v8314_v25 = vpop.f32.mrf.mxu0 }
0x1134   : > { %v8329_v2 = vadd.f32 %v8314_v25, %v8104_v16  ;;  %v10203_v25 = vld [vmem:[%s17221_s8 + $0x88] sm:$0xff] }
0x1136   : > { %v8342_v49 = vmax.f32 %v8329_v2, 0.0  ;;  %v10202_v2 = vld [vmem:[%s17221_s8 + $0x80] sm:$0xff] }
0x1138   : > { %10175 = vmatpush.msk.msrb.mxu1 %vm2247_vm3, %v8342_v49  ;;  %v10227_v49 = vld [vmem:[%s17221_s8 + $0x108] sm:$0xff] }
0x113a   : > { %8367 = vmatpush.msrb.mxu1 %v8341_v36 }
0x113c   : > { %8368 = vmatpush.msrb.mxu1 %v8340_v23  ;;  %v10226_v23 = vld [vmem:[%s17221_s8 + $0x100] sm:$0xff] }
0x113e   : > { %8369 = vmatpush.msrb.mxu1 %v8339_v38 }
0x1140   : > { %8370 = vmatpush.msrb.mxu1 %v8338_v8  ;;  %v10239_v8 = vld [vmem:[%s17221_s8 + $0x148] sm:$0xff] }
0x1142   : > { %8371 = vmatpush.msrb.mxu1 %v8337_v34  ;;  %v10221_v34 = vld [vmem:[%s17221_s8 + $0xe8] sm:$0xff] }
0x1144   : > { %8372 = vmatpush.msrb.mxu1 %v8336_v24  ;;  %v10238_v24 = vld [vmem:[%s17221_s8 + $0x140] sm:$0xff] }
0x1146   : > { %8373 = vmatpush.msrb.mxu1 %v8335_v53  ;;  %v10220_v53 = vld [vmem:[%s17221_s8 + $0xe0] sm:$0xff] }
0x1148   : > { %8374 = vmatpush.msrb.mxu1 %v8334_v63  ;;  %v10229_v63 = vld [vmem:[%s17221_s8 + $0x110] sm:$0xff] }
0x114a   : > { %8375 = vmatpush.msrb.mxu1 %v8333_v4  ;;  %v10251_v4 = vld [vmem:[%s17221_s8 + $0x188] sm:$0xff] }
0x114c   : > { %8376 = vmatpush.msrb.mxu1 %v8332_v57  ;;  %v10242_v57 = vld [vmem:[%s17221_s8 + $0x158] sm:$0xff] }
0x114e   : > { %8377 = vmatpush.msrb.mxu1 %v8331_v9  ;;  %v10250_v9 = vld [vmem:[%s17221_s8 + $0x180] sm:$0xff] }
0x1150   : > { %8378 = vmatpush.msrb.mxu1 %v8330_v27  ;;  %v10232_v27 = vld [vmem:[%s17221_s8 + $0x120] sm:$0xff] }
0x1151   : > { %10176 = vmatmul.msk.f32.vlgmr.msrb.gmra.mxu1 %vm8347_vm8, %v8343_v6  ;;  %v10241_v6 = vld [vmem:[%s17221_s8 + $0x150] sm:$0xff] }
0x1152   : > { %8412 = vmatpush.msra.mxu1 %v8394_v30  ;;  %v10245_v30 = vld [vmem:[%s17221_s8 + $0x168] sm:$0xff] }
0x1154   : > { %8413 = vmatpush.msra.mxu1 %v8393_v62  ;;  %v10244_v62 = vld [vmem:[%s17221_s8 + $0x160] sm:$0xff] }
0x1156   : > { %8574 = vmatpush.msrb.mxu1 %v10197_v44 }
0x1158   : > { %8575 = vmatpush.msrb.mxu1 %v10196_v41 }
0x1159   : > { %10177 = vmatmul.msk.f32.gmra.mxu1 %vm8347_vm8, %v8344_v50 }
0x1161   : > { %10178 = vmatmul.msk.f32.gmra.mxu1 %vm8347_vm8, %v8345_v51 }
0x1169   : > { %10179 = vmatmul.msk.f32.gmra.mxu1 %vm8347_vm8, %v8346_v46 }
0x11ce   : > { %v8380_v60 = vpop.f32.mrf.mxu1 }
0x11cf   : > { %v8422_v32 = vrot.slane %v8380_v60, 1  ;;  %v8449_v13 = vrot.slane %v8380_v60, 2  ;;  %10180 = vmatmul.msk.f32.vlgmr.msra.gmra.mxu1 %vm1456_vm2, %v8380_v60  ;;  %v8557_v48 = vrot.slane %v8380_v60, 6  ;;  %v8476_v15 = vrot.slane %v8380_v60, 3 }
0x11d0   : > { %8655 = vmatpush.msra.mxu1 %v10206_v20  ;;  %v8503_v16 = vrot.slane %v8380_v60, 4  ;;  %v8530_v40 = vrot.slane %v8380_v60, 5  ;;  %v8584_v36 = vrot.slane %v8380_v60, 7  ;;  %v8392_v20 = vld [vmem:[%s17222_s9] sm:$0x1] }
0x11d1   : > { %10183 = vmatmul.msk.f32.vlgmr.msra.gmra.mxu3 %vm1456_vm2, %v8422_v32  ;;  %10186 = vmatmul.msk.f32.vlgmr.msra.gmra.mxu2 %vm1456_vm2, %v8449_v13  ;;  %v9082_v32 = vld [vmem:[%s17223_s10 + $0x70] sm:$0xff] }
0x11d2   : > { %8547 = vmatpush.msra.mxu3 %v10194_v10  ;;  %8601 = vmatpush.msra.mxu2 %v10200_v39  ;;  %v9081_v10 = vld [vmem:[%s17223_s10 + $0x68] sm:$0xff] }
0x11d3   : > { %8656 = vmatpush.msra.mxu1 %v10205_v3 }
0x11d4   : > { %8548 = vmatpush.msra.mxu3 %v10193_v61  ;;  %8602 = vmatpush.msra.mxu2 %v10199_v12  ;;  %v9080_v61 = vld [vmem:[%s17223_s10 + $0x60] sm:$0xff] }
0x11d6   : > { %v16967_v21 = vpop.f32.mrf.mxu1 }
0x11d7   : > { %10198 = vmatmul.msk.f32.vlgmr.msrb.gmra.mxu1 %vm1456_vm2, %v8557_v48  ;;  %v8800_v33 = vrot.slane %v16967_v21, 7  ;;  %v8638_v22 = vrot.slane %v16967_v21, 1  ;;  %v8719_v38 = vrot.slane %v16967_v21, 4  ;;  %v8665_v11 = vrot.slane %v16967_v21, 2 }
0x11d8   : > { %8736 = vmatpush.msrb.mxu1 %v10215_v37  ;;  %v8692_v5 = vrot.slane %v16967_v21, 3  ;;  %v8746_v56 = vrot.slane %v16967_v21, 5  ;;  %v8773_v46 = vrot.slane %v16967_v21, 6  ;;  %v9078_v37 = vld [vmem:[%s17223_s10 + $0x50] sm:$0xff] }
0x11d9   : > { %10189 = vmatmul.msk.f32.vlgmr.msrb.gmra.mxu3 %vm1456_vm2, %v8476_v15  ;;  %10192 = vmatmul.msk.f32.vlgmr.msrb.gmra.mxu2 %vm1456_vm2, %v8503_v16 }
0x11da   : > { %8628 = vmatpush.msrb.mxu3 %v10203_v25  ;;  %8682 = vmatpush.msrb.mxu2 %v10209_v18  ;;  %v9076_v18 = vld [vmem:[%s17223_s10 + $0x40] sm:$0xff] }
0x11db   : > { %8737 = vmatpush.msrb.mxu1 %v10214_v45  ;;  %10225 = vmatmul.msk.f32.vlgmr.msrb.gmra.mxu0 %vm1456_vm2, %v8800_v33  ;;  %v9075_v33 = vld [vmem:[%s17223_s10 + $0x38] sm:$0xff] }
0x11dc   : > { %8629 = vmatpush.msrb.mxu3 %v10202_v2  ;;  %8683 = vmatpush.msrb.mxu2 %v10208_v52  ;;  %v9074_v52 = vld [vmem:[%s17223_s10 + $0x30] sm:$0xff] }
0x11dd   : > { %9033 = vmatpush.msrb.mxu0 %v10248_v17  ;;  %v9073_v17 = vld [vmem:[%s17223_s10 + $0x28] sm:$0xff] }
0x11de   : > { %v16999_v26 = vpop.f32.mrf.mxu1 }
0x11df   : > { %10207 = vmatmul.msk.f32.vlgmr.msra.gmra.mxu1 %vm1456_vm2, %v8638_v22  ;;  %v8908_v42 = vrot.slane %v16999_v26, 3  ;;  %9034 = vmatpush.msrb.mxu0 %v10247_v7  ;;  %v9016_v54 = vrot.slane %v16999_v26, 7  ;;  %v8935_v50 = vrot.slane %v16999_v26, 4  ;;  %v8854_v51 = vrot.slane %v16999_v26, 1 }
0x11e0   : > { %8844 = vmatpush.msra.mxu1 %v10227_v49  ;;  %v8881_v0 = vrot.slane %v16999_v26, 2  ;;  %v8962_v44 = vrot.slane %v16999_v26, 5  ;;  %v8989_v31 = vrot.slane %v16999_v26, 6 }
0x11e1   : > { %10195 = vmatmul.msk.f32.vlgmr.msra.gmra.mxu3 %vm1456_vm2, %v8530_v40  ;;  %10201 = vmatmul.msk.f32.vlgmr.msra.gmra.mxu2 %vm1456_vm2, %v8584_v36  ;;  %v9072_v40 = vld [vmem:[%s17223_s10 + $0x20] sm:$0xff] }
0x11e2   : > { %8709 = vmatpush.msra.mxu3 %v10212_v1  ;;  %8763 = vmatpush.msra.mxu2 %v10218_v28  ;;  %v9071_v1 = vld [vmem:[%s17223_s10 + $0x18] sm:$0xff] }
0x11e3   : > { %8845 = vmatpush.msra.mxu1 %v10226_v23  ;;  %10237 = vmatmul.msk.f32.vlgmr.msra.gmra.mxu0 %vm1456_vm2, %v8908_v42  ;;  %v9070_v42 = vld [vmem:[%s17223_s10 + $0x10] sm:$0xff]  ;;  %v9069_v23 = vld [vmem:[%s17223_s10 + $0x8] sm:$0xff] }
0x11e4   : > { %8710 = vmatpush.msra.mxu3 %v10211_v59  ;;  %8764 = vmatpush.msra.mxu2 %v10217_v35  ;;  %v9068_v35 = vld [vmem:[%s17223_s10] sm:$0xff] }
0x11e6   : > { %v8389_v58 = vpop.f32.mrf.mxu1 }
0x11e7   : > { %10216 = vmatmul.msk.f32.vlgmr.msrb.gmra.mxu1 %vm1456_vm2, %v8719_v38 }
0x11e8   : > { %8952 = vmatpush.msrb.mxu1 %v10239_v8 }
0x11e9   : > { %10204 = vmatmul.msk.f32.vlgmr.msrb.gmra.mxu3 %vm1456_vm2, %v16967_v21  ;;  %10210 = vmatmul.msk.f32.vlgmr.msrb.gmra.mxu2 %vm1456_vm2, %v8665_v11 }
0x11ea   : > { %8790 = vmatpush.msrb.mxu3 %v10221_v34  ;;  %8871 = vmatpush.msrb.mxu2 %v10230_v14  ;;  %v9119_v34 = vld [vmem:[%s17225_s12 + $0x50] sm:$0xf]  ;;  %v9118_v14 = vld [vmem:[%s17225_s12 + $0x48] sm:$0xff] }
0x11eb   : > { %8953 = vmatpush.msrb.mxu1 %v10238_v24  ;;  %10249 = vmatmul.msk.f32.vlgmr.msrb.gmra.mxu0 %vm1456_vm2, %v9016_v54 }
0x11ec   : > { %8791 = vmatpush.msrb.mxu3 %v10220_v53  ;;  %8872 = vmatpush.msrb.mxu2 %v10229_v63  ;;  %v9117_v53 = vld [vmem:[%s17225_s12 + $0x40] sm:$0xff]  ;;  %v9116_v63 = vld [vmem:[%s17225_s12 + $0x38] sm:$0xff] }
0x11ef   : > { %10228 = vmatmul.msk.f32.vlgmr.msra.gmra.mxu1 %vm1456_vm2, %v16999_v26 }
0x11f0   : > { %9060 = vmatpush.msra.mxu1 %v10251_v4 }
0x11f1   : > { %10213 = vmatmul.msk.f32.vlgmr.msra.gmra.mxu3 %vm1456_vm2, %v8692_v5  ;;  %10219 = vmatmul.msk.f32.vlgmr.msra.gmra.mxu2 %vm1456_vm2, %v8746_v56  ;;  %v9115_v56 = vld [vmem:[%s17225_s12 + $0x30] sm:$0xff] }
0x11f2   : > { %8898 = vmatpush.msra.mxu3 %v10233_v29  ;;  %8979 = vmatpush.msra.mxu2 %v10242_v57 }
0x11f3   : > { %9061 = vmatpush.msra.mxu1 %v10250_v9 }
0x11f4   : > { %8899 = vmatpush.msra.mxu3 %v10232_v27  ;;  %8980 = vmatpush.msra.mxu2 %v10241_v6  ;;  %v9114_v27 = vld [vmem:[%s17225_s12 + $0x28] sm:$0xff] }
0x11f7   : > { %10240 = vmatmul.msk.f32.vlgmr.msrb.gmra.mxu1 %vm1456_vm2, %v8935_v50  ;;  %v9113_v50 = vld [vmem:[%s17225_s12 + $0x20] sm:$0xff] }
0x11f9   : > { %10222 = vmatmul.msk.f32.vlgmr.msrb.gmra.mxu3 %vm1456_vm2, %v8773_v46  ;;  %10231 = vmatmul.msk.f32.vlgmr.msrb.gmra.mxu2 %vm1456_vm2, %v8854_v51 }
0x11fa   : > { %9006 = vmatpush.msrb.mxu3 %v10245_v30  ;;  %9089 = vmatpush.msrb.mxu2 %v9082_v32  ;;  %v9112_v30 = vld [vmem:[%s17225_s12 + $0x18] sm:$0xff] }
0x11fc   : > { %9007 = vmatpush.msrb.mxu3 %v10244_v62  ;;  %9090 = vmatpush.msrb.mxu2 %v9081_v10 }
0x11fe   : > { %9091 = vmatpush.msrb.mxu2 %v9080_v61 }
0x11ff   : > { %10252 = vmatmul.msk.f32.vlgmr.msra.gmra.mxu1 %vm1456_vm2, %v8389_v58 }
0x1200   : > { %9092 = vmatpush.msrb.mxu2 %v9079_v55  ;;  %v9110_v55 = vld [vmem:[%s17225_s12 + $0x8] sm:$0xff] }
0x1201   : > { %10234 = vmatmul.msk.f32.vlgmr.msra.gmra.mxu3 %vm1456_vm2, %v8881_v0  ;;  %10243 = vmatmul.msk.f32.vlgmr.msra.gmra.mxu2 %vm1456_vm2, %v8962_v44 }
0x1202   : > { %9093 = vmatpush.msrb.mxu2 %v9078_v37  ;;  %10254 = vmatpush.msk.msra.mxu3 %vm2247_vm3, %v9119_v34  ;;  %v9083_v37 = vld [vmem:[%s17224_s11] sm:$0x1] }
0x1204   : > { %9094 = vmatpush.msrb.mxu2 %v9077_v47  ;;  %9134 = vmatpush.msra.mxu3 %v9118_v14 }
0x1206   : > { %9095 = vmatpush.msrb.mxu2 %v9076_v18  ;;  %9135 = vmatpush.msra.mxu3 %v9117_v53 }
0x1208   : > { %9096 = vmatpush.msrb.mxu2 %v9075_v33  ;;  %9136 = vmatpush.msra.mxu3 %v9116_v63 }
0x1209   : > { %10246 = vmatmul.msk.f32.vlgmr.msrb.gmra.mxu3 %vm1456_vm2, %v8989_v31 }
0x120a   : > { %9097 = vmatpush.msrb.mxu2 %v9074_v52  ;;  %9137 = vmatpush.msra.mxu3 %v9115_v56 }
0x120c   : > { %9098 = vmatpush.msrb.mxu2 %v9073_v17  ;;  %9138 = vmatpush.msra.mxu3 %v9114_v27 }
0x120e   : > { %9099 = vmatpush.msrb.mxu2 %v9072_v40  ;;  %9139 = vmatpush.msra.mxu3 %v9113_v50 }
0x1210   : > { %9100 = vmatpush.msrb.mxu2 %v9071_v1  ;;  %9140 = vmatpush.msra.mxu3 %v9112_v30 }
0x1212   : > { %9101 = vmatpush.msrb.mxu2 %v9070_v42 }
0x1214   : > { %9102 = vmatpush.msrb.mxu2 %v9069_v23 }
0x1216   : > { %9103 = vmatpush.msrb.mxu2 %v9068_v35 }
0x124c   : > { %v8415_v41 = vpop.f32.mrf.mxu1 }
0x124d   : > { %v8418_v60 = vadd.f32 %v8415_v41, %v8392_v20 }
0x1254   : > { %v8442_v43 = vpop.f32.mrf.mxu3  ;;  %v8469_v19 = vpop.f32.mrf.mxu2 }
0x1255   : > { %v8445_v13 = vadd.f32 %v8442_v43, %v8418_v60  ;;  %v8577_v21 = vpop.f32.mrf.mxu1 }
0x1257   : > { %v8472_v12 = vadd.f32 %v8469_v19, %v8445_v13 }
0x1258   : > { %v8820_v5 = vpop.f32.mrf.mxu0 }
0x125c   : > { %v8496_v39 = vpop.f32.mrf.mxu3  ;;  %v8523_v3 = vpop.f32.mrf.mxu2 }
0x125d   : > { %v8499_v48 = vadd.f32 %v8496_v39, %v8472_v12  ;;  %v8658_v22 = vpop.f32.mrf.mxu1  ;;  %v9111_v12 = vld [vmem:[%s17225_s12 + $0x10] sm:$0xff] }
0x125e   : > { %9141 = vmatpush.msra.mxu3 %v9111_v12 }
0x125f   : > { %v8526_v15 = vadd.f32 %v8523_v3, %v8499_v48  ;;  %v9109_v48 = vld [vmem:[%s17225_s12] sm:$0xff] }
0x1260   : > { %v8928_v0 = vpop.f32.mrf.mxu0  ;;  %9142 = vmatpush.msra.mxu3 %v9110_v55 }
0x1262   : > { %9143 = vmatpush.msra.mxu3 %v9109_v48 }
0x1264   : > { %v8550_v16 = vpop.f32.mrf.mxu3  ;;  %v8604_v25 = vpop.f32.mrf.mxu2 }
0x1265   : > { %v8553_v45 = vadd.f32 %v8550_v16, %v8526_v15  ;;  %v8739_v11 = vpop.f32.mrf.mxu1  ;;  %v9120_v16 = vld [vmem:[%s17226_s13] sm:$0x1] }
0x1267   : > { %v8580_v2 = vadd.f32 %v8577_v21, %v8553_v45 }
0x1268   : > { %v9036_v13 = vpop.f32.mrf.mxu0 }
0x1269   : > { %v8607_v49 = vadd.f32 %v8604_v25, %v8580_v2 }
0x126c   : > { %v8631_v26 = vpop.f32.mrf.mxu3  ;;  %v8685_v7 = vpop.f32.mrf.mxu2 }
0x126d   : > { %v8634_v36 = vadd.f32 %v8631_v26, %v8607_v49  ;;  %v8847_v57 = vpop.f32.mrf.mxu1 }
0x126f   : > { %v8661_v28 = vadd.f32 %v8658_v22, %v8634_v36 }
0x1271   : > { %v8688_v59 = vadd.f32 %v8685_v7, %v8661_v28 }
0x1274   : > { %v8712_v38 = vpop.f32.mrf.mxu3  ;;  %v8766_v54 = vpop.f32.mrf.mxu2 }
0x1275   : > { %v8715_v8 = vadd.f32 %v8712_v38, %v8688_v59  ;;  %v8955_v31 = vpop.f32.mrf.mxu1 }
0x1277   : > { %v8742_v24 = vadd.f32 %v8739_v11, %v8715_v8 }
0x1279   : > { %v8769_v4 = vadd.f32 %v8766_v54, %v8742_v24 }
0x127c   : > { %v8793_v29 = vpop.f32.mrf.mxu3  ;;  %v8874_v51 = vpop.f32.mrf.mxu2 }
0x127d   : > { %v8796_v9 = vadd.f32 %v8793_v29, %v8769_v4  ;;  %v9063_v10 = vpop.f32.mrf.mxu1 }
0x127f   : > { %v8823_v6 = vadd.f32 %v8820_v5, %v8796_v9 }
0x1281   : > { %v8850_v46 = vadd.f32 %v8847_v57, %v8823_v6 }
0x1283   : > { %v8877_v62 = vadd.f32 %v8874_v51, %v8850_v46 }
0x1284   : > { %v8901_v58 = vpop.f32.mrf.mxu3  ;;  %v8982_v19 = vpop.f32.mrf.mxu2 }
0x1285   : > { %v8904_v44 = vadd.f32 %v8901_v58, %v8877_v62 }
0x1287   : > { %v8931_v41 = vadd.f32 %v8928_v0, %v8904_v44 }
0x1289   : > { %v8958_v43 = vadd.f32 %v8955_v31, %v8931_v41 }
0x128b   : > { %v8985_v20 = vadd.f32 %v8982_v19, %v8958_v43 }
0x128c   : > { %v9009_v60 = vpop.f32.mrf.mxu3 }
0x128d   : > { %v9012_v32 = vadd.f32 %v9009_v60, %v8985_v20 }
0x128f   : > { %v9039_v39 = vadd.f32 %v9036_v13, %v9012_v32 }
0x1291   : > { %v9066_v3 = vadd.f32 %v9063_v10, %v9039_v39 }
0x1293   : > { %v9067_v61 = vmax.f32 %v9066_v3, 0.0 }
0x1295   : > { %10253 = vmatmul.msk.f32.vlgmr.msrb.gmra.mxu2 %vm9084_vm9, %v9067_v61 }
0x1318   : > { %v9105_v21 = vpop.f32.mrf.mxu2 }
0x1319   : > { %v9106_v47 = vadd.f32 %v9105_v21, %v9083_v37 }
0x131b   : > { %v9108_v15 = vmax.f32 %v9106_v47, 0.0 }
0x131d   : > { %10255 = vmatmul.msk.f32.vlgmr.msra.gmra.mxu3 %vm9121_vm10, %v9108_v15 }
0x13a0   : > { %v9145_v25 = vpop.f32.mrf.mxu3 }
0x13a1   : > { %v9146_v18 = vadd.f32 %v9145_v25, %v9120_v16 }
0x13a3   : > { %9149 = vst.msk [vmem:[%s460_s0] sm:$0x1] %vm9148_vm11, %v9146_v18 }
0x13a4   : > { %10863 = shalt.err (!%p10860_p3)
}
0x13a5   : > { %10274 = dma.vmem_to_hbm [thread:$0]  (%p11013_p5), %s9162_s18, 16, %s9164_s1, %s9151_s20  }
0x13a6 PF: > { %p10280_p4 = scmp.ge.s32.totalorder %s10898_s16, 2  ;;  %s9175_s25 = sand.u32 1, %s10886_s29  }
0x13a7   : > { %s9176_s22 = scalar_lea.sflag [#allocation3], %s9175_s25 }
0x13a8   : > { %p10277_p7 = pnand %p10280_p4, %p11017_p6 }
0x13aa   : > { %p10278_p8 = pneg %p10277_p7 }
0x13ac   : > { %10881 = dma.done.wait (%p10278_p8), %s9176_s22, 16  }
0x13ad   : > { %10883 = vsyncadd (%p10278_p8), %s9176_s22, 4294967280  ;;  %s17546_s2 = sld [smem:[#allocation5_spill]]  ;;  %p24_p9 = scmp.ge.s32.totalorder %s11000_s19, 4  }
0x13ae   : > { %s17547_s15 = sld [smem:[#allocation6_spill]]  ;;  %s17548_s29 = smov %s10890_s30 }
0x13af   : > { %s17550_s16 = smov %s11000_s19  ;;  %26 = sbr.rel (!%p24_p9) target bundleno = 7 (0x7), region = 163 }
0x13b3   : > { %s17549_s30 = smov %s17546_s2 }
0x13b4   :  { %9181 = vsyncpa [#allocation3], 1 }
0x13b5   :  { %9183 = vsyncpa [#allocation3 + $0x1], 1 }

</bundles_post_ra>
